<compile_context>
chip_gen: v7x
topology: tpu7x:2x2x1
jax: 0.10.0
libtpu: 0.0.40
codegen_flags: <defaults>
</compile_context>

<pallas_src>
import numpy as np

import jax
import jax.numpy as jnp
from jax import lax
from jax.experimental import pallas as pl
from jax.experimental.pallas import tpu as pltpu


_ACTS = ("relu", "relu", "none", "relu", "relu", "sigmoid")


# ----------------------------------------------------------------------------
# Fused Pallas kernel: 6 layers of (row-select -> wide-K matmul -> bias -> act)
# ----------------------------------------------------------------------------
def _fused_autoencoder_kernel(x_ref, *refs):
    out_ref = refs[-1]
    layer_refs = refs[:-1]
    n_layers = len(layer_refs) // 3

    x = x_ref[...]                                            # bf16 [nimg*28, 128]
    for l in range(n_layers):
        L_ref, R_ref, b_ref = layer_refs[3 * l: 3 * l + 3]
        k = L_ref.shape[0]

        # 0/1 row selection per tap (batched block-diagonal), exact in bf16.
        parts = [jnp.dot(L_ref[t], x, preferred_element_type=jnp.float32).astype(jnp.bfloat16)
                 for t in range(k)]
        # Taps fused on lanes -> a single wide-K MXU matmul per layer.
        xg = jnp.concatenate(parts, axis=-1) if k > 1 else parts[0]
        acc = jnp.dot(xg, R_ref[...], preferred_element_type=jnp.float32) + b_ref[...]

        act = _ACTS[l]
        if act == "relu":
            x = jnp.maximum(acc, 0.0).astype(jnp.bfloat16)
        elif act == "none":
            x = acc.astype(jnp.bfloat16)
        else:  # sigmoid -> final output, f32, lane-dense 128-wide store
            out_ref[...] = jnp.minimum(
                pl.reciprocal(1.0 + jnp.exp(-acc), approx=True), 1.0)


# ----------------------------------------------------------------------------
# One-time (outside jit) lowering of conv weights into (L, R, bias_row) constants.
# Activation planes are [H, W*C] with channels fastest on lanes.
# ----------------------------------------------------------------------------
def _conv_to_LR(w, b, hin, win, stride, padding):
    """PyTorch Conv2d weights [Cout, Cin, k, k] -> L [k, Hout, Hin], R [k, Win*Cin, Wout*Cout]."""
    cout, cin, k, _ = w.shape
    hout = (hin + 2 * padding - k) // stride + 1
    wout = (win + 2 * padding - k) // stride + 1
    L = np.zeros((k, hout, hin), np.float32)
    R = np.zeros((k, win * cin, wout * cout), np.float32)
    for i in range(k):
        for oh in range(hout):
            h = stride * oh + i - padding
            if 0 <= h < hin:
                L[i, oh, h] = 1.0
        for j in range(k):
            for ow in range(wout):
                wi = stride * ow + j - padding
                if 0 <= wi < win:
                    R[i, wi * cin:(wi + 1) * cin, ow * cout:(ow + 1) * cout] += w[:, :, i, j].T
    brow = np.tile(np.asarray(b, np.float32), wout)[None, :]
    return L, R, brow, hout, wout


def _convT_to_LR(w, b, hin, win, stride, padding, output_padding):
    """PyTorch ConvTranspose2d weights [Cin, Cout, k, k] (exact semantics incl. output_padding)."""
    cin, cout, k, _ = w.shape
    hout = (hin - 1) * stride - 2 * padding + k + output_padding
    wout = (win - 1) * stride - 2 * padding + k + output_padding
    L = np.zeros((k, hout, hin), np.float32)
    R = np.zeros((k, win * cin, wout * cout), np.float32)
    for kh in range(k):
        for ih in range(hin):
            oh = stride * ih + kh - padding
            if 0 <= oh < hout:
                L[kh, oh, ih] = 1.0
        for kw in range(k):
            for iw in range(win):
                ow = stride * iw + kw - padding
                if 0 <= ow < wout:
                    R[kh, iw * cin:(iw + 1) * cin, ow * cout:(ow + 1) * cout] += w[:, :, kh, kw]
    brow = np.tile(np.asarray(b, np.float32), wout)[None, :]
    return L, R, brow, hout, wout


def prepare_constants(params, nimg, dtype=jnp.bfloat16):
    """Fold module weights into per-layer (Lb, Rp, bias_row) for an nimg-image block.

    Lb[l]: [k, nimg*Hout, nimg*Hin]  bf16 block-diagonal 0/1 row selection (exact in bf16).
    Rp[l]: [k*lanes_in_pad, lanes_out_pad] bf16, taps stacked along rows, lanes padded to 128.
    bp[l]: [1, lanes_out_pad] f32 bias row (zero in padded lanes).
    Call ONCE, outside jit.
    """
    p = {k: np.asarray(v, np.float32) for k, v in params.items()}

    raw = []
    L, R, brow, h, w = _conv_to_LR(p["enc1_w"], p["enc1_b"], 28, 28, 2, 1); raw.append((L, R, brow))
    L, R, brow, h, w = _conv_to_LR(p["enc3_w"], p["enc3_b"], h, w, 2, 1);   raw.append((L, R, brow))
    L, R, brow, h, w = _conv_to_LR(p["enc5_w"], p["enc5_b"], h, w, 1, 0);   raw.append((L, R, brow))
    L, R, brow, h, w = _convT_to_LR(p["dec1_w"], p["dec1_b"], h, w, 1, 0, 0); raw.append((L, R, brow))
    L, R, brow, h, w = _convT_to_LR(p["dec3_w"], p["dec3_b"], h, w, 2, 1, 1); raw.append((L, R, brow))
    L, R, brow, h, w = _convT_to_LR(p["dec5_w"], p["dec5_b"], h, w, 2, 1, 1); raw.append((L, R, brow))

    def pad128(n):
        return int(-(-n // 128) * 128)

    consts = []
    lanes_real, lanes_pad = 28, 128                 # input plane: 28 real lanes padded to 128
    eye = np.eye(nimg, dtype=np.float32)
    for (L, R, brow) in raw:
        k, hout, hin = L.shape
        _, rin, rout = R.shape
        assert rin == lanes_real
        lout_pad = pad128(rout)
        Rp = np.zeros((k * lanes_pad, lout_pad), np.float32)
        for t in range(k):
            Rp[t * lanes_pad: t * lanes_pad + rin, :rout] = R[t]
        bp = np.zeros((1, lout_pad), np.float32)
        bp[0, :rout] = brow[0]
        Lb = np.stack([np.kron(eye, L[t]) for t in range(k)])   # [k, nimg*Hout, nimg*Hin]
        consts.append((jnp.asarray(Lb, dtype), jnp.asarray(Rp, dtype),
                       jnp.asarray(bp, jnp.float32)))
        lanes_real, lanes_pad = rout, lout_pad
    return consts


# ----------------------------------------------------------------------------
# Forward pass: one pallas_call over grid=(B/nimg,)
# ----------------------------------------------------------------------------
def conv_autoencoder_forward(x, consts, nimg=8):
    """x: [B, 1, 28, 28] float32 NCHW. consts: output of prepare_constants(params, nimg)."""
    B, C, H, W = x.shape
    assert (C, H, W) == (1, 28, 28)
    Bp = -(-B // nimg) * nimg
    W_pad = 128

    # bf16 input, batch padded to a multiple of nimg, lanes padded to 128,
    # batch stacked on sublanes -> [Bp*28, 128]
    x2 = x[:, 0].astype(jnp.bfloat16)
    x2 = jnp.pad(x2, ((0, Bp - B), (0, 0), (0, W_pad - W)))
    x2 = x2.reshape(Bp * H, W_pad)

    out_lanes = consts[-1][1].shape[1]              # 128 (28 real + zero pad)
    steps = Bp // nimg

    flat = []
    in_specs = [pl.BlockSpec((nimg * H, W_pad), lambda b: (b, 0))]
    for (Lb, Rp, bp) in consts:
        flat += [Lb, Rp, bp]
        in_specs += [pl.BlockSpec(Lb.shape, lambda b: (0, 0, 0)),
                     pl.BlockSpec(Rp.shape, lambda b: (0, 0)),
                     pl.BlockSpec(bp.shape, lambda b: (0, 0))]

    # Advisory cost estimate for the XLA scheduler.
    flops = 0
    for (Lb, Rp, bp) in consts:
        k, mo, mi = Lb.shape
        kin, lout = Rp.shape
        flops += 2 * k * mo * mi * (kin // k) + 2 * mo * kin * lout
    const_bytes = sum(int(Lb.size) * 2 + int(Rp.size) * 2 + int(bp.size) * 4
                      for (Lb, Rp, bp) in consts)
    cost = pl.CostEstimate(flops=int(flops * steps),
                           transcendentals=int(Bp * H * out_lanes),
                           bytes_accessed=int(x2.size * 2 + Bp * H * out_lanes * 4 + const_bytes))

    out = pl.pallas_call(
        _fused_autoencoder_kernel,
        out_shape=jax.ShapeDtypeStruct((Bp * H, out_lanes), jnp.float32),
        grid=(steps,),
        in_specs=in_specs,
        out_specs=pl.BlockSpec((nimg * H, out_lanes), lambda b: (b, 0)),
        compiler_params=pltpu.CompilerParams(dimension_semantics=("parallel",)),
        cost_estimate=cost,
    )(x2, *flat)

    out = out.reshape(Bp, H, out_lanes)[:B, :, :W]  # drop batch / lane padding
    return out[:, None, :, :]                        # back to NCHW


# ----------------------------------------------------------------------------
# Deterministic parameter init (same shapes as the PyTorch module's __init__)
# ----------------------------------------------------------------------------
def init_params(key):
    ks = jax.random.split(key, 12)

    def uni(k, shape, fan_in):
        bound = 1.0 / jnp.sqrt(jnp.float32(fan_in))
        return jax.random.uniform(k, shape, jnp.float32, -bound, bound)

    p = {}
    p["enc1_w"] = uni(ks[0], (16, 1, 3, 3), 1 * 9);    p["enc1_b"] = uni(ks[1], (16,), 1 * 9)
    p["enc3_w"] = uni(ks[2], (32, 16, 3, 3), 16 * 9);  p["enc3_b"] = uni(ks[3], (32,), 16 * 9)
    p["enc5_w"] = uni(ks[4], (64, 32, 7, 7), 32 * 49); p["enc5_b"] = uni(ks[5], (64,), 32 * 49)
    p["dec1_w"] = uni(ks[6], (64, 32, 7, 7), 32 * 49); p["dec1_b"] = uni(ks[7], (32,), 32 * 49)
    p["dec3_w"] = uni(ks[8], (32, 16, 3, 3), 16 * 9);  p["dec3_b"] = uni(ks[9], (16,), 16 * 9)
    p["dec5_w"] = uni(ks[10], (16, 1, 3, 3), 1 * 9);   p["dec5_b"] = uni(ks[11], (1,), 1 * 9)
    return p


# ----------------------------------------------------------------------------
# Pure-JAX reference (exact PyTorch semantics) for verification
# ----------------------------------------------------------------------------
def _reference_forward(x, p):
    def conv(x, w, b, stride, pad):
        y = lax.conv_general_dilated(
            x, w, (stride, stride), [(pad, pad), (pad, pad)],
            dimension_numbers=("NCHW", "OIHW", "NCHW"),
            precision=lax.Precision.HIGHEST)
        return y + b[None, :, None, None]

    def convT(x, w, b, stride, pad, opad):
        k = w.shape[2]
        w_conv = jnp.flip(w, (2, 3)).transpose(1, 0, 2, 3)
        lo, hi = k - 1 - pad, k - 1 - pad + opad
        y = lax.conv_general_dilated(
            x, w_conv, (1, 1), [(lo, hi), (lo, hi)], lhs_dilation=(stride, stride),
            dimension_numbers=("NCHW", "OIHW", "NCHW"),
            precision=lax.Precision.HIGHEST)
        return y + b[None, :, None, None]

    x = jax.nn.relu(conv(x, p["enc1_w"], p["enc1_b"], 2, 1))
    x = jax.nn.relu(conv(x, p["enc3_w"], p["enc3_b"], 2, 1))
    x = conv(x, p["enc5_w"], p["enc5_b"], 1, 0)
    x = jax.nn.relu(convT(x, p["dec1_w"], p["dec1_b"], 1, 0, 0))
    x = jax.nn.relu(convT(x, p["dec3_w"], p["dec3_b"], 2, 1, 1))
    x = jax.nn.sigmoid(convT(x, p["dec5_w"], p["dec5_b"], 2, 1, 1))
    return x


if __name__ == "__main__":
    key = jax.random.PRNGKey(0)
    k_params, k_x = jax.random.split(key)
    params = init_params(k_params)

    NIMG = 8                                   # images per grid step (raise to 16-32 for big batches)
    consts = prepare_constants(params, nimg=NIMG)   # one-time weight transform, outside jit

    # MNIST-style input implied by the architecture (enc5 k=7 on a 7x7 map): 28x28.
    # B=16 -> 2 grid steps so both v7x TensorCores get work.
    x = jax.random.normal(k_x, (16, 1, 28, 28), dtype=jnp.float32)

    fwd = jax.jit(lambda xx, cc: conv_autoencoder_forward(xx, cc, nimg=NIMG))
    y = jax.block_until_ready(fwd(x, consts))

    assert y.shape == (16, 1, 28, 28), y.shape
    assert y.dtype == jnp.float32
    assert bool(jnp.all((y >= 0.0) & (y <= 1.0)))            # sigmoid output range

    # Numerical check against an exact-precision pure-JAX reference (bf16 weight rounding
    # + approx reciprocal give sub-1e-2 deviations after the sigmoid at these scales).
    y_ref = _reference_forward(x, params)
    err = float(jnp.max(jnp.abs(y - y_ref)))
    assert err < 1e-2, f"max abs error vs reference: {err}"

    print("KERNEL_OK")
</pallas_src>

<mosaic_0001>
module attributes {stable_mosaic.version = 11 : i64} {
  func.func @_fused_autoencoder_kernel(%arg0: i32, %arg1: memref<224x128xbf16, #tpu.memory_space<vmem>>, %arg2: memref<3x112x224xbf16, #tpu.memory_space<vmem>>, %arg3: memref<384x256xbf16, #tpu.memory_space<vmem>>, %arg4: memref<1x256xf32, #tpu.memory_space<vmem>>, %arg5: memref<3x56x112xbf16, #tpu.memory_space<vmem>>, %arg6: memref<768x256xbf16, #tpu.memory_space<vmem>>, %arg7: memref<1x256xf32, #tpu.memory_space<vmem>>, %arg8: memref<7x8x56xbf16, #tpu.memory_space<vmem>>, %arg9: memref<1792x128xbf16, #tpu.memory_space<vmem>>, %arg10: memref<1x128xf32, #tpu.memory_space<vmem>>, %arg11: memref<7x56x8xbf16, #tpu.memory_space<vmem>>, %arg12: memref<896x256xbf16, #tpu.memory_space<vmem>>, %arg13: memref<1x256xf32, #tpu.memory_space<vmem>>, %arg14: memref<3x112x56xbf16, #tpu.memory_space<vmem>>, %arg15: memref<768x256xbf16, #tpu.memory_space<vmem>>, %arg16: memref<1x256xf32, #tpu.memory_space<vmem>>, %arg17: memref<3x224x112xbf16, #tpu.memory_space<vmem>>, %arg18: memref<768x128xbf16, #tpu.memory_space<vmem>>, %arg19: memref<1x128xf32, #tpu.memory_space<vmem>>, %arg20: memref<224x128xf32, #tpu.memory_space<vmem>>) attributes {dimension_semantics = [#tpu.dimension_semantics<parallel>], iteration_bounds = array<i64: 2>, scalar_prefetch = 0 : i64, scratch_operands = 0 : i64, tpu.core_type = #tpu.core_type<tc>, window_params = [{transform_indices = @transform_0, window_bounds = array<i64: 224, 128>}, {pipeline_mode = #tpu.pipeline_mode<synchronous>, transform_indices = @transform_1, window_bounds = array<i64: 3, 112, 224>}, {pipeline_mode = #tpu.pipeline_mode<synchronous>, transform_indices = @transform_2, window_bounds = array<i64: 384, 256>}, {pipeline_mode = #tpu.pipeline_mode<synchronous>, transform_indices = @transform_3, window_bounds = array<i64: 1, 256>}, {pipeline_mode = #tpu.pipeline_mode<synchronous>, transform_indices = @transform_4, window_bounds = array<i64: 3, 56, 112>}, {pipeline_mode = #tpu.pipeline_mode<synchronous>, transform_indices = @transform_5, window_bounds = array<i64: 768, 256>}, {pipeline_mode = #tpu.pipeline_mode<synchronous>, transform_indices = @transform_6, window_bounds = array<i64: 1, 256>}, {pipeline_mode = #tpu.pipeline_mode<synchronous>, transform_indices = @transform_7, window_bounds = array<i64: 7, 8, 56>}, {pipeline_mode = #tpu.pipeline_mode<synchronous>, transform_indices = @transform_8, window_bounds = array<i64: 1792, 128>}, {pipeline_mode = #tpu.pipeline_mode<synchronous>, transform_indices = @transform_9, window_bounds = array<i64: 1, 128>}, {pipeline_mode = #tpu.pipeline_mode<synchronous>, transform_indices = @transform_10, window_bounds = array<i64: 7, 56, 8>}, {pipeline_mode = #tpu.pipeline_mode<synchronous>, transform_indices = @transform_11, window_bounds = array<i64: 896, 256>}, {pipeline_mode = #tpu.pipeline_mode<synchronous>, transform_indices = @transform_12, window_bounds = array<i64: 1, 256>}, {pipeline_mode = #tpu.pipeline_mode<synchronous>, transform_indices = @transform_13, window_bounds = array<i64: 3, 112, 56>}, {pipeline_mode = #tpu.pipeline_mode<synchronous>, transform_indices = @transform_14, window_bounds = array<i64: 768, 256>}, {pipeline_mode = #tpu.pipeline_mode<synchronous>, transform_indices = @transform_15, window_bounds = array<i64: 1, 256>}, {pipeline_mode = #tpu.pipeline_mode<synchronous>, transform_indices = @transform_16, window_bounds = array<i64: 3, 224, 112>}, {pipeline_mode = #tpu.pipeline_mode<synchronous>, transform_indices = @transform_17, window_bounds = array<i64: 768, 128>}, {pipeline_mode = #tpu.pipeline_mode<synchronous>, transform_indices = @transform_18, window_bounds = array<i64: 1, 128>}, {transform_indices = @transform_19, window_bounds = array<i64: 224, 128>}]} {
    %c0 = arith.constant 0 : index
    %c0_0 = arith.constant 0 : index
    %0 = vector.load %arg1[%c0, %c0_0] : memref<224x128xbf16, #tpu.memory_space<vmem>>, vector<224x128xbf16>
    %c0_1 = arith.constant 0 : index
    %c0_2 = arith.constant 0 : index
    %c0_3 = arith.constant 0 : index
    %1 = vector.load %arg2[%c0_1, %c0_2, %c0_3] : memref<3x112x224xbf16, #tpu.memory_space<vmem>>, vector<1x112x224xbf16>
    %2 = vector.shape_cast %1 : vector<1x112x224xbf16> to vector<112x224xbf16>
    %cst = arith.constant dense<0.000000e+00> : vector<112x128xf32>
    %3 = tpu.matmul %2, %0, %cst {dimension_numbers = #tpu.dot_dimension_numbers<[1], [0], [0], [1], [0, 0, 1, 1], [], []>} : vector<112x224xbf16>, vector<224x128xbf16>, vector<112x128xf32> -> vector<112x128xf32>
    %4 = arith.truncf %3 : vector<112x128xf32> to vector<112x128xbf16>
    %c1 = arith.constant 1 : index
    %c0_4 = arith.constant 0 : index
    %c0_5 = arith.constant 0 : index
    %5 = vector.load %arg2[%c1, %c0_4, %c0_5] : memref<3x112x224xbf16, #tpu.memory_space<vmem>>, vector<1x112x224xbf16>
    %6 = vector.shape_cast %5 : vector<1x112x224xbf16> to vector<112x224xbf16>
    %cst_6 = arith.constant dense<0.000000e+00> : vector<112x128xf32>
    %7 = tpu.matmul %6, %0, %cst_6 {dimension_numbers = #tpu.dot_dimension_numbers<[1], [0], [0], [1], [0, 0, 1, 1], [], []>} : vector<112x224xbf16>, vector<224x128xbf16>, vector<112x128xf32> -> vector<112x128xf32>
    %8 = arith.truncf %7 : vector<112x128xf32> to vector<112x128xbf16>
    %c2 = arith.constant 2 : index
    %c0_7 = arith.constant 0 : index
    %c0_8 = arith.constant 0 : index
    %9 = vector.load %arg2[%c2, %c0_7, %c0_8] : memref<3x112x224xbf16, #tpu.memory_space<vmem>>, vector<1x112x224xbf16>
    %10 = vector.shape_cast %9 : vector<1x112x224xbf16> to vector<112x224xbf16>
    %cst_9 = arith.constant dense<0.000000e+00> : vector<112x128xf32>
    %11 = tpu.matmul %10, %0, %cst_9 {dimension_numbers = #tpu.dot_dimension_numbers<[1], [0], [0], [1], [0, 0, 1, 1], [], []>} : vector<112x224xbf16>, vector<224x128xbf16>, vector<112x128xf32> -> vector<112x128xf32>
    %12 = arith.truncf %11 : vector<112x128xf32> to vector<112x128xbf16>
    %13 = tpu.concatenate %4, %8, %12 in 1 : vector<112x128xbf16>, vector<112x128xbf16>, vector<112x128xbf16> -> vector<112x384xbf16>
    %c0_10 = arith.constant 0 : index
    %c0_11 = arith.constant 0 : index
    %14 = vector.load %arg3[%c0_10, %c0_11] : memref<384x256xbf16, #tpu.memory_space<vmem>>, vector<384x256xbf16>
    %cst_12 = arith.constant dense<0.000000e+00> : vector<112x256xf32>
    %15 = tpu.matmul %13, %14, %cst_12 {dimension_numbers = #tpu.dot_dimension_numbers<[1], [0], [0], [1], [0, 0, 1, 1], [], []>} : vector<112x384xbf16>, vector<384x256xbf16>, vector<112x256xf32> -> vector<112x256xf32>
    %c0_13 = arith.constant 0 : index
    %c0_14 = arith.constant 0 : index
    %16 = vector.load %arg4[%c0_13, %c0_14] : memref<1x256xf32, #tpu.memory_space<vmem>>, vector<1x256xf32>
    %17 = vector.broadcast %16 : vector<1x256xf32> to vector<112x256xf32>
    %18 = arith.addf %15, %17 : vector<112x256xf32>
    %cst_15 = arith.constant 0.000000e+00 : f32
    %19 = vector.broadcast %cst_15 : f32 to vector<112x256xf32>
    %20 = arith.maximumf %18, %19 : vector<112x256xf32>
    %21 = arith.truncf %20 : vector<112x256xf32> to vector<112x256xbf16>
    %c0_16 = arith.constant 0 : index
    %c0_17 = arith.constant 0 : index
    %c0_18 = arith.constant 0 : index
    %22 = vector.load %arg5[%c0_16, %c0_17, %c0_18] : memref<3x56x112xbf16, #tpu.memory_space<vmem>>, vector<1x56x112xbf16>
    %23 = vector.shape_cast %22 : vector<1x56x112xbf16> to vector<56x112xbf16>
    %cst_19 = arith.constant dense<0.000000e+00> : vector<56x256xf32>
    %24 = tpu.matmul %23, %21, %cst_19 {dimension_numbers = #tpu.dot_dimension_numbers<[1], [0], [0], [1], [0, 0, 1, 1], [], []>} : vector<56x112xbf16>, vector<112x256xbf16>, vector<56x256xf32> -> vector<56x256xf32>
    %25 = arith.truncf %24 : vector<56x256xf32> to vector<56x256xbf16>
    %c1_20 = arith.constant 1 : index
    %c0_21 = arith.constant 0 : index
    %c0_22 = arith.constant 0 : index
    %26 = vector.load %arg5[%c1_20, %c0_21, %c0_22] : memref<3x56x112xbf16, #tpu.memory_space<vmem>>, vector<1x56x112xbf16>
    %27 = vector.shape_cast %26 : vector<1x56x112xbf16> to vector<56x112xbf16>
    %cst_23 = arith.constant dense<0.000000e+00> : vector<56x256xf32>
    %28 = tpu.matmul %27, %21, %cst_23 {dimension_numbers = #tpu.dot_dimension_numbers<[1], [0], [0], [1], [0, 0, 1, 1], [], []>} : vector<56x112xbf16>, vector<112x256xbf16>, vector<56x256xf32> -> vector<56x256xf32>
    %29 = arith.truncf %28 : vector<56x256xf32> to vector<56x256xbf16>
    %c2_24 = arith.constant 2 : index
    %c0_25 = arith.constant 0 : index
    %c0_26 = arith.constant 0 : index
    %30 = vector.load %arg5[%c2_24, %c0_25, %c0_26] : memref<3x56x112xbf16, #tpu.memory_space<vmem>>, vector<1x56x112xbf16>
    %31 = vector.shape_cast %30 : vector<1x56x112xbf16> to vector<56x112xbf16>
    %cst_27 = arith.constant dense<0.000000e+00> : vector<56x256xf32>
    %32 = tpu.matmul %31, %21, %cst_27 {dimension_numbers = #tpu.dot_dimension_numbers<[1], [0], [0], [1], [0, 0, 1, 1], [], []>} : vector<56x112xbf16>, vector<112x256xbf16>, vector<56x256xf32> -> vector<56x256xf32>
    %33 = arith.truncf %32 : vector<56x256xf32> to vector<56x256xbf16>
    %34 = tpu.concatenate %25, %29, %33 in 1 : vector<56x256xbf16>, vector<56x256xbf16>, vector<56x256xbf16> -> vector<56x768xbf16>
    %c0_28 = arith.constant 0 : index
    %c0_29 = arith.constant 0 : index
    %35 = vector.load %arg6[%c0_28, %c0_29] : memref<768x256xbf16, #tpu.memory_space<vmem>>, vector<768x256xbf16>
    %cst_30 = arith.constant dense<0.000000e+00> : vector<56x256xf32>
    %36 = tpu.matmul %34, %35, %cst_30 {dimension_numbers = #tpu.dot_dimension_numbers<[1], [0], [0], [1], [0, 0, 1, 1], [], []>} : vector<56x768xbf16>, vector<768x256xbf16>, vector<56x256xf32> -> vector<56x256xf32>
    %c0_31 = arith.constant 0 : index
    %c0_32 = arith.constant 0 : index
    %37 = vector.load %arg7[%c0_31, %c0_32] : memref<1x256xf32, #tpu.memory_space<vmem>>, vector<1x256xf32>
    %38 = vector.broadcast %37 : vector<1x256xf32> to vector<56x256xf32>
    %39 = arith.addf %36, %38 : vector<56x256xf32>
    %cst_33 = arith.constant 0.000000e+00 : f32
    %40 = vector.broadcast %cst_33 : f32 to vector<56x256xf32>
    %41 = arith.maximumf %39, %40 : vector<56x256xf32>
    %42 = arith.truncf %41 : vector<56x256xf32> to vector<56x256xbf16>
    %c0_34 = arith.constant 0 : index
    %c0_35 = arith.constant 0 : index
    %c0_36 = arith.constant 0 : index
    %43 = vector.load %arg8[%c0_34, %c0_35, %c0_36] : memref<7x8x56xbf16, #tpu.memory_space<vmem>>, vector<1x8x56xbf16>
    %44 = vector.shape_cast %43 : vector<1x8x56xbf16> to vector<8x56xbf16>
    %cst_37 = arith.constant dense<0.000000e+00> : vector<8x256xf32>
    %45 = tpu.matmul %44, %42, %cst_37 {dimension_numbers = #tpu.dot_dimension_numbers<[1], [0], [0], [1], [0, 0, 1, 1], [], []>} : vector<8x56xbf16>, vector<56x256xbf16>, vector<8x256xf32> -> vector<8x256xf32>
    %46 = arith.truncf %45 : vector<8x256xf32> to vector<8x256xbf16>
    %c1_38 = arith.constant 1 : index
    %c0_39 = arith.constant 0 : index
    %c0_40 = arith.constant 0 : index
    %47 = vector.load %arg8[%c1_38, %c0_39, %c0_40] : memref<7x8x56xbf16, #tpu.memory_space<vmem>>, vector<1x8x56xbf16>
    %48 = vector.shape_cast %47 : vector<1x8x56xbf16> to vector<8x56xbf16>
    %cst_41 = arith.constant dense<0.000000e+00> : vector<8x256xf32>
    %49 = tpu.matmul %48, %42, %cst_41 {dimension_numbers = #tpu.dot_dimension_numbers<[1], [0], [0], [1], [0, 0, 1, 1], [], []>} : vector<8x56xbf16>, vector<56x256xbf16>, vector<8x256xf32> -> vector<8x256xf32>
    %50 = arith.truncf %49 : vector<8x256xf32> to vector<8x256xbf16>
    %c2_42 = arith.constant 2 : index
    %c0_43 = arith.constant 0 : index
    %c0_44 = arith.constant 0 : index
    %51 = vector.load %arg8[%c2_42, %c0_43, %c0_44] : memref<7x8x56xbf16, #tpu.memory_space<vmem>>, vector<1x8x56xbf16>
    %52 = vector.shape_cast %51 : vector<1x8x56xbf16> to vector<8x56xbf16>
    %cst_45 = arith.constant dense<0.000000e+00> : vector<8x256xf32>
    %53 = tpu.matmul %52, %42, %cst_45 {dimension_numbers = #tpu.dot_dimension_numbers<[1], [0], [0], [1], [0, 0, 1, 1], [], []>} : vector<8x56xbf16>, vector<56x256xbf16>, vector<8x256xf32> -> vector<8x256xf32>
    %54 = arith.truncf %53 : vector<8x256xf32> to vector<8x256xbf16>
    %c3 = arith.constant 3 : index
    %c0_46 = arith.constant 0 : index
    %c0_47 = arith.constant 0 : index
    %55 = vector.load %arg8[%c3, %c0_46, %c0_47] : memref<7x8x56xbf16, #tpu.memory_space<vmem>>, vector<1x8x56xbf16>
    %56 = vector.shape_cast %55 : vector<1x8x56xbf16> to vector<8x56xbf16>
    %cst_48 = arith.constant dense<0.000000e+00> : vector<8x256xf32>
    %57 = tpu.matmul %56, %42, %cst_48 {dimension_numbers = #tpu.dot_dimension_numbers<[1], [0], [0], [1], [0, 0, 1, 1], [], []>} : vector<8x56xbf16>, vector<56x256xbf16>, vector<8x256xf32> -> vector<8x256xf32>
    %58 = arith.truncf %57 : vector<8x256xf32> to vector<8x256xbf16>
    %c4 = arith.constant 4 : index
    %c0_49 = arith.constant 0 : index
    %c0_50 = arith.constant 0 : index
    %59 = vector.load %arg8[%c4, %c0_49, %c0_50] : memref<7x8x56xbf16, #tpu.memory_space<vmem>>, vector<1x8x56xbf16>
    %60 = vector.shape_cast %59 : vector<1x8x56xbf16> to vector<8x56xbf16>
    %cst_51 = arith.constant dense<0.000000e+00> : vector<8x256xf32>
    %61 = tpu.matmul %60, %42, %cst_51 {dimension_numbers = #tpu.dot_dimension_numbers<[1], [0], [0], [1], [0, 0, 1, 1], [], []>} : vector<8x56xbf16>, vector<56x256xbf16>, vector<8x256xf32> -> vector<8x256xf32>
    %62 = arith.truncf %61 : vector<8x256xf32> to vector<8x256xbf16>
    %c5 = arith.constant 5 : index
    %c0_52 = arith.constant 0 : index
    %c0_53 = arith.constant 0 : index
    %63 = vector.load %arg8[%c5, %c0_52, %c0_53] : memref<7x8x56xbf16, #tpu.memory_space<vmem>>, vector<1x8x56xbf16>
    %64 = vector.shape_cast %63 : vector<1x8x56xbf16> to vector<8x56xbf16>
    %cst_54 = arith.constant dense<0.000000e+00> : vector<8x256xf32>
    %65 = tpu.matmul %64, %42, %cst_54 {dimension_numbers = #tpu.dot_dimension_numbers<[1], [0], [0], [1], [0, 0, 1, 1], [], []>} : vector<8x56xbf16>, vector<56x256xbf16>, vector<8x256xf32> -> vector<8x256xf32>
    %66 = arith.truncf %65 : vector<8x256xf32> to vector<8x256xbf16>
    %c6 = arith.constant 6 : index
    %c0_55 = arith.constant 0 : index
    %c0_56 = arith.constant 0 : index
    %67 = vector.load %arg8[%c6, %c0_55, %c0_56] : memref<7x8x56xbf16, #tpu.memory_space<vmem>>, vector<1x8x56xbf16>
    %68 = vector.shape_cast %67 : vector<1x8x56xbf16> to vector<8x56xbf16>
    %cst_57 = arith.constant dense<0.000000e+00> : vector<8x256xf32>
    %69 = tpu.matmul %68, %42, %cst_57 {dimension_numbers = #tpu.dot_dimension_numbers<[1], [0], [0], [1], [0, 0, 1, 1], [], []>} : vector<8x56xbf16>, vector<56x256xbf16>, vector<8x256xf32> -> vector<8x256xf32>
    %70 = arith.truncf %69 : vector<8x256xf32> to vector<8x256xbf16>
    %71 = tpu.concatenate %46, %50, %54, %58, %62, %66, %70 in 1 : vector<8x256xbf16>, vector<8x256xbf16>, vector<8x256xbf16>, vector<8x256xbf16>, vector<8x256xbf16>, vector<8x256xbf16>, vector<8x256xbf16> -> vector<8x1792xbf16>
    %c0_58 = arith.constant 0 : index
    %c0_59 = arith.constant 0 : index
    %72 = vector.load %arg9[%c0_58, %c0_59] : memref<1792x128xbf16, #tpu.memory_space<vmem>>, vector<1792x128xbf16>
    %cst_60 = arith.constant dense<0.000000e+00> : vector<8x128xf32>
    %73 = tpu.matmul %71, %72, %cst_60 {dimension_numbers = #tpu.dot_dimension_numbers<[1], [0], [0], [1], [0, 0, 1, 1], [], []>} : vector<8x1792xbf16>, vector<1792x128xbf16>, vector<8x128xf32> -> vector<8x128xf32>
    %c0_61 = arith.constant 0 : index
    %c0_62 = arith.constant 0 : index
    %74 = vector.load %arg10[%c0_61, %c0_62] : memref<1x128xf32, #tpu.memory_space<vmem>>, vector<1x128xf32>
    %75 = vector.broadcast %74 : vector<1x128xf32> to vector<8x128xf32>
    %76 = arith.addf %73, %75 : vector<8x128xf32>
    %77 = arith.truncf %76 : vector<8x128xf32> to vector<8x128xbf16>
    %c0_63 = arith.constant 0 : index
    %c0_64 = arith.constant 0 : index
    %c0_65 = arith.constant 0 : index
    %78 = vector.load %arg11[%c0_63, %c0_64, %c0_65] : memref<7x56x8xbf16, #tpu.memory_space<vmem>>, vector<1x56x8xbf16>
    %79 = vector.shape_cast %78 : vector<1x56x8xbf16> to vector<56x8xbf16>
    %cst_66 = arith.constant dense<0.000000e+00> : vector<56x128xf32>
    %80 = tpu.matmul %79, %77, %cst_66 {dimension_numbers = #tpu.dot_dimension_numbers<[1], [0], [0], [1], [0, 0, 1, 1], [], []>} : vector<56x8xbf16>, vector<8x128xbf16>, vector<56x128xf32> -> vector<56x128xf32>
    %81 = arith.truncf %80 : vector<56x128xf32> to vector<56x128xbf16>
    %c1_67 = arith.constant 1 : index
    %c0_68 = arith.constant 0 : index
    %c0_69 = arith.constant 0 : index
    %82 = vector.load %arg11[%c1_67, %c0_68, %c0_69] : memref<7x56x8xbf16, #tpu.memory_space<vmem>>, vector<1x56x8xbf16>
    %83 = vector.shape_cast %82 : vector<1x56x8xbf16> to vector<56x8xbf16>
    %cst_70 = arith.constant dense<0.000000e+00> : vector<56x128xf32>
    %84 = tpu.matmul %83, %77, %cst_70 {dimension_numbers = #tpu.dot_dimension_numbers<[1], [0], [0], [1], [0, 0, 1, 1], [], []>} : vector<56x8xbf16>, vector<8x128xbf16>, vector<56x128xf32> -> vector<56x128xf32>
    %85 = arith.truncf %84 : vector<56x128xf32> to vector<56x128xbf16>
    %c2_71 = arith.constant 2 : index
    %c0_72 = arith.constant 0 : index
    %c0_73 = arith.constant 0 : index
    %86 = vector.load %arg11[%c2_71, %c0_72, %c0_73] : memref<7x56x8xbf16, #tpu.memory_space<vmem>>, vector<1x56x8xbf16>
    %87 = vector.shape_cast %86 : vector<1x56x8xbf16> to vector<56x8xbf16>
    %cst_74 = arith.constant dense<0.000000e+00> : vector<56x128xf32>
    %88 = tpu.matmul %87, %77, %cst_74 {dimension_numbers = #tpu.dot_dimension_numbers<[1], [0], [0], [1], [0, 0, 1, 1], [], []>} : vector<56x8xbf16>, vector<8x128xbf16>, vector<56x128xf32> -> vector<56x128xf32>
    %89 = arith.truncf %88 : vector<56x128xf32> to vector<56x128xbf16>
    %c3_75 = arith.constant 3 : index
    %c0_76 = arith.constant 0 : index
    %c0_77 = arith.constant 0 : index
    %90 = vector.load %arg11[%c3_75, %c0_76, %c0_77] : memref<7x56x8xbf16, #tpu.memory_space<vmem>>, vector<1x56x8xbf16>
    %91 = vector.shape_cast %90 : vector<1x56x8xbf16> to vector<56x8xbf16>
    %cst_78 = arith.constant dense<0.000000e+00> : vector<56x128xf32>
    %92 = tpu.matmul %91, %77, %cst_78 {dimension_numbers = #tpu.dot_dimension_numbers<[1], [0], [0], [1], [0, 0, 1, 1], [], []>} : vector<56x8xbf16>, vector<8x128xbf16>, vector<56x128xf32> -> vector<56x128xf32>
    %93 = arith.truncf %92 : vector<56x128xf32> to vector<56x128xbf16>
    %c4_79 = arith.constant 4 : index
    %c0_80 = arith.constant 0 : index
    %c0_81 = arith.constant 0 : index
    %94 = vector.load %arg11[%c4_79, %c0_80, %c0_81] : memref<7x56x8xbf16, #tpu.memory_space<vmem>>, vector<1x56x8xbf16>
    %95 = vector.shape_cast %94 : vector<1x56x8xbf16> to vector<56x8xbf16>
    %cst_82 = arith.constant dense<0.000000e+00> : vector<56x128xf32>
    %96 = tpu.matmul %95, %77, %cst_82 {dimension_numbers = #tpu.dot_dimension_numbers<[1], [0], [0], [1], [0, 0, 1, 1], [], []>} : vector<56x8xbf16>, vector<8x128xbf16>, vector<56x128xf32> -> vector<56x128xf32>
    %97 = arith.truncf %96 : vector<56x128xf32> to vector<56x128xbf16>
    %c5_83 = arith.constant 5 : index
    %c0_84 = arith.constant 0 : index
    %c0_85 = arith.constant 0 : index
    %98 = vector.load %arg11[%c5_83, %c0_84, %c0_85] : memref<7x56x8xbf16, #tpu.memory_space<vmem>>, vector<1x56x8xbf16>
    %99 = vector.shape_cast %98 : vector<1x56x8xbf16> to vector<56x8xbf16>
    %cst_86 = arith.constant dense<0.000000e+00> : vector<56x128xf32>
    %100 = tpu.matmul %99, %77, %cst_86 {dimension_numbers = #tpu.dot_dimension_numbers<[1], [0], [0], [1], [0, 0, 1, 1], [], []>} : vector<56x8xbf16>, vector<8x128xbf16>, vector<56x128xf32> -> vector<56x128xf32>
    %101 = arith.truncf %100 : vector<56x128xf32> to vector<56x128xbf16>
    %c6_87 = arith.constant 6 : index
    %c0_88 = arith.constant 0 : index
    %c0_89 = arith.constant 0 : index
    %102 = vector.load %arg11[%c6_87, %c0_88, %c0_89] : memref<7x56x8xbf16, #tpu.memory_space<vmem>>, vector<1x56x8xbf16>
    %103 = vector.shape_cast %102 : vector<1x56x8xbf16> to vector<56x8xbf16>
    %cst_90 = arith.constant dense<0.000000e+00> : vector<56x128xf32>
    %104 = tpu.matmul %103, %77, %cst_90 {dimension_numbers = #tpu.dot_dimension_numbers<[1], [0], [0], [1], [0, 0, 1, 1], [], []>} : vector<56x8xbf16>, vector<8x128xbf16>, vector<56x128xf32> -> vector<56x128xf32>
    %105 = arith.truncf %104 : vector<56x128xf32> to vector<56x128xbf16>
    %106 = tpu.concatenate %81, %85, %89, %93, %97, %101, %105 in 1 : vector<56x128xbf16>, vector<56x128xbf16>, vector<56x128xbf16>, vector<56x128xbf16>, vector<56x128xbf16>, vector<56x128xbf16>, vector<56x128xbf16> -> vector<56x896xbf16>
    %c0_91 = arith.constant 0 : index
    %c0_92 = arith.constant 0 : index
    %107 = vector.load %arg12[%c0_91, %c0_92] : memref<896x256xbf16, #tpu.memory_space<vmem>>, vector<896x256xbf16>
    %cst_93 = arith.constant dense<0.000000e+00> : vector<56x256xf32>
    %108 = tpu.matmul %106, %107, %cst_93 {dimension_numbers = #tpu.dot_dimension_numbers<[1], [0], [0], [1], [0, 0, 1, 1], [], []>} : vector<56x896xbf16>, vector<896x256xbf16>, vector<56x256xf32> -> vector<56x256xf32>
    %c0_94 = arith.constant 0 : index
    %c0_95 = arith.constant 0 : index
    %109 = vector.load %arg13[%c0_94, %c0_95] : memref<1x256xf32, #tpu.memory_space<vmem>>, vector<1x256xf32>
    %110 = vector.broadcast %109 : vector<1x256xf32> to vector<56x256xf32>
    %111 = arith.addf %108, %110 : vector<56x256xf32>
    %cst_96 = arith.constant 0.000000e+00 : f32
    %112 = vector.broadcast %cst_96 : f32 to vector<56x256xf32>
    %113 = arith.maximumf %111, %112 : vector<56x256xf32>
    %114 = arith.truncf %113 : vector<56x256xf32> to vector<56x256xbf16>
    %c0_97 = arith.constant 0 : index
    %c0_98 = arith.constant 0 : index
    %c0_99 = arith.constant 0 : index
    %115 = vector.load %arg14[%c0_97, %c0_98, %c0_99] : memref<3x112x56xbf16, #tpu.memory_space<vmem>>, vector<1x112x56xbf16>
    %116 = vector.shape_cast %115 : vector<1x112x56xbf16> to vector<112x56xbf16>
    %cst_100 = arith.constant dense<0.000000e+00> : vector<112x256xf32>
    %117 = tpu.matmul %116, %114, %cst_100 {dimension_numbers = #tpu.dot_dimension_numbers<[1], [0], [0], [1], [0, 0, 1, 1], [], []>} : vector<112x56xbf16>, vector<56x256xbf16>, vector<112x256xf32> -> vector<112x256xf32>
    %118 = arith.truncf %117 : vector<112x256xf32> to vector<112x256xbf16>
    %c1_101 = arith.constant 1 : index
    %c0_102 = arith.constant 0 : index
    %c0_103 = arith.constant 0 : index
    %119 = vector.load %arg14[%c1_101, %c0_102, %c0_103] : memref<3x112x56xbf16, #tpu.memory_space<vmem>>, vector<1x112x56xbf16>
    %120 = vector.shape_cast %119 : vector<1x112x56xbf16> to vector<112x56xbf16>
    %cst_104 = arith.constant dense<0.000000e+00> : vector<112x256xf32>
    %121 = tpu.matmul %120, %114, %cst_104 {dimension_numbers = #tpu.dot_dimension_numbers<[1], [0], [0], [1], [0, 0, 1, 1], [], []>} : vector<112x56xbf16>, vector<56x256xbf16>, vector<112x256xf32> -> vector<112x256xf32>
    %122 = arith.truncf %121 : vector<112x256xf32> to vector<112x256xbf16>
    %c2_105 = arith.constant 2 : index
    %c0_106 = arith.constant 0 : index
    %c0_107 = arith.constant 0 : index
    %123 = vector.load %arg14[%c2_105, %c0_106, %c0_107] : memref<3x112x56xbf16, #tpu.memory_space<vmem>>, vector<1x112x56xbf16>
    %124 = vector.shape_cast %123 : vector<1x112x56xbf16> to vector<112x56xbf16>
    %cst_108 = arith.constant dense<0.000000e+00> : vector<112x256xf32>
    %125 = tpu.matmul %124, %114, %cst_108 {dimension_numbers = #tpu.dot_dimension_numbers<[1], [0], [0], [1], [0, 0, 1, 1], [], []>} : vector<112x56xbf16>, vector<56x256xbf16>, vector<112x256xf32> -> vector<112x256xf32>
    %126 = arith.truncf %125 : vector<112x256xf32> to vector<112x256xbf16>
    %127 = tpu.concatenate %118, %122, %126 in 1 : vector<112x256xbf16>, vector<112x256xbf16>, vector<112x256xbf16> -> vector<112x768xbf16>
    %c0_109 = arith.constant 0 : index
    %c0_110 = arith.constant 0 : index
    %128 = vector.load %arg15[%c0_109, %c0_110] : memref<768x256xbf16, #tpu.memory_space<vmem>>, vector<768x256xbf16>
    %cst_111 = arith.constant dense<0.000000e+00> : vector<112x256xf32>
    %129 = tpu.matmul %127, %128, %cst_111 {dimension_numbers = #tpu.dot_dimension_numbers<[1], [0], [0], [1], [0, 0, 1, 1], [], []>} : vector<112x768xbf16>, vector<768x256xbf16>, vector<112x256xf32> -> vector<112x256xf32>
    %c0_112 = arith.constant 0 : index
    %c0_113 = arith.constant 0 : index
    %130 = vector.load %arg16[%c0_112, %c0_113] : memref<1x256xf32, #tpu.memory_space<vmem>>, vector<1x256xf32>
    %131 = vector.broadcast %130 : vector<1x256xf32> to vector<112x256xf32>
    %132 = arith.addf %129, %131 : vector<112x256xf32>
    %cst_114 = arith.constant 0.000000e+00 : f32
    %133 = vector.broadcast %cst_114 : f32 to vector<112x256xf32>
    %134 = arith.maximumf %132, %133 : vector<112x256xf32>
    %135 = arith.truncf %134 : vector<112x256xf32> to vector<112x256xbf16>
    %c0_115 = arith.constant 0 : index
    %c0_116 = arith.constant 0 : index
    %c0_117 = arith.constant 0 : index
    %136 = vector.load %arg17[%c0_115, %c0_116, %c0_117] : memref<3x224x112xbf16, #tpu.memory_space<vmem>>, vector<1x224x112xbf16>
    %137 = vector.shape_cast %136 : vector<1x224x112xbf16> to vector<224x112xbf16>
    %cst_118 = arith.constant dense<0.000000e+00> : vector<224x256xf32>
    %138 = tpu.matmul %137, %135, %cst_118 {dimension_numbers = #tpu.dot_dimension_numbers<[1], [0], [0], [1], [0, 0, 1, 1], [], []>} : vector<224x112xbf16>, vector<112x256xbf16>, vector<224x256xf32> -> vector<224x256xf32>
    %139 = arith.truncf %138 : vector<224x256xf32> to vector<224x256xbf16>
    %c1_119 = arith.constant 1 : index
    %c0_120 = arith.constant 0 : index
    %c0_121 = arith.constant 0 : index
    %140 = vector.load %arg17[%c1_119, %c0_120, %c0_121] : memref<3x224x112xbf16, #tpu.memory_space<vmem>>, vector<1x224x112xbf16>
    %141 = vector.shape_cast %140 : vector<1x224x112xbf16> to vector<224x112xbf16>
    %cst_122 = arith.constant dense<0.000000e+00> : vector<224x256xf32>
    %142 = tpu.matmul %141, %135, %cst_122 {dimension_numbers = #tpu.dot_dimension_numbers<[1], [0], [0], [1], [0, 0, 1, 1], [], []>} : vector<224x112xbf16>, vector<112x256xbf16>, vector<224x256xf32> -> vector<224x256xf32>
    %143 = arith.truncf %142 : vector<224x256xf32> to vector<224x256xbf16>
    %c2_123 = arith.constant 2 : index
    %c0_124 = arith.constant 0 : index
    %c0_125 = arith.constant 0 : index
    %144 = vector.load %arg17[%c2_123, %c0_124, %c0_125] : memref<3x224x112xbf16, #tpu.memory_space<vmem>>, vector<1x224x112xbf16>
    %145 = vector.shape_cast %144 : vector<1x224x112xbf16> to vector<224x112xbf16>
    %cst_126 = arith.constant dense<0.000000e+00> : vector<224x256xf32>
    %146 = tpu.matmul %145, %135, %cst_126 {dimension_numbers = #tpu.dot_dimension_numbers<[1], [0], [0], [1], [0, 0, 1, 1], [], []>} : vector<224x112xbf16>, vector<112x256xbf16>, vector<224x256xf32> -> vector<224x256xf32>
    %147 = arith.truncf %146 : vector<224x256xf32> to vector<224x256xbf16>
    %148 = tpu.concatenate %139, %143, %147 in 1 : vector<224x256xbf16>, vector<224x256xbf16>, vector<224x256xbf16> -> vector<224x768xbf16>
    %c0_127 = arith.constant 0 : index
    %c0_128 = arith.constant 0 : index
    %149 = vector.load %arg18[%c0_127, %c0_128] : memref<768x128xbf16, #tpu.memory_space<vmem>>, vector<768x128xbf16>
    %cst_129 = arith.constant dense<0.000000e+00> : vector<224x128xf32>
    %150 = tpu.matmul %148, %149, %cst_129 {dimension_numbers = #tpu.dot_dimension_numbers<[1], [0], [0], [1], [0, 0, 1, 1], [], []>} : vector<224x768xbf16>, vector<768x128xbf16>, vector<224x128xf32> -> vector<224x128xf32>
    %c0_130 = arith.constant 0 : index
    %c0_131 = arith.constant 0 : index
    %151 = vector.load %arg19[%c0_130, %c0_131] : memref<1x128xf32, #tpu.memory_space<vmem>>, vector<1x128xf32>
    %152 = vector.broadcast %151 : vector<1x128xf32> to vector<224x128xf32>
    %153 = arith.addf %150, %152 : vector<224x128xf32>
    %cst_132 = arith.constant 0.000000e+00 : f32
    %154 = vector.broadcast %cst_132 : f32 to vector<224x128xf32>
    %155 = arith.subf %154, %153 : vector<224x128xf32>
    %156 = math.exp %155 : vector<224x128xf32>
    %cst_133 = arith.constant 1.000000e+00 : f32
    %157 = vector.broadcast %cst_133 : f32 to vector<224x128xf32>
    %158 = arith.addf %157, %156 : vector<224x128xf32>
    %159 = tpu.reciprocal %158 {approx = true} : vector<224x128xf32> -> vector<224x128xf32>
    %cst_134 = arith.constant 1.000000e+00 : f32
    %160 = vector.broadcast %cst_134 : f32 to vector<224x128xf32>
    %161 = arith.minimumf %159, %160 : vector<224x128xf32>
    %c0_135 = arith.constant 0 : index
    %c0_136 = arith.constant 0 : index
    %162 = vector.load %arg20[%c0_135, %c0_136] : memref<224x128xf32, #tpu.memory_space<vmem>>, vector<224x128xf32>
    tpu.vector_store %arg20[%c0_135, %c0_136], %161 {strides = array<i32>} : memref<224x128xf32, #tpu.memory_space<vmem>>, vector<224x128xf32>,
    return
  }
  func.func @transform_0(%arg0: i32) -> (i32, i32) {
    %c0_i32 = arith.constant 0 : i32
    %c0_i32_0 = arith.constant 0 : i32
    return %arg0, %c0_i32 : i32, i32
  }
  func.func @transform_1(%arg0: i32) -> (i32, i32, i32) {
    %c0_i32 = arith.constant 0 : i32
    %c0_i32_0 = arith.constant 0 : i32
    %c0_i32_1 = arith.constant 0 : i32
    %c0_i32_2 = arith.constant 0 : i32
    return %c0_i32, %c0_i32_0, %c0_i32_1 : i32, i32, i32
  }
  func.func @transform_2(%arg0: i32) -> (i32, i32) {
    %c0_i32 = arith.constant 0 : i32
    %c0_i32_0 = arith.constant 0 : i32
    %c0_i32_1 = arith.constant 0 : i32
    return %c0_i32, %c0_i32_0 : i32, i32
  }
  func.func @transform_3(%arg0: i32) -> (i32, i32) {
    %c0_i32 = arith.constant 0 : i32
    %c0_i32_0 = arith.constant 0 : i32
    %c0_i32_1 = arith.constant 0 : i32
    return %c0_i32, %c0_i32_0 : i32, i32
  }
  func.func @transform_4(%arg0: i32) -> (i32, i32, i32) {
    %c0_i32 = arith.constant 0 : i32
    %c0_i32_0 = arith.constant 0 : i32
    %c0_i32_1 = arith.constant 0 : i32
    %c0_i32_2 = arith.constant 0 : i32
    return %c0_i32, %c0_i32_0, %c0_i32_1 : i32, i32, i32
  }
  func.func @transform_5(%arg0: i32) -> (i32, i32) {
    %c0_i32 = arith.constant 0 : i32
    %c0_i32_0 = arith.constant 0 : i32
    %c0_i32_1 = arith.constant 0 : i32
    return %c0_i32, %c0_i32_0 : i32, i32
  }
  func.func @transform_6(%arg0: i32) -> (i32, i32) {
    %c0_i32 = arith.constant 0 : i32
    %c0_i32_0 = arith.constant 0 : i32
    %c0_i32_1 = arith.constant 0 : i32
    return %c0_i32, %c0_i32_0 : i32, i32
  }
  func.func @transform_7(%arg0: i32) -> (i32, i32, i32) {
    %c0_i32 = arith.constant 0 : i32
    %c0_i32_0 = arith.constant 0 : i32
    %c0_i32_1 = arith.constant 0 : i32
    %c0_i32_2 = arith.constant 0 : i32
    return %c0_i32, %c0_i32_0, %c0_i32_1 : i32, i32, i32
  }
  func.func @transform_8(%arg0: i32) -> (i32, i32) {
    %c0_i32 = arith.constant 0 : i32
    %c0_i32_0 = arith.constant 0 : i32
    %c0_i32_1 = arith.constant 0 : i32
    return %c0_i32, %c0_i32_0 : i32, i32
  }
  func.func @transform_9(%arg0: i32) -> (i32, i32) {
    %c0_i32 = arith.constant 0 : i32
    %c0_i32_0 = arith.constant 0 : i32
    %c0_i32_1 = arith.constant 0 : i32
    return %c0_i32, %c0_i32_0 : i32, i32
  }
  func.func @transform_10(%arg0: i32) -> (i32, i32, i32) {
    %c0_i32 = arith.constant 0 : i32
    %c0_i32_0 = arith.constant 0 : i32
    %c0_i32_1 = arith.constant 0 : i32
    %c0_i32_2 = arith.constant 0 : i32
    return %c0_i32, %c0_i32_0, %c0_i32_1 : i32, i32, i32
  }
  func.func @transform_11(%arg0: i32) -> (i32, i32) {
    %c0_i32 = arith.constant 0 : i32
    %c0_i32_0 = arith.constant 0 : i32
    %c0_i32_1 = arith.constant 0 : i32
    return %c0_i32, %c0_i32_0 : i32, i32
  }
  func.func @transform_12(%arg0: i32) -> (i32, i32) {
    %c0_i32 = arith.constant 0 : i32
    %c0_i32_0 = arith.constant 0 : i32
    %c0_i32_1 = arith.constant 0 : i32
    return %c0_i32, %c0_i32_0 : i32, i32
  }
  func.func @transform_13(%arg0: i32) -> (i32, i32, i32) {
    %c0_i32 = arith.constant 0 : i32
    %c0_i32_0 = arith.constant 0 : i32
    %c0_i32_1 = arith.constant 0 : i32
    %c0_i32_2 = arith.constant 0 : i32
    return %c0_i32, %c0_i32_0, %c0_i32_1 : i32, i32, i32
  }
  func.func @transform_14(%arg0: i32) -> (i32, i32) {
    %c0_i32 = arith.constant 0 : i32
    %c0_i32_0 = arith.constant 0 : i32
    %c0_i32_1 = arith.constant 0 : i32
    return %c0_i32, %c0_i32_0 : i32, i32
  }
  func.func @transform_15(%arg0: i32) -> (i32, i32) {
    %c0_i32 = arith.constant 0 : i32
    %c0_i32_0 = arith.constant 0 : i32
    %c0_i32_1 = arith.constant 0 : i32
    return %c0_i32, %c0_i32_0 : i32, i32
  }
  func.func @transform_16(%arg0: i32) -> (i32, i32, i32) {
    %c0_i32 = arith.constant 0 : i32
    %c0_i32_0 = arith.constant 0 : i32
    %c0_i32_1 = arith.constant 0 : i32
    %c0_i32_2 = arith.constant 0 : i32
    return %c0_i32, %c0_i32_0, %c0_i32_1 : i32, i32, i32
  }
  func.func @transform_17(%arg0: i32) -> (i32, i32) {
    %c0_i32 = arith.constant 0 : i32
    %c0_i32_0 = arith.constant 0 : i32
    %c0_i32_1 = arith.constant 0 : i32
    return %c0_i32, %c0_i32_0 : i32, i32
  }
  func.func @transform_18(%arg0: i32) -> (i32, i32) {
    %c0_i32 = arith.constant 0 : i32
    %c0_i32_0 = arith.constant 0 : i32
    %c0_i32_1 = arith.constant 0 : i32
    return %c0_i32, %c0_i32_0 : i32, i32
  }
  func.func @transform_19(%arg0: i32) -> (i32, i32) {
    %c0_i32 = arith.constant 0 : i32
    %c0_i32_0 = arith.constant 0 : i32
    return %arg0, %c0_i32 : i32, i32
  }
}

</mosaic_0001>

<bundles_post_ra>
// kernel: _lambda_.1
= control target key start
LH: loop header
LB: loop body
LE: loop exit
PB: predicated region body
PF: predicated region fallthrough
CT: control target
= control target key end

     0   :  { %s15968_s0 = inlined_call_operand.vmem [shape: bf16[448,128], index: 0, kind: input, shape index: {}]   ;;  %s15969_s1 = inlined_call_operand.hbm [shape: bf16[3,112,224], index: 1, kind: input, shape index: {}]   ;;  %s15970_s2 = inlined_call_operand.hbm [shape: bf16[384,256], index: 2, kind: input, shape index: {}]   ;;  %s15971_s3 = inlined_call_operand.vmem [shape: f32[1,256], index: 3, kind: input, shape index: {}]   ;;  %s15972_s4 = inlined_call_operand.hbm [shape: bf16[3,56,112], index: 4, kind: input, shape index: {}]   ;;  %s15973_s5 = inlined_call_operand.vmem [shape: bf16[768,256], index: 5, kind: input, shape index: {}]   ;;  %s15974_s6 = inlined_call_operand.vmem [shape: f32[1,256], index: 6, kind: input, shape index: {}]   ;;  %s15975_s7 = inlined_call_operand.vmem [shape: bf16[7,8,56], index: 7, kind: input, shape index: {}]   ;;  %s15976_s8 = inlined_call_operand.vmem [shape: bf16[1792,128], index: 8, kind: input, shape index: {}]   ;;  %s15977_s9 = inlined_call_operand.vmem [shape: f32[1,128], index: 9, kind: input, shape index: {}]   ;;  %s15978_s10 = inlined_call_operand.vmem [shape: bf16[7,56,8], index: 10, kind: input, shape index: {}]   ;;  %s15979_s11 = inlined_call_operand.vmem [shape: bf16[896,256], index: 11, kind: input, shape index: {}]   ;;  %s15980_s12 = inlined_call_operand.vmem [shape: f32[1,256], index: 12, kind: input, shape index: {}]   ;;  %s15981_s13 = inlined_call_operand.vmem [shape: bf16[3,112,56], index: 13, kind: input, shape index: {}]   ;;  %s15982_s14 = inlined_call_operand.hbm [shape: bf16[768,256], index: 14, kind: input, shape index: {}]   ;;  %s15983_s15 = inlined_call_operand.vmem [shape: f32[1,256], index: 15, kind: input, shape index: {}]   ;;  %s15984_s16 = inlined_call_operand.hbm [shape: bf16[3,224,112], index: 16, kind: input, shape index: {}]   ;;  %s15985_s17 = inlined_call_operand.hbm [shape: bf16[768,128], index: 17, kind: input, shape index: {}]   ;;  %s15986_s18 = inlined_call_operand.vmem [shape: f32[1,128], index: 18, kind: input, shape index: {}]   ;;  %s15987_s19 = inlined_call_operand.vmem [shape: f32[448,128], index: 19, kind: output, shape index: {}]  }
   0x1   :  { %15997 = sst [smem:[#allocation16_spill]] %s15968_s0 }
   0x2   :  { %15998 = sst [smem:[#allocation17_spill]] %s15969_s1 }
   0x3   :  { %15999 = sst [smem:[#allocation18_spill]] %s15970_s2 }
   0x4   :  { %16000 = sst [smem:[#allocation19_spill]] %s15971_s3 }
   0x5   :  { %16001 = sst [smem:[#allocation20_spill]] %s15979_s11 }
   0x6   :  { %16002 = sst [smem:[#allocation21_spill]] %s15980_s12 }
   0x7   :  { %16003 = sst [smem:[#allocation22_spill]] %s15981_s13 }
   0x8   :  { %16004 = sst [smem:[#allocation23_spill]] %s15982_s14 }
   0x9   :  { %16005 = sst [smem:[#allocation24_spill]] %s15983_s15 }
   0xa   :  { %16006 = sst [smem:[#allocation25_spill]] %s15986_s18 }
   0xb   :  { %16007 = sst [smem:[#allocation26_spill]] %s15987_s19 }
   0xc   :  { %24 = vsyncpa [#allocation3], 0 }
   0xd   :  { %25 = vsyncpa [#allocation5], 0 }
   0xe   :  { %26 = vsyncpa [#allocation8], 0 }
   0xf   :  { %27 = vsyncpa [#allocation11], 0  ;;  %s13143_s0 = smov 0  }
  0x10 LB: > { %s15990_s30 = sadd.s32 4294967295, %s13030_s0   ;;  %p10049_p0 = scmp.ge.s32.totalorder %s13030_s0, 1  ;;  %s13030_s0 = sphi %s13143_s0, %s33_s0  }
  0x11   : > { %p468_p1 = scmp.lt.s32.totalorder %s13030_s0, 3  ;;  %p13153_p2 = scmp.eq.s32.totalorder %s15990_s30, 0 }
  0x12   : > { %s13032_s1 = smov [#allocation4]   ;;  %s13033_s2 = smov [#allocation7]  }
  0x13   : > { %s16008_s20 = scalar_select %p13153_p2, 1, 0 }
  0x14   : > { %p13157_p3 = pnand %p10049_p0, %p468_p1  ;;  %s493_s22 = sshll.u32 %s13032_s1, 4  ;;  %s13161_s22 = int_to_ptr.vmem [resolvable:$true] %s493_s22 }
  0x15   : > { %s549_s23 = sshll.u32 %s13033_s2, 4  ;;  %s13034_s25 = smov [#allocation2]   ;;  %s13165_s23 = int_to_ptr.vmem [resolvable:$true] %s549_s23 }
  0x16   : > { %s16009_s21 = scalar_select %p13157_p3, 1, 0 }
  0x17   : > { %p11810_p4 = pneg %p13157_p3  ;;  %s480_s3 = sshll.u32 %s13034_s25, 4  ;;  %s13173_s3 = int_to_ptr.vmem [resolvable:$true] %s480_s3 }
  0x18   : > { %s13035_s26 = smov [#allocation6]   ;;  %s16011_s1 = sld [smem:[#allocation18_spill]] }
  0x19   : > { %p13169_p5 = pnand %p13153_p2, %p11810_p4  ;;  %s13175_s27 = sshll.u32 %s13035_s26, 4  ;;  %s510_s27 = int_to_ptr.vmem [resolvable:$true] %s13175_s27 }
  0x1b   : > { %p13185_p7 = pneg %p13169_p5 }
  0x1e   : > { %s12840_s30 = scalar_lea.hbm %s16011_s1, 6144 }
  0x1f   : > { %p12841_p6 = scmp.ne.s32.totalorder %s16011_s1, %s12840_s30  ;;  %p12847_p10 = scmp.lt.u32.totalorder %s12840_s30, %s16011_s1 }
  0x21   : > { %p12843_p8 = pnand %p13185_p7, %p12841_p6 }
  0x23   : > { %p12844_p9 = pneg %p12843_p8 }
  0x25   : > { %p12849_p11 = pnand %p12847_p10, %p12844_p9 }
  0x27   : > { %12852 = shalt.err (!%p12849_p11)
}
  0x28   : > { %s12853_s19 = scalar_lea.vmem %s13161_s22, 6144  ;;  %p12861_p1 = scmp.lt.s32.totalorder %s13161_s22, %s13161_s22 }
  0x29   : > { %p12854_p12 = scmp.ne.s32.totalorder %s13161_s22, %s12853_s19  ;;  %p12862_p4 = scmp.lt.s32.totalorder %s12853_s19, %s12853_s19 }
  0x2b   : > { %p12856_p13 = pnand %p12854_p12, %p13185_p7  ;;  %p12863_p6 = por %p12862_p4, %p12861_p1 }
  0x2d   : > { %p12857_p0 = pneg %p12856_p13 }
  0x2f   : > { %p12864_p8 = pnand %p12863_p6, %p12857_p0 }
  0x31   : > { %12867 = shalt.err (!%p12864_p8)
}
  0x32   : > { %s13036_s28 = smov 128   ;;  %s13037_s30 = smov 8  }
  0x33   : > { %11816 = dma.hbm_to_vmem [thread:$0]  (!%p13169_p5), %s16011_s1, 6144, %s13161_s22, [#allocation5], %s13036_s28, %s13036_s28, %s13037_s30  }
  0x34   : > { %s16013_s14 = sld [smem:[#allocation23_spill]] }
  0x3a   : > { %s12868_s19 = scalar_lea.hbm %s16013_s14, 12288 }
  0x3b   : > { %p12869_p9 = scmp.ne.s32.totalorder %s16013_s14, %s12868_s19  ;;  %p12875_p12 = scmp.lt.u32.totalorder %s12868_s19, %s16013_s14 }
  0x3d   : > { %p12871_p10 = pnand %p12869_p9, %p13185_p7 }
  0x3f   : > { %p12872_p11 = pneg %p12871_p10 }
  0x41   : > { %p12877_p13 = pnand %p12875_p12, %p12872_p11 }
  0x43   : > { %12880 = shalt.err (!%p12877_p13)
}
  0x44   : > { %s12881_s22 = scalar_lea.vmem %s13165_s23, 12288  ;;  %p12889_p6 = scmp.lt.s32.totalorder %s13165_s23, %s13165_s23 }
  0x45   : > { %p12882_p0 = scmp.ne.s32.totalorder %s13165_s23, %s12881_s22  ;;  %p12890_p8 = scmp.lt.s32.totalorder %s12881_s22, %s12881_s22 }
  0x47   : > { %p12884_p1 = pnand %p12882_p0, %p13185_p7  ;;  %p12891_p9 = por %p12890_p8, %p12889_p6 }
  0x49   : > { %p12885_p4 = pneg %p12884_p1 }
  0x4b   : > { %p12892_p10 = pnand %p12891_p9, %p12885_p4 }
  0x4d   : > { %12895 = shalt.err (!%p12892_p10)
}
  0x4e   : > { %11822 = dma.hbm_to_vmem [thread:$0]  (!%p13169_p5), %s16013_s14, 12288, %s13165_s23, [#allocation8], %s13036_s28, %s13036_s28, %s13037_s30  }
  0x4f   : > { %s16014_s29 = sld [smem:[#allocation17_spill]] }
  0x55   : > { %s12896_s2 = scalar_lea.hbm %s16014_s29, 5376 }
  0x56   : > { %p12897_p11 = scmp.ne.s32.totalorder %s16014_s29, %s12896_s2  ;;  %p12903_p0 = scmp.lt.u32.totalorder %s12896_s2, %s16014_s29 }
  0x58   : > { %p12899_p12 = pnand %p12897_p11, %p13185_p7 }
  0x5a   : > { %p12900_p13 = pneg %p12899_p12 }
  0x5c   : > { %p12905_p1 = pnand %p12903_p0, %p12900_p13 }
  0x5e   : > { %12908 = shalt.err (!%p12905_p1)
}
  0x5f   : > { %s12909_s23 = scalar_lea.vmem %s13173_s3, 5376  ;;  %p12917_p9 = scmp.lt.s32.totalorder %s13173_s3, %s13173_s3 }
  0x60   : > { %p12910_p4 = scmp.ne.s32.totalorder %s13173_s3, %s12909_s23  ;;  %p12918_p10 = scmp.lt.s32.totalorder %s12909_s23, %s12909_s23 }
  0x62   : > { %p12912_p6 = pnand %p12910_p4, %p13185_p7  ;;  %p12919_p11 = por %p12918_p10, %p12917_p9 }
  0x64   : > { %p12913_p8 = pneg %p12912_p6 }
  0x66   : > { %p12920_p12 = pnand %p12919_p11, %p12913_p8 }
  0x68   : > { %12923 = shalt.err (!%p12920_p12)
}
  0x69   : > { %11813 = dma.hbm_to_vmem [thread:$0]  (!%p13169_p5), %s16014_s29, 5376, %s13173_s3, [#allocation3], %s13036_s28, %s13036_s28, %s13037_s30  }
  0x6a   : > { %s12924_s2 = scalar_lea.hbm %s15972_s4, 1344 }
  0x6b   : > { %p12925_p13 = scmp.ne.s32.totalorder %s15972_s4, %s12924_s2  ;;  %p12931_p4 = scmp.lt.u32.totalorder %s12924_s2, %s15972_s4 }
  0x6d   : > { %p12927_p0 = pnand %p12925_p13, %p13185_p7 }
  0x6f   : > { %p12928_p1 = pneg %p12927_p0 }
  0x71   : > { %p12933_p6 = pnand %p12931_p4, %p12928_p1 }
  0x73   : > { %12936 = shalt.err (!%p12933_p6)
}
  0x74   : > { %s12937_s23 = scalar_lea.vmem %s510_s27, 1344  ;;  %p12945_p11 = scmp.lt.s32.totalorder %s510_s27, %s510_s27 }
  0x75   : > { %p12938_p8 = scmp.ne.s32.totalorder %s510_s27, %s12937_s23  ;;  %p12946_p12 = scmp.lt.s32.totalorder %s12937_s23, %s12937_s23 }
  0x77   : > { %p12940_p9 = pnand %p12938_p8, %p13185_p7  ;;  %p12947_p2 = por %p12946_p12, %p12945_p11 }
  0x79   : > { %p12941_p10 = pneg %p12940_p9 }
  0x7b   : > { %p12948_p3 = pnand %p12947_p2, %p12941_p10 }
  0x7d   : > { %12951 = shalt.err (!%p12948_p3)
}
  0x7e   : > { %s13038_s3 = smov 64   ;;  %s13039_s28 = smov 4  }
  0x7f   : > { %11819 = dma.hbm_to_vmem [thread:$0]  (!%p13169_p5), %s15972_s4, 1344, %s510_s27, [#allocation5], %s13038_s3, %s13038_s3, %s13039_s28  }
  0x80   : > { %s13040_s12 = smov [#allocation9]   ;;  %s13041_s15 = smov [#allocation10]  }
  0x81   : > { %s565_s13 = sshll.u32 %s13040_s12, 4  ;;  %s578_s2 = sshll.u32 %s13041_s15, 4  ;;  %s566_s13 = int_to_ptr.vmem [resolvable:$true] %s565_s13  ;;  %s579_s2 = int_to_ptr.vmem [resolvable:$true] %s578_s2 }
  0x82   : > { %s12952_s19 = scalar_lea.hbm %s15984_s16, 5376 }
  0x83   : > { %p12953_p2 = scmp.ne.s32.totalorder %s15984_s16, %s12952_s19  ;;  %p12959_p0 = scmp.lt.u32.totalorder %s12952_s19, %s15984_s16 }
  0x85   : > { %p12955_p3 = pnand %p12953_p2, %p13185_p7 }
  0x87   : > { %p12956_p13 = pneg %p12955_p3 }
  0x89   : > { %p12961_p1 = pnand %p12959_p0, %p12956_p13 }
  0x8b   : > { %12964 = shalt.err (!%p12961_p1)
}
  0x8c   : > { %s12965_s27 = scalar_lea.vmem %s566_s13, 5376  ;;  %p12973_p9 = scmp.lt.s32.totalorder %s566_s13, %s566_s13 }
  0x8d   : > { %p12966_p4 = scmp.ne.s32.totalorder %s566_s13, %s12965_s27  ;;  %p12974_p10 = scmp.lt.s32.totalorder %s12965_s27, %s12965_s27 }
  0x8f   : > { %p12968_p6 = pnand %p12966_p4, %p13185_p7  ;;  %p12975_p11 = por %p12974_p10, %p12973_p9 }
  0x91   : > { %p12969_p8 = pneg %p12968_p6 }
  0x93   : > { %p12976_p12 = pnand %p12975_p11, %p12969_p8 }
  0x95   : > { %12979 = shalt.err (!%p12976_p12)
}
  0x96   : > { %11825 = dma.hbm_to_vmem [thread:$0]  (!%p13169_p5), %s15984_s16, 5376, %s566_s13, [#allocation8], %s13038_s3, %s13038_s3, %s13039_s28  }
  0x97   : > { %s12980_s12 = scalar_lea.hbm %s15985_s17, 6144 }
  0x98   : > { %p12981_p2 = scmp.ne.s32.totalorder %s15985_s17, %s12980_s12  ;;  %p12987_p0 = scmp.lt.u32.totalorder %s12980_s12, %s15985_s17 }
  0x9a   : > { %p12983_p3 = pnand %p12981_p2, %p13185_p7 }
  0x9c   : > { %p12984_p13 = pneg %p12983_p3 }
  0x9e   : > { %p12989_p1 = pnand %p12987_p0, %p12984_p13 }
  0xa0   : > { %12992 = shalt.err (!%p12989_p1)
}
  0xa1   : > { %s12993_s22 = scalar_lea.vmem %s579_s2, 6144  ;;  %p13001_p9 = scmp.lt.s32.totalorder %s579_s2, %s579_s2 }
  0xa2   : > { %p12994_p4 = scmp.ne.s32.totalorder %s579_s2, %s12993_s22  ;;  %p13002_p10 = scmp.lt.s32.totalorder %s12993_s22, %s12993_s22 }
  0xa4   : > { %p12996_p6 = pnand %p12994_p4, %p13185_p7  ;;  %p13003_p11 = por %p13002_p10, %p13001_p9 }
  0xa6   : > { %p12997_p8 = pneg %p12996_p6 }
  0xa8   : > { %p13004_p12 = pnand %p13003_p11, %p12997_p8 }
  0xaa   : > { %13007 = shalt.err (!%p13004_p12)
}
  0xab   : > { %11828 = dma.hbm_to_vmem [thread:$0]  (!%p13169_p5), %s15985_s17, 6144, %s579_s2, [#allocation11], %s13038_s3, %s13038_s3, %s13039_s28  }
  0xac   : > { %p16015_p2 = scmp.ne.s32.totalorder %s16009_s21, 0 }
  0xad   : > { %p16016_p7 = scmp.ne.s32.totalorder (!%p16015_p2), %s16008_s20, 0 }
  0xae   : > { %606 = sbr.rel (%p16015_p2) target bundleno = 3870 (0xf1e), region = 96 }
  0xb5   : > { %13013 = dma.done.wait (%p16016_p7), [#allocation3], 5376  }
  0xb6   : > { %13015 = vsyncadd (%p16016_p7), [#allocation3], 4294961920 }
  0xb7   : > { %13017 = dma.done.wait (%p16016_p7), [#allocation5], 7488  }
  0xb8   : > { %13019 = vsyncadd (%p16016_p7), [#allocation5], 4294959808 }
  0xb9   : > { %13021 = dma.done.wait (%p16016_p7), [#allocation8], 17664  }
  0xba   : > { %13023 = vsyncadd (%p16016_p7), [#allocation8], 4294949632 }
  0xbb   : > { %13025 = dma.done.wait (%p16016_p7), [#allocation11], 6144  }
  0xbc   : > { %13027 = vsyncadd (%p16016_p7), [#allocation11], 4294961152  ;;  %s16017_s18 = sadd.s32 4294967295, %s13030_s0   ;;  %v13042_v0 = vmov 0   ;;  %s16018_s2 = sld [smem:[#allocation16_spill]]  ;;  %vm884_vm0 = vcmask 785408  }
  0xbd   : > { %s682_s21 = smul.u32 28, %s16017_s18  ;;  %906 = vmatprep.subr.bf16.mxu0 %v13042_v0  ;;  %1101 = vmatprep.subr.bf16.mxu1 %v13042_v0  ;;  %v11876_v6 = vld [vmem:[#allocation2 + $0x4] ss:$8 sps:$4 sm:$0xff]   ;;  %v11879_v7 = vld [vmem:[#allocation2 + $0x74] ss:$8 sps:$4 sm:$0xff]   ;;  %s16019_s1 = sld [smem:[#allocation19_spill]] }
  0xbe   : > { %10094 = vmatprep.mubr.msk.bf16.mxu0 %vm884_vm0, %v11876_v6  ;;  %10115 = vmatprep.mubr.msk.bf16.mxu1 %vm884_vm0, %v11879_v7  ;;  %v11939_v17 = vld [vmem:[#allocation4 + $0x4] ss:$8 sps:$4 sm:$0xff]   ;;  %v11874_v18 = vld [vmem:[#allocation2] ss:$8 sps:$4 sm:$0xff]   ;;  %v11877_v19 = vld [vmem:[#allocation2 + $0x70] ss:$8 sps:$4 sm:$0xff]  }
  0xbf   : > { %p683_p5 = scmp.lt.s32.totalorder %s682_s21, 55  ;;  %v11880_v20 = vld [vmem:[#allocation2 + $0x14] ss:$8 sps:$4 sm:$0xff]   ;;  %v11882_v21 = vld [vmem:[#allocation2 + $0x84] ss:$8 sps:$4 sm:$0xff]   ;;  %vm1965_vm1 = vcmask 916480  }
  0xc0   : > { %v11937_v22 = vld [vmem:[#allocation4] ss:$8 sps:$4 sm:$0xff]   ;;  %v11942_v23 = vld [vmem:[#allocation4 + $0x14] ss:$8 sps:$4 sm:$0xff]   ;;  %v11885_v25 = vld [vmem:[#allocation2 + $0x80] ss:$8 sps:$4 sm:$0xff]  }
  0xc1   : > { %s16027_s21 = smov (!%p683_p5, %s682_s21), 55  ;;  %v11884_v24 = vld [vmem:[#allocation2 + $0x10] ss:$8 sps:$4 sm:$0xff]   ;;  %v11886_v26 = vld [vmem:[#allocation2 + $0x24] ss:$8 sps:$4 sm:$0xff]   ;;  %vm3119_vm2 = vcmask 1043456  }
  0xc2   : > { %s10064_s24 = sshll.u32 %s16027_s21, 2  ;;  %v11940_v27 = vld [vmem:[#allocation4 + $0x10] ss:$8 sps:$4 sm:$0xff]   ;;  %v11888_v28 = vld [vmem:[#allocation2 + $0x94] ss:$8 sps:$4 sm:$0xff]   ;;  %vm3115_vm3 = vcmask 457728  }
  0xc3   : > { %s13353_s27 = scalar_lea.vmem %s16018_s2, %s10064_s24  ;;  %v11945_v29 = vld [vmem:[#allocation4 + $0x24] ss:$8 sps:$4 sm:$0xff]   ;;  %v11943_v30 = vld [vmem:[#allocation4 + $0x20] ss:$8 sps:$4 sm:$0xff]   ;;  %v11948_v31 = vld [vmem:[#allocation4 + $0x34] ss:$8 sps:$4 sm:$0xff]  }
  0xc4   : > { %v13356_v1 = vld [vmem:[%s13353_s27] sm:$0xff]   ;;  %v13361_v2 = vld [vmem:[%s13353_s27 + $0x8] sm:$0xff]   ;;  %v13368_v3 = vld [vmem:[%s13353_s27 + $0x10] sm:$0xff]   ;;  %vm4666_vm4 = vcmask 64512   ;;  %s16020_s15 = sld [smem:[#allocation20_spill]]  ;;  %s16021_s13 = sld [smem:[#allocation21_spill]] }
  0xc5   : > { %907 = vmatpush1.bf16.msra.mxu0 %v13356_v1  ;;  %1102 = vmatpush1.bf16.msra.mxu1 %v13356_v1  ;;  %v13375_v4 = vld [vmem:[%s13353_s27 + $0x18] sm:$0xff]   ;;  %v13380_v5 = vld [vmem:[%s13353_s27 + $0x20] sm:$0xff]   ;;  %v13391_v8 = vld [vmem:[%s13353_s27 + $0x28] sm:$0xff]   ;;  %s16022_s24 = sld [smem:[#allocation22_spill]]  ;;  %s16023_s11 = sld [smem:[#allocation24_spill]] }
  0xc6   : > { %908 = vmatprep.subr.bf16.mxu0 %v13042_v0  ;;  %1103 = vmatprep.subr.bf16.mxu1 %v13042_v0  ;;  %v13398_v9 = vld [vmem:[%s13353_s27 + $0x30] sm:$0xff]   ;;  %v13405_v10 = vld [vmem:[%s13353_s27 + $0x38] sm:$0xff]   ;;  %v13412_v11 = vld [vmem:[%s13353_s27 + $0x40] sm:$0xff]   ;;  %s16024_s26 = sld [smem:[#allocation25_spill]]  ;;  %s10065_s19 = sshll.u32 %s16027_s21, 3 }
  0xc7   : > { %v13419_v12 = vld [vmem:[%s13353_s27 + $0x48] sm:$0xff]   ;;  %v13426_v13 = vld [vmem:[%s13353_s27 + $0x50] sm:$0xff]   ;;  %v13433_v14 = vld [vmem:[%s13353_s27 + $0x58] sm:$0xff]   ;;  %s16025_s23 = sld [smem:[#allocation26_spill]] }
  0xc8   : > { %v13440_v15 = vld [vmem:[%s13353_s27 + $0x60] sm:$0xff]   ;;  %v13447_v16 = vld [vmem:[%s13353_s27 + $0x68] sm:$0xff]   ;;  %v11891_v33 = vld [vmem:[#allocation2 + $0x90] ss:$8 sps:$4 sm:$0xff]  }
  0xc9   : > { %909 = vmatpush1.bf16.msra.mxu0 %v13361_v2  ;;  %1104 = vmatpush1.bf16.msra.mxu1 %v13361_v2  ;;  %v11890_v32 = vld [vmem:[#allocation2 + $0x20] ss:$8 sps:$4 sm:$0xff]   ;;  %v11892_v34 = vld [vmem:[#allocation2 + $0x34] ss:$8 sps:$4 sm:$0xff]   ;;  %v11894_v35 = vld [vmem:[#allocation2 + $0xa4] ss:$8 sps:$4 sm:$0xff]  }
  0xca   : > { %910 = vmatprep.subr.bf16.mxu0 %v13042_v0  ;;  %1105 = vmatprep.subr.bf16.mxu1 %v13042_v0  ;;  %v11946_v36 = vld [vmem:[#allocation4 + $0x30] ss:$8 sps:$4 sm:$0xff]   ;;  %v11951_v37 = vld [vmem:[#allocation4 + $0x44] ss:$8 sps:$4 sm:$0xff]   ;;  %v11949_v38 = vld [vmem:[#allocation4 + $0x40] ss:$8 sps:$4 sm:$0xff]  }
  0xcb   : > { %v11896_v39 = vld [vmem:[#allocation2 + $0x30] ss:$8 sps:$4 sm:$0xff]   ;;  %v11897_v40 = vld [vmem:[#allocation2 + $0xa0] ss:$8 sps:$4 sm:$0xff]   ;;  %v11898_v41 = vld [vmem:[#allocation2 + $0x44] ss:$8 sps:$4 sm:$0xff]  }
  0xcc   : > { %v11900_v42 = vld [vmem:[#allocation2 + $0xb4] ss:$8 sps:$4 sm:$0xff]   ;;  %v11954_v43 = vld [vmem:[#allocation4 + $0x54] ss:$8 sps:$4 sm:$0xff]   ;;  %v11952_v44 = vld [vmem:[#allocation4 + $0x50] ss:$8 sps:$4 sm:$0xff]  }
  0xcd   : > { %911 = vmatpush1.bf16.msra.mxu0 %v13368_v3  ;;  %1106 = vmatpush1.bf16.msra.mxu1 %v13368_v3  ;;  %v11957_v45 = vld [vmem:[#allocation4 + $0x64] ss:$8 sps:$4 sm:$0xff]   ;;  %v11902_v46 = vld [vmem:[#allocation2 + $0x40] ss:$8 sps:$4 sm:$0xff]   ;;  %v11903_v47 = vld [vmem:[#allocation2 + $0xb0] ss:$8 sps:$4 sm:$0xff]   ;;  %s15883_s18 = scalar_lea.vmem %s16025_s23, %s10065_s19 }
  0xce   : > { %912 = vmatprep.subr.bf16.mxu0 %v13042_v0  ;;  %1107 = vmatprep.subr.bf16.mxu1 %v13042_v0  ;;  %v11904_v48 = vld [vmem:[#allocation2 + $0x54] ss:$8 sps:$4 sm:$0xff]   ;;  %v11906_v49 = vld [vmem:[#allocation2 + $0xc4] ss:$8 sps:$4 sm:$0xff]   ;;  %v11955_v50 = vld [vmem:[#allocation4 + $0x60] ss:$8 sps:$4 sm:$0xff]  }
  0xcf   : > { %v11960_v51 = vld [vmem:[#allocation4 + $0x74] ss:$8 sps:$4 sm:$0xff]   ;;  %v11958_v52 = vld [vmem:[#allocation4 + $0x70] ss:$8 sps:$4 sm:$0xff]   ;;  %v11908_v53 = vld [vmem:[#allocation2 + $0x50] ss:$8 sps:$4 sm:$0xff]  }
  0xd0   : > { %v11909_v54 = vld [vmem:[#allocation2 + $0xc0] ss:$8 sps:$4 sm:$0xff]   ;;  %v11910_v55 = vld [vmem:[#allocation2 + $0x64] ss:$8 sps:$4 sm:$0xff]   ;;  %v11912_v56 = vld [vmem:[#allocation2 + $0xd4] ss:$8 sps:$4 sm:$0xff]  }
  0xd1   : > { %913 = vmatpush1.bf16.msra.mxu0 %v13375_v4  ;;  %1108 = vmatpush1.bf16.msra.mxu1 %v13375_v4  ;;  %v11963_v57 = vld [vmem:[#allocation4 + $0x84] ss:$8 sps:$4 sm:$0xff]   ;;  %v11961_v58 = vld [vmem:[#allocation4 + $0x80] ss:$8 sps:$4 sm:$0xff]   ;;  %v11966_v59 = vld [vmem:[#allocation4 + $0x94] ss:$8 sps:$4 sm:$0xff]  }
  0xd2   : > { %914 = vmatprep.subr.bf16.mxu0 %v13042_v0  ;;  %1109 = vmatprep.subr.bf16.mxu1 %v13042_v0  ;;  %v11914_v60 = vld [vmem:[#allocation2 + $0x60] ss:$8 sps:$4 sm:$0xff]   ;;  %v11915_v61 = vld [vmem:[#allocation2 + $0xd0] ss:$8 sps:$4 sm:$0xff]   ;;  %v11918_v62 = vld [vmem:[#allocation2 + $0xe4] ss:$8 sps:$4 sm:$0xff]  }
  0xd3   : > { %v11964_v63 = vld [vmem:[#allocation4 + $0x90] ss:$8 sps:$4 sm:$0xff]   ;;  %v11975_v7 = vld [vmem:[#allocation4 + $0xc4] ss:$8 sps:$4 sm:$0xff]  }
  0xd4   : > { %v11970_v6 = vld [vmem:[#allocation4 + $0xb0] ss:$8 sps:$4 sm:$0xff]  }
  0xd5   : > { %915 = vmatpush1.bf16.msra.mxu0 %v13380_v5  ;;  %1110 = vmatpush1.bf16.msra.mxu1 %v13380_v5 }
  0xd6   : > { %916 = vmatprep.subr.bf16.mxu0 %v13042_v0  ;;  %1111 = vmatprep.subr.bf16.mxu1 %v13042_v0 }
  0xd9   : > { %917 = vmatpush1.bf16.msra.mxu0 %v13391_v8  ;;  %1112 = vmatpush1.bf16.msra.mxu1 %v13391_v8 }
  0xda   : > { %918 = vmatprep.subr.bf16.mxu0 %v13042_v0  ;;  %1113 = vmatprep.subr.bf16.mxu1 %v13042_v0 }
  0xdd   : > { %919 = vmatpush1.bf16.msra.mxu0 %v13398_v9  ;;  %1114 = vmatpush1.bf16.msra.mxu1 %v13398_v9 }
  0xde   : > { %920 = vmatprep.subr.bf16.mxu0 %v13042_v0  ;;  %1115 = vmatprep.subr.bf16.mxu1 %v13042_v0 }
  0xe1   : > { %921 = vmatpush1.bf16.msra.mxu0 %v13405_v10  ;;  %1116 = vmatpush1.bf16.msra.mxu1 %v13405_v10 }
  0xe2   : > { %922 = vmatprep.subr.bf16.mxu0 %v13042_v0  ;;  %1117 = vmatprep.subr.bf16.mxu1 %v13042_v0 }
  0xe5   : > { %923 = vmatpush1.bf16.msra.mxu0 %v13412_v11  ;;  %1118 = vmatpush1.bf16.msra.mxu1 %v13412_v11 }
  0xe6   : > { %924 = vmatprep.subr.bf16.mxu0 %v13042_v0  ;;  %1119 = vmatprep.subr.bf16.mxu1 %v13042_v0 }
  0xe9   : > { %925 = vmatpush1.bf16.msra.mxu0 %v13419_v12  ;;  %1120 = vmatpush1.bf16.msra.mxu1 %v13419_v12 }
  0xea   : > { %926 = vmatprep.subr.bf16.mxu0 %v13042_v0  ;;  %1121 = vmatprep.subr.bf16.mxu1 %v13042_v0 }
  0xed   : > { %927 = vmatpush1.bf16.msra.mxu0 %v13426_v13  ;;  %1122 = vmatpush1.bf16.msra.mxu1 %v13426_v13 }
  0xee   : > { %928 = vmatprep.subr.bf16.mxu0 %v13042_v0  ;;  %1123 = vmatprep.subr.bf16.mxu1 %v13042_v0 }
  0xf1   : > { %929 = vmatpush1.bf16.msra.mxu0 %v13433_v14  ;;  %1124 = vmatpush1.bf16.msra.mxu1 %v13433_v14 }
  0xf2   : > { %930 = vmatprep.subr.bf16.mxu0 %v13042_v0  ;;  %1125 = vmatprep.subr.bf16.mxu1 %v13042_v0 }
  0xf5   : > { %931 = vmatpush1.bf16.msra.mxu0 %v13440_v15  ;;  %1126 = vmatpush1.bf16.msra.mxu1 %v13440_v15 }
  0xf6   : > { %932 = vmatprep.subr.bf16.mxu0 %v13042_v0  ;;  %1127 = vmatprep.subr.bf16.mxu1 %v13042_v0 }
  0xf9   : > { %933 = vmatpush1.bf16.msra.mxu0 %v13447_v16  ;;  %1128 = vmatpush1.bf16.msra.mxu1 %v13447_v16 }
  0xfa   : > { %1296 = vmatprep.subr.bf16.mxu0 %v13042_v0  ;;  %1692 = vmatprep.subr.bf16.mxu1 %v11939_v17  ;;  %v11927_v17 = vld [vmem:[#allocation2 + $0x110] ss:$8 sps:$4 sm:$0xff]  }
  0xfc   : > { %939 = vmatmul.mubr.bf16.vlgmr.msra.gmra.mrb[0].mxu0 %v11874_v18  ;;  %1134 = vmatmul.mubr.bf16.vlgmr.msra.gmra.mrb[0].mxu1 %v11877_v19  ;;  %v11928_v18 = vld [vmem:[#allocation2 + $0x124] ss:$8 sps:$4 sm:$0xff]   ;;  %v11930_v19 = vld [vmem:[#allocation2 + $0x120] ss:$8 sps:$4 sm:$0xff]  }
  0xfd   : > { %1297 = vmatpush1.bf16.msra.mxu0 %v13356_v1  ;;  %10095 = vmatprep.mubr.msk.bf16.mxu0 %vm884_vm0, %v11880_v20  ;;  %v11969_v1 = vld [vmem:[#allocation4 + $0xa4] ss:$8 sps:$4 sm:$0xff]  }
  0xfe   : > { %1298 = vmatprep.subr.bf16.mxu0 %v13042_v0  ;;  %10116 = vmatprep.mubr.msk.bf16.mxu1 %vm884_vm0, %v11882_v21  ;;  %v11931_v20 = vld [vmem:[#allocation2 + $0x134] ss:$8 sps:$4 sm:$0xff]   ;;  %v11984_v21 = vld [vmem:[#allocation4 + $0xf4] ss:$8 sps:$4 sm:$0xff]  }
  0xff   : > { %1693 = vmatpush1.bf16.msra.mxu1 %v11937_v22  ;;  %v11982_v22 = vld [vmem:[#allocation4 + $0xf0] ss:$8 sps:$4 sm:$0xff]  }
 0x100   : > { %1694 = vmatprep.subr.bf16.mxu1 %v11942_v23  ;;  %v11933_v23 = vld [vmem:[#allocation2 + $0x130] ss:$8 sps:$4 sm:$0xff]  }
 0x101   : > { %1299 = vmatpush1.bf16.msra.mxu0 %v13361_v2  ;;  %v11967_v2 = vld [vmem:[#allocation4 + $0xa0] ss:$8 sps:$4 sm:$0xff]  }
 0x102   : > { %1300 = vmatprep.subr.bf16.mxu0 %v13042_v0 }
 0x103   : > { %1695 = vmatpush1.bf16.msra.mxu1 %v11940_v27 }
 0x104   : > { %947 = vmatmul.mubr.bf16.gmra.mrb[4].mxu0 %v11884_v24  ;;  %1142 = vmatmul.mubr.bf16.gmra.mrb[4].mxu1 %v11885_v25  ;;  %v11934_v24 = vld [vmem:[#allocation2 + $0x144] ss:$8 sps:$4 sm:$0xff]   ;;  %v11987_v25 = vld [vmem:[#allocation4 + $0x104] ss:$8 sps:$4 sm:$0xff]  }
 0x105   : > { %1301 = vmatpush1.bf16.msra.mxu0 %v13368_v3  ;;  %10096 = vmatprep.mubr.msk.bf16.mxu0 %vm884_vm0, %v11886_v26  ;;  %v11972_v3 = vld [vmem:[#allocation4 + $0xb4] ss:$8 sps:$4 sm:$0xff]   ;;  %v11936_v26 = vld [vmem:[#allocation2 + $0x140] ss:$8 sps:$4 sm:$0xff]  }
 0x106   : > { %1302 = vmatprep.subr.bf16.mxu0 %v13042_v0  ;;  %10117 = vmatprep.mubr.msk.bf16.mxu1 %vm884_vm0, %v11888_v28 }
 0x107   : > { %1696 = vmatprep.subr.bf16.mxu1 %v11945_v29 }
 0x108   : > { %1697 = vmatpush1.bf16.msra.mxu1 %v11943_v30 }
 0x109   : > { %1303 = vmatpush1.bf16.msra.mxu0 %v13375_v4  ;;  %1698 = vmatprep.subr.bf16.mxu1 %v11948_v31  ;;  %v11916_v4 = vld [vmem:[#allocation2 + $0xe0] ss:$8 sps:$4 sm:$0xff]   ;;  %v11985_v31 = vld [vmem:[#allocation4 + $0x100] ss:$8 sps:$4 sm:$0xff]  }
 0x10a   : > { %1304 = vmatprep.subr.bf16.mxu0 %v13042_v0 }
 0x10c   : > { %955 = vmatmul.mubr.bf16.gmra.mrb[8].mxu0 %v11890_v32  ;;  %1150 = vmatmul.mubr.bf16.gmra.mrb[8].mxu1 %v11891_v33 }
 0x10d   : > { %1305 = vmatpush1.bf16.msra.mxu0 %v13380_v5  ;;  %10097 = vmatprep.mubr.msk.bf16.mxu0 %vm884_vm0, %v11892_v34  ;;  %v11919_v5 = vld [vmem:[#allocation2 + $0xf4] ss:$8 sps:$4 sm:$0xff]   ;;  %v11990_v34 = vld [vmem:[#allocation4 + $0x114] ss:$8 sps:$4 sm:$0xff]  }
 0x10e   : > { %1306 = vmatprep.subr.bf16.mxu0 %v13042_v0  ;;  %10118 = vmatprep.mubr.msk.bf16.mxu1 %vm884_vm0, %v11894_v35 }
 0x10f   : > { %1699 = vmatpush1.bf16.msra.mxu1 %v11946_v36 }
 0x110   : > { %1700 = vmatprep.subr.bf16.mxu1 %v11951_v37 }
 0x111   : > { %1307 = vmatpush1.bf16.msra.mxu0 %v13391_v8  ;;  %v11973_v8 = vld [vmem:[#allocation4 + $0xc0] ss:$8 sps:$4 sm:$0xff]  }
 0x112   : > { %1308 = vmatprep.subr.bf16.mxu0 %v13042_v0 }
 0x113   : > { %1701 = vmatpush1.bf16.msra.mxu1 %v11949_v38 }
 0x114   : > { %963 = vmatmul.mubr.bf16.gmra.mrb[12].mxu0 %v11896_v39  ;;  %1158 = vmatmul.mubr.bf16.gmra.mrb[12].mxu1 %v11897_v40  ;;  %v11988_v39 = vld [vmem:[#allocation4 + $0x110] ss:$8 sps:$4 sm:$0xff]   ;;  %v11993_v40 = vld [vmem:[#allocation4 + $0x124] ss:$8 sps:$4 sm:$0xff]  }
 0x115   : > { %1309 = vmatpush1.bf16.msra.mxu0 %v13398_v9  ;;  %10098 = vmatprep.mubr.msk.bf16.mxu0 %vm884_vm0, %v11898_v41  ;;  %v11978_v9 = vld [vmem:[#allocation4 + $0xd4] ss:$8 sps:$4 sm:$0xff]  }
 0x116   : > { %1310 = vmatprep.subr.bf16.mxu0 %v13042_v0  ;;  %10119 = vmatprep.mubr.msk.bf16.mxu1 %vm884_vm0, %v11900_v42 }
 0x117   : > { %1702 = vmatprep.subr.bf16.mxu1 %v11954_v43 }
 0x118   : > { %1703 = vmatpush1.bf16.msra.mxu1 %v11952_v44 }
 0x119   : > { %1311 = vmatpush1.bf16.msra.mxu0 %v13405_v10  ;;  %1704 = vmatprep.subr.bf16.mxu1 %v11957_v45  ;;  %v11921_v10 = vld [vmem:[#allocation2 + $0xf0] ss:$8 sps:$4 sm:$0xff]  }
 0x11a   : > { %1312 = vmatprep.subr.bf16.mxu0 %v13042_v0  ;;  %v11991_v45 = vld [vmem:[#allocation4 + $0x120] ss:$8 sps:$4 sm:$0xff]  }
 0x11c   : > { %971 = vmatmul.mubr.bf16.gmra.mrb[16].mxu0 %v11902_v46  ;;  %1166 = vmatmul.mubr.bf16.gmra.mrb[16].mxu1 %v11903_v47 }
 0x11d   : > { %1313 = vmatpush1.bf16.msra.mxu0 %v13412_v11  ;;  %10099 = vmatprep.mubr.msk.bf16.mxu0 %vm884_vm0, %v11904_v48  ;;  %v11922_v11 = vld [vmem:[#allocation2 + $0x104] ss:$8 sps:$4 sm:$0xff]  }
 0x11e   : > { %1314 = vmatprep.subr.bf16.mxu0 %v13042_v0  ;;  %10120 = vmatprep.mubr.msk.bf16.mxu1 %vm884_vm0, %v11906_v49  ;;  %v11996_v48 = vld [vmem:[#allocation4 + $0x134] ss:$8 sps:$4 sm:$0xff]  }
 0x11f   : > { %1705 = vmatpush1.bf16.msra.mxu1 %v11955_v50 }
 0x120   : > { %1706 = vmatprep.subr.bf16.mxu1 %v11960_v51 }
 0x121   : > { %1315 = vmatpush1.bf16.msra.mxu0 %v13419_v12  ;;  %v11976_v12 = vld [vmem:[#allocation4 + $0xd0] ss:$8 sps:$4 sm:$0xff]  }
 0x122   : > { %1316 = vmatprep.subr.bf16.mxu0 %v13042_v0 }
 0x123   : > { %1707 = vmatpush1.bf16.msra.mxu1 %v11958_v52 }
 0x124   : > { %979 = vmatmul.mubr.bf16.gmra.mrb[20].mxu0 %v11908_v53  ;;  %1174 = vmatmul.mubr.bf16.gmra.mrb[20].mxu1 %v11909_v54  ;;  %v11994_v53 = vld [vmem:[#allocation4 + $0x130] ss:$8 sps:$4 sm:$0xff]   ;;  %v11999_v54 = vld [vmem:[#allocation4 + $0x144] ss:$8 sps:$4 sm:$0xff]  }
 0x125   : > { %1317 = vmatpush1.bf16.msra.mxu0 %v13426_v13  ;;  %10100 = vmatprep.mubr.msk.bf16.mxu0 %vm884_vm0, %v11910_v55  ;;  %v11981_v13 = vld [vmem:[#allocation4 + $0xe4] ss:$8 sps:$4 sm:$0xff]  }
 0x126   : > { %1318 = vmatprep.subr.bf16.mxu0 %v13042_v0  ;;  %10121 = vmatprep.mubr.msk.bf16.mxu1 %vm884_vm0, %v11912_v56 }
 0x127   : > { %1708 = vmatprep.subr.bf16.mxu1 %v11963_v57 }
 0x128   : > { %1709 = vmatpush1.bf16.msra.mxu1 %v11961_v58 }
 0x129   : > { %1319 = vmatpush1.bf16.msra.mxu0 %v13433_v14  ;;  %1710 = vmatprep.subr.bf16.mxu1 %v11966_v59  ;;  %v11979_v14 = vld [vmem:[#allocation4 + $0xe0] ss:$8 sps:$4 sm:$0xff]  }
 0x12a   : > { %1320 = vmatprep.subr.bf16.mxu0 %v13042_v0  ;;  %v11997_v59 = vld [vmem:[#allocation4 + $0x140] ss:$8 sps:$4 sm:$0xff]  }
 0x12c   : > { %987 = vmatmul.mubr.bf16.gmra.mrb[24].mxu0 %v11914_v60  ;;  %1182 = vmatmul.mubr.bf16.gmra.mrb[24].mxu1 %v11915_v61 }
 0x12d   : > { %1321 = vmatpush1.bf16.msra.mxu0 %v13440_v15  ;;  %10136 = vmatprep.mubr.msk.bf16.mxu0 %vm884_vm0, %v11918_v62  ;;  %v11924_v15 = vld [vmem:[#allocation2 + $0x100] ss:$8 sps:$4 sm:$0xff]   ;;  %v12002_v62 = vld [vmem:[#allocation4 + $0x154] ss:$8 sps:$4 sm:$0xff]  }
 0x12e   : > { %1322 = vmatprep.subr.bf16.mxu0 %v13042_v0  ;;  %1711 = vmatpush1.bf16.msra.mxu1 %v11964_v63 }
 0x12f   : > { %1712 = vmatprep.subr.bf16.mxu1 %v11969_v1 }
 0x131   : > { %1323 = vmatpush1.bf16.msra.mxu0 %v13447_v16  ;;  %v11925_v16 = vld [vmem:[#allocation2 + $0x114] ss:$8 sps:$4 sm:$0xff]  }
 0x132   : > { %1713 = vmatpush1.bf16.msra.mxu1 %v11967_v2 }
 0x133   : > { %1714 = vmatprep.subr.bf16.mxu1 %v11972_v3 }
 0x134   : > { %1329 = vmatmul.mubr.bf16.vlgmr.msra.gmra.mrb[28].mxu0 %v11916_v4  ;;  %v12000_v4 = vld [vmem:[#allocation4 + $0x150] ss:$8 sps:$4 sm:$0xff]  }
 0x135   : > { %10137 = vmatprep.mubr.msk.bf16.mxu0 %vm884_vm0, %v11919_v5  ;;  %v12005_v5 = vld [vmem:[#allocation4 + $0x164] ss:$8 sps:$4 sm:$0xff]  }
 0x136   : > { %1715 = vmatpush1.bf16.msra.mxu1 %v11970_v6 }
 0x137   : > { %1716 = vmatprep.subr.bf16.mxu1 %v11975_v7 }
 0x13a   : > { %1717 = vmatpush1.bf16.msra.mxu1 %v11973_v8 }
 0x13b   : > { %1718 = vmatprep.subr.bf16.mxu1 %v11978_v9 }
 0x13c   : > { %1337 = vmatmul.mubr.bf16.gmra.mrb[32].mxu0 %v11921_v10  ;;  %v12003_v10 = vld [vmem:[#allocation4 + $0x160] ss:$8 sps:$4 sm:$0xff]  }
 0x13d   : > { %10138 = vmatprep.mubr.msk.bf16.mxu0 %vm884_vm0, %v11922_v11 }
 0x13e   : > { %1719 = vmatpush1.bf16.msra.mxu1 %v11976_v12 }
 0x13f   : > { %1720 = vmatprep.subr.bf16.mxu1 %v11981_v13  ;;  %v12008_v13 = vld [vmem:[#allocation4 + $0x174] ss:$8 sps:$4 sm:$0xff]  }
 0x142   : > { %1721 = vmatpush1.bf16.msra.mxu1 %v11979_v14 }
 0x143   : > { %1722 = vmatprep.subr.bf16.mxu1 %v11984_v21 }
 0x144   : > { %1345 = vmatmul.mubr.bf16.gmra.mrb[36].mxu0 %v11924_v15 }
 0x145   : > { %10139 = vmatprep.mubr.msk.bf16.mxu0 %vm884_vm0, %v11925_v16 }
 0x146   : > { %1723 = vmatpush1.bf16.msra.mxu1 %v11982_v22 }
 0x147   : > { %1795 = vmatprep.subr.bf16.mxu1 %v11987_v25 }
 0x14c   : > { %1353 = vmatmul.mubr.bf16.gmra.mrb[40].mxu0 %v11927_v17 }
 0x14d   : > { %10140 = vmatprep.mubr.msk.bf16.mxu0 %vm884_vm0, %v11928_v18  ;;  %v12006_v18 = vld [vmem:[#allocation4 + $0x170] ss:$8 sps:$4 sm:$0xff]  }
 0x154   : > { %1361 = vmatmul.mubr.bf16.gmra.mrb[44].mxu0 %v11930_v19 }
 0x155   : > { %10141 = vmatprep.mubr.msk.bf16.mxu0 %vm884_vm0, %v11931_v20 }
 0x15c   : > { %1369 = vmatmul.mubr.bf16.gmra.mrb[48].mxu0 %v11933_v23 }
 0x15d   : > { %10142 = vmatprep.mubr.msk.bf16.mxu0 %vm884_vm0, %v11934_v24 }
 0x164   : > { %1377 = vmatmul.mubr.bf16.gmra.mrb[52].mxu0 %v11936_v26 }
 0x165   : > { %2010 = vmatprep.mubr.bf16.mxu0 %v13042_v0 }
 0x1cf   : > { %v940_v27 = vpop.f32.mrb[0].mxu0  ;;  %v1135_v28 = vpop.f32.mrb[0].mxu1 }
 0x1d0   : > { %v942_v29 = vpop.f32.mrb[1].mxu0  ;;  %v1137_v30 = vpop.f32.mrb[1].mxu1 }
 0x1d1   : > { %v943_v32 = vpop.f32.mrb[2].mxu0  ;;  %v1138_v33 = vpop.f32.mrb[2].mxu1 }
 0x1d2   : > { %v995_v35 = vpack.c.bf16 %v943_v32, %v940_v27  ;;  %v1190_v36 = vpack.c.bf16 %v1138_v33, %v1135_v28  ;;  %v945_v37 = vpop.f32.mrb[3].mxu0  ;;  %v1140_v38 = vpop.f32.mrb[3].mxu1 }
 0x1d4   : > { %1724 = vmatprep.mubr.bf16.mxu1 %v1190_v36 }
 0x1d5   : > { %1725 = vmatmul.mubr.bf16.vlgmr.msra.gmra.mrb[28].mxu1 %v995_v35 }
 0x1d6   : > { %1796 = vmatpush1.bf16.msra.mxu1 %v11985_v31 }
 0x1d7   : > { %v948_v41 = vpop.f32.mrb[4].mxu0  ;;  %v1143_v42 = vpop.f32.mrb[4].mxu1  ;;  %1797 = vmatprep.subr.bf16.mxu1 %v11990_v34 }
 0x1d8   : > { %v950_v43 = vpop.f32.mrb[5].mxu0  ;;  %v1145_v44 = vpop.f32.mrb[5].mxu1 }
 0x1d9   : > { %v951_v46 = vpop.f32.mrb[6].mxu0  ;;  %v1146_v47 = vpop.f32.mrb[6].mxu1 }
 0x1da   : > { %v1191_v49 = vpack.c.bf16 %v1146_v47, %v1143_v42  ;;  %v953_v50 = vpop.f32.mrb[7].mxu0  ;;  %v1148_v51 = vpop.f32.mrb[7].mxu1  ;;  %v996_v52 = vpack.c.bf16 %v951_v46, %v948_v41  ;;  %1798 = vmatpush1.bf16.msra.mxu1 %v11988_v39 }
 0x1db   : > { %1799 = vmatprep.subr.bf16.mxu1 %v11993_v40 }
 0x1dc   : > { %1734 = vmatprep.mubr.bf16.mxu1 %v1191_v49 }
 0x1dd   : > { %1735 = vmatmul.mubr.bf16.gmra.mrb[32].mxu1 %v996_v52 }
 0x1de   : > { %1800 = vmatpush1.bf16.msra.mxu1 %v11991_v45 }
 0x1df   : > { %v956_v55 = vpop.f32.mrb[8].mxu0  ;;  %v1151_v56 = vpop.f32.mrb[8].mxu1  ;;  %1801 = vmatprep.subr.bf16.mxu1 %v11996_v48 }
 0x1e0   : > { %v958_v57 = vpop.f32.mrb[9].mxu0  ;;  %v1153_v58 = vpop.f32.mrb[9].mxu1 }
 0x1e1   : > { %v959_v60 = vpop.f32.mrb[10].mxu0  ;;  %v1154_v61 = vpop.f32.mrb[10].mxu1 }
 0x1e2   : > { %v1192_v63 = vpack.c.bf16 %v1154_v61, %v1151_v56  ;;  %v961_v1 = vpop.f32.mrb[11].mxu0  ;;  %v1156_v2 = vpop.f32.mrb[11].mxu1  ;;  %v997_v3 = vpack.c.bf16 %v959_v60, %v956_v55  ;;  %1802 = vmatpush1.bf16.msra.mxu1 %v11994_v53 }
 0x1e3   : > { %1803 = vmatprep.subr.bf16.mxu1 %v11999_v54 }
 0x1e4   : > { %1744 = vmatprep.mubr.bf16.mxu1 %v1192_v63 }
 0x1e5   : > { %1745 = vmatmul.mubr.bf16.gmra.mrb[36].mxu1 %v997_v3 }
 0x1e6   : > { %1804 = vmatpush1.bf16.msra.mxu1 %v11997_v59 }
 0x1e7   : > { %v964_v6 = vpop.f32.mrb[12].mxu0  ;;  %v1159_v7 = vpop.f32.mrb[12].mxu1  ;;  %1805 = vmatprep.subr.bf16.mxu1 %v12002_v62 }
 0x1e8   : > { %v966_v8 = vpop.f32.mrb[13].mxu0  ;;  %v1161_v9 = vpop.f32.mrb[13].mxu1 }
 0x1e9   : > { %v967_v11 = vpop.f32.mrb[14].mxu0  ;;  %v1162_v12 = vpop.f32.mrb[14].mxu1 }
 0x1ea   : > { %v1193_v14 = vpack.c.bf16 %v1162_v12, %v1159_v7  ;;  %v969_v15 = vpop.f32.mrb[15].mxu0  ;;  %v1164_v16 = vpop.f32.mrb[15].mxu1  ;;  %v998_v17 = vpack.c.bf16 %v967_v11, %v964_v6  ;;  %1806 = vmatpush1.bf16.msra.mxu1 %v12000_v4 }
 0x1eb   : > { %1807 = vmatprep.subr.bf16.mxu1 %v12005_v5 }
 0x1ec   : > { %1754 = vmatprep.mubr.bf16.mxu1 %v1193_v14 }
 0x1ed   : > { %1755 = vmatmul.mubr.bf16.gmra.mrb[40].mxu1 %v998_v17 }
 0x1ee   : > { %1808 = vmatpush1.bf16.msra.mxu1 %v12003_v10 }
 0x1ef   : > { %v972_v19 = vpop.f32.mrb[16].mxu0  ;;  %v1167_v20 = vpop.f32.mrb[16].mxu1  ;;  %1809 = vmatprep.subr.bf16.mxu1 %v12008_v13 }
 0x1f0   : > { %v974_v21 = vpop.f32.mrb[17].mxu0  ;;  %v1169_v22 = vpop.f32.mrb[17].mxu1 }
 0x1f1   : > { %v975_v23 = vpop.f32.mrb[18].mxu0  ;;  %v1170_v24 = vpop.f32.mrb[18].mxu1  ;;  %v1442_v21 = vlaneseq }
 0x1f2   : > { %v1194_v25 = vpack.c.bf16 %v1170_v24, %v1167_v20  ;;  %v977_v26 = vpop.f32.mrb[19].mxu0  ;;  %v1172_v27 = vpop.f32.mrb[19].mxu1  ;;  %v999_v28 = vpack.c.bf16 %v975_v23, %v972_v19  ;;  %1810 = vmatpush1.bf16.msra.mxu1 %v12006_v18  ;;  %v1440_v24 = vld [vmem:[%s16019_s1] sm:$0x3] }
 0x1f3   : > { %v1443_v22 = vshrl.u32 %v1442_v21, 7 }
 0x1f4   : > { %1764 = vmatprep.mubr.bf16.mxu1 %v1194_v25 }
 0x1f5   : > { %1765 = vmatmul.mubr.bf16.gmra.mrb[44].mxu1 %v999_v28  ;;  %v13508_v23 = vsub.s32 0, %v1443_v22  ;;  %v13513_v25 = vsub.s32 1, %v1443_v22  ;;  %v12027_v22 = vld [vmem:[%s15973_s5 + $0x20] ss:$8 sps:$4 sm:$0xff]  }
 0x1f7   : > { %v980_v29 = vpop.f32.mrb[20].mxu0  ;;  %v1175_v30 = vpop.f32.mrb[20].mxu1  ;;  %v13516_v26 = vrot.slane %v1440_v24, %v13508_v23  ;;  %v13519_v27 = vrot.slane %v1440_v24, %v13513_v25 }
 0x1f8   : > { %v982_v31 = vpop.f32.mrb[21].mxu0  ;;  %v1177_v32 = vpop.f32.mrb[21].mxu1 }
 0x1f9   : > { %v983_v33 = vpop.f32.mrb[22].mxu0  ;;  %v1178_v34 = vpop.f32.mrb[22].mxu1 }
 0x1fa   : > { %v1195_v35 = vpack.c.bf16 %v1178_v34, %v1175_v30  ;;  %v985_v36 = vpop.f32.mrb[23].mxu0  ;;  %v1180_v37 = vpop.f32.mrb[23].mxu1  ;;  %v1000_v38 = vpack.c.bf16 %v983_v33, %v980_v29 }
 0x1fc   : > { %1774 = vmatprep.mubr.bf16.mxu1 %v1195_v35 }
 0x1fd   : > { %1775 = vmatmul.mubr.bf16.gmra.mrb[48].mxu1 %v1000_v38 }
 0x1ff   : > { %v988_v39 = vpop.f32.mrb[24].mxu0  ;;  %v1183_v40 = vpop.f32.mrb[24].mxu1 }
 0x200   : > { %v990_v41 = vpop.f32.mrb[25].mxu0  ;;  %v1185_v42 = vpop.f32.mrb[25].mxu1 }
 0x201   : > { %v991_v43 = vpop.f32.mrb[26].mxu0  ;;  %v1186_v44 = vpop.f32.mrb[26].mxu1 }
 0x202   : > { %v1196_v45 = vpack.c.bf16 %v1186_v44, %v1183_v40  ;;  %v993_v46 = vpop.f32.mrb[27].mxu0  ;;  %v1188_v47 = vpop.f32.mrb[27].mxu1  ;;  %v1001_v48 = vpack.c.bf16 %v991_v43, %v988_v39 }
 0x204   : > { %1784 = vmatprep.mubr.bf16.mxu1 %v1196_v45 }
 0x205   : > { %1785 = vmatmul.mubr.bf16.gmra.mrb[52].mxu1 %v1001_v48 }
 0x206   : > { %1827 = vmatprep.mubr.bf16.mxu1 %v13042_v0 }
 0x207   : > { %v1330_v49 = vpop.f32.mrb[28].mxu0 }
 0x208   : > { %v1332_v50 = vpop.f32.mrb[29].mxu0 }
 0x209   : > { %v1333_v51 = vpop.f32.mrb[30].mxu0 }
 0x20a   : > { %v1385_v52 = vpack.c.bf16 %v1333_v51, %v1330_v49  ;;  %v1335_v53 = vpop.f32.mrb[31].mxu0 }
 0x20d   : > { %1828 = vmatmul.mubr.bf16.vlgmr.msra.gmra.mrb[28].mxu1 %v1385_v52 }
 0x20e   : > { %1837 = vmatprep.mubr.bf16.mxu1 %v13042_v0 }
 0x20f   : > { %v1338_v54 = vpop.f32.mrb[32].mxu0 }
 0x210   : > { %v1340_v55 = vpop.f32.mrb[33].mxu0 }
 0x211   : > { %v1341_v56 = vpop.f32.mrb[34].mxu0 }
 0x212   : > { %v1386_v57 = vpack.c.bf16 %v1341_v56, %v1338_v54  ;;  %v1343_v58 = vpop.f32.mrb[35].mxu0 }
 0x215   : > { %1838 = vmatmul.mubr.bf16.gmra.mrb[32].mxu1 %v1386_v57 }
 0x216   : > { %1847 = vmatprep.mubr.bf16.mxu1 %v13042_v0 }
 0x217   : > { %v1346_v59 = vpop.f32.mrb[36].mxu0 }
 0x218   : > { %v1348_v60 = vpop.f32.mrb[37].mxu0 }
 0x219   : > { %v1349_v61 = vpop.f32.mrb[38].mxu0 }
 0x21a   : > { %v1387_v62 = vpack.c.bf16 %v1349_v61, %v1346_v59  ;;  %v1351_v63 = vpop.f32.mrb[39].mxu0 }
 0x21d   : > { %1848 = vmatmul.mubr.bf16.gmra.mrb[36].mxu1 %v1387_v62 }
 0x21e   : > { %1857 = vmatprep.mubr.bf16.mxu1 %v13042_v0 }
 0x21f   : > { %v1354_v1 = vpop.f32.mrb[40].mxu0 }
 0x220   : > { %v1356_v2 = vpop.f32.mrb[41].mxu0 }
 0x221   : > { %v1357_v3 = vpop.f32.mrb[42].mxu0 }
 0x222   : > { %v1388_v4 = vpack.c.bf16 %v1357_v3, %v1354_v1  ;;  %v1359_v5 = vpop.f32.mrb[43].mxu0 }
 0x223   : > { %v12021_v5 = vld [vmem:[%s15973_s5] ss:$8 sps:$4 sm:$0xff]  }
 0x225   : > { %1858 = vmatmul.mubr.bf16.gmra.mrb[40].mxu1 %v1388_v4 }
 0x226   : > { %1867 = vmatprep.mubr.bf16.mxu1 %v13042_v0 }
 0x227   : > { %v1362_v6 = vpop.f32.mrb[44].mxu0 }
 0x228   : > { %v1364_v7 = vpop.f32.mrb[45].mxu0 }
 0x229   : > { %v1365_v8 = vpop.f32.mrb[46].mxu0 }
 0x22a   : > { %v1389_v9 = vpack.c.bf16 %v1365_v8, %v1362_v6  ;;  %v1367_v10 = vpop.f32.mrb[47].mxu0  ;;  %v12023_v6 = vld [vmem:[%s15973_s5 + $0x4] ss:$8 sps:$4 sm:$0xff]   ;;  %v12026_v8 = vld [vmem:[%s15973_s5 + $0x14] ss:$8 sps:$4 sm:$0xff]  }
 0x22b   : > { %2879 = vmatprep.subr.bf16.mxu1 %v12023_v6  ;;  %v12044_v6 = vld [vmem:[%s15973_s5 + $0x74] ss:$8 sps:$4 sm:$0xff]  }
 0x22c   : > { %2880 = vmatpush1.bf16.msra.mxu1 %v12021_v5 }
 0x22d   : > { %1868 = vmatmul.mubr.bf16.gmra.mrb[44].mxu1 %v1389_v9  ;;  %2881 = vmatprep.subr.bf16.mxu1 %v12026_v8 }
 0x22e   : > { %1877 = vmatprep.mubr.bf16.mxu1 %v13042_v0 }
 0x22f   : > { %v1370_v11 = vpop.f32.mrb[48].mxu0 }
 0x230   : > { %v1372_v12 = vpop.f32.mrb[49].mxu0 }
 0x231   : > { %v1373_v13 = vpop.f32.mrb[50].mxu0 }
 0x232   : > { %v1390_v14 = vpack.c.bf16 %v1373_v13, %v1370_v11  ;;  %v1375_v15 = vpop.f32.mrb[51].mxu0  ;;  %v12024_v13 = vld [vmem:[%s15973_s5 + $0x10] ss:$8 sps:$4 sm:$0xff]  }
 0x233   : > { %2882 = vmatpush1.bf16.msra.mxu1 %v12024_v13 }
 0x235   : > { %1878 = vmatmul.mubr.bf16.gmra.mrb[48].mxu1 %v1390_v14 }
 0x236   : > { %1887 = vmatprep.mubr.bf16.mxu1 %v13042_v0 }
 0x237   : > { %v1378_v16 = vpop.f32.mrb[52].mxu0 }
 0x238   : > { %v1380_v17 = vpop.f32.mrb[53].mxu0 }
 0x239   : > { %v1381_v18 = vpop.f32.mrb[54].mxu0 }
 0x23a   : > { %v1391_v19 = vpack.c.bf16 %v1381_v18, %v1378_v16  ;;  %v1383_v20 = vpop.f32.mrb[55].mxu0  ;;  %v12029_v16 = vld [vmem:[%s15973_s5 + $0x24] ss:$8 sps:$4 sm:$0xff]  }
 0x23b   : > { %2883 = vmatprep.subr.bf16.mxu1 %v12029_v16 }
 0x23c   : > { %2884 = vmatpush1.bf16.msra.mxu1 %v12027_v22 }
 0x23d   : > { %1888 = vmatmul.mubr.bf16.gmra.mrb[52].mxu1 %v1391_v19 }
 0x2e0   : > { %v1829_v28 = vpop.f32.mrb[28].mxu1 }
 0x2e1   : > { %v11531_v29 = vadd.f32 %v1829_v28, %v13516_v26  ;;  %v1831_v30 = vpop.f32.mrb[29].mxu1 }
 0x2e2   : > { %v11532_v31 = vadd.f32 %v1831_v30, %v13519_v27  ;;  %v1833_v32 = vpop.f32.mrb[30].mxu1 }
 0x2e3   : > { %v11533_v33 = vadd.f32 %v1833_v32, %v13516_v26  ;;  %v1835_v34 = vpop.f32.mrb[31].mxu1  ;;  %v1898_v36 = vmax.f32 %v11531_v29, 0.0  ;;  %v12032_v29 = vld [vmem:[%s15973_s5 + $0x34] ss:$8 sps:$4 sm:$0xff]  }
 0x2e4   : > { %v11534_v35 = vadd.f32 %v1835_v34, %v13519_v27  ;;  %v1899_v38 = vmax.f32 %v11532_v31, 0.0  ;;  %2885 = vmatprep.subr.bf16.mxu1 %v12032_v29 }
 0x2e5   : > { %v1900_v37 = vmax.f32 %v11533_v33, 0.0 }
 0x2e6   : > { %v1901_v39 = vmax.f32 %v11534_v35, 0.0  ;;  %v12030_v35 = vld [vmem:[%s15973_s5 + $0x30] ss:$8 sps:$4 sm:$0xff]  }
 0x2e7   : > { %v13525_v40 = vpack.c.bf16 %v1900_v37, %v1898_v36  ;;  %2886 = vmatpush1.bf16.msra.mxu1 %v12030_v35  ;;  %v12053_v35 = vld [vmem:[%s15973_s5 + $0xa4] ss:$8 sps:$4 sm:$0xff]  }
 0x2e8   : > { %v1839_v41 = vpop.f32.mrb[32].mxu1  ;;  %v13527_v42 = vpack.c.bf16 %v1901_v39, %v1899_v38  ;;  %v12035_v38 = vld [vmem:[%s15973_s5 + $0x44] ss:$8 sps:$4 sm:$0xff]  }
 0x2e9   : > { %v11535_v43 = vadd.f32 %v1839_v41, %v13516_v26  ;;  %v1841_v44 = vpop.f32.mrb[33].mxu1  ;;  %2887 = vmatprep.subr.bf16.mxu1 %v12035_v38  ;;  %v12054_v38 = vld [vmem:[%s15973_s5 + $0xb0] ss:$8 sps:$4 sm:$0xff]  }
 0x2ea   : > { %v11536_v45 = vadd.f32 %v1841_v44, %v13519_v27  ;;  %v1843_v46 = vpop.f32.mrb[34].mxu1  ;;  %1978 = vmatprep.subr.bf16.mxu0 %v13527_v42 }
 0x2eb   : > { %v11537_v47 = vadd.f32 %v1843_v46, %v13516_v26  ;;  %v1845_v48 = vpop.f32.mrb[35].mxu1  ;;  %1979 = vmatpush1.bf16.msra.mxu0 %v13525_v40  ;;  %v1902_v50 = vmax.f32 %v11535_v43, 0.0  ;;  %v12033_v46 = vld [vmem:[%s15973_s5 + $0x40] ss:$8 sps:$4 sm:$0xff]  }
 0x2ec   : > { %v11538_v49 = vadd.f32 %v1845_v48, %v13519_v27  ;;  %v1903_v52 = vmax.f32 %v11536_v45, 0.0  ;;  %2888 = vmatpush1.bf16.msra.mxu1 %v12033_v46  ;;  %v12011_v46 = vld [vmem:[#allocation6 + $0x10] sm:$0xff]  }
 0x2ed   : > { %v1904_v51 = vmax.f32 %v11537_v47, 0.0 }
 0x2ee   : > { %v1905_v53 = vmax.f32 %v11538_v49, 0.0  ;;  %v12038_v49 = vld [vmem:[%s15973_s5 + $0x54] ss:$8 sps:$4 sm:$0xff]  }
 0x2ef   : > { %v13535_v54 = vpack.c.bf16 %v1904_v51, %v1902_v50  ;;  %2889 = vmatprep.subr.bf16.mxu1 %v12038_v49  ;;  %v12012_v49 = vld [vmem:[#allocation6 + $0x18] ss:$0 sps:$4 sm:$0xff]  }
 0x2f0   : > { %v1849_v55 = vpop.f32.mrb[36].mxu1  ;;  %v13537_v56 = vpack.c.bf16 %v1905_v53, %v1903_v52 }
 0x2f1   : > { %v11539_v57 = vadd.f32 %v1849_v55, %v13516_v26  ;;  %v1851_v58 = vpop.f32.mrb[37].mxu1 }
 0x2f2   : > { %v11540_v59 = vadd.f32 %v1851_v58, %v13519_v27  ;;  %v1853_v60 = vpop.f32.mrb[38].mxu1  ;;  %1980 = vmatprep.subr.bf16.mxu0 %v13537_v56 }
 0x2f3   : > { %v11541_v61 = vadd.f32 %v1853_v60, %v13516_v26  ;;  %v1855_v62 = vpop.f32.mrb[39].mxu1  ;;  %1981 = vmatpush1.bf16.msra.mxu0 %v13535_v54  ;;  %v1906_v1 = vmax.f32 %v11539_v57, 0.0  ;;  %v12036_v57 = vld [vmem:[%s15973_s5 + $0x50] ss:$8 sps:$4 sm:$0xff]   ;;  %v12041_v60 = vld [vmem:[%s15973_s5 + $0x64] ss:$8 sps:$4 sm:$0xff]  }
 0x2f4   : > { %v11542_v63 = vadd.f32 %v1855_v62, %v13519_v27  ;;  %v1907_v3 = vmax.f32 %v11540_v59, 0.0  ;;  %2890 = vmatpush1.bf16.msra.mxu1 %v12036_v57 }
 0x2f5   : > { %v1908_v2 = vmax.f32 %v11541_v61, 0.0  ;;  %2891 = vmatprep.subr.bf16.mxu1 %v12041_v60 }
 0x2f6   : > { %v1909_v4 = vmax.f32 %v11542_v63, 0.0 }
 0x2f7   : > { %v13551_v7 = vpack.c.bf16 %v1908_v2, %v1906_v1 }
 0x2f8   : > { %v1859_v9 = vpop.f32.mrb[40].mxu1  ;;  %v13556_v10 = vpack.c.bf16 %v1909_v4, %v1907_v3  ;;  %v12039_v3 = vld [vmem:[%s15973_s5 + $0x60] ss:$8 sps:$4 sm:$0xff]  }
 0x2f9   : > { %v11543_v11 = vadd.f32 %v1859_v9, %v13516_v26  ;;  %v1861_v12 = vpop.f32.mrb[41].mxu1  ;;  %2892 = vmatpush1.bf16.msra.mxu1 %v12039_v3 }
 0x2fa   : > { %v11544_v14 = vadd.f32 %v1861_v12, %v13519_v27  ;;  %v1863_v15 = vpop.f32.mrb[42].mxu1  ;;  %1982 = vmatprep.subr.bf16.mxu0 %v13556_v10  ;;  %2893 = vmatprep.subr.bf16.mxu1 %v12044_v6 }
 0x2fb   : > { %v11545_v17 = vadd.f32 %v1863_v15, %v13516_v26  ;;  %v1865_v18 = vpop.f32.mrb[43].mxu1  ;;  %1983 = vmatpush1.bf16.msra.mxu0 %v13551_v7  ;;  %v1910_v20 = vmax.f32 %v11543_v11, 0.0 }
 0x2fc   : > { %v11546_v19 = vadd.f32 %v1865_v18, %v13519_v27  ;;  %v1911_v24 = vmax.f32 %v11544_v14, 0.0  ;;  %v12042_v14 = vld [vmem:[%s15973_s5 + $0x70] ss:$8 sps:$4 sm:$0xff]  }
 0x2fd   : > { %v1912_v21 = vmax.f32 %v11545_v17, 0.0  ;;  %v12047_v17 = vld [vmem:[%s15973_s5 + $0x84] ss:$8 sps:$4 sm:$0xff]   ;;  %2894 = vmatpush1.bf16.msra.mxu1 %v12042_v14 }
 0x2fe   : > { %v1913_v28 = vmax.f32 %v11546_v19, 0.0  ;;  %2895 = vmatprep.subr.bf16.mxu1 %v12047_v17  ;;  %v12083_v14 = vld [vmem:[%s15973_s5 + $0x144] ss:$8 sps:$4 sm:$0xff]  }
 0x2ff   : > { %v13576_v30 = vpack.c.bf16 %v1912_v21, %v1910_v20 }
 0x300   : > { %v1869_v31 = vpop.f32.mrb[44].mxu1  ;;  %v13578_v32 = vpack.c.bf16 %v1913_v28, %v1911_v24  ;;  %v12045_v24 = vld [vmem:[%s15973_s5 + $0x80] ss:$8 sps:$4 sm:$0xff]  }
 0x301   : > { %v11547_v33 = vadd.f32 %v1869_v31, %v13516_v26  ;;  %v1871_v34 = vpop.f32.mrb[45].mxu1  ;;  %v12050_v31 = vld [vmem:[%s15973_s5 + $0x94] ss:$8 sps:$4 sm:$0xff]   ;;  %2896 = vmatpush1.bf16.msra.mxu1 %v12045_v24 }
 0x302   : > { %v11548_v36 = vadd.f32 %v1871_v34, %v13519_v27  ;;  %v1873_v37 = vpop.f32.mrb[46].mxu1  ;;  %1984 = vmatprep.subr.bf16.mxu0 %v13578_v32  ;;  %v12009_v34 = vld [vmem:[#allocation6] sm:$0xff]   ;;  %2897 = vmatprep.subr.bf16.mxu1 %v12050_v31 }
 0x303   : > { %v11549_v39 = vadd.f32 %v1873_v37, %v13516_v26  ;;  %v1875_v41 = vpop.f32.mrb[47].mxu1  ;;  %1985 = vmatpush1.bf16.msra.mxu0 %v13576_v30  ;;  %v1914_v44 = vmax.f32 %v11547_v33, 0.0  ;;  %v12056_v37 = vld [vmem:[%s15973_s5 + $0xb4] ss:$8 sps:$4 sm:$0xff]  }
 0x304   : > { %v11550_v43 = vadd.f32 %v1875_v41, %v13519_v27  ;;  %v1915_v47 = vmax.f32 %v11548_v36, 0.0  ;;  %v12051_v36 = vld [vmem:[%s15973_s5 + $0xa0] ss:$8 sps:$4 sm:$0xff]   ;;  %v12059_v41 = vld [vmem:[%s15973_s5 + $0xc4] ss:$8 sps:$4 sm:$0xff]  }
 0x305   : > { %v1916_v45 = vmax.f32 %v11549_v39, 0.0  ;;  %v12010_v39 = vld [vmem:[#allocation6 + $0x8] sm:$0xff]  }
 0x306   : > { %v1917_v48 = vmax.f32 %v11550_v43, 0.0  ;;  %v12057_v43 = vld [vmem:[%s15973_s5 + $0xc0] ss:$8 sps:$4 sm:$0xff]  }
 0x307   : > { %v13598_v50 = vpack.c.bf16 %v1916_v45, %v1914_v44  ;;  %v12062_v44 = vld [vmem:[%s15973_s5 + $0xd4] ss:$8 sps:$4 sm:$0xff]   ;;  %v12060_v45 = vld [vmem:[%s15973_s5 + $0xd0] ss:$8 sps:$4 sm:$0xff]  }
 0x308   : > { %v1879_v51 = vpop.f32.mrb[48].mxu1  ;;  %v13600_v52 = vpack.c.bf16 %v1917_v48, %v1915_v47  ;;  %v12065_v47 = vld [vmem:[%s15973_s5 + $0xe4] ss:$8 sps:$4 sm:$0xff]   ;;  %v12063_v48 = vld [vmem:[%s15973_s5 + $0xe0] ss:$8 sps:$4 sm:$0xff]  }
 0x309   : > { %v11551_v53 = vadd.f32 %v1879_v51, %v13516_v26  ;;  %v1881_v55 = vpop.f32.mrb[49].mxu1  ;;  %v12013_v51 = vld [vmem:[#allocation6 + $0x1c] sm:$0xff]  }
 0x30a   : > { %v11552_v58 = vadd.f32 %v1881_v55, %v13519_v27  ;;  %v1883_v59 = vpop.f32.mrb[50].mxu1  ;;  %1986 = vmatprep.subr.bf16.mxu0 %v13600_v52 }
 0x30b   : > { %v11553_v61 = vadd.f32 %v1883_v59, %v13516_v26  ;;  %v1885_v62 = vpop.f32.mrb[51].mxu1  ;;  %1987 = vmatpush1.bf16.msra.mxu0 %v13598_v50  ;;  %v1918_v1 = vmax.f32 %v11551_v53, 0.0  ;;  %v12014_v53 = vld [vmem:[#allocation6 + $0x24] sm:$0xff]  }
 0x30c   : > { %v11554_v63 = vadd.f32 %v1885_v62, %v13519_v27  ;;  %v1919_v4 = vmax.f32 %v11552_v58, 0.0  ;;  %v12074_v62 = vld [vmem:[%s15973_s5 + $0x114] ss:$8 sps:$4 sm:$0xff]  }
 0x30d   : > { %v1920_v2 = vmax.f32 %v11553_v61, 0.0  ;;  %v12069_v61 = vld [vmem:[%s15973_s5 + $0x100] ss:$8 sps:$4 sm:$0xff]  }
 0x30e   : > { %v1921_v5 = vmax.f32 %v11554_v63, 0.0  ;;  %v12072_v63 = vld [vmem:[%s15973_s5 + $0x110] ss:$8 sps:$4 sm:$0xff]  }
 0x30f   : > { %v13620_v8 = vpack.c.bf16 %v1920_v2, %v1918_v1  ;;  %v12077_v2 = vld [vmem:[%s15973_s5 + $0x124] ss:$8 sps:$4 sm:$0xff]  }
 0x310   : > { %v1889_v9 = vpop.f32.mrb[52].mxu1  ;;  %v13622_v11 = vpack.c.bf16 %v1921_v5, %v1919_v4 }
 0x311   : > { %v11555_v12 = vadd.f32 %v1889_v9, %v13516_v26  ;;  %v1891_v13 = vpop.f32.mrb[53].mxu1 }
 0x312   : > { %v11556_v15 = vadd.f32 %v1891_v13, %v13519_v27  ;;  %v1893_v16 = vpop.f32.mrb[54].mxu1  ;;  %1988 = vmatprep.subr.bf16.mxu0 %v13622_v11 }
 0x313   : > { %v11557_v18 = vadd.f32 %v1893_v16, %v13516_v26  ;;  %v1895_v19 = vpop.f32.mrb[55].mxu1  ;;  %1989 = vmatpush1.bf16.msra.mxu0 %v13620_v8  ;;  %v1922_v21 = vmax.f32 %v11555_v12, 0.0  ;;  %v12078_v12 = vld [vmem:[%s15973_s5 + $0x130] ss:$8 sps:$4 sm:$0xff]  }
 0x314   : > { %v11558_v20 = vadd.f32 %v1895_v19, %v13519_v27  ;;  %v1923_v28 = vmax.f32 %v11556_v15, 0.0  ;;  %v12048_v27 = vld [vmem:[%s15973_s5 + $0x90] ss:$8 sps:$4 sm:$0xff]   ;;  %v12081_v19 = vld [vmem:[%s15973_s5 + $0x140] ss:$8 sps:$4 sm:$0xff]  }
 0x315   : > { %v1924_v22 = vmax.f32 %v11557_v18, 0.0  ;;  %2898 = vmatpush1.bf16.msra.mxu1 %v12048_v27 }
 0x316   : > { %v1925_v29 = vmax.f32 %v11558_v20, 0.0  ;;  %2899 = vmatprep.subr.bf16.mxu1 %v12053_v35  ;;  %v12092_v35 = vld [vmem:[%s15973_s5 + $0x174] ss:$8 sps:$4 sm:$0xff]  }
 0x317   : > { %v13642_v26 = vpack.c.bf16 %v1924_v22, %v1922_v21  ;;  %v12086_v21 = vld [vmem:[%s15973_s5 + $0x154] ss:$8 sps:$4 sm:$0xff]   ;;  %v12084_v22 = vld [vmem:[%s15973_s5 + $0x150] ss:$8 sps:$4 sm:$0xff]  }
 0x318   : > { %v13644_v33 = vpack.c.bf16 %v1925_v29, %v1923_v28  ;;  %v12089_v28 = vld [vmem:[%s15973_s5 + $0x164] ss:$8 sps:$4 sm:$0xff]  }
 0x319   : > { %2900 = vmatpush1.bf16.msra.mxu1 %v12051_v36  ;;  %v12090_v36 = vld [vmem:[%s15973_s5 + $0x170] ss:$8 sps:$4 sm:$0xff]  }
 0x31a   : > { %1990 = vmatprep.subr.bf16.mxu0 %v13644_v33  ;;  %2901 = vmatprep.subr.bf16.mxu1 %v12056_v37 }
 0x31b   : > { %1991 = vmatpush1.bf16.msra.mxu0 %v13642_v26 }
 0x31c   : > { %2095 = vmatprep.subr.bf16.mxu0 %v13527_v42 }
 0x31d   : > { %2902 = vmatpush1.bf16.msra.mxu1 %v12054_v38  ;;  %v12095_v38 = vld [vmem:[%s15973_s5 + $0x184] ss:$8 sps:$4 sm:$0xff]  }
 0x31e   : > { %10195 = vmatmul.mubr.msk.bf16.vlgmr.msra.gmra.mrb[56].mxu0 %vm1965_vm1, %v12009_v34  ;;  %2903 = vmatprep.subr.bf16.mxu1 %v12059_v41  ;;  %v12087_v34 = vld [vmem:[%s15973_s5 + $0x160] ss:$8 sps:$4 sm:$0xff]  }
 0x31f   : > { %2096 = vmatpush1.bf16.msra.mxu0 %v13525_v40  ;;  %2020 = vmatprep.mubr.bf16.mxu0 %v13042_v0 }
 0x320   : > { %2097 = vmatprep.subr.bf16.mxu0 %v13537_v56 }
 0x321   : > { %2904 = vmatpush1.bf16.msra.mxu1 %v12057_v43 }
 0x322   : > { %2905 = vmatprep.subr.bf16.mxu1 %v12062_v44 }
 0x323   : > { %2098 = vmatpush1.bf16.msra.mxu0 %v13535_v54 }
 0x324   : > { %2099 = vmatprep.subr.bf16.mxu0 %v13556_v10 }
 0x325   : > { %2906 = vmatpush1.bf16.msra.mxu1 %v12060_v45  ;;  %v12093_v45 = vld [vmem:[%s15973_s5 + $0x180] ss:$8 sps:$4 sm:$0xff]  }
 0x326   : > { %10196 = vmatmul.mubr.msk.bf16.gmra.mrb[60].mxu0 %vm1965_vm1, %v12010_v39  ;;  %2907 = vmatprep.subr.bf16.mxu1 %v12065_v47  ;;  %v12098_v47 = vld [vmem:[%s15973_s5 + $0x194] ss:$8 sps:$4 sm:$0xff]  }
 0x327   : > { %2100 = vmatpush1.bf16.msra.mxu0 %v13551_v7  ;;  %2030 = vmatprep.mubr.bf16.mxu0 %v13042_v0 }
 0x328   : > { %2101 = vmatprep.subr.bf16.mxu0 %v13578_v32 }
 0x329   : > { %2908 = vmatpush1.bf16.msra.mxu1 %v12063_v48  ;;  %v12096_v48 = vld [vmem:[%s15973_s5 + $0x190] ss:$8 sps:$4 sm:$0xff]  }
 0x32b   : > { %2102 = vmatpush1.bf16.msra.mxu0 %v13576_v30 }
 0x32c   : > { %2103 = vmatprep.subr.bf16.mxu0 %v13600_v52 }
 0x32e   : > { %10197 = vmatmul.mubr.msk.bf16.gmra.mrb[64].mxu0 %vm1965_vm1, %v12011_v46 }
 0x32f   : > { %2104 = vmatpush1.bf16.msra.mxu0 %v13598_v50  ;;  %2040 = vmatprep.mubr.bf16.mxu0 %v13042_v0 }
 0x330   : > { %2105 = vmatprep.subr.bf16.mxu0 %v13622_v11 }
 0x333   : > { %2106 = vmatpush1.bf16.msra.mxu0 %v13620_v8 }
 0x334   : > { %2107 = vmatprep.subr.bf16.mxu0 %v13644_v33 }
 0x336   : > { %10198 = vmatmul.mubr.msk.bf16.gmra.mrb[68].mxu0 %vm1965_vm1, %v12012_v49 }
 0x337   : > { %2108 = vmatpush1.bf16.msra.mxu0 %v13642_v26  ;;  %2127 = vmatprep.mubr.bf16.mxu0 %v13042_v0 }
 0x338   : > { %2212 = vmatprep.subr.bf16.mxu0 %v13527_v42  ;;  %v12015_v42 = vld [vmem:[#allocation6 + $0x2c] sm:$0xff]  }
 0x33e   : > { %10203 = vmatmul.mubr.msk.bf16.vlgmr.msra.gmra.mrb[72].mxu0 %vm1965_vm1, %v12013_v51  ;;  %v12101_v51 = vld [vmem:[%s15973_s5 + $0x1a4] ss:$8 sps:$4 sm:$0xff]  }
 0x33f   : > { %2213 = vmatpush1.bf16.msra.mxu0 %v13525_v40  ;;  %2137 = vmatprep.mubr.bf16.mxu0 %v13042_v0  ;;  %v12016_v40 = vld [vmem:[#allocation6 + $0x34] ss:$0 sps:$4 sm:$0xff]  }
 0x340   : > { %2214 = vmatprep.subr.bf16.mxu0 %v13537_v56  ;;  %v12018_v56 = vld [vmem:[#allocation6 + $0x40] sm:$0xff]  }
 0x343   : > { %2215 = vmatpush1.bf16.msra.mxu0 %v13535_v54  ;;  %v12017_v54 = vld [vmem:[#allocation6 + $0x38] sm:$0xff]  }
 0x344   : > { %2216 = vmatprep.subr.bf16.mxu0 %v13556_v10  ;;  %v12020_v10 = vld [vmem:[#allocation6 + $0x50] ss:$0 sps:$4 sm:$0xff]  }
 0x346   : > { %10204 = vmatmul.mubr.msk.bf16.gmra.mrb[76].mxu0 %vm1965_vm1, %v12014_v53 }
 0x347   : > { %2217 = vmatpush1.bf16.msra.mxu0 %v13551_v7  ;;  %2147 = vmatprep.mubr.bf16.mxu0 %v13042_v0  ;;  %v12019_v7 = vld [vmem:[#allocation6 + $0x48] sm:$0xff]  }
 0x348   : > { %2218 = vmatprep.subr.bf16.mxu0 %v13578_v32  ;;  %v12066_v32 = vld [vmem:[%s15973_s5 + $0xf0] ss:$8 sps:$4 sm:$0xff]  }
 0x34b   : > { %2219 = vmatpush1.bf16.msra.mxu0 %v13576_v30  ;;  %v12068_v30 = vld [vmem:[%s15973_s5 + $0xf4] ss:$8 sps:$4 sm:$0xff]  }
 0x34c   : > { %2220 = vmatprep.subr.bf16.mxu0 %v13600_v52  ;;  %2909 = vmatprep.subr.bf16.mxu1 %v12068_v30  ;;  %v12102_v30 = vld [vmem:[%s15973_s5 + $0x1b0] ss:$8 sps:$4 sm:$0xff]  }
 0x34d   : > { %2910 = vmatpush1.bf16.msra.mxu1 %v12066_v32 }
 0x34e   : > { %10205 = vmatmul.mubr.msk.bf16.gmra.mrb[80].mxu0 %vm1965_vm1, %v12015_v42 }
 0x34f   : > { %2221 = vmatpush1.bf16.msra.mxu0 %v13598_v50  ;;  %2157 = vmatprep.mubr.bf16.mxu0 %v13042_v0  ;;  %v12071_v50 = vld [vmem:[%s15973_s5 + $0x104] ss:$8 sps:$4 sm:$0xff]  }
 0x350   : > { %2222 = vmatprep.subr.bf16.mxu0 %v13622_v11  ;;  %2950 = vmatprep.subr.bf16.mxu1 %v12071_v50  ;;  %v12080_v11 = vld [vmem:[%s15973_s5 + $0x134] ss:$8 sps:$4 sm:$0xff]   ;;  %v12107_v50 = vld [vmem:[%s15973_s5 + $0x1c4] ss:$8 sps:$4 sm:$0xff]  }
 0x353   : > { %2223 = vmatpush1.bf16.msra.mxu0 %v13620_v8  ;;  %v12075_v8 = vld [vmem:[%s15973_s5 + $0x120] ss:$8 sps:$4 sm:$0xff]  }
 0x354   : > { %2224 = vmatprep.subr.bf16.mxu0 %v13644_v33 }
 0x356   : > { %10206 = vmatmul.mubr.msk.bf16.gmra.mrb[84].mxu0 %vm1965_vm1, %v12016_v40 }
 0x357   : > { %2225 = vmatpush1.bf16.msra.mxu0 %v13642_v26  ;;  %2244 = vmatprep.mubr.bf16.mxu0 %v13042_v0 }
 0x35e   : > { %10211 = vmatmul.mubr.msk.bf16.vlgmr.msra.gmra.mrb[88].mxu0 %vm1965_vm1, %v12017_v54 }
 0x35f   : > { %2254 = vmatprep.mubr.bf16.mxu0 %v13042_v0 }
 0x366   : > { %10212 = vmatmul.mubr.msk.bf16.gmra.mrb[92].mxu0 %vm1965_vm1, %v12018_v56  ;;  %v12099_v56 = vld [vmem:[%s15973_s5 + $0x1a0] ss:$8 sps:$4 sm:$0xff]  }
 0x367   : > { %2264 = vmatprep.mubr.bf16.mxu0 %v13042_v0 }
 0x36e   : > { %10213 = vmatmul.mubr.msk.bf16.gmra.mrb[96].mxu0 %vm1965_vm1, %v12019_v7 }
 0x36f   : > { %2274 = vmatprep.mubr.bf16.mxu0 %v13042_v0 }
 0x376   : > { %10214 = vmatmul.mubr.msk.bf16.gmra.mrb[100].mxu0 %vm1965_vm1, %v12020_v10  ;;  %v12104_v10 = vld [vmem:[%s15973_s5 + $0x1b4] ss:$8 sps:$4 sm:$0xff]  }
 0x377   : > { %3158 = vmatprep.mubr.bf16.mxu0 %v13042_v0 }
 0x3f1   : > { %v2012_v52 = vpop.f32.mrb[56].mxu0 }
 0x3f2   : > { %v2014_v55 = vpop.f32.mrb[57].mxu0 }
 0x3f3   : > { %v2016_v57 = vpop.f32.mrb[58].mxu0 }
 0x3f4   : > { %v2049_v58 = vpack.c.bf16 %v2016_v57, %v2012_v52  ;;  %v2018_v59 = vpop.f32.mrb[59].mxu0 }
 0x3f5   : > { %v2050_v60 = vpack.c.bf16 %v2018_v59, %v2014_v55  ;;  %v12105_v59 = vld [vmem:[%s15973_s5 + $0x1c0] ss:$8 sps:$4 sm:$0xff]  }
 0x3f7   : > { %2911 = vmatprep.mubr.bf16.mxu1 %v2050_v60 }
 0x3f8   : > { %2912 = vmatmul.mubr.bf16.vlgmr.msra.gmra.mrb[56].mxu1 %v2049_v58 }
 0x3f9   : > { %2951 = vmatpush1.bf16.msra.mxu1 %v12069_v61  ;;  %v2022_v1 = vpop.f32.mrb[60].mxu0  ;;  %v12110_v61 = vld [vmem:[%s15973_s5 + $0x1d4] ss:$8 sps:$4 sm:$0xff]  }
 0x3fa   : > { %2952 = vmatprep.subr.bf16.mxu1 %v12074_v62  ;;  %v2024_v3 = vpop.f32.mrb[61].mxu0  ;;  %v12108_v62 = vld [vmem:[%s15973_s5 + $0x1d0] ss:$8 sps:$4 sm:$0xff]  }
 0x3fb   : > { %v2026_v4 = vpop.f32.mrb[62].mxu0 }
 0x3fc   : > { %v2051_v5 = vpack.c.bf16 %v2026_v4, %v2022_v1  ;;  %v2028_v6 = vpop.f32.mrb[63].mxu0  ;;  %v12113_v1 = vld [vmem:[%s15973_s5 + $0x1e4] ss:$8 sps:$4 sm:$0xff]  }
 0x3fd   : > { %2953 = vmatpush1.bf16.msra.mxu1 %v12072_v63  ;;  %v2052_v9 = vpack.c.bf16 %v2028_v6, %v2024_v3  ;;  %v12116_v6 = vld [vmem:[%s15973_s5 + $0x1f4] ss:$8 sps:$4 sm:$0xff]  }
 0x3fe   : > { %2954 = vmatprep.subr.bf16.mxu1 %v12077_v2 }
 0x3ff   : > { %2921 = vmatprep.mubr.bf16.mxu1 %v2052_v9 }
 0x400   : > { %2922 = vmatmul.mubr.bf16.gmra.mrb[60].mxu1 %v2051_v5  ;;  %v12111_v5 = vld [vmem:[%s15973_s5 + $0x1e0] ss:$8 sps:$4 sm:$0xff]  }
 0x401   : > { %2955 = vmatpush1.bf16.msra.mxu1 %v12075_v8  ;;  %v2032_v13 = vpop.f32.mrb[64].mxu0  ;;  %v12114_v8 = vld [vmem:[%s15973_s5 + $0x1f0] ss:$8 sps:$4 sm:$0xff]  }
 0x402   : > { %2956 = vmatprep.subr.bf16.mxu1 %v12080_v11  ;;  %v2034_v15 = vpop.f32.mrb[65].mxu0  ;;  %v12119_v11 = vld [vmem:[%s15973_s5 + $0x204] ss:$8 sps:$4 sm:$0xff]  }
 0x403   : > { %v2036_v16 = vpop.f32.mrb[66].mxu0 }
 0x404   : > { %v2053_v17 = vpack.c.bf16 %v2036_v16, %v2032_v13  ;;  %v2038_v18 = vpop.f32.mrb[67].mxu0  ;;  %v12117_v16 = vld [vmem:[%s15973_s5 + $0x200] ss:$8 sps:$4 sm:$0xff]  }
 0x405   : > { %2957 = vmatpush1.bf16.msra.mxu1 %v12078_v12  ;;  %v2054_v20 = vpack.c.bf16 %v2038_v18, %v2034_v15  ;;  %v12122_v18 = vld [vmem:[%s15973_s5 + $0x214] ss:$8 sps:$4 sm:$0xff]  }
 0x406   : > { %2958 = vmatprep.subr.bf16.mxu1 %v12083_v14 }
 0x407   : > { %2931 = vmatprep.mubr.bf16.mxu1 %v2054_v20 }
 0x408   : > { %2932 = vmatmul.mubr.bf16.gmra.mrb[64].mxu1 %v2053_v17 }
 0x409   : > { %2959 = vmatpush1.bf16.msra.mxu1 %v12081_v19  ;;  %v2042_v24 = vpop.f32.mrb[68].mxu0  ;;  %v12120_v19 = vld [vmem:[%s15973_s5 + $0x210] ss:$8 sps:$4 sm:$0xff]  }
 0x40a   : > { %2960 = vmatprep.subr.bf16.mxu1 %v12086_v21  ;;  %v2044_v29 = vpop.f32.mrb[69].mxu0  ;;  %v2055_v33 = vpack.c.bf16 %v2042_v24, %v2042_v24  ;;  %v12125_v21 = vld [vmem:[%s15973_s5 + $0x224] ss:$8 sps:$4 sm:$0xff]  }
 0x40b   : > { %v2056_v31 = vpack.c.bf16 %v2044_v29, %v2044_v29  ;;  %v2046_v26 = vpop.f32.mrb[70].mxu0 }
 0x40c   : > { %v2047_v27 = vpop.f32.mrb[71].mxu0 }
 0x40d   : > { %2961 = vmatpush1.bf16.msra.mxu1 %v12084_v22  ;;  %2941 = vmatprep.mubr.bf16.mxu1 %v2056_v31  ;;  %v12123_v31 = vld [vmem:[%s15973_s5 + $0x220] ss:$8 sps:$4 sm:$0xff]   ;;  %v12126_v27 = vld [vmem:[%s15973_s5 + $0x230] ss:$8 sps:$4 sm:$0xff]  }
 0x40e   : > { %2962 = vmatprep.subr.bf16.mxu1 %v12089_v28 }
 0x410   : > { %2942 = vmatmul.mubr.bf16.gmra.mrb[68].mxu1 %v2055_v33  ;;  %v12128_v33 = vld [vmem:[%s15973_s5 + $0x234] ss:$8 sps:$4 sm:$0xff]  }
 0x411   : > { %2963 = vmatpush1.bf16.msra.mxu1 %v12087_v34  ;;  %v13787_v37 = vpop.f32.mrb[72].mxu0 }
 0x412   : > { %2964 = vmatprep.subr.bf16.mxu1 %v12092_v35  ;;  %v2131_v39 = vpop.f32.mrb[73].mxu0  ;;  %v12131_v35 = vld [vmem:[%s15973_s5 + $0x244] ss:$8 sps:$4 sm:$0xff]  }
 0x413   : > { %v13792_v41 = vpop.f32.mrb[74].mxu0 }
 0x414   : > { %v2166_v43 = vpack.c.bf16 %v13792_v41, %v13787_v37  ;;  %v2135_v44 = vpop.f32.mrb[75].mxu0  ;;  %v12129_v41 = vld [vmem:[%s15973_s5 + $0x240] ss:$8 sps:$4 sm:$0xff]  }
 0x415   : > { %2965 = vmatpush1.bf16.msra.mxu1 %v12090_v36  ;;  %v2167_v46 = vpack.c.bf16 %v2135_v44, %v2131_v39 }
 0x416   : > { %2966 = vmatprep.subr.bf16.mxu1 %v12095_v38 }
 0x417   : > { %2982 = vmatprep.mubr.bf16.mxu1 %v2167_v46  ;;  %v12132_v46 = vld [vmem:[%s15973_s5 + $0x250] ss:$8 sps:$4 sm:$0xff]  }
 0x419   : > { %2967 = vmatpush1.bf16.msra.mxu1 %v12093_v45  ;;  %v13805_v49 = vpop.f32.mrb[76].mxu0  ;;  %v12134_v45 = vld [vmem:[%s15973_s5 + $0x254] ss:$8 sps:$4 sm:$0xff]  }
 0x41a   : > { %2968 = vmatprep.subr.bf16.mxu1 %v12098_v47  ;;  %v2141_v53 = vpop.f32.mrb[77].mxu0 }
 0x41b   : > { %v13810_v42 = vpop.f32.mrb[78].mxu0 }
 0x41c   : > { %v2168_v40 = vpack.c.bf16 %v13810_v42, %v13805_v49  ;;  %v2145_v54 = vpop.f32.mrb[79].mxu0 }
 0x41d   : > { %2969 = vmatpush1.bf16.msra.mxu1 %v12096_v48  ;;  %v2169_v7 = vpack.c.bf16 %v2145_v54, %v2141_v53  ;;  %v12137_v48 = vld [vmem:[%s15973_s5 + $0x264] ss:$8 sps:$4 sm:$0xff]   ;;  %v12140_v54 = vld [vmem:[%s15973_s5 + $0x274] ss:$8 sps:$4 sm:$0xff]  }
 0x41e   : > { %2970 = vmatprep.subr.bf16.mxu1 %v12101_v51 }
 0x421   : > { %2971 = vmatpush1.bf16.msra.mxu1 %v12099_v56  ;;  %v13823_v32 = vpop.f32.mrb[80].mxu0  ;;  %v12138_v56 = vld [vmem:[%s15973_s5 + $0x270] ss:$8 sps:$4 sm:$0xff]  }
 0x422   : > { %2972 = vmatprep.subr.bf16.mxu1 %v12104_v10  ;;  %v2151_v52 = vpop.f32.mrb[81].mxu0  ;;  %v12141_v10 = vld [vmem:[%s15973_s5 + $0x280] ss:$8 sps:$4 sm:$0xff]  }
 0x423   : > { %v13828_v55 = vpop.f32.mrb[82].mxu0 }
 0x424   : > { %v2170_v57 = vpack.c.bf16 %v13828_v55, %v13823_v32  ;;  %v2155_v58 = vpop.f32.mrb[83].mxu0  ;;  %v12144_v32 = vld [vmem:[%s15973_s5 + $0x290] ss:$8 sps:$4 sm:$0xff]   ;;  %v12152_v55 = vld [vmem:[%s15973_s5 + $0x2b4] ss:$8 sps:$4 sm:$0xff]  }
 0x425   : > { %2973 = vmatpush1.bf16.msra.mxu1 %v12102_v30  ;;  %v2171_v60 = vpack.c.bf16 %v2155_v58, %v2151_v52  ;;  %v12146_v30 = vld [vmem:[%s15973_s5 + $0x294] ss:$8 sps:$4 sm:$0xff]   ;;  %v12147_v52 = vld [vmem:[%s15973_s5 + $0x2a0] ss:$8 sps:$4 sm:$0xff]   ;;  %v12155_v58 = vld [vmem:[%s15973_s5 + $0x2c4] ss:$8 sps:$4 sm:$0xff]  }
 0x426   : > { %2974 = vmatprep.subr.bf16.mxu1 %v12107_v50  ;;  %v12149_v50 = vld [vmem:[%s15973_s5 + $0x2a4] ss:$8 sps:$4 sm:$0xff]  }
 0x429   : > { %2975 = vmatpush1.bf16.msra.mxu1 %v12105_v59  ;;  %v13841_v63 = vpop.f32.mrb[84].mxu0  ;;  %v12153_v59 = vld [vmem:[%s15973_s5 + $0x2c0] ss:$8 sps:$4 sm:$0xff]  }
 0x42a   : > { %2976 = vmatprep.subr.bf16.mxu1 %v12110_v61  ;;  %v2161_v2 = vpop.f32.mrb[85].mxu0  ;;  %v2172_v53 = vpack.c.bf16 %v13841_v63, %v13841_v63  ;;  %v12156_v61 = vld [vmem:[%s15973_s5 + $0x2d0] ss:$8 sps:$4 sm:$0xff]   ;;  %v12159_v63 = vld [vmem:[%s15973_s5 + $0x2e0] ss:$8 sps:$4 sm:$0xff]  }
 0x42b   : > { %v2163_v3 = vpop.f32.mrb[86].mxu0 }
 0x42c   : > { %v2164_v4 = vpop.f32.mrb[87].mxu0 }
 0x42d   : > { %2977 = vmatpush1.bf16.msra.mxu1 %v12108_v62  ;;  %v12161_v62 = vld [vmem:[%s15973_s5 + $0x2e4] ss:$8 sps:$4 sm:$0xff]  }
 0x42e   : > { %2978 = vmatprep.subr.bf16.mxu1 %v12113_v1  ;;  %v12164_v1 = vld [vmem:[%s15973_s5 + $0x2f4] ss:$8 sps:$4 sm:$0xff]  }
 0x431   : > { %2979 = vmatpush1.bf16.msra.mxu1 %v12111_v5  ;;  %v13855_v9 = vpop.f32.mrb[88].mxu0  ;;  %v2387_v5 = vld [vmem:[%s15974_s6] sm:$0x3] }
 0x432   : > { %2980 = vmatprep.subr.bf16.mxu1 %v12116_v6  ;;  %v2248_v12 = vpop.f32.mrb[89].mxu0  ;;  %v2392_v6 = vrot.slane %v2387_v5, %v13508_v23 }
 0x433   : > { %v13860_v13 = vpop.f32.mrb[90].mxu0 }
 0x434   : > { %v2283_v14 = vpack.c.bf16 %v13860_v13, %v13855_v9  ;;  %v2252_v15 = vpop.f32.mrb[91].mxu0 }
 0x435   : > { %2981 = vmatpush1.bf16.msra.mxu1 %v12114_v8  ;;  %v2284_v17 = vpack.c.bf16 %v2252_v15, %v2248_v12  ;;  %v2396_v8 = vrot.slane %v2387_v5, %v13513_v25 }
 0x436   : > { %3021 = vmatprep.subr.bf16.mxu1 %v12119_v11 }
 0x438   : > { %2983 = vmatmul.mubr.bf16.vlgmr.msra.gmra.mrb[56].mxu1 %v2166_v43  ;;  %v2173_v43 = vpack.c.bf16 %v2161_v2, %v2161_v2  ;;  %v12162_v2 = vld [vmem:[%s15973_s5 + $0x2f0] ss:$8 sps:$4 sm:$0xff]  }
 0x439   : > { %3022 = vmatpush1.bf16.msra.mxu1 %v12117_v16  ;;  %2992 = vmatprep.mubr.bf16.mxu1 %v2169_v7  ;;  %v13873_v20 = vpop.f32.mrb[92].mxu0  ;;  %v12143_v7 = vld [vmem:[%s15973_s5 + $0x284] ss:$8 sps:$4 sm:$0xff]  }
 0x43a   : > { %3023 = vmatprep.subr.bf16.mxu1 %v12122_v18  ;;  %v13878_v22 = vpop.f32.mrb[93].mxu0 }
 0x43b   : > { %v13880_v24 = vpop.f32.mrb[94].mxu0 }
 0x43c   : > { %v2285_v28 = vpack.c.bf16 %v13880_v24, %v13873_v20  ;;  %v13884_v29 = vpop.f32.mrb[95].mxu0 }
 0x43d   : > { %3024 = vmatpush1.bf16.msra.mxu1 %v12120_v19  ;;  %v2286_v26 = vpack.c.bf16 %v13884_v29, %v13878_v22 }
 0x43e   : > { %3025 = vmatprep.subr.bf16.mxu1 %v12125_v21 }
 0x440   : > { %2993 = vmatmul.mubr.bf16.gmra.mrb[60].mxu1 %v2168_v40  ;;  %v12135_v40 = vld [vmem:[%s15973_s5 + $0x260] ss:$8 sps:$4 sm:$0xff]  }
 0x441   : > { %3026 = vmatpush1.bf16.msra.mxu1 %v12123_v31  ;;  %3002 = vmatprep.mubr.bf16.mxu1 %v2171_v60  ;;  %v13897_v34 = vpop.f32.mrb[96].mxu0  ;;  %v12158_v60 = vld [vmem:[%s15973_s5 + $0x2d4] ss:$8 sps:$4 sm:$0xff]  }
 0x442   : > { %3027 = vmatprep.subr.bf16.mxu1 %v12128_v33  ;;  %v13902_v36 = vpop.f32.mrb[97].mxu0 }
 0x443   : > { %v13904_v37 = vpop.f32.mrb[98].mxu0 }
 0x444   : > { %v2287_v38 = vpack.c.bf16 %v13904_v37, %v13897_v34  ;;  %v13908_v39 = vpop.f32.mrb[99].mxu0 }
 0x445   : > { %3028 = vmatpush1.bf16.msra.mxu1 %v12126_v27  ;;  %v2288_v44 = vpack.c.bf16 %v13908_v39, %v13902_v36 }
 0x446   : > { %3029 = vmatprep.subr.bf16.mxu1 %v12131_v35 }
 0x448   : > { %3003 = vmatmul.mubr.bf16.gmra.mrb[64].mxu1 %v2170_v57  ;;  %v12150_v57 = vld [vmem:[%s15973_s5 + $0x2b0] ss:$8 sps:$4 sm:$0xff]  }
 0x449   : > { %3030 = vmatpush1.bf16.msra.mxu1 %v12129_v41  ;;  %3012 = vmatprep.mubr.bf16.mxu1 %v2173_v43  ;;  %v2276_v47 = vpop.f32.mrb[100].mxu0 }
 0x44a   : > { %3031 = vmatprep.subr.bf16.mxu1 %v12134_v45  ;;  %v2278_v49 = vpop.f32.mrb[101].mxu0  ;;  %v2289_v4 = vpack.c.bf16 %v2276_v47, %v2276_v47 }
 0x44b   : > { %v2280_v51 = vpop.f32.mrb[102].mxu0  ;;  %v2290_v3 = vpack.c.bf16 %v2278_v49, %v2278_v49  ;;  %v12174_v49 = vld [vmem:[%s15976_s8 + $0xc0] sm:$0xff]  }
 0x44c   : > { %v2281_v42 = vpop.f32.mrb[103].mxu0 }
 0x44d   : > { %3032 = vmatpush1.bf16.msra.mxu1 %v12132_v46 }
 0x44e   : > { %3033 = vmatprep.subr.bf16.mxu1 %v12137_v48 }
 0x450   : > { %3013 = vmatmul.mubr.bf16.gmra.mrb[68].mxu1 %v2172_v53 }
 0x451   : > { %3034 = vmatpush1.bf16.msra.mxu1 %v12135_v40  ;;  %3053 = vmatprep.mubr.bf16.mxu1 %v2284_v17 }
 0x452   : > { %3035 = vmatprep.subr.bf16.mxu1 %v12140_v54 }
 0x455   : > { %3036 = vmatpush1.bf16.msra.mxu1 %v12138_v56  ;;  %v12176_v56 = vld [vmem:[%s15976_s8 + $0x80] sm:$0xff]  }
 0x456   : > { %3037 = vmatprep.subr.bf16.mxu1 %v12143_v7 }
 0x459   : > { %3038 = vmatpush1.bf16.msra.mxu1 %v12141_v10 }
 0x45a   : > { %3039 = vmatprep.subr.bf16.mxu1 %v12146_v30  ;;  %v12178_v30 = vld [vmem:[%s15976_s8 + $0xc8] sm:$0xff]  }
 0x45d   : > { %3040 = vmatpush1.bf16.msra.mxu1 %v12144_v32 }
 0x45e   : > { %3041 = vmatprep.subr.bf16.mxu1 %v12149_v50 }
 0x461   : > { %3042 = vmatpush1.bf16.msra.mxu1 %v12147_v52 }
 0x462   : > { %3043 = vmatprep.subr.bf16.mxu1 %v12152_v55 }
 0x465   : > { %3044 = vmatpush1.bf16.msra.mxu1 %v12150_v57 }
 0x466   : > { %3045 = vmatprep.subr.bf16.mxu1 %v12155_v58  ;;  %v12180_v58 = vld [vmem:[%s15976_s8 + $0x88] sm:$0xff]  }
 0x469   : > { %3046 = vmatpush1.bf16.msra.mxu1 %v12153_v59 }
 0x46a   : > { %3047 = vmatprep.subr.bf16.mxu1 %v12158_v60 }
 0x46d   : > { %3048 = vmatpush1.bf16.msra.mxu1 %v12156_v61  ;;  %v12182_v61 = vld [vmem:[%s15976_s8 + $0xd0] sm:$0xff]  }
 0x46e   : > { %3049 = vmatprep.subr.bf16.mxu1 %v12161_v62 }
 0x471   : > { %3050 = vmatpush1.bf16.msra.mxu1 %v12159_v63 }
 0x472   : > { %3051 = vmatprep.subr.bf16.mxu1 %v12164_v1 }
 0x475   : > { %3052 = vmatpush1.bf16.msra.mxu1 %v12162_v2 }
 0x476   : > { %10980 = vmatprep.subr.bf16.mxu1 %v12174_v49 }
 0x478   : > { %3054 = vmatmul.mubr.bf16.vlgmr.msra.gmra.mrb[56].mxu1 %v2283_v14 }
 0x479   : > { %3063 = vmatprep.mubr.bf16.mxu1 %v2286_v26  ;;  %10981 = vmatpush3.bf16.msra.mxu1 %v12176_v56 }
 0x47a   : > { %10982 = vmatprep.subr.bf16.mxu1 %v12178_v30  ;;  %v12198_v30 = vld [vmem:[%s15976_s8 + $0x150] sm:$0xff]  }
 0x47d   : > { %10983 = vmatpush3.bf16.msra.mxu1 %v12180_v58 }
 0x47e   : > { %10984 = vmatprep.subr.bf16.mxu1 %v12182_v61 }
 0x480   : > { %3064 = vmatmul.mubr.bf16.gmra.mrb[60].mxu1 %v2285_v28 }
 0x481   : > { %3073 = vmatprep.mubr.bf16.mxu1 %v2288_v44 }
 0x488   : > { %3074 = vmatmul.mubr.bf16.gmra.mrb[64].mxu1 %v2287_v38 }
 0x489   : > { %3083 = vmatprep.mubr.bf16.mxu1 %v2290_v3  ;;  %v12184_v3 = vld [vmem:[%s15976_s8 + $0x90] sm:$0xff]  }
 0x48a   : > { %10985 = vmatpush3.bf16.msra.mxu1 %v12184_v3  ;;  %v12210_v3 = vld [vmem:[%s15976_s8 + $0x1c8] sm:$0xff]  }
 0x490   : > { %3084 = vmatmul.mubr.bf16.gmra.mrb[68].mxu1 %v2289_v4 }
 0x54b   : > { %v3055_v9 = vpop.f32.mrb[56].mxu1 }
 0x54c   : > { %v11559_v11 = vadd.f32 %v3055_v9, %v2392_v6  ;;  %v3057_v12 = vpop.f32.mrb[57].mxu1  ;;  %v10316_v9 = vld [vmem:[%s15975_s7 + $0x8] sm:$0xf] }
 0x54d   : > { %v11560_v13 = vadd.f32 %v3057_v12, %v2396_v8  ;;  %v3059_v14 = vpop.f32.mrb[58].mxu1  ;;  %v10322_v12 = vld [vmem:[%s15975_s7 + $0x10] sm:$0xf] }
 0x54e   : > { %v11561_v15 = vadd.f32 %v3059_v14, %v2392_v6  ;;  %v3061_v16 = vpop.f32.mrb[59].mxu1  ;;  %v3092_v18 = vmax.f32 %v11559_v11, 0.0  ;;  %v10319_v11 = vld [vmem:[%s15975_s7 + $0xc] sm:$0xf]  ;;  %v12186_v14 = vld [vmem:[%s15976_s8 + $0xd8] sm:$0xff]  }
 0x54f   : > { %v11562_v17 = vadd.f32 %v3061_v16, %v2396_v8  ;;  %v3093_v20 = vmax.f32 %v11560_v13, 0.0  ;;  %v10325_v13 = vld [vmem:[%s15975_s7 + $0x14] sm:$0xf]  ;;  %10986 = vmatprep.subr.bf16.mxu1 %v12186_v14  ;;  %v12189_v16 = vld [vmem:[%s15976_s8 + $0xe0] sm:$0xff]   ;;  %v12219_v14 = vld [vmem:[%s15976_s8 + $0x138] sm:$0xff]  }
 0x550   : > { %v3094_v19 = vmax.f32 %v11561_v15, 0.0  ;;  %v12188_v15 = vld [vmem:[%s15976_s8 + $0x98] sm:$0xff]  }
 0x551   : > { %v3095_v21 = vmax.f32 %v11562_v17, 0.0  ;;  %10987 = vmatpush3.bf16.msra.mxu1 %v12188_v15  ;;  %v12191_v17 = vld [vmem:[%s15976_s8 + $0xa0] sm:$0xff]   ;;  %v12220_v15 = vld [vmem:[%s15976_s8 + $0x198] sm:$0xff]  }
 0x552   : > { %v14003_v22 = vpack.c.bf16 %v3094_v19, %v3092_v18  ;;  %10988 = vmatprep.subr.bf16.mxu1 %v12189_v16  ;;  %v12193_v18 = vld [vmem:[%s15976_s8 + $0xe8] sm:$0xff]   ;;  %v12165_v19 = vld [vmem:[%s15976_s8 + $0x40] sm:$0xff]  }
 0x553   : > { %v14005_v24 = vpack.c.bf16 %v3095_v21, %v3093_v20  ;;  %v3065_v28 = vpop.f32.mrb[60].mxu1  ;;  %v12195_v20 = vld [vmem:[%s15976_s8 + $0xa8] sm:$0xff]   ;;  %v10328_v21 = vld [vmem:[%s15975_s7 + $0x18] sm:$0xf]  ;;  %v12221_v16 = vld [vmem:[%s15976_s8 + $0x1e0] sm:$0xff]  }
 0x554   : > { %v11563_v29 = vadd.f32 %v3065_v28, %v2392_v6  ;;  %v3067_v31 = vpop.f32.mrb[61].mxu1  ;;  %v12167_v28 = vld [vmem:[%s15976_s8 + $0x48] sm:$0xff]  }
 0x555   : > { %v11564_v26 = vadd.f32 %v3067_v31, %v2396_v8  ;;  %v3069_v33 = vpop.f32.mrb[62].mxu1  ;;  %3126 = vmatprep.subr.bf16.mxu0 %v14005_v24  ;;  %10989 = vmatpush3.bf16.msra.mxu1 %v12191_v17  ;;  %v12168_v31 = vld [vmem:[%s15976_s8 + $0x8] sm:$0xff]   ;;  %v12222_v17 = vld [vmem:[%s15976_s8 + $0x240] sm:$0xff]  }
 0x556   : > { %v11565_v27 = vadd.f32 %v3069_v33, %v2392_v6  ;;  %v3071_v34 = vpop.f32.mrb[63].mxu1  ;;  %3127 = vmatpush1.bf16.msra.mxu0 %v14003_v22  ;;  %v3096_v36 = vmax.f32 %v11563_v29, 0.0  ;;  %10990 = vmatprep.subr.bf16.mxu1 %v12193_v18  ;;  %v12199_v29 = vld [vmem:[%s15976_s8 + $0xb0] sm:$0xff]   ;;  %v12201_v33 = vld [vmem:[%s15976_s8 + $0xf8] sm:$0xff]  }
 0x557   : > { %v11566_v35 = vadd.f32 %v3071_v34, %v2396_v8  ;;  %v3097_v38 = vmax.f32 %v11564_v26, 0.0  ;;  %v12169_v26 = vld [vmem:[%s15976_s8 + $0x50] sm:$0xff]  }
 0x558   : > { %v3098_v37 = vmax.f32 %v11565_v27, 0.0  ;;  %v12203_v27 = vld [vmem:[%s15976_s8 + $0xb8] sm:$0xff]   ;;  %v12170_v34 = vld [vmem:[%s15976_s8 + $0x10] sm:$0xff]  }
 0x559   : > { %v3099_v39 = vmax.f32 %v11566_v35, 0.0  ;;  %10991 = vmatpush3.bf16.msra.mxu1 %v12195_v20  ;;  %v12171_v35 = vld [vmem:[%s15976_s8 + $0x58] sm:$0xff]  }
 0x55a   : > { %v14009_v41 = vpack.c.bf16 %v3098_v37, %v3096_v36  ;;  %v12206_v36 = vld [vmem:[%s15976_s8 + $0x1c0] sm:$0xff]   ;;  %v12172_v37 = vld [vmem:[%s15976_s8 + $0x18] sm:$0xff]  }
 0x55b   : > { %v14011_v43 = vpack.c.bf16 %v3099_v39, %v3097_v38  ;;  %v3075_v44 = vpop.f32.mrb[64].mxu1  ;;  %v12173_v38 = vld [vmem:[%s15976_s8 + $0x60] sm:$0xff]  }
 0x55c   : > { %v11567_v45 = vadd.f32 %v3075_v44, %v2392_v6  ;;  %v3077_v46 = vpop.f32.mrb[65].mxu1  ;;  %v12175_v39 = vld [vmem:[%s15976_s8 + $0x20] sm:$0xff]   ;;  %v12181_v44 = vld [vmem:[%s15976_s8 + $0x70] sm:$0xff]  }
 0x55d   : > { %v11568_v47 = vadd.f32 %v3077_v46, %v2396_v8  ;;  %v3079_v48 = vpop.f32.mrb[66].mxu1  ;;  %3128 = vmatprep.subr.bf16.mxu0 %v14011_v43  ;;  %v12185_v46 = vld [vmem:[%s15976_s8 + $0x78] sm:$0xff]  }
 0x55e   : > { %v11569_v51 = vadd.f32 %v3079_v48, %v2392_v6  ;;  %v3081_v53 = vpop.f32.mrb[67].mxu1  ;;  %3129 = vmatpush1.bf16.msra.mxu0 %v14009_v41  ;;  %v3100_v40 = vmax.f32 %v11567_v45, 0.0  ;;  %v12183_v45 = vld [vmem:[%s15976_s8 + $0x30] sm:$0xff]   ;;  %v12190_v48 = vld [vmem:[%s15976_s8 + $0x140] sm:$0xff]  }
 0x55f   : > { %v11570_v42 = vadd.f32 %v3081_v53, %v2396_v8  ;;  %v3101_v7 = vmax.f32 %v11568_v47, 0.0  ;;  %v12187_v47 = vld [vmem:[%s15976_s8 + $0x38] sm:$0xff]  }
 0x560   : > { %v3102_v54 = vmax.f32 %v11569_v51, 0.0 }
 0x561   : > { %v3103_v10 = vmax.f32 %v11570_v42, 0.0 }
 0x562   : > { %v14024_v32 = vpack.c.bf16 %v3102_v54, %v3100_v40  ;;  %v12192_v54 = vld [vmem:[%s15976_s8 + $0x100] sm:$0xff]  }
 0x563   : > { %v14026_v50 = vpack.c.bf16 %v3103_v10, %v3101_v7  ;;  %v3085_v52 = vpop.f32.mrb[68].mxu1  ;;  %v12194_v7 = vld [vmem:[%s15976_s8 + $0x148] sm:$0xff]  }
 0x564   : > { %v11571_v55 = vadd.f32 %v3085_v52, %v2392_v6  ;;  %v3087_v57 = vpop.f32.mrb[69].mxu1  ;;  %v3114_v6 = vld [vmem:[%s15975_s7] sm:$0xf]  ;;  %v12196_v10 = vld [vmem:[%s15976_s8 + $0x108] sm:$0xff]   ;;  %v12204_v52 = vld [vmem:[%s15976_s8 + $0x118] sm:$0xff]  }
 0x565   : > { %v11572_v59 = vadd.f32 %v3087_v57, %v2396_v8  ;;  %v3089_v60 = vpop.f32.mrb[70].mxu1  ;;  %3130 = vmatprep.subr.bf16.mxu0 %v14026_v50  ;;  %v10313_v8 = vld [vmem:[%s15975_s7 + $0x4] sm:$0xf] }
 0x566   : > { %v3104_v62 = vmax.f32 %v11571_v55, 0.0  ;;  %v3090_v63 = vpop.f32.mrb[71].mxu1  ;;  %3131 = vmatpush1.bf16.msra.mxu0 %v14024_v32  ;;  %v12205_v55 = vld [vmem:[%s15976_s8 + $0x160] sm:$0xff]  }
 0x567   : > { %v3105_v1 = vmax.f32 %v11572_v59, 0.0  ;;  %v12208_v63 = vld [vmem:[%s15976_s8 + $0x180] sm:$0xff]  }
 0x568   : > { %v3112_v2 = vpack.c.bf16 %v3104_v62, %v3104_v62  ;;  %v12207_v62 = vld [vmem:[%s15976_s8 + $0x120] sm:$0xff]  }
 0x569   : > { %v14039_v4 = vpack.c.bf16 %v3105_v1, %v3105_v1 }
 0x56a   : > { %v14042_v5 = vsel %vm3119_vm2, %v3112_v2, 0  ;;  %v12209_v2 = vld [vmem:[%s15976_s8 + $0x168] sm:$0xff]  }
 0x56b   : > { %10311 = vmatprep.subr.msk.bf16.mxu0 %vm3119_vm2, %v14039_v4 }
 0x56c   : > { %3133 = vmatpush1.bf16.msra.mxu0 %v14042_v5 }
 0x56d   : > { %3174 = vmatprep.subr.bf16.mxu0 %v14005_v24 }
 0x56f   : > { %10312 = vmatmul.mubr.msk.bf16.vlgmr.msra.gmra.mrb[104].mxu0 %vm3115_vm3, %v3114_v6  ;;  %v12213_v6 = vld [vmem:[%s15976_s8 + $0x170] sm:$0xff]  }
 0x570   : > { %3175 = vmatpush1.bf16.msra.mxu0 %v14003_v22  ;;  %3206 = vmatprep.mubr.bf16.mxu0 %v13042_v0 }
 0x571   : > { %3176 = vmatprep.subr.bf16.mxu0 %v14011_v43 }
 0x574   : > { %3177 = vmatpush1.bf16.msra.mxu0 %v14009_v41 }
 0x575   : > { %3178 = vmatprep.subr.bf16.mxu0 %v14026_v50 }
 0x578   : > { %3179 = vmatpush1.bf16.msra.mxu0 %v14024_v32 }
 0x579   : > { %10314 = vmatprep.subr.msk.bf16.mxu0 %vm3119_vm2, %v14039_v4 }
 0x57c   : > { %3181 = vmatpush1.bf16.msra.mxu0 %v14042_v5 }
 0x57d   : > { %3222 = vmatprep.subr.bf16.mxu0 %v14005_v24 }
 0x57f   : > { %10315 = vmatmul.mubr.msk.bf16.vlgmr.msra.gmra.mrb[108].mxu0 %vm3115_vm3, %v10313_v8  ;;  %v12214_v8 = vld [vmem:[%s15976_s8 + $0x1d0] sm:$0xff]  }
 0x580   : > { %3223 = vmatpush1.bf16.msra.mxu0 %v14003_v22  ;;  %3254 = vmatprep.mubr.bf16.mxu0 %v13042_v0 }
 0x581   : > { %3224 = vmatprep.subr.bf16.mxu0 %v14011_v43 }
 0x584   : > { %3225 = vmatpush1.bf16.msra.mxu0 %v14009_v41 }
 0x585   : > { %3226 = vmatprep.subr.bf16.mxu0 %v14026_v50 }
 0x588   : > { %3227 = vmatpush1.bf16.msra.mxu0 %v14024_v32 }
 0x589   : > { %10317 = vmatprep.subr.msk.bf16.mxu0 %vm3119_vm2, %v14039_v4 }
 0x58c   : > { %3229 = vmatpush1.bf16.msra.mxu0 %v14042_v5 }
 0x58d   : > { %3270 = vmatprep.subr.bf16.mxu0 %v14005_v24 }
 0x58f   : > { %10318 = vmatmul.mubr.msk.bf16.vlgmr.msra.gmra.mrb[112].mxu0 %vm3115_vm3, %v10316_v9  ;;  %v12215_v9 = vld [vmem:[%s15976_s8 + $0x130] sm:$0xff]  }
 0x590   : > { %3271 = vmatpush1.bf16.msra.mxu0 %v14003_v22  ;;  %3302 = vmatprep.mubr.bf16.mxu0 %v13042_v0 }
 0x591   : > { %3272 = vmatprep.subr.bf16.mxu0 %v14011_v43 }
 0x594   : > { %3273 = vmatpush1.bf16.msra.mxu0 %v14009_v41 }
 0x595   : > { %3274 = vmatprep.subr.bf16.mxu0 %v14026_v50 }
 0x598   : > { %3275 = vmatpush1.bf16.msra.mxu0 %v14024_v32 }
 0x599   : > { %10320 = vmatprep.subr.msk.bf16.mxu0 %vm3119_vm2, %v14039_v4 }
 0x59c   : > { %3277 = vmatpush1.bf16.msra.mxu0 %v14042_v5 }
 0x59d   : > { %3318 = vmatprep.subr.bf16.mxu0 %v14005_v24 }
 0x59f   : > { %10321 = vmatmul.mubr.msk.bf16.vlgmr.msra.gmra.mrb[116].mxu0 %vm3115_vm3, %v10319_v11  ;;  %v12216_v11 = vld [vmem:[%s15976_s8 + $0x190] sm:$0xff]  }
 0x5a0   : > { %3319 = vmatpush1.bf16.msra.mxu0 %v14003_v22  ;;  %3350 = vmatprep.mubr.bf16.mxu0 %v13042_v0 }
 0x5a1   : > { %3320 = vmatprep.subr.bf16.mxu0 %v14011_v43 }
 0x5a4   : > { %3321 = vmatpush1.bf16.msra.mxu0 %v14009_v41 }
 0x5a5   : > { %3322 = vmatprep.subr.bf16.mxu0 %v14026_v50 }
 0x5a8   : > { %3323 = vmatpush1.bf16.msra.mxu0 %v14024_v32 }
 0x5a9   : > { %10323 = vmatprep.subr.msk.bf16.mxu0 %vm3119_vm2, %v14039_v4 }
 0x5ac   : > { %3325 = vmatpush1.bf16.msra.mxu0 %v14042_v5 }
 0x5ad   : > { %3366 = vmatprep.subr.bf16.mxu0 %v14005_v24 }
 0x5af   : > { %10324 = vmatmul.mubr.msk.bf16.vlgmr.msra.gmra.mrb[120].mxu0 %vm3115_vm3, %v10322_v12  ;;  %v12217_v12 = vld [vmem:[%s15976_s8 + $0x178] sm:$0xff]  }
 0x5b0   : > { %3367 = vmatpush1.bf16.msra.mxu0 %v14003_v22  ;;  %3398 = vmatprep.mubr.bf16.mxu0 %v13042_v0 }
 0x5b1   : > { %3368 = vmatprep.subr.bf16.mxu0 %v14011_v43 }
 0x5b4   : > { %3369 = vmatpush1.bf16.msra.mxu0 %v14009_v41 }
 0x5b5   : > { %3370 = vmatprep.subr.bf16.mxu0 %v14026_v50 }
 0x5b8   : > { %3371 = vmatpush1.bf16.msra.mxu0 %v14024_v32 }
 0x5b9   : > { %10326 = vmatprep.subr.msk.bf16.mxu0 %vm3119_vm2, %v14039_v4 }
 0x5bc   : > { %3373 = vmatpush1.bf16.msra.mxu0 %v14042_v5 }
 0x5bd   : > { %3414 = vmatprep.subr.bf16.mxu0 %v14005_v24  ;;  %v12197_v24 = vld [vmem:[%s15976_s8 + $0xf0] sm:$0xff]  }
 0x5be   : > { %10992 = vmatprep.subr.bf16.mxu1 %v12197_v24  ;;  %v12223_v24 = vld [vmem:[%s15976_s8 + $0x1a0] sm:$0xff]  }
 0x5bf   : > { %10327 = vmatmul.mubr.msk.bf16.vlgmr.msra.gmra.mrb[124].mxu0 %vm3115_vm3, %v10325_v13  ;;  %10993 = vmatpush3.bf16.msra.mxu1 %v12199_v29  ;;  %v12218_v13 = vld [vmem:[%s15976_s8 + $0x1d8] sm:$0xff]  }
 0x5c0   : > { %3415 = vmatpush1.bf16.msra.mxu0 %v14003_v22  ;;  %3446 = vmatprep.mubr.bf16.mxu0 %v13042_v0  ;;  %v12166_v22 = vld [vmem:[%s15976_s8] sm:$0xff]  }
 0x5c1   : > { %3416 = vmatprep.subr.bf16.mxu0 %v14011_v43  ;;  %10994 = vmatprep.subr.bf16.mxu1 %v12201_v33  ;;  %v12179_v43 = vld [vmem:[%s15976_s8 + $0x28] sm:$0xff]  }
 0x5c2   : > { %v12227_v33 = vld [vmem:[%s15976_s8 + $0x1a8] sm:$0xff]  }
 0x5c3   : > { %10995 = vmatpush3.bf16.msra.mxu1 %v12203_v27  ;;  %v12228_v27 = vld [vmem:[%s15976_s8 + $0x208] sm:$0xff]  }
 0x5c4   : > { %3417 = vmatpush1.bf16.msra.mxu0 %v14009_v41  ;;  %11024 = vmatprep.subr.bf16.mxu1 %v12206_v36  ;;  %v12177_v41 = vld [vmem:[%s15976_s8 + $0x68] sm:$0xff]   ;;  %v12231_v36 = vld [vmem:[%s15976_s8 + $0x1b0] sm:$0xff]  }
 0x5c5   : > { %3418 = vmatprep.subr.bf16.mxu0 %v14026_v50  ;;  %v12202_v50 = vld [vmem:[%s15976_s8 + $0x158] sm:$0xff]  }
 0x5c8   : > { %3419 = vmatpush1.bf16.msra.mxu0 %v14024_v32  ;;  %v12200_v32 = vld [vmem:[%s15976_s8 + $0x110] sm:$0xff]  }
 0x5c9   : > { %10329 = vmatprep.subr.msk.bf16.mxu0 %vm3119_vm2, %v14039_v4  ;;  %v12211_v4 = vld [vmem:[%s15976_s8 + $0x128] sm:$0xff]  }
 0x5cc   : > { %3421 = vmatpush1.bf16.msra.mxu0 %v14042_v5  ;;  %v12212_v5 = vld [vmem:[%s15976_s8 + $0x188] sm:$0xff]  }
 0x5cd   : > { %10958 = vmatprep.subr.bf16.mxu0 %v12165_v19 }
 0x5cf   : > { %10330 = vmatmul.mubr.msk.bf16.vlgmr.msra.gmra.mrb[128].mxu0 %vm3115_vm3, %v10328_v21 }
 0x5d0   : > { %10959 = vmatpush3.bf16.msra.mxu0 %v12166_v22 }
 0x5d1   : > { %10960 = vmatprep.subr.bf16.mxu0 %v12167_v28  ;;  %v12224_v28 = vld [vmem:[%s15976_s8 + $0x200] sm:$0xff]  }
 0x5d4   : > { %10961 = vmatpush3.bf16.msra.mxu0 %v12168_v31  ;;  %v12225_v31 = vld [vmem:[%s15976_s8 + $0x1e8] sm:$0xff]  }
 0x5d5   : > { %10962 = vmatprep.subr.bf16.mxu0 %v12169_v26  ;;  %v12226_v26 = vld [vmem:[%s15976_s8 + $0x248] sm:$0xff]  }
 0x5d8   : > { %10963 = vmatpush3.bf16.msra.mxu0 %v12170_v34  ;;  %v12229_v34 = vld [vmem:[%s15976_s8 + $0x1f0] sm:$0xff]  }
 0x5d9   : > { %10964 = vmatprep.subr.bf16.mxu0 %v12171_v35  ;;  %v12230_v35 = vld [vmem:[%s15976_s8 + $0x250] sm:$0xff]  }
 0x5dc   : > { %10965 = vmatpush3.bf16.msra.mxu0 %v12172_v37  ;;  %v12232_v37 = vld [vmem:[%s15976_s8 + $0x210] sm:$0xff]  }
 0x5dd   : > { %10966 = vmatprep.subr.bf16.mxu0 %v12173_v38  ;;  %v12233_v38 = vld [vmem:[%s15976_s8 + $0x1f8] sm:$0xff]  }
 0x5e0   : > { %10967 = vmatpush3.bf16.msra.mxu0 %v12175_v39  ;;  %v12234_v39 = vld [vmem:[%s15976_s8 + $0x258] sm:$0xff]  }
 0x5e1   : > { %10968 = vmatprep.subr.bf16.mxu0 %v12177_v41  ;;  %v12235_v41 = vld [vmem:[%s15976_s8 + $0x1b8] sm:$0xff]  }
 0x5e4   : > { %10969 = vmatpush3.bf16.msra.mxu0 %v12179_v43  ;;  %v12236_v43 = vld [vmem:[%s15976_s8 + $0x218] sm:$0xff]  }
 0x5e5   : > { %10970 = vmatprep.subr.bf16.mxu0 %v12181_v44  ;;  %v12237_v44 = vld [vmem:[%s15976_s8 + $0x260] sm:$0xff]  }
 0x5e8   : > { %10971 = vmatpush3.bf16.msra.mxu0 %v12183_v45  ;;  %v12238_v45 = vld [vmem:[%s15976_s8 + $0x2c0] sm:$0xff]  }
 0x5e9   : > { %10972 = vmatprep.subr.bf16.mxu0 %v12185_v46 }
 0x5ec   : > { %10973 = vmatpush3.bf16.msra.mxu0 %v12187_v47 }
 0x5ed   : > { %11002 = vmatprep.subr.bf16.mxu0 %v12190_v48 }
 0x642   : > { %v3160_v49 = vpop.f32.mrb[104].mxu0 }
 0x643   : > { %v3167_v51 = vpack.c.bf16 %v3160_v49, %v3160_v49  ;;  %v3162_v53 = vpop.f32.mrb[105].mxu0 }
 0x644   : > { %v3168_v42 = vpack.c.bf16 %v3162_v53, %v3162_v53  ;;  %v3164_v40 = vpop.f32.mrb[106].mxu0  ;;  %v12239_v53 = vld [vmem:[%s15976_s8 + $0x220] sm:$0xff]  }
 0x645   : > { %v3165_v56 = vpop.f32.mrb[107].mxu0 }
 0x646   : > { %4392 = vmatprep.mubr.bf16.mxu0 %v3168_v42  ;;  %v12240_v42 = vld [vmem:[%s15976_s8 + $0x280] sm:$0xff]   ;;  %v12242_v56 = vld [vmem:[%s15976_s8 + $0x2c8] sm:$0xff]  }
 0x647   : > { %4393 = vmatmul.mubr.bf16.vlgmr.msra.gmra.mrb[132].mxu0 %v3167_v51 }
 0x648   : > { %11003 = vmatpush3.bf16.msra.mxu0 %v12192_v54  ;;  %v12241_v54 = vld [vmem:[%s15976_s8 + $0x268] sm:$0xff]  }
 0x649   : > { %11004 = vmatprep.subr.bf16.mxu0 %v12194_v7  ;;  %v12243_v7 = vld [vmem:[%s15976_s8 + $0x228] sm:$0xff]  }
 0x64c   : > { %11005 = vmatpush3.bf16.msra.mxu0 %v12196_v10  ;;  %v12244_v10 = vld [vmem:[%s15976_s8 + $0x288] sm:$0xff]  }
 0x64d   : > { %11006 = vmatprep.subr.bf16.mxu0 %v12198_v30  ;;  %v12245_v30 = vld [vmem:[%s15976_s8 + $0x270] sm:$0xff]  }
 0x650   : > { %11007 = vmatpush3.bf16.msra.mxu0 %v12200_v32  ;;  %v12246_v32 = vld [vmem:[%s15976_s8 + $0x2d0] sm:$0xff]  }
 0x651   : > { %11008 = vmatprep.subr.bf16.mxu0 %v12202_v50  ;;  %v12247_v50 = vld [vmem:[%s15976_s8 + $0x230] sm:$0xff]  }
 0x652   : > { %v3208_v57 = vpop.f32.mrb[108].mxu0 }
 0x653   : > { %v3215_v58 = vpack.c.bf16 %v3208_v57, %v3208_v57  ;;  %v3210_v59 = vpop.f32.mrb[109].mxu0  ;;  %v12250_v57 = vld [vmem:[%s15976_s8 + $0x2d8] sm:$0xff]  }
 0x654   : > { %v3216_v60 = vpack.c.bf16 %v3210_v59, %v3210_v59  ;;  %v3212_v61 = vpop.f32.mrb[110].mxu0  ;;  %11009 = vmatpush3.bf16.msra.mxu0 %v12204_v52  ;;  %v12248_v52 = vld [vmem:[%s15976_s8 + $0x290] sm:$0xff]   ;;  %v12252_v59 = vld [vmem:[%s15976_s8 + $0x298] sm:$0xff]  }
 0x655   : > { %v3213_v1 = vpop.f32.mrb[111].mxu0  ;;  %11010 = vmatprep.subr.bf16.mxu0 %v12205_v55  ;;  %v12249_v55 = vld [vmem:[%s15976_s8 + $0x278] sm:$0xff]   ;;  %v12254_v61 = vld [vmem:[%s15976_s8 + $0x340] sm:$0xff]  }
 0x656   : > { %4432 = vmatprep.mubr.bf16.mxu1 %v3216_v60  ;;  %v12253_v60 = vld [vmem:[%s15976_s8 + $0x2e0] sm:$0xff]  }
 0x657   : > { %4433 = vmatmul.mubr.bf16.vlgmr.msra.gmra.mrb[72].mxu1 %v3215_v58  ;;  %v12251_v58 = vld [vmem:[%s15976_s8 + $0x238] sm:$0xff]  }
 0x658   : > { %11011 = vmatpush3.bf16.msra.mxu0 %v12207_v62  ;;  %11025 = vmatpush3.bf16.msra.mxu1 %v12208_v63 }
 0x659   : > { %11012 = vmatprep.subr.bf16.mxu0 %v12209_v2  ;;  %11026 = vmatprep.subr.bf16.mxu1 %v12210_v3 }
 0x65c   : > { %11013 = vmatpush3.bf16.msra.mxu0 %v12211_v4  ;;  %11027 = vmatpush3.bf16.msra.mxu1 %v12212_v5  ;;  %v12255_v4 = vld [vmem:[%s15976_s8 + $0x2a0] sm:$0xff]  }
 0x65d   : > { %11014 = vmatprep.subr.bf16.mxu0 %v12213_v6  ;;  %11028 = vmatprep.subr.bf16.mxu1 %v12214_v8  ;;  %v12256_v5 = vld [vmem:[%s15976_s8 + $0x300] sm:$0xff]   ;;  %v12257_v8 = vld [vmem:[%s15976_s8 + $0x2e8] sm:$0xff]  }
 0x660   : > { %11015 = vmatpush3.bf16.msra.mxu0 %v12215_v9  ;;  %11029 = vmatpush3.bf16.msra.mxu1 %v12216_v11  ;;  %v12258_v9 = vld [vmem:[%s15976_s8 + $0x348] sm:$0xff]  }
 0x661   : > { %11016 = vmatprep.subr.bf16.mxu0 %v12217_v12  ;;  %11030 = vmatprep.subr.bf16.mxu1 %v12218_v13  ;;  %v12259_v11 = vld [vmem:[%s15976_s8 + $0x2a8] sm:$0xff]   ;;  %v12261_v13 = vld [vmem:[%s15976_s8 + $0x2f0] sm:$0xff]  }
 0x662   : > { %v3256_v18 = vpop.f32.mrb[112].mxu0  ;;  %v12260_v12 = vld [vmem:[%s15976_s8 + $0x308] sm:$0xff]  }
 0x663   : > { %v3263_v19 = vpack.c.bf16 %v3256_v18, %v3256_v18  ;;  %v3258_v20 = vpop.f32.mrb[113].mxu0  ;;  %v12266_v18 = vld [vmem:[%s15976_s8 + $0x358] sm:$0xff]  }
 0x664   : > { %v3264_v21 = vpack.c.bf16 %v3258_v20, %v3258_v20  ;;  %v3260_v22 = vpop.f32.mrb[114].mxu0  ;;  %11017 = vmatpush3.bf16.msra.mxu0 %v12219_v14  ;;  %11031 = vmatpush3.bf16.msra.mxu1 %v12220_v15  ;;  %v12262_v14 = vld [vmem:[%s15976_s8 + $0x350] sm:$0xff]   ;;  %v12268_v20 = vld [vmem:[%s15976_s8 + $0x318] sm:$0xff]  }
 0x665   : > { %v3261_v29 = vpop.f32.mrb[115].mxu0  ;;  %11032 = vmatprep.subr.bf16.mxu1 %v12221_v16  ;;  %11046 = vmatprep.subr.bf16.mxu0 %v12222_v17  ;;  %v12263_v15 = vld [vmem:[%s15976_s8 + $0x2b0] sm:$0xff]   ;;  %v12265_v17 = vld [vmem:[%s15976_s8 + $0x2f8] sm:$0xff]  }
 0x666   : > { %4472 = vmatprep.mubr.bf16.mxu0 %v3264_v21  ;;  %v12264_v16 = vld [vmem:[%s15976_s8 + $0x310] sm:$0xff]   ;;  %v12269_v21 = vld [vmem:[%s15976_s8 + $0x360] sm:$0xff]  }
 0x667   : > { %4473 = vmatmul.mubr.bf16.vlgmr.msra.gmra.mrb[136].mxu0 %v3263_v19  ;;  %v12267_v19 = vld [vmem:[%s15976_s8 + $0x2b8] sm:$0xff]  }
 0x668   : > { %11033 = vmatpush3.bf16.msra.mxu1 %v12223_v24  ;;  %11047 = vmatpush3.bf16.msra.mxu0 %v12224_v28 }
 0x669   : > { %11034 = vmatprep.subr.bf16.mxu1 %v12225_v31  ;;  %11048 = vmatprep.subr.bf16.mxu0 %v12226_v26  ;;  %v12270_v26 = vld [vmem:[%s15976_s8 + $0x320] sm:$0xff]  }
 0x66c   : > { %11035 = vmatpush3.bf16.msra.mxu1 %v12227_v33  ;;  %11049 = vmatpush3.bf16.msra.mxu0 %v12228_v27  ;;  %v12271_v27 = vld [vmem:[%s15976_s8 + $0x368] sm:$0xff]  }
 0x66d   : > { %11036 = vmatprep.subr.bf16.mxu1 %v12229_v34  ;;  %11050 = vmatprep.subr.bf16.mxu0 %v12230_v35  ;;  %v12272_v34 = vld [vmem:[%s15976_s8 + $0x328] sm:$0xff]   ;;  %v12273_v35 = vld [vmem:[%s15976_s8 + $0x370] sm:$0xff]  }
 0x670   : > { %11037 = vmatpush3.bf16.msra.mxu1 %v12231_v36  ;;  %11051 = vmatpush3.bf16.msra.mxu0 %v12232_v37  ;;  %v12274_v36 = vld [vmem:[%s15976_s8 + $0x330] sm:$0xff]   ;;  %v12275_v37 = vld [vmem:[%s15976_s8 + $0x378] sm:$0xff]  }
 0x671   : > { %11038 = vmatprep.subr.bf16.mxu1 %v12233_v38  ;;  %11052 = vmatprep.subr.bf16.mxu0 %v12234_v39  ;;  %v12276_v38 = vld [vmem:[%s15976_s8 + $0x338] sm:$0xff]  }
 0x672   : > { %v3304_v46 = vpop.f32.mrb[116].mxu0 }
 0x673   : > { %v3311_v47 = vpack.c.bf16 %v3304_v46, %v3304_v46  ;;  %v3306_v48 = vpop.f32.mrb[117].mxu0 }
 0x674   : > { %v3312_v49 = vpack.c.bf16 %v3306_v48, %v3306_v48  ;;  %v3308_v51 = vpop.f32.mrb[118].mxu0  ;;  %11039 = vmatpush3.bf16.msra.mxu1 %v12235_v41  ;;  %11053 = vmatpush3.bf16.msra.mxu0 %v12236_v43  ;;  %v12278_v48 = vld [vmem:[%s15978_s10 + $0x38] sm:$0xff]  }
 0x675   : > { %v3309_v40 = vpop.f32.mrb[119].mxu0  ;;  %11054 = vmatprep.subr.bf16.mxu0 %v12237_v44  ;;  %11068 = vmatprep.subr.bf16.mxu1 %v12238_v45 }
 0x676   : > { %4512 = vmatprep.mubr.bf16.mxu1 %v3312_v49 }
 0x677   : > { %4513 = vmatmul.mubr.bf16.vlgmr.msra.gmra.mrb[76].mxu1 %v3311_v47  ;;  %v12277_v47 = vld [vmem:[%s15978_s10] sm:$0xff]  }
 0x678   : > { %11055 = vmatpush3.bf16.msra.mxu0 %v12239_v53  ;;  %11069 = vmatpush3.bf16.msra.mxu1 %v12240_v42 }
 0x679   : > { %11056 = vmatprep.subr.bf16.mxu0 %v12241_v54  ;;  %11070 = vmatprep.subr.bf16.mxu1 %v12242_v56  ;;  %v10331_v54 = vld [vmem:[%s15977_s9] ss:$0 sm:$0xff] }
 0x67c   : > { %11057 = vmatpush3.bf16.msra.mxu0 %v12243_v7  ;;  %11071 = vmatpush3.bf16.msra.mxu1 %v12244_v10 }
 0x67d   : > { %11058 = vmatprep.subr.bf16.mxu0 %v12245_v30  ;;  %11072 = vmatprep.subr.bf16.mxu1 %v12246_v32 }
 0x680   : > { %11059 = vmatpush3.bf16.msra.mxu0 %v12247_v50  ;;  %11073 = vmatpush3.bf16.msra.mxu1 %v12248_v52 }
 0x681   : > { %11060 = vmatprep.subr.bf16.mxu0 %v12249_v55  ;;  %11074 = vmatprep.subr.bf16.mxu1 %v12250_v57 }
 0x682   : > { %v3352_v62 = vpop.f32.mrb[120].mxu0 }
 0x683   : > { %v3359_v63 = vpack.c.bf16 %v3352_v62, %v3352_v62  ;;  %v3354_v1 = vpop.f32.mrb[121].mxu0 }
 0x684   : > { %v3360_v2 = vpack.c.bf16 %v3354_v1, %v3354_v1  ;;  %v3356_v3 = vpop.f32.mrb[122].mxu0  ;;  %11061 = vmatpush3.bf16.msra.mxu0 %v12251_v58  ;;  %11075 = vmatpush3.bf16.msra.mxu1 %v12252_v59 }
 0x685   : > { %v3357_v6 = vpop.f32.mrb[123].mxu0  ;;  %11076 = vmatprep.subr.bf16.mxu1 %v12253_v60  ;;  %11090 = vmatprep.subr.bf16.mxu0 %v12254_v61 }
 0x686   : > { %4552 = vmatprep.mubr.bf16.mxu0 %v3360_v2 }
 0x687   : > { %4553 = vmatmul.mubr.bf16.vlgmr.msra.gmra.mrb[140].mxu0 %v3359_v63 }
 0x688   : > { %11077 = vmatpush3.bf16.msra.mxu1 %v12255_v4  ;;  %11091 = vmatpush3.bf16.msra.mxu0 %v12256_v5 }
 0x689   : > { %11078 = vmatprep.subr.bf16.mxu1 %v12257_v8  ;;  %11092 = vmatprep.subr.bf16.mxu0 %v12258_v9 }
 0x68c   : > { %11079 = vmatpush3.bf16.msra.mxu1 %v12259_v11  ;;  %11093 = vmatpush3.bf16.msra.mxu0 %v12260_v12 }
 0x68d   : > { %11080 = vmatprep.subr.bf16.mxu1 %v12261_v13  ;;  %11094 = vmatprep.subr.bf16.mxu0 %v12262_v14 }
 0x690   : > { %11081 = vmatpush3.bf16.msra.mxu1 %v12263_v15  ;;  %11095 = vmatpush3.bf16.msra.mxu0 %v12264_v16 }
 0x691   : > { %11082 = vmatprep.subr.bf16.mxu1 %v12265_v17  ;;  %11096 = vmatprep.subr.bf16.mxu0 %v12266_v18 }
 0x692   : > { %v3400_v22 = vpop.f32.mrb[124].mxu0 }
 0x693   : > { %v3407_v24 = vpack.c.bf16 %v3400_v22, %v3400_v22  ;;  %v3402_v28 = vpop.f32.mrb[125].mxu0 }
 0x694   : > { %v3408_v29 = vpack.c.bf16 %v3402_v28, %v3402_v28  ;;  %v3404_v31 = vpop.f32.mrb[126].mxu0  ;;  %11083 = vmatpush3.bf16.msra.mxu1 %v12267_v19  ;;  %11097 = vmatpush3.bf16.msra.mxu0 %v12268_v20 }
 0x695   : > { %v3405_v33 = vpop.f32.mrb[127].mxu0  ;;  %11098 = vmatprep.subr.bf16.mxu0 %v12269_v21 }
 0x696   : > { %4592 = vmatprep.mubr.bf16.mxu1 %v3408_v29  ;;  %v12280_v33 = vld [vmem:[%s15978_s10 + $0x40] sm:$0xff]  }
 0x697   : > { %4593 = vmatmul.mubr.bf16.vlgmr.msra.gmra.mrb[80].mxu1 %v3407_v24 }
 0x698   : > { %11099 = vmatpush3.bf16.msra.mxu0 %v12270_v26  ;;  %11449 = vmatprep.mubr.msk.bf16.mxu1 %vm4666_vm4, %v12277_v47  ;;  %v12279_v26 = vld [vmem:[%s15978_s10 + $0x8] sm:$0xff]   ;;  %v12291_v47 = vld [vmem:[%s15978_s10 + $0x54] sm:$0xff]  }
 0x699   : > { %11100 = vmatprep.subr.bf16.mxu0 %v12271_v27  ;;  %v12281_v27 = vld [vmem:[%s15978_s10 + $0x10] sm:$0xff]  }
 0x69c   : > { %11101 = vmatpush3.bf16.msra.mxu0 %v12272_v34  ;;  %v12282_v34 = vld [vmem:[%s15978_s10 + $0x48] sm:$0xff]  }
 0x69d   : > { %11102 = vmatprep.subr.bf16.mxu0 %v12273_v35  ;;  %v12283_v35 = vld [vmem:[%s15978_s10 + $0x18] ss:$0 sps:$4 sm:$0xff]  }
 0x6a0   : > { %11103 = vmatpush3.bf16.msra.mxu0 %v12274_v36  ;;  %v12284_v36 = vld [vmem:[%s15978_s10 + $0x50] ss:$0 sps:$4 sm:$0xff]  }
 0x6a1   : > { %11104 = vmatprep.subr.bf16.mxu0 %v12275_v37  ;;  %v12285_v37 = vld [vmem:[%s15978_s10 + $0x1c] sm:$0xff]  }
 0x6a2   : > { %v3448_v39 = vpop.f32.mrb[128].mxu0 }
 0x6a3   : > { %v3450_v41 = vpop.f32.mrb[129].mxu0  ;;  %v3455_v45 = vpack.c.bf16 %v3448_v39, %v3448_v39  ;;  %v12287_v39 = vld [vmem:[%s15978_s10 + $0x24] sm:$0xff]  }
 0x6a4   : > { %v3456_v43 = vpack.c.bf16 %v3450_v41, %v3450_v41  ;;  %v3452_v44 = vpop.f32.mrb[130].mxu0  ;;  %11105 = vmatpush3.bf16.msra.mxu0 %v12276_v38  ;;  %v12286_v38 = vld [vmem:[%s15978_s10 + $0x70] sm:$0xff]   ;;  %v12288_v41 = vld [vmem:[%s15978_s10 + $0x78] sm:$0xff]  }
 0x6a5   : > { %v3453_v46 = vpop.f32.mrb[131].mxu0  ;;  %v12298_v44 = vld [vmem:[%s15978_s10 + $0x80] sm:$0xff]  }
 0x6a6   : > { %4632 = vmatprep.mubr.bf16.mxu0 %v3456_v43  ;;  %v12289_v43 = vld [vmem:[%s15978_s10 + $0x2c] sm:$0xff]   ;;  %v12300_v46 = vld [vmem:[%s15978_s10 + $0x88] ss:$0 sps:$4 sm:$0xff]  }
 0x6a7   : > { %4633 = vmatmul.mubr.bf16.vlgmr.msra.gmra.mrb[144].mxu0 %v3455_v45  ;;  %v12290_v45 = vld [vmem:[%s15978_s10 + $0x34] ss:$0 sps:$4 sm:$0xff]  }
 0x6a8   : > { %11469 = vmatprep.mubr.msk.bf16.mxu0 %vm4666_vm4, %v12278_v48  ;;  %v12304_v48 = vld [vmem:[%s15978_s10 + $0xa8] sm:$0xff]  }
 0x71a   : > { %v10974_v49 = vpop.f32.mrb[132].mxu0 }
 0x71b   : > { %v10975_v51 = vpop.f32.mrb[133].mxu0 }
 0x71c   : > { %v10976_v53 = vadd.f32 %v10975_v51, %v10974_v49  ;;  %v10977_v42 = vpop.f32.mrb[134].mxu0  ;;  %v12292_v49 = vld [vmem:[%s15978_s10 + $0x5c] sm:$0xff]   ;;  %v12308_v51 = vld [vmem:[%s15978_s10 + $0xb0] sm:$0xff]  }
 0x71d   : > { %v10978_v40 = vpop.f32.mrb[135].mxu0  ;;  %v12303_v42 = vld [vmem:[%s16020_s15 + $0x4] ss:$8 sps:$4 sm:$0xff]  }
 0x71e   : > { %v4395_v10 = vadd.f32 %v10976_v53, %v10331_v54  ;;  %v12293_v53 = vld [vmem:[%s15978_s10 + $0x64] sm:$0xff]   ;;  %v12318_v40 = vld [vmem:[%s15978_s10 + $0xb8] sm:$0xff]   ;;  %v12294_v54 = vld [vmem:[%s15978_s10 + $0x6c] ss:$0 sps:$4 sm:$0xff]  }
 0x72a   : > { %v10996_v56 = vpop.f32.mrb[72].mxu1 }
 0x72b   : > { %v10997_v7 = vpop.f32.mrb[73].mxu1 }
 0x72c   : > { %v10998_v30 = vadd.f32 %v10997_v7, %v10996_v56  ;;  %v10999_v32 = vpop.f32.mrb[74].mxu1  ;;  %v12322_v56 = vld [vmem:[%s15978_s10 + $0xc0] ss:$0 sps:$4 sm:$0xff]   ;;  %v12295_v7 = vld [vmem:[%s15978_s10 + $0x8c] sm:$0xff]  }
 0x72d   : > { %v11000_v50 = vpop.f32.mrb[75].mxu1  ;;  %v12301_v32 = vld [vmem:[%s16020_s15] ss:$8 sps:$4 sm:$0xff]  }
 0x72e   : > { %v4435_v52 = vadd.f32 %v10998_v30, %v4395_v10  ;;  %v12296_v10 = vld [vmem:[%s15978_s10 + $0x94] sm:$0xff]   ;;  %v12297_v30 = vld [vmem:[%s15978_s10 + $0x9c] sm:$0xff]  }
 0x72f   : > { %v12307_v50 = vld [vmem:[%s16020_s15 + $0x14] ss:$8 sps:$4 sm:$0xff]  }
 0x73a   : > { %v11018_v55 = vpop.f32.mrb[136].mxu0 }
 0x73b   : > { %v11019_v57 = vpop.f32.mrb[137].mxu0 }
 0x73c   : > { %v11020_v58 = vadd.f32 %v11019_v57, %v11018_v55  ;;  %v11021_v59 = vpop.f32.mrb[138].mxu0  ;;  %v12311_v55 = vld [vmem:[%s16020_s15 + $0x24] ss:$8 sps:$4 sm:$0xff]  }
 0x73d   : > { %v11022_v60 = vpop.f32.mrb[139].mxu0  ;;  %v12299_v57 = vld [vmem:[%s15978_s10 + $0xa4] ss:$0 sps:$4 sm:$0xff]   ;;  %v12314_v59 = vld [vmem:[%s16020_s15 + $0x34] ss:$8 sps:$4 sm:$0xff]  }
 0x73e   : > { %v4475_v61 = vadd.f32 %v11020_v58, %v4435_v52  ;;  %v12305_v52 = vld [vmem:[%s16020_s15 + $0x10] ss:$8 sps:$4 sm:$0xff]   ;;  %v12309_v58 = vld [vmem:[%s16020_s15 + $0x20] ss:$8 sps:$4 sm:$0xff]  }
 0x73f   : > { %v12312_v60 = vld [vmem:[%s16020_s15 + $0x30] ss:$8 sps:$4 sm:$0xff]  }
 0x74a   : > { %v11040_v62 = vpop.f32.mrb[76].mxu1 }
 0x74b   : > { %v11041_v63 = vpop.f32.mrb[77].mxu1 }
 0x74c   : > { %v11042_v1 = vadd.f32 %v11041_v63, %v11040_v62  ;;  %v11043_v2 = vpop.f32.mrb[78].mxu1  ;;  %v12315_v62 = vld [vmem:[%s16020_s15 + $0x40] ss:$8 sps:$4 sm:$0xff]   ;;  %v12321_v63 = vld [vmem:[%s16020_s15 + $0x54] ss:$8 sps:$4 sm:$0xff]  }
 0x74d   : > { %v11044_v3 = vpop.f32.mrb[79].mxu1  ;;  %v12325_v2 = vld [vmem:[%s16020_s15 + $0x64] ss:$8 sps:$4 sm:$0xff]  }
 0x74e   : > { %v4515_v4 = vadd.f32 %v11042_v1, %v4475_v61  ;;  %v12317_v61 = vld [vmem:[%s16020_s15 + $0x44] ss:$8 sps:$4 sm:$0xff]   ;;  %v12319_v1 = vld [vmem:[%s16020_s15 + $0x50] ss:$8 sps:$4 sm:$0xff]   ;;  %v12323_v3 = vld [vmem:[%s16020_s15 + $0x60] ss:$8 sps:$4 sm:$0xff]  }
 0x75a   : > { %v11062_v5 = vpop.f32.mrb[140].mxu0 }
 0x75b   : > { %v11063_v6 = vpop.f32.mrb[141].mxu0 }
 0x75c   : > { %v11064_v8 = vadd.f32 %v11063_v6, %v11062_v5  ;;  %v11065_v9 = vpop.f32.mrb[142].mxu0  ;;  %v12326_v5 = vld [vmem:[%s16020_s15 + $0x70] ss:$8 sps:$4 sm:$0xff]   ;;  %v12331_v6 = vld [vmem:[%s16020_s15 + $0x84] ss:$8 sps:$4 sm:$0xff]  }
 0x75d   : > { %v11066_v11 = vpop.f32.mrb[143].mxu0  ;;  %v12334_v9 = vld [vmem:[%s16020_s15 + $0x94] ss:$8 sps:$4 sm:$0xff]  }
 0x75e   : > { %v4555_v12 = vadd.f32 %v11064_v8, %v4515_v4  ;;  %v12328_v4 = vld [vmem:[%s16020_s15 + $0x74] ss:$8 sps:$4 sm:$0xff]   ;;  %v12329_v8 = vld [vmem:[%s16020_s15 + $0x80] ss:$8 sps:$4 sm:$0xff]   ;;  %v12332_v11 = vld [vmem:[%s16020_s15 + $0x90] ss:$8 sps:$4 sm:$0xff]  }
 0x76a   : > { %v11084_v13 = vpop.f32.mrb[80].mxu1 }
 0x76b   : > { %v11085_v14 = vpop.f32.mrb[81].mxu1 }
 0x76c   : > { %v11086_v15 = vadd.f32 %v11085_v14, %v11084_v13  ;;  %v11087_v16 = vpop.f32.mrb[82].mxu1  ;;  %v12335_v13 = vld [vmem:[%s16020_s15 + $0xa0] ss:$8 sps:$4 sm:$0xff]   ;;  %v12340_v14 = vld [vmem:[%s16020_s15 + $0xb4] ss:$8 sps:$4 sm:$0xff]  }
 0x76d   : > { %v11088_v17 = vpop.f32.mrb[83].mxu1  ;;  %v12343_v16 = vld [vmem:[%s16020_s15 + $0xc4] ss:$8 sps:$4 sm:$0xff]  }
 0x76e   : > { %v4595_v18 = vadd.f32 %v11086_v15, %v4555_v12  ;;  %v12337_v12 = vld [vmem:[%s16020_s15 + $0xa4] ss:$8 sps:$4 sm:$0xff]   ;;  %v12338_v15 = vld [vmem:[%s16020_s15 + $0xb0] ss:$8 sps:$4 sm:$0xff]   ;;  %v12341_v17 = vld [vmem:[%s16020_s15 + $0xc0] ss:$8 sps:$4 sm:$0xff]  }
 0x77a   : > { %v11106_v19 = vpop.f32.mrb[144].mxu0 }
 0x77b   : > { %v11107_v20 = vpop.f32.mrb[145].mxu0 }
 0x77c   : > { %v11108_v21 = vadd.f32 %v11107_v20, %v11106_v19  ;;  %v11109_v22 = vpop.f32.mrb[146].mxu0  ;;  %v12344_v19 = vld [vmem:[%s16020_s15 + $0xd0] ss:$8 sps:$4 sm:$0xff]   ;;  %v12349_v20 = vld [vmem:[%s16020_s15 + $0xe4] ss:$8 sps:$4 sm:$0xff]  }
 0x77d   : > { %v11110_v24 = vpop.f32.mrb[147].mxu0  ;;  %v12352_v22 = vld [vmem:[%s16020_s15 + $0xf4] ss:$8 sps:$4 sm:$0xff]  }
 0x77e   : > { %v4635_v28 = vadd.f32 %v11108_v21, %v4595_v18  ;;  %v12346_v18 = vld [vmem:[%s16020_s15 + $0xd4] ss:$8 sps:$4 sm:$0xff]   ;;  %v12347_v21 = vld [vmem:[%s16020_s15 + $0xe0] ss:$8 sps:$4 sm:$0xff]   ;;  %v12350_v24 = vld [vmem:[%s16020_s15 + $0xf0] ss:$8 sps:$4 sm:$0xff]  }
 0x780   : > { %v4640_v29 = vpack.c.bf16 %v4635_v28, %v4635_v28  ;;  %v12355_v28 = vld [vmem:[%s16020_s15 + $0x104] ss:$8 sps:$4 sm:$0xff]  }
 0x782   : > { %11779 = vmatprep.subr.msk.bf16.mxu1 %vm3119_vm2, %v4640_v29  ;;  %11781 = vmatprep.subr.msk.bf16.mxu0 %vm3119_vm2, %v4640_v29  ;;  %v4680_v31 = vsel %vm3119_vm2, %v4640_v29, 0 }
 0x783   : > { %11448 = vmatpush3.bf16.msra.mxu1 %v4680_v31  ;;  %11468 = vmatpush3.bf16.msra.mxu0 %v4680_v31 }
 0x784   : > { %11780 = vmatprep.subr.msk.bf16.mxu1 %vm3119_vm2, %v4640_v29  ;;  %11783 = vmatprep.subr.msk.bf16.mxu0 %vm3119_vm2, %v4640_v29 }
 0x786   : > { %11450 = vmatmul.mubr.msk.bf16.vlgmr.msra.gmra.mrb[84].mxu1 %vm4666_vm4, %v12279_v26  ;;  %11470 = vmatmul.mubr.msk.bf16.vlgmr.msra.gmra.mrb[148].mxu0 %vm4666_vm4, %v12280_v33 }
 0x787   : > { %11458 = vmatpush3.bf16.msra.mxu1 %v4680_v31  ;;  %11488 = vmatpush3.bf16.msra.mxu0 %v4680_v31 }
 0x788   : > { %11782 = vmatprep.subr.msk.bf16.mxu1 %vm3119_vm2, %v4640_v29  ;;  %11785 = vmatprep.subr.msk.bf16.mxu0 %vm3119_vm2, %v4640_v29 }
 0x789   : > { %11453 = vmatprep.mubr.msk.bf16.mxu1 %vm4666_vm4, %v12281_v27  ;;  %11473 = vmatprep.mubr.msk.bf16.mxu0 %vm4666_vm4, %v12282_v34 }
 0x78e   : > { %11454 = vmatmul.mubr.msk.bf16.gmra.mrb[88].mxu1 %vm4666_vm4, %v12283_v35  ;;  %11474 = vmatmul.mubr.msk.bf16.gmra.mrb[152].mxu0 %vm4666_vm4, %v12284_v36 }
 0x78f   : > { %11459 = vmatprep.mubr.msk.bf16.mxu1 %vm4666_vm4, %v12285_v37  ;;  %11489 = vmatprep.mubr.msk.bf16.mxu0 %vm4666_vm4, %v12286_v38 }
 0x796   : > { %11460 = vmatmul.mubr.msk.bf16.vlgmr.msra.gmra.mrb[92].mxu1 %vm4666_vm4, %v12287_v39  ;;  %11490 = vmatmul.mubr.msk.bf16.vlgmr.msra.gmra.mrb[156].mxu0 %vm4666_vm4, %v12288_v41 }
 0x797   : > { %11478 = vmatpush3.bf16.msra.mxu1 %v4680_v31  ;;  %11508 = vmatpush3.bf16.msra.mxu0 %v4680_v31 }
 0x798   : > { %11784 = vmatprep.subr.msk.bf16.mxu1 %vm3119_vm2, %v4640_v29  ;;  %11463 = vmatprep.mubr.msk.bf16.mxu1 %vm4666_vm4, %v12289_v43 }
 0x799   : > { %11493 = vmatprep.mubr.msk.bf16.mxu0 %vm4666_vm4, %v12298_v44 }
 0x79e   : > { %11464 = vmatmul.mubr.msk.bf16.gmra.mrb[96].mxu1 %vm4666_vm4, %v12290_v45  ;;  %11494 = vmatmul.mubr.msk.bf16.gmra.mrb[160].mxu0 %vm4666_vm4, %v12300_v46 }
 0x79f   : > { %11479 = vmatprep.mubr.msk.bf16.mxu1 %vm4666_vm4, %v12291_v47  ;;  %11509 = vmatprep.mubr.msk.bf16.mxu0 %vm4666_vm4, %v12304_v48 }
 0x7a6   : > { %11480 = vmatmul.mubr.msk.bf16.vlgmr.msra.gmra.mrb[100].mxu1 %vm4666_vm4, %v12292_v49  ;;  %11510 = vmatmul.mubr.msk.bf16.vlgmr.msra.gmra.mrb[164].mxu0 %vm4666_vm4, %v12308_v51 }
 0x7a7   : > { %11498 = vmatpush3.bf16.msra.mxu1 %v4680_v31  ;;  %11483 = vmatprep.mubr.msk.bf16.mxu1 %vm4666_vm4, %v12293_v53 }
 0x7a8   : > { %6070 = vmatprep.subr.bf16.mxu1 %v12303_v42  ;;  %11513 = vmatprep.mubr.msk.bf16.mxu0 %vm4666_vm4, %v12318_v40 }
 0x7ae   : > { %11484 = vmatmul.mubr.msk.bf16.gmra.mrb[104].mxu1 %vm4666_vm4, %v12294_v54  ;;  %11514 = vmatmul.mubr.msk.bf16.gmra.mrb[168].mxu0 %vm4666_vm4, %v12322_v56 }
 0x7af   : > { %11499 = vmatprep.mubr.msk.bf16.mxu1 %vm4666_vm4, %v12295_v7  ;;  %6484 = vmatprep.mubr.bf16.mxu0 %v13042_v0 }
 0x7b6   : > { %11500 = vmatmul.mubr.msk.bf16.vlgmr.msra.gmra.mrb[108].mxu1 %vm4666_vm4, %v12296_v10 }
 0x7b7   : > { %11503 = vmatprep.mubr.msk.bf16.mxu1 %vm4666_vm4, %v12297_v30  ;;  %6071 = vmatpush1.bf16.msra.mxu1 %v12301_v32 }
 0x7b8   : > { %6072 = vmatprep.subr.bf16.mxu1 %v12307_v50 }
 0x7bb   : > { %6073 = vmatpush1.bf16.msra.mxu1 %v12305_v52 }
 0x7bc   : > { %6074 = vmatprep.subr.bf16.mxu1 %v12311_v55 }
 0x7be   : > { %11504 = vmatmul.mubr.msk.bf16.gmra.mrb[112].mxu1 %vm4666_vm4, %v12299_v57 }
 0x7bf   : > { %6075 = vmatpush1.bf16.msra.mxu1 %v12309_v58  ;;  %v12353_v58 = vld [vmem:[%s16020_s15 + $0x100] ss:$8 sps:$4 sm:$0xff]  }
 0x7c0   : > { %6076 = vmatprep.subr.bf16.mxu1 %v12314_v59 }
 0x7c3   : > { %6077 = vmatpush1.bf16.msra.mxu1 %v12312_v60  ;;  %v12358_v60 = vld [vmem:[%s16020_s15 + $0x114] ss:$8 sps:$4 sm:$0xff]  }
 0x7c4   : > { %6078 = vmatprep.subr.bf16.mxu1 %v12317_v61  ;;  %v12356_v61 = vld [vmem:[%s16020_s15 + $0x110] ss:$8 sps:$4 sm:$0xff]  }
 0x7c7   : > { %6079 = vmatpush1.bf16.msra.mxu1 %v12315_v62 }
 0x7c8   : > { %6080 = vmatprep.subr.bf16.mxu1 %v12321_v63  ;;  %v12361_v63 = vld [vmem:[%s16020_s15 + $0x124] ss:$8 sps:$4 sm:$0xff]  }
 0x7cb   : > { %6081 = vmatpush1.bf16.msra.mxu1 %v12319_v1 }
 0x7cc   : > { %6082 = vmatprep.subr.bf16.mxu1 %v12325_v2 }
 0x7cf   : > { %6083 = vmatpush1.bf16.msra.mxu1 %v12323_v3 }
 0x7d0   : > { %6084 = vmatprep.subr.bf16.mxu1 %v12328_v4  ;;  %v12359_v4 = vld [vmem:[%s16020_s15 + $0x120] ss:$8 sps:$4 sm:$0xff]  }
 0x7d3   : > { %6085 = vmatpush1.bf16.msra.mxu1 %v12326_v5 }
 0x7d4   : > { %6086 = vmatprep.subr.bf16.mxu1 %v12331_v6 }
 0x7d7   : > { %6087 = vmatpush1.bf16.msra.mxu1 %v12329_v8  ;;  %v12364_v8 = vld [vmem:[%s16020_s15 + $0x134] ss:$8 sps:$4 sm:$0xff]  }
 0x7d8   : > { %6088 = vmatprep.subr.bf16.mxu1 %v12334_v9 }
 0x7db   : > { %6089 = vmatpush1.bf16.msra.mxu1 %v12332_v11  ;;  %v12362_v11 = vld [vmem:[%s16020_s15 + $0x130] ss:$8 sps:$4 sm:$0xff]  }
 0x7dc   : > { %6090 = vmatprep.subr.bf16.mxu1 %v12337_v12 }
 0x7df   : > { %6091 = vmatpush1.bf16.msra.mxu1 %v12335_v13 }
 0x7e0   : > { %6092 = vmatprep.subr.bf16.mxu1 %v12340_v14  ;;  %v12367_v14 = vld [vmem:[%s16020_s15 + $0x144] ss:$8 sps:$4 sm:$0xff]  }
 0x7e3   : > { %6093 = vmatpush1.bf16.msra.mxu1 %v12338_v15 }
 0x7e4   : > { %6094 = vmatprep.subr.bf16.mxu1 %v12343_v16 }
 0x7e7   : > { %6095 = vmatpush1.bf16.msra.mxu1 %v12341_v17 }
 0x7e8   : > { %6096 = vmatprep.subr.bf16.mxu1 %v12346_v18 }
 0x7eb   : > { %6097 = vmatpush1.bf16.msra.mxu1 %v12344_v19 }
 0x7ec   : > { %6098 = vmatprep.subr.bf16.mxu1 %v12349_v20 }
 0x7ef   : > { %6099 = vmatpush1.bf16.msra.mxu1 %v12347_v21 }
 0x7f0   : > { %6100 = vmatprep.subr.bf16.mxu1 %v12352_v22  ;;  %v12365_v22 = vld [vmem:[%s16020_s15 + $0x140] ss:$8 sps:$4 sm:$0xff]  }
 0x7f3   : > { %6101 = vmatpush1.bf16.msra.mxu1 %v12350_v24 }
 0x7f4   : > { %6141 = vmatprep.subr.bf16.mxu1 %v12355_v28  ;;  %v12370_v28 = vld [vmem:[%s16020_s15 + $0x154] ss:$8 sps:$4 sm:$0xff]  }
 0x859   : > { %v11451_v29 = vpop.f32.mrb[84].mxu1  ;;  %v14676_v31 = vpop.f32.mrb[148].mxu0 }
 0x85a   : > { %v4716_v26 = vpop.f32.mrb[85].mxu1  ;;  %v14678_v33 = vpop.f32.mrb[149].mxu0 }
 0x85b   : > { %v11452_v27 = vpop.f32.mrb[86].mxu1  ;;  %v14680_v34 = vpop.f32.mrb[150].mxu0 }
 0x85c   : > { %v4747_v35 = vpack.c.bf16 %v11452_v27, %v11451_v29  ;;  %v4719_v36 = vpop.f32.mrb[87].mxu1  ;;  %v4959_v37 = vpack.c.bf16 %v14680_v34, %v14676_v31  ;;  %v14684_v38 = vpop.f32.mrb[151].mxu0  ;;  %v12368_v29 = vld [vmem:[%s16020_s15 + $0x150] ss:$8 sps:$4 sm:$0xff]   ;;  %v12373_v27 = vld [vmem:[%s16020_s15 + $0x164] ss:$8 sps:$4 sm:$0xff]  }
 0x85d   : > { %v4746_v39 = vpack.c.bf16 %v4719_v36, %v4716_v26  ;;  %v4958_v41 = vpack.c.bf16 %v14684_v38, %v14678_v33  ;;  %v12407_v33 = vld [vmem:[%s16020_s15 + $0x220] ss:$8 sps:$4 sm:$0xff]   ;;  %v12412_v38 = vld [vmem:[%s16020_s15 + $0x234] ss:$8 sps:$4 sm:$0xff]  }
 0x85e   : > { %v12413_v31 = vld [vmem:[%s16020_s15 + $0x240] ss:$8 sps:$4 sm:$0xff]  }
 0x861   : > { %v14688_v43 = vpop.f32.mrb[88].mxu1  ;;  %v14690_v44 = vpop.f32.mrb[152].mxu0 }
 0x862   : > { %v4732_v45 = vpop.f32.mrb[89].mxu1  ;;  %v14692_v46 = vpop.f32.mrb[153].mxu0 }
 0x863   : > { %v11456_v47 = vpop.f32.mrb[90].mxu1  ;;  %v11476_v48 = vpop.f32.mrb[154].mxu0 }
 0x864   : > { %v4735_v49 = vpop.f32.mrb[91].mxu1  ;;  %v14694_v51 = vpop.f32.mrb[155].mxu0 }
 0x865   : > { %v4748_v53 = vpack.c.bf16 %v4735_v49, %v4732_v45  ;;  %v4960_v42 = vpack.c.bf16 %v14694_v51, %v14692_v46  ;;  %v12371_v45 = vld [vmem:[%s16020_s15 + $0x160] ss:$8 sps:$4 sm:$0xff]   ;;  %v4749_v49 = vpack.c.bf16 %v14688_v43, %v14688_v43  ;;  %v12379_v43 = vld [vmem:[%s16020_s15 + $0x184] ss:$8 sps:$4 sm:$0xff]   ;;  %v12424_v51 = vld [vmem:[%s16020_s15 + $0x274] ss:$8 sps:$4 sm:$0xff]  }
 0x866   : > { %v12419_v46 = vld [vmem:[%s16020_s15 + $0x260] ss:$8 sps:$4 sm:$0xff]  }
 0x869   : > { %v11461_v40 = vpop.f32.mrb[92].mxu1  ;;  %v14698_v54 = vpop.f32.mrb[156].mxu0 }
 0x86a   : > { %v4822_v56 = vpop.f32.mrb[93].mxu1  ;;  %v14700_v7 = vpop.f32.mrb[157].mxu0 }
 0x86b   : > { %v11462_v10 = vpop.f32.mrb[94].mxu1  ;;  %v14702_v30 = vpop.f32.mrb[158].mxu0 }
 0x86c   : > { %v4853_v32 = vpack.c.bf16 %v11462_v10, %v11461_v40  ;;  %v4825_v50 = vpop.f32.mrb[95].mxu1  ;;  %v5171_v52 = vpack.c.bf16 %v14702_v30, %v14698_v54  ;;  %v14706_v55 = vpop.f32.mrb[159].mxu0  ;;  %v12461_v54 = vld [vmem:[%s16020_s15 + $0x340] ss:$8 sps:$4 sm:$0xff]   ;;  %v12466_v30 = vld [vmem:[%s16020_s15 + $0x354] ss:$8 sps:$4 sm:$0xff]  }
 0x86d   : > { %v4852_v57 = vpack.c.bf16 %v4825_v50, %v4822_v56  ;;  %v5170_v59 = vpack.c.bf16 %v14706_v55, %v14700_v7  ;;  %v12374_v56 = vld [vmem:[%s16020_s15 + $0x170] ss:$8 sps:$4 sm:$0xff]   ;;  %v12455_v7 = vld [vmem:[%s16020_s15 + $0x320] ss:$8 sps:$4 sm:$0xff]   ;;  %v12460_v55 = vld [vmem:[%s16020_s15 + $0x334] ss:$8 sps:$4 sm:$0xff]  }
 0x86f   : > { %6102 = vmatprep.mubr.bf16.mxu1 %v4852_v57 }
 0x870   : > { %6103 = vmatmul.mubr.bf16.vlgmr.msra.gmra.mrb[116].mxu1 %v4746_v39 }
 0x871   : > { %6142 = vmatpush1.bf16.msra.mxu1 %v12353_v58  ;;  %6112 = vmatprep.mubr.bf16.mxu1 %v4853_v32  ;;  %v11465_v62 = vpop.f32.mrb[96].mxu1  ;;  %v14725_v6 = vpop.f32.mrb[160].mxu0 }
 0x872   : > { %6143 = vmatprep.subr.bf16.mxu1 %v12358_v60  ;;  %v4838_v1 = vpop.f32.mrb[97].mxu1  ;;  %v14730_v9 = vpop.f32.mrb[161].mxu0  ;;  %v4855_v21 = vpack.c.bf16 %v11465_v62, %v11465_v62 }
 0x873   : > { %v11466_v2 = vpop.f32.mrb[98].mxu1  ;;  %v11496_v13 = vpop.f32.mrb[162].mxu0 }
 0x874   : > { %v4841_v3 = vpop.f32.mrb[99].mxu1  ;;  %v14740_v16 = vpop.f32.mrb[163].mxu0 }
 0x875   : > { %6144 = vmatpush1.bf16.msra.mxu1 %v12356_v61  ;;  %v4854_v5 = vpack.c.bf16 %v4841_v3, %v4838_v1  ;;  %v5172_v18 = vpack.c.bf16 %v14740_v16, %v14730_v9  ;;  %v12377_v1 = vld [vmem:[%s16020_s15 + $0x180] ss:$8 sps:$4 sm:$0xff]   ;;  %v12382_v3 = vld [vmem:[%s16020_s15 + $0x194] ss:$8 sps:$4 sm:$0xff]   ;;  %v5173_v9 = vpack.c.bf16 %v14725_v6, %v14725_v6 }
 0x876   : > { %6145 = vmatprep.subr.bf16.mxu1 %v12361_v63  ;;  %v12472_v16 = vld [vmem:[%s16020_s15 + $0x374] ss:$8 sps:$4 sm:$0xff]  }
 0x878   : > { %6113 = vmatmul.mubr.bf16.gmra.mrb[120].mxu1 %v4747_v35 }
 0x879   : > { %6146 = vmatpush1.bf16.msra.mxu1 %v12359_v4  ;;  %6122 = vmatprep.mubr.bf16.mxu1 %v4854_v5  ;;  %v14735_v12 = vpop.f32.mrb[100].mxu1  ;;  %v14771_v48 = vpop.f32.mrb[164].mxu0  ;;  %v12380_v4 = vld [vmem:[%s16020_s15 + $0x190] ss:$8 sps:$4 sm:$0xff]  }
 0x87a   : > { %6147 = vmatprep.subr.bf16.mxu1 %v12364_v8  ;;  %v5034_v15 = vpop.f32.mrb[101].mxu1  ;;  %v14778_v40 = vpop.f32.mrb[165].mxu0 }
 0x87b   : > { %v14742_v17 = vpop.f32.mrb[102].mxu1  ;;  %v14785_v32 = vpop.f32.mrb[166].mxu0 }
 0x87c   : > { %v5065_v19 = vpack.c.bf16 %v14742_v17, %v14735_v12  ;;  %v5037_v20 = vpop.f32.mrb[103].mxu1  ;;  %v5383_v57 = vpack.c.bf16 %v14785_v32, %v14771_v48  ;;  %v14794_v58 = vpop.f32.mrb[167].mxu0  ;;  %v12415_v12 = vld [vmem:[%s16020_s15 + $0x244] ss:$8 sps:$4 sm:$0xff]   ;;  %v12416_v17 = vld [vmem:[%s16020_s15 + $0x250] ss:$8 sps:$4 sm:$0xff]  }
 0x87d   : > { %6148 = vmatpush1.bf16.msra.mxu1 %v12362_v11  ;;  %v5064_v24 = vpack.c.bf16 %v5037_v20, %v5034_v15  ;;  %v5382_v61 = vpack.c.bf16 %v14794_v58, %v14778_v40  ;;  %v12385_v11 = vld [vmem:[%s16020_s15 + $0x1a4] ss:$8 sps:$4 sm:$0xff]   ;;  %v12383_v20 = vld [vmem:[%s16020_s15 + $0x1a0] ss:$8 sps:$4 sm:$0xff]  }
 0x87e   : > { %6149 = vmatprep.subr.bf16.mxu1 %v12367_v14  ;;  %v5498_v40 = vld [vmem:[%s16021_s13] sm:$0x3] }
 0x87f   : > { %v5503_v48 = vrot.slane %v5498_v40, %v13508_v23  ;;  %v5507_v32 = vrot.slane %v5498_v40, %v13513_v25  ;;  %v12478_v40 = vld [vmem:[%s16022_s24 + $0x28] sm:$0xff]  }
 0x880   : > { %6123 = vmatmul.mubr.bf16.gmra.mrb[124].mxu1 %v4748_v53  ;;  %v12376_v53 = vld [vmem:[%s16020_s15 + $0x174] ss:$8 sps:$4 sm:$0xff]  }
 0x881   : > { %6150 = vmatpush1.bf16.msra.mxu1 %v12365_v22  ;;  %6132 = vmatprep.mubr.bf16.mxu1 %v4855_v21  ;;  %v14757_v26 = vpop.f32.mrb[104].mxu1  ;;  %v14817_v8 = vpop.f32.mrb[168].mxu0  ;;  %v12388_v22 = vld [vmem:[%s16020_s15 + $0x1b4] ss:$8 sps:$4 sm:$0xff]  }
 0x882   : > { %6151 = vmatprep.subr.bf16.mxu1 %v12370_v28  ;;  %v14762_v35 = vpop.f32.mrb[105].mxu1  ;;  %v12386_v28 = vld [vmem:[%s16020_s15 + $0x1b0] ss:$8 sps:$4 sm:$0xff]   ;;  %v5067_v34 = vpack.c.bf16 %v14757_v26, %v14757_v26  ;;  %v4961_v26 = vpack.c.bf16 %v14690_v44, %v14690_v44  ;;  %v12427_v44 = vld [vmem:[%s16020_s15 + $0x284] ss:$8 sps:$4 sm:$0xff]   ;;  %v5385_v6 = vpack.c.bf16 %v14817_v8, %v14817_v8 }
 0x883   : > { %v11486_v36 = vpop.f32.mrb[106].mxu1 }
 0x884   : > { %v14764_v39 = vpop.f32.mrb[107].mxu1 }
 0x885   : > { %6152 = vmatpush1.bf16.msra.mxu1 %v12368_v29  ;;  %v5066_v47 = vpack.c.bf16 %v14764_v39, %v14762_v35  ;;  %v12425_v35 = vld [vmem:[%s16020_s15 + $0x280] ss:$8 sps:$4 sm:$0xff]   ;;  %v12430_v39 = vld [vmem:[%s16020_s15 + $0x294] ss:$8 sps:$4 sm:$0xff]  }
 0x886   : > { %6153 = vmatprep.subr.bf16.mxu1 %v12373_v27  ;;  %v12391_v27 = vld [vmem:[%s16020_s15 + $0x1c4] ss:$8 sps:$4 sm:$0xff]  }
 0x888   : > { %6133 = vmatmul.mubr.bf16.gmra.mrb[128].mxu1 %v4749_v49  ;;  %v12389_v49 = vld [vmem:[%s16020_s15 + $0x1c0] ss:$8 sps:$4 sm:$0xff]  }
 0x889   : > { %6154 = vmatpush1.bf16.msra.mxu1 %v12371_v45  ;;  %6173 = vmatprep.mubr.bf16.mxu1 %v5064_v24  ;;  %v14783_v10 = vpop.f32.mrb[108].mxu1  ;;  %v14834_v24 = vpop.f32.mrb[169].mxu0 }
 0x88a   : > { %6155 = vmatprep.subr.bf16.mxu1 %v12376_v53  ;;  %v14790_v50 = vpop.f32.mrb[109].mxu1  ;;  %v11516_v29 = vpop.f32.mrb[170].mxu0  ;;  %v12394_v53 = vld [vmem:[%s16020_s15 + $0x1d4] ss:$8 sps:$4 sm:$0xff]  }
 0x88b   : > { %v14796_v60 = vpop.f32.mrb[110].mxu1  ;;  %v14842_v36 = vpop.f32.mrb[171].mxu0  ;;  %v12434_v29 = vld [vmem:[%s16020_s15 + $0x2b0] ss:$8 sps:$4 sm:$0xff]  }
 0x88c   : > { %v5277_v62 = vpack.c.bf16 %v14796_v60, %v14783_v10  ;;  %v14802_v63 = vpop.f32.mrb[111].mxu1  ;;  %v5384_v45 = vpack.c.bf16 %v14842_v36, %v14834_v24  ;;  %v12463_v10 = vld [vmem:[%s16020_s15 + $0x344] ss:$8 sps:$4 sm:$0xff]   ;;  %v12464_v60 = vld [vmem:[%s16020_s15 + $0x350] ss:$8 sps:$4 sm:$0xff]  }
 0x88d   : > { %6156 = vmatpush1.bf16.msra.mxu1 %v12374_v56  ;;  %v5276_v2 = vpack.c.bf16 %v14802_v63, %v14790_v50  ;;  %v12392_v56 = vld [vmem:[%s16020_s15 + $0x1d0] ss:$8 sps:$4 sm:$0xff]   ;;  %v12433_v50 = vld [vmem:[%s16020_s15 + $0x2a4] ss:$8 sps:$4 sm:$0xff]   ;;  %v12431_v63 = vld [vmem:[%s16020_s15 + $0x2a0] ss:$8 sps:$4 sm:$0xff]  }
 0x88e   : > { %6157 = vmatprep.subr.bf16.mxu1 %v12379_v43  ;;  %v12397_v43 = vld [vmem:[%s16020_s15 + $0x1e4] ss:$8 sps:$4 sm:$0xff]  }
 0x891   : > { %6158 = vmatpush1.bf16.msra.mxu1 %v12377_v1  ;;  %v14815_v5 = vpop.f32.mrb[112].mxu1  ;;  %v12395_v1 = vld [vmem:[%s16020_s15 + $0x1e0] ss:$8 sps:$4 sm:$0xff]  }
 0x892   : > { %6159 = vmatprep.subr.bf16.mxu1 %v12382_v3  ;;  %v14822_v13 = vpop.f32.mrb[113].mxu1  ;;  %v12400_v3 = vld [vmem:[%s16020_s15 + $0x1f4] ss:$8 sps:$4 sm:$0xff]  }
 0x893   : > { %v11506_v14 = vpop.f32.mrb[114].mxu1 }
 0x894   : > { %v14824_v15 = vpop.f32.mrb[115].mxu1  ;;  %v12401_v14 = vld [vmem:[%s16020_s15 + $0x200] ss:$8 sps:$4 sm:$0xff]  }
 0x895   : > { %6160 = vmatpush1.bf16.msra.mxu1 %v12380_v4  ;;  %v5278_v21 = vpack.c.bf16 %v14824_v15, %v14822_v13  ;;  %v12398_v4 = vld [vmem:[%s16020_s15 + $0x1f0] ss:$8 sps:$4 sm:$0xff]  }
 0x896   : > { %6161 = vmatprep.subr.bf16.mxu1 %v12385_v11  ;;  %v12403_v11 = vld [vmem:[%s16020_s15 + $0x204] ss:$8 sps:$4 sm:$0xff]  }
 0x899   : > { %6162 = vmatpush1.bf16.msra.mxu1 %v12383_v20  ;;  %v12406_v20 = vld [vmem:[%s16020_s15 + $0x214] ss:$8 sps:$4 sm:$0xff]  }
 0x89a   : > { %6163 = vmatprep.subr.bf16.mxu1 %v12388_v22  ;;  %v12404_v22 = vld [vmem:[%s16020_s15 + $0x210] ss:$8 sps:$4 sm:$0xff]  }
 0x89d   : > { %6164 = vmatpush1.bf16.msra.mxu1 %v12386_v28  ;;  %v12409_v28 = vld [vmem:[%s16020_s15 + $0x224] ss:$8 sps:$4 sm:$0xff]  }
 0x89e   : > { %6165 = vmatprep.subr.bf16.mxu1 %v12391_v27  ;;  %v12439_v27 = vld [vmem:[%s16020_s15 + $0x2c4] ss:$8 sps:$4 sm:$0xff]  }
 0x8a1   : > { %6166 = vmatpush1.bf16.msra.mxu1 %v12389_v49  ;;  %v12437_v49 = vld [vmem:[%s16020_s15 + $0x2c0] ss:$8 sps:$4 sm:$0xff]  }
 0x8a2   : > { %6167 = vmatprep.subr.bf16.mxu1 %v12394_v53  ;;  %v12442_v53 = vld [vmem:[%s16020_s15 + $0x2d4] ss:$8 sps:$4 sm:$0xff]  }
 0x8a5   : > { %6168 = vmatpush1.bf16.msra.mxu1 %v12392_v56  ;;  %v12440_v56 = vld [vmem:[%s16020_s15 + $0x2d0] ss:$8 sps:$4 sm:$0xff]  }
 0x8a6   : > { %6169 = vmatprep.subr.bf16.mxu1 %v12397_v43  ;;  %v12445_v43 = vld [vmem:[%s16020_s15 + $0x2e4] ss:$8 sps:$4 sm:$0xff]  }
 0x8a9   : > { %6170 = vmatpush1.bf16.msra.mxu1 %v12395_v1  ;;  %v12443_v1 = vld [vmem:[%s16020_s15 + $0x2e0] ss:$8 sps:$4 sm:$0xff]  }
 0x8aa   : > { %6171 = vmatprep.subr.bf16.mxu1 %v12400_v3  ;;  %v12448_v3 = vld [vmem:[%s16020_s15 + $0x2f4] ss:$8 sps:$4 sm:$0xff]  }
 0x8ad   : > { %6172 = vmatpush1.bf16.msra.mxu1 %v12398_v4  ;;  %v12446_v4 = vld [vmem:[%s16020_s15 + $0x2f0] ss:$8 sps:$4 sm:$0xff]  }
 0x8ae   : > { %6212 = vmatprep.subr.bf16.mxu1 %v12403_v11  ;;  %v12451_v11 = vld [vmem:[%s16020_s15 + $0x304] ss:$8 sps:$4 sm:$0xff]  }
 0x8b0   : > { %6174 = vmatmul.mubr.bf16.vlgmr.msra.gmra.mrb[116].mxu1 %v4958_v41  ;;  %v12410_v41 = vld [vmem:[%s16020_s15 + $0x230] ss:$8 sps:$4 sm:$0xff]  }
 0x8b1   : > { %6183 = vmatprep.mubr.bf16.mxu1 %v5065_v19  ;;  %6213 = vmatpush1.bf16.msra.mxu1 %v12401_v14  ;;  %v12421_v19 = vld [vmem:[%s16020_s15 + $0x264] ss:$8 sps:$4 sm:$0xff]   ;;  %v12449_v14 = vld [vmem:[%s16020_s15 + $0x300] ss:$8 sps:$4 sm:$0xff]  }
 0x8b2   : > { %6214 = vmatprep.subr.bf16.mxu1 %v12406_v20  ;;  %v12454_v20 = vld [vmem:[%s16020_s15 + $0x314] ss:$8 sps:$4 sm:$0xff]  }
 0x8b5   : > { %6215 = vmatpush1.bf16.msra.mxu1 %v12404_v22  ;;  %v12452_v22 = vld [vmem:[%s16020_s15 + $0x310] ss:$8 sps:$4 sm:$0xff]  }
 0x8b6   : > { %6216 = vmatprep.subr.bf16.mxu1 %v12409_v28  ;;  %v12457_v28 = vld [vmem:[%s16020_s15 + $0x324] ss:$8 sps:$4 sm:$0xff]  }
 0x8b8   : > { %6184 = vmatmul.mubr.bf16.gmra.mrb[120].mxu1 %v4959_v37  ;;  %v12418_v37 = vld [vmem:[%s16020_s15 + $0x254] ss:$8 sps:$4 sm:$0xff]  }
 0x8b9   : > { %6217 = vmatpush1.bf16.msra.mxu1 %v12407_v33  ;;  %6193 = vmatprep.mubr.bf16.mxu1 %v5066_v47  ;;  %v12428_v47 = vld [vmem:[%s16020_s15 + $0x290] ss:$8 sps:$4 sm:$0xff]  }
 0x8ba   : > { %6218 = vmatprep.subr.bf16.mxu1 %v12412_v38 }
 0x8bd   : > { %6219 = vmatpush1.bf16.msra.mxu1 %v12410_v41 }
 0x8be   : > { %6220 = vmatprep.subr.bf16.mxu1 %v12415_v12 }
 0x8c0   : > { %6194 = vmatmul.mubr.bf16.gmra.mrb[124].mxu1 %v4960_v42  ;;  %v12422_v42 = vld [vmem:[%s16020_s15 + $0x270] ss:$8 sps:$4 sm:$0xff]  }
 0x8c1   : > { %6221 = vmatpush1.bf16.msra.mxu1 %v12413_v31  ;;  %6203 = vmatprep.mubr.bf16.mxu1 %v5067_v34 }
 0x8c2   : > { %6222 = vmatprep.subr.bf16.mxu1 %v12418_v37 }
 0x8c5   : > { %6223 = vmatpush1.bf16.msra.mxu1 %v12416_v17 }
 0x8c6   : > { %6224 = vmatprep.subr.bf16.mxu1 %v12421_v19 }
 0x8c8   : > { %6204 = vmatmul.mubr.bf16.gmra.mrb[128].mxu1 %v4961_v26 }
 0x8c9   : > { %6225 = vmatpush1.bf16.msra.mxu1 %v12419_v46  ;;  %6244 = vmatprep.mubr.bf16.mxu1 %v5276_v2  ;;  %v12436_v2 = vld [vmem:[%s16020_s15 + $0x2b4] ss:$8 sps:$4 sm:$0xff]  }
 0x8ca   : > { %6226 = vmatprep.subr.bf16.mxu1 %v12424_v51 }
 0x8cd   : > { %6227 = vmatpush1.bf16.msra.mxu1 %v12422_v42 }
 0x8ce   : > { %6228 = vmatprep.subr.bf16.mxu1 %v12427_v44 }
 0x8d1   : > { %6229 = vmatpush1.bf16.msra.mxu1 %v12425_v35 }
 0x8d2   : > { %6230 = vmatprep.subr.bf16.mxu1 %v12430_v39 }
 0x8d5   : > { %6231 = vmatpush1.bf16.msra.mxu1 %v12428_v47 }
 0x8d6   : > { %6232 = vmatprep.subr.bf16.mxu1 %v12433_v50 }
 0x8d9   : > { %6233 = vmatpush1.bf16.msra.mxu1 %v12431_v63 }
 0x8da   : > { %6234 = vmatprep.subr.bf16.mxu1 %v12436_v2 }
 0x8dd   : > { %6235 = vmatpush1.bf16.msra.mxu1 %v12434_v29 }
 0x8de   : > { %6236 = vmatprep.subr.bf16.mxu1 %v12439_v27 }
 0x8e1   : > { %6237 = vmatpush1.bf16.msra.mxu1 %v12437_v49 }
 0x8e2   : > { %6238 = vmatprep.subr.bf16.mxu1 %v12442_v53 }
 0x8e5   : > { %6239 = vmatpush1.bf16.msra.mxu1 %v12440_v56 }
 0x8e6   : > { %6240 = vmatprep.subr.bf16.mxu1 %v12445_v43 }
 0x8e9   : > { %6241 = vmatpush1.bf16.msra.mxu1 %v12443_v1 }
 0x8ea   : > { %6242 = vmatprep.subr.bf16.mxu1 %v12448_v3 }
 0x8ed   : > { %6243 = vmatpush1.bf16.msra.mxu1 %v12446_v4 }
 0x8ee   : > { %6283 = vmatprep.subr.bf16.mxu1 %v12451_v11 }
 0x8f0   : > { %6245 = vmatmul.mubr.bf16.vlgmr.msra.gmra.mrb[116].mxu1 %v5170_v59  ;;  %v12458_v59 = vld [vmem:[%s16020_s15 + $0x330] ss:$8 sps:$4 sm:$0xff]  }
 0x8f1   : > { %6254 = vmatprep.mubr.bf16.mxu1 %v5277_v62  ;;  %6284 = vmatpush1.bf16.msra.mxu1 %v12449_v14  ;;  %v12469_v62 = vld [vmem:[%s16020_s15 + $0x364] ss:$8 sps:$4 sm:$0xff]  }
 0x8f2   : > { %6285 = vmatprep.subr.bf16.mxu1 %v12454_v20 }
 0x8f5   : > { %6286 = vmatpush1.bf16.msra.mxu1 %v12452_v22 }
 0x8f6   : > { %6287 = vmatprep.subr.bf16.mxu1 %v12457_v28 }
 0x8f8   : > { %6255 = vmatmul.mubr.bf16.gmra.mrb[120].mxu1 %v5171_v52  ;;  %v5279_v52 = vpack.c.bf16 %v14815_v5, %v14815_v5  ;;  %v12467_v5 = vld [vmem:[%s16020_s15 + $0x360] ss:$8 sps:$4 sm:$0xff]  }
 0x8f9   : > { %6288 = vmatpush1.bf16.msra.mxu1 %v12455_v7  ;;  %6264 = vmatprep.mubr.bf16.mxu1 %v5278_v21 }
 0x8fa   : > { %6289 = vmatprep.subr.bf16.mxu1 %v12460_v55 }
 0x8fd   : > { %6290 = vmatpush1.bf16.msra.mxu1 %v12458_v59 }
 0x8fe   : > { %6291 = vmatprep.subr.bf16.mxu1 %v12463_v10 }
 0x900   : > { %6265 = vmatmul.mubr.bf16.gmra.mrb[124].mxu1 %v5172_v18  ;;  %v12470_v18 = vld [vmem:[%s16020_s15 + $0x370] ss:$8 sps:$4 sm:$0xff]  }
 0x901   : > { %6274 = vmatprep.mubr.bf16.mxu1 %v5279_v52  ;;  %6292 = vmatpush1.bf16.msra.mxu1 %v12461_v54 }
 0x902   : > { %6293 = vmatprep.subr.bf16.mxu1 %v12466_v30 }
 0x905   : > { %6294 = vmatpush1.bf16.msra.mxu1 %v12464_v60 }
 0x906   : > { %6295 = vmatprep.subr.bf16.mxu1 %v12469_v62 }
 0x908   : > { %6275 = vmatmul.mubr.bf16.gmra.mrb[128].mxu1 %v5173_v9  ;;  %v12474_v9 = vld [vmem:[%s16022_s24 + $0x8] sm:$0xff]  }
 0x909   : > { %6296 = vmatpush1.bf16.msra.mxu1 %v12467_v5  ;;  %6315 = vmatprep.mubr.bf16.mxu1 %v13042_v0  ;;  %v12473_v5 = vld [vmem:[%s16022_s24] sm:$0xff]  }
 0x90a   : > { %6297 = vmatprep.subr.bf16.mxu1 %v12472_v16  ;;  %v12475_v16 = vld [vmem:[%s16022_s24 + $0x10] sm:$0xff]  }
 0x90d   : > { %6298 = vmatpush1.bf16.msra.mxu1 %v12470_v18  ;;  %v12476_v18 = vld [vmem:[%s16022_s24 + $0x18] sm:$0xff]  }
 0x910   : > { %6316 = vmatmul.mubr.bf16.vlgmr.msra.gmra.mrb[116].mxu1 %v5382_v61 }
 0x911   : > { %6325 = vmatprep.mubr.bf16.mxu1 %v13042_v0 }
 0x918   : > { %6326 = vmatmul.mubr.bf16.gmra.mrb[120].mxu1 %v5383_v57 }
 0x919   : > { %6335 = vmatprep.mubr.bf16.mxu1 %v13042_v0 }
 0x920   : > { %6336 = vmatmul.mubr.bf16.gmra.mrb[124].mxu1 %v5384_v45 }
 0x921   : > { %6345 = vmatprep.mubr.bf16.mxu1 %v13042_v0 }
 0x928   : > { %6346 = vmatmul.mubr.bf16.gmra.mrb[128].mxu1 %v5385_v6  ;;  %v12477_v6 = vld [vmem:[%s16022_s24 + $0x20] sm:$0xff]  }
 0x929   : > { %8116 = vmatprep.mubr.bf16.mxu1 %v13042_v0 }
 0x9e3   : > { %v6317_v57 = vpop.f32.mrb[116].mxu1 }
 0x9e4   : > { %v11573_v58 = vadd.f32 %v6317_v57, %v5503_v48  ;;  %v6319_v61 = vpop.f32.mrb[117].mxu1  ;;  %v12481_v57 = vld [vmem:[%s16022_s24 + $0x40] sm:$0xff]  }
 0x9e5   : > { %v11574_v13 = vadd.f32 %v6319_v61, %v5507_v32  ;;  %v6321_v15 = vpop.f32.mrb[118].mxu1  ;;  %v12482_v61 = vld [vmem:[%s16022_s24 + $0x48] sm:$0xff]  }
 0x9e6   : > { %v11575_v21 = vadd.f32 %v6321_v15, %v5503_v48  ;;  %v6323_v24 = vpop.f32.mrb[119].mxu1  ;;  %v6354_v8 = vmax.f32 %v11573_v58, 0.0  ;;  %v12493_v58 = vld [vmem:[#allocation7 + $0x4] ss:$8 sps:$4 sm:$0xff]   ;;  %v12484_v15 = vld [vmem:[%s16022_s24 + $0x58] sm:$0xff]  }
 0x9e7   : > { %v11576_v36 = vadd.f32 %v6323_v24, %v5507_v32  ;;  %v6355_v33 = vmax.f32 %v11574_v13, 0.0  ;;  %v12483_v13 = vld [vmem:[%s16022_s24 + $0x50] sm:$0xff]   ;;  %v12486_v24 = vld [vmem:[%s16022_s24 + $0x68] sm:$0xff]  }
 0x9e8   : > { %v6356_v45 = vmax.f32 %v11575_v21, 0.0  ;;  %v12485_v21 = vld [vmem:[%s16022_s24 + $0x60] sm:$0xff]  }
 0x9e9   : > { %v6357_v38 = vmax.f32 %v11576_v36, 0.0  ;;  %v12487_v36 = vld [vmem:[%s16022_s24 + $0x70] sm:$0xff]  }
 0x9ea   : > { %v15073_v41 = vpack.c.bf16 %v6356_v45, %v6354_v8  ;;  %v12491_v8 = vld [vmem:[#allocation7] ss:$8 sps:$4 sm:$0xff]   ;;  %v12497_v45 = vld [vmem:[#allocation7 + $0x14] ss:$8 sps:$4 sm:$0xff]  }
 0x9eb   : > { %v6369_v12 = vpack.c.bf16 %v6357_v38, %v6355_v33  ;;  %v6327_v31 = vpop.f32.mrb[120].mxu1  ;;  %v12495_v33 = vld [vmem:[#allocation7 + $0x10] ss:$8 sps:$4 sm:$0xff]   ;;  %v12500_v38 = vld [vmem:[#allocation7 + $0x24] ss:$8 sps:$4 sm:$0xff]  }
 0x9ec   : > { %v11577_v34 = vadd.f32 %v6327_v31, %v5503_v48  ;;  %v6329_v37 = vpop.f32.mrb[121].mxu1  ;;  %v12504_v31 = vld [vmem:[#allocation7 + $0x34] ss:$8 sps:$4 sm:$0xff]  }
 0x9ed   : > { %v11578_v17 = vadd.f32 %v6329_v37, %v5507_v32  ;;  %v6331_v19 = vpop.f32.mrb[122].mxu1  ;;  %6452 = vmatprep.subr.bf16.mxu0 %v6369_v12  ;;  %v12507_v37 = vld [vmem:[#allocation7 + $0x44] ss:$8 sps:$4 sm:$0xff]  }
 0x9ee   : > { %v11579_v26 = vadd.f32 %v6331_v19, %v5503_v48  ;;  %v6333_v46 = vpop.f32.mrb[123].mxu1  ;;  %6453 = vmatpush1.bf16.msra.mxu0 %v15073_v41  ;;  %v6358_v42 = vmax.f32 %v11577_v34, 0.0  ;;  %v12502_v34 = vld [vmem:[#allocation7 + $0x30] ss:$8 sps:$4 sm:$0xff]   ;;  %v12505_v19 = vld [vmem:[#allocation7 + $0x40] ss:$8 sps:$4 sm:$0xff]  }
 0x9ef   : > { %v11580_v51 = vadd.f32 %v6333_v46, %v5507_v32  ;;  %v6359_v35 = vmax.f32 %v11578_v17, 0.0  ;;  %v12489_v17 = vld [vmem:[%s16022_s24 + $0x80] sm:$0xff]   ;;  %v12509_v46 = vld [vmem:[#allocation7 + $0x50] ss:$8 sps:$4 sm:$0xff]  }
 0x9f0   : > { %v6360_v44 = vmax.f32 %v11579_v26, 0.0  ;;  %v12511_v26 = vld [vmem:[#allocation7 + $0x54] ss:$8 sps:$4 sm:$0xff]  }
 0x9f1   : > { %v6361_v39 = vmax.f32 %v11580_v51, 0.0  ;;  %v12514_v51 = vld [vmem:[#allocation7 + $0x64] ss:$8 sps:$4 sm:$0xff]  }
 0x9f2   : > { %v15076_v47 = vpack.c.bf16 %v6360_v44, %v6358_v42  ;;  %v12490_v42 = vld [vmem:[%s16022_s24 + $0x88] sm:$0xff]  }
 0x9f3   : > { %v15078_v50 = vpack.c.bf16 %v6361_v39, %v6359_v35  ;;  %v6337_v63 = vpop.f32.mrb[124].mxu1  ;;  %v12512_v44 = vld [vmem:[#allocation7 + $0x60] ss:$8 sps:$4 sm:$0xff]   ;;  %v12517_v35 = vld [vmem:[#allocation7 + $0x74] ss:$8 sps:$4 sm:$0xff]  }
 0x9f4   : > { %v11581_v2 = vadd.f32 %v6337_v63, %v5503_v48  ;;  %v6339_v29 = vpop.f32.mrb[125].mxu1  ;;  %v12515_v39 = vld [vmem:[#allocation7 + $0x70] ss:$8 sps:$4 sm:$0xff]   ;;  %v12518_v63 = vld [vmem:[#allocation7 + $0x80] ss:$8 sps:$4 sm:$0xff]  }
 0x9f5   : > { %v11582_v27 = vadd.f32 %v6339_v29, %v5507_v32  ;;  %v6341_v49 = vpop.f32.mrb[126].mxu1  ;;  %6454 = vmatprep.subr.bf16.mxu0 %v15078_v50  ;;  %v12521_v29 = vld [vmem:[#allocation7 + $0x90] ss:$8 sps:$4 sm:$0xff]  }
 0x9f6   : > { %v11583_v53 = vadd.f32 %v6341_v49, %v5503_v48  ;;  %v6343_v56 = vpop.f32.mrb[127].mxu1  ;;  %6455 = vmatpush1.bf16.msra.mxu0 %v15076_v47  ;;  %v6362_v1 = vmax.f32 %v11581_v2, 0.0  ;;  %v12523_v2 = vld [vmem:[#allocation7 + $0x94] ss:$8 sps:$4 sm:$0xff]  }
 0x9f7   : > { %v11584_v43 = vadd.f32 %v6343_v56, %v5507_v32  ;;  %v6363_v4 = vmax.f32 %v11582_v27, 0.0  ;;  %v12526_v27 = vld [vmem:[#allocation7 + $0xa4] ss:$8 sps:$4 sm:$0xff]   ;;  %v12501_v49 = vld [vmem:[%s16022_s24 + $0x98] sm:$0xff]  }
 0x9f8   : > { %v6364_v3 = vmax.f32 %v11583_v53, 0.0  ;;  %v12524_v53 = vld [vmem:[#allocation7 + $0xa0] ss:$8 sps:$4 sm:$0xff]   ;;  %v12529_v56 = vld [vmem:[#allocation7 + $0xb4] ss:$8 sps:$4 sm:$0xff]  }
 0x9f9   : > { %v6365_v11 = vmax.f32 %v11584_v43, 0.0  ;;  %v12527_v43 = vld [vmem:[#allocation7 + $0xb0] ss:$8 sps:$4 sm:$0xff]  }
 0x9fa   : > { %v6372_v14 = vpack.c.bf16 %v6364_v3, %v6362_v1  ;;  %v12532_v1 = vld [vmem:[#allocation7 + $0xc4] ss:$8 sps:$4 sm:$0xff]   ;;  %v12508_v3 = vld [vmem:[%s16022_s24 + $0xa0] sm:$0xff]  }
 0x9fb   : > { %v6373_v20 = vpack.c.bf16 %v6365_v11, %v6363_v4  ;;  %v6347_v22 = vpop.f32.mrb[128].mxu1  ;;  %v12530_v4 = vld [vmem:[#allocation7 + $0xc0] ss:$8 sps:$4 sm:$0xff]   ;;  %v12535_v11 = vld [vmem:[#allocation7 + $0xd4] ss:$8 sps:$4 sm:$0xff]  }
 0x9fc   : > { %v11585_v28 = vadd.f32 %v6347_v22, %v5503_v48  ;;  %v6349_v7 = vpop.f32.mrb[129].mxu1  ;;  %v12479_v48 = vld [vmem:[%s16022_s24 + $0x30] sm:$0xff]   ;;  %v12536_v22 = vld [vmem:[#allocation7 + $0xe0] ss:$8 sps:$4 sm:$0xff]  }
 0x9fd   : > { %v11586_v55 = vadd.f32 %v6349_v7, %v5507_v32  ;;  %v6351_v59 = vpop.f32.mrb[130].mxu1  ;;  %6456 = vmatprep.subr.bf16.mxu0 %v6373_v20  ;;  %v12480_v32 = vld [vmem:[%s16022_s24 + $0x38] sm:$0xff]  }
 0x9fe   : > { %v6366_v10 = vmax.f32 %v11585_v28, 0.0  ;;  %v6352_v54 = vpop.f32.mrb[131].mxu1  ;;  %6457 = vmatpush1.bf16.msra.mxu0 %v6372_v14  ;;  %v12541_v28 = vld [vmem:[#allocation7 + $0xf4] ss:$8 sps:$4 sm:$0xff]   ;;  %v12539_v7 = vld [vmem:[#allocation7 + $0xf0] ss:$8 sps:$4 sm:$0xff]  }
 0x9ff   : > { %v6367_v30 = vmax.f32 %v11586_v55, 0.0  ;;  %v12544_v55 = vld [vmem:[#allocation7 + $0x104] ss:$8 sps:$4 sm:$0xff]  }
 0xa00   : > { %v6374_v52 = vpack.c.bf16 %v6366_v10, %v6366_v10 }
 0xa01   : > { %v6375_v60 = vpack.c.bf16 %v6367_v30, %v6367_v30 }
 0xa02   : > { %v6447_v62 = vsel %vm3119_vm2, %v6374_v52, 0 }
 0xa03   : > { %10661 = vmatprep.subr.msk.bf16.mxu0 %vm3119_vm2, %v6375_v60 }
 0xa04   : > { %6459 = vmatpush1.bf16.msra.mxu0 %v6447_v62 }
 0xa05   : > { %6640 = vmatprep.subr.bf16.mxu0 %v6369_v12 }
 0xa07   : > { %10662 = vmatmul.mubr.msk.bf16.vlgmr.msra.gmra.mrb[172].mxu0 %vm3115_vm3, %v12473_v5  ;;  %v12547_v5 = vld [vmem:[#allocation7 + $0x114] ss:$8 sps:$4 sm:$0xff]  }
 0xa08   : > { %6641 = vmatpush1.bf16.msra.mxu0 %v15073_v41  ;;  %6494 = vmatprep.mubr.bf16.mxu0 %v13042_v0 }
 0xa09   : > { %6642 = vmatprep.subr.bf16.mxu0 %v15078_v50 }
 0xa0c   : > { %6643 = vmatpush1.bf16.msra.mxu0 %v15076_v47 }
 0xa0d   : > { %6644 = vmatprep.subr.bf16.mxu0 %v6373_v20 }
 0xa0f   : > { %10663 = vmatmul.mubr.msk.bf16.gmra.mrb[176].mxu0 %vm3115_vm3, %v12474_v9  ;;  %v12545_v9 = vld [vmem:[#allocation7 + $0x110] ss:$8 sps:$4 sm:$0xff]  }
 0xa10   : > { %6645 = vmatpush1.bf16.msra.mxu0 %v6372_v14  ;;  %6504 = vmatprep.mubr.bf16.mxu0 %v13042_v0 }
 0xa11   : > { %10690 = vmatprep.subr.msk.bf16.mxu0 %vm3119_vm2, %v6375_v60 }
 0xa14   : > { %6647 = vmatpush1.bf16.msra.mxu0 %v6447_v62 }
 0xa15   : > { %6828 = vmatprep.subr.bf16.mxu0 %v6369_v12  ;;  %v12498_v12 = vld [vmem:[#allocation7 + $0x20] ss:$8 sps:$4 sm:$0xff]  }
 0xa17   : > { %10664 = vmatmul.mubr.msk.bf16.gmra.mrb[180].mxu0 %vm3115_vm3, %v12475_v16 }
 0xa18   : > { %6514 = vmatprep.mubr.bf16.mxu0 %v13042_v0 }
 0xa1f   : > { %10665 = vmatmul.mubr.msk.bf16.gmra.mrb[184].mxu0 %vm3115_vm3, %v12476_v18 }
 0xa20   : > { %6524 = vmatprep.mubr.bf16.mxu0 %v13042_v0 }
 0xa27   : > { %10666 = vmatmul.mubr.msk.bf16.gmra.mrb[188].mxu0 %vm3115_vm3, %v12477_v6  ;;  %v12550_v6 = vld [vmem:[#allocation7 + $0x124] ss:$8 sps:$4 sm:$0xff]  }
 0xa28   : > { %6534 = vmatprep.mubr.bf16.mxu0 %v13042_v0 }
 0xa2f   : > { %10667 = vmatmul.mubr.msk.bf16.gmra.mrb[192].mxu0 %vm3115_vm3, %v12478_v40 }
 0xa30   : > { %6544 = vmatprep.mubr.bf16.mxu0 %v13042_v0 }
 0xa37   : > { %10668 = vmatmul.mubr.msk.bf16.gmra.mrb[196].mxu0 %vm3115_vm3, %v12479_v48 }
 0xa38   : > { %6672 = vmatprep.mubr.bf16.mxu0 %v13042_v0 }
 0xa3f   : > { %10691 = vmatmul.mubr.msk.bf16.vlgmr.msra.gmra.mrb[200].mxu0 %vm3115_vm3, %v12480_v32 }
 0xa40   : > { %6829 = vmatpush1.bf16.msra.mxu0 %v15073_v41  ;;  %6682 = vmatprep.mubr.bf16.mxu0 %v13042_v0  ;;  %v12488_v41 = vld [vmem:[%s16022_s24 + $0x78] sm:$0xff]  }
 0xa41   : > { %6830 = vmatprep.subr.bf16.mxu0 %v15078_v50  ;;  %v12494_v50 = vld [vmem:[%s16022_s24 + $0x90] sm:$0xff]  }
 0xa44   : > { %6831 = vmatpush1.bf16.msra.mxu0 %v15076_v47  ;;  %v12520_v47 = vld [vmem:[#allocation7 + $0x84] ss:$8 sps:$4 sm:$0xff]  }
 0xa45   : > { %6832 = vmatprep.subr.bf16.mxu0 %v6373_v20  ;;  %v12538_v20 = vld [vmem:[#allocation7 + $0xe4] ss:$8 sps:$4 sm:$0xff]  }
 0xa47   : > { %10692 = vmatmul.mubr.msk.bf16.gmra.mrb[204].mxu0 %vm3115_vm3, %v12481_v57  ;;  %v12548_v57 = vld [vmem:[#allocation7 + $0x120] ss:$8 sps:$4 sm:$0xff]  }
 0xa48   : > { %6833 = vmatpush1.bf16.msra.mxu0 %v6372_v14  ;;  %6692 = vmatprep.mubr.bf16.mxu0 %v13042_v0  ;;  %v12533_v14 = vld [vmem:[#allocation7 + $0xd0] ss:$8 sps:$4 sm:$0xff]  }
 0xa49   : > { %10719 = vmatprep.subr.msk.bf16.mxu0 %vm3119_vm2, %v6375_v60 }
 0xa4c   : > { %6835 = vmatpush1.bf16.msra.mxu0 %v6447_v62  ;;  %v12542_v62 = vld [vmem:[#allocation7 + $0x100] ss:$8 sps:$4 sm:$0xff]  }
 0xa4d   : > { %7533 = vmatprep.subr.bf16.mxu0 %v12493_v58 }
 0xa4f   : > { %10693 = vmatmul.mubr.msk.bf16.gmra.mrb[208].mxu0 %vm3115_vm3, %v12482_v61  ;;  %v12553_v61 = vld [vmem:[#allocation7 + $0x134] ss:$8 sps:$4 sm:$0xff]  }
 0xa50   : > { %6702 = vmatprep.mubr.bf16.mxu0 %v13042_v0 }
 0xa57   : > { %10694 = vmatmul.mubr.msk.bf16.gmra.mrb[212].mxu0 %vm3115_vm3, %v12483_v13  ;;  %v12551_v13 = vld [vmem:[#allocation7 + $0x130] ss:$8 sps:$4 sm:$0xff]  }
 0xa58   : > { %6712 = vmatprep.mubr.bf16.mxu0 %v13042_v0 }
 0xa5f   : > { %10695 = vmatmul.mubr.msk.bf16.gmra.mrb[216].mxu0 %vm3115_vm3, %v12484_v15 }
 0xa60   : > { %6722 = vmatprep.mubr.bf16.mxu0 %v13042_v0 }
 0xa67   : > { %10696 = vmatmul.mubr.msk.bf16.gmra.mrb[220].mxu0 %vm3115_vm3, %v12485_v21 }
 0xa68   : > { %6732 = vmatprep.mubr.bf16.mxu0 %v13042_v0 }
 0xa6f   : > { %10697 = vmatmul.mubr.msk.bf16.gmra.mrb[224].mxu0 %vm3115_vm3, %v12486_v24  ;;  %v12556_v24 = vld [vmem:[#allocation7 + $0x144] ss:$8 sps:$4 sm:$0xff]  }
 0xa70   : > { %6860 = vmatprep.mubr.bf16.mxu0 %v13042_v0 }
 0xa77   : > { %10720 = vmatmul.mubr.msk.bf16.vlgmr.msra.gmra.mrb[228].mxu0 %vm3115_vm3, %v12487_v36 }
 0xa78   : > { %6870 = vmatprep.mubr.bf16.mxu0 %v13042_v0  ;;  %7534 = vmatpush1.bf16.msra.mxu0 %v12491_v8 }
 0xa79   : > { %7535 = vmatprep.subr.bf16.mxu0 %v12497_v45 }
 0xa7c   : > { %7536 = vmatpush1.bf16.msra.mxu0 %v12495_v33  ;;  %v12554_v33 = vld [vmem:[#allocation7 + $0x140] ss:$8 sps:$4 sm:$0xff]  }
 0xa7d   : > { %7537 = vmatprep.subr.bf16.mxu0 %v12500_v38 }
 0xa7f   : > { %10721 = vmatmul.mubr.msk.bf16.gmra.mrb[232].mxu0 %vm3115_vm3, %v12488_v41  ;;  %v12559_v41 = vld [vmem:[#allocation7 + $0x154] ss:$8 sps:$4 sm:$0xff]  }
 0xa80   : > { %6880 = vmatprep.mubr.bf16.mxu0 %v13042_v0  ;;  %7538 = vmatpush1.bf16.msra.mxu0 %v12498_v12  ;;  %v12557_v12 = vld [vmem:[#allocation7 + $0x150] ss:$8 sps:$4 sm:$0xff]  }
 0xa81   : > { %7539 = vmatprep.subr.bf16.mxu0 %v12504_v31 }
 0xa84   : > { %7540 = vmatpush1.bf16.msra.mxu0 %v12502_v34 }
 0xa85   : > { %7541 = vmatprep.subr.bf16.mxu0 %v12507_v37  ;;  %v12562_v37 = vld [vmem:[#allocation7 + $0x164] ss:$8 sps:$4 sm:$0xff]  }
 0xa87   : > { %10722 = vmatmul.mubr.msk.bf16.gmra.mrb[236].mxu0 %vm3115_vm3, %v12489_v17 }
 0xa88   : > { %6890 = vmatprep.mubr.bf16.mxu0 %v13042_v0  ;;  %7542 = vmatpush1.bf16.msra.mxu0 %v12505_v19 }
 0xa89   : > { %7543 = vmatprep.subr.bf16.mxu0 %v12511_v26 }
 0xa8c   : > { %7544 = vmatpush1.bf16.msra.mxu0 %v12509_v46  ;;  %v12560_v46 = vld [vmem:[#allocation7 + $0x160] ss:$8 sps:$4 sm:$0xff]  }
 0xa8d   : > { %7545 = vmatprep.subr.bf16.mxu0 %v12514_v51 }
 0xa8f   : > { %10723 = vmatmul.mubr.msk.bf16.gmra.mrb[240].mxu0 %vm3115_vm3, %v12490_v42  ;;  %v12565_v42 = vld [vmem:[#allocation7 + $0x174] ss:$8 sps:$4 sm:$0xff]  }
 0xa90   : > { %6900 = vmatprep.mubr.bf16.mxu0 %v13042_v0  ;;  %7546 = vmatpush1.bf16.msra.mxu0 %v12512_v44  ;;  %v12563_v44 = vld [vmem:[#allocation7 + $0x170] ss:$8 sps:$4 sm:$0xff]  }
 0xa91   : > { %7547 = vmatprep.subr.bf16.mxu0 %v12517_v35 }
 0xa94   : > { %7548 = vmatpush1.bf16.msra.mxu0 %v12515_v39 }
 0xa95   : > { %7549 = vmatprep.subr.bf16.mxu0 %v12520_v47  ;;  %v12568_v47 = vld [vmem:[#allocation7 + $0x184] ss:$8 sps:$4 sm:$0xff]  }
 0xa97   : > { %10724 = vmatmul.mubr.msk.bf16.gmra.mrb[244].mxu0 %vm3115_vm3, %v12494_v50 }
 0xa98   : > { %6910 = vmatprep.mubr.bf16.mxu0 %v13042_v0  ;;  %7550 = vmatpush1.bf16.msra.mxu0 %v12518_v63 }
 0xa99   : > { %7551 = vmatprep.subr.bf16.mxu0 %v12523_v2 }
 0xa9c   : > { %7552 = vmatpush1.bf16.msra.mxu0 %v12521_v29  ;;  %v12566_v29 = vld [vmem:[#allocation7 + $0x180] ss:$8 sps:$4 sm:$0xff]  }
 0xa9d   : > { %7553 = vmatprep.subr.bf16.mxu0 %v12526_v27 }
 0xa9f   : > { %10725 = vmatmul.mubr.msk.bf16.gmra.mrb[248].mxu0 %vm3115_vm3, %v12501_v49  ;;  %v12571_v49 = vld [vmem:[#allocation7 + $0x194] ss:$8 sps:$4 sm:$0xff]  }
 0xaa0   : > { %6920 = vmatprep.mubr.bf16.mxu0 %v13042_v0  ;;  %7554 = vmatpush1.bf16.msra.mxu0 %v12524_v53  ;;  %v12569_v53 = vld [vmem:[#allocation7 + $0x190] ss:$8 sps:$4 sm:$0xff]  }
 0xaa1   : > { %7555 = vmatprep.subr.bf16.mxu0 %v12529_v56 }
 0xaa4   : > { %7556 = vmatpush1.bf16.msra.mxu0 %v12527_v43 }
 0xaa5   : > { %7557 = vmatprep.subr.bf16.mxu0 %v12532_v1  ;;  %v12574_v1 = vld [vmem:[#allocation7 + $0x1a4] ss:$8 sps:$4 sm:$0xff]  }
 0xaa7   : > { %10726 = vmatmul.mubr.msk.bf16.gmra.mrb[252].mxu0 %vm3115_vm3, %v12508_v3 }
 0xaa8   : > { %7558 = vmatpush1.bf16.msra.mxu0 %v12530_v4 }
 0xaa9   : > { %7559 = vmatprep.subr.bf16.mxu0 %v12535_v11 }
 0xaac   : > { %7560 = vmatpush1.bf16.msra.mxu0 %v12533_v14  ;;  %v12572_v14 = vld [vmem:[#allocation7 + $0x1a0] ss:$8 sps:$4 sm:$0xff]  }
 0xaad   : > { %7561 = vmatprep.subr.bf16.mxu0 %v12538_v20 }
 0xab0   : > { %7562 = vmatpush1.bf16.msra.mxu0 %v12536_v22  ;;  %v12577_v22 = vld [vmem:[#allocation7 + $0x1b4] ss:$8 sps:$4 sm:$0xff]  }
 0xab1   : > { %7563 = vmatprep.subr.bf16.mxu0 %v12541_v28  ;;  %v12575_v28 = vld [vmem:[#allocation7 + $0x1b0] ss:$8 sps:$4 sm:$0xff]  }
 0xab4   : > { %7564 = vmatpush1.bf16.msra.mxu0 %v12539_v7 }
 0xab5   : > { %7636 = vmatprep.subr.bf16.mxu0 %v12544_v55 }
 0xada   : > { %v6486_v59 = vpop.f32.mrb[172].mxu0 }
 0xadb   : > { %v6488_v10 = vpop.f32.mrb[173].mxu0 }
 0xadc   : > { %v6490_v54 = vpop.f32.mrb[174].mxu0 }
 0xadd   : > { %v6555_v30 = vpack.c.bf16 %v6490_v54, %v6486_v59  ;;  %v6492_v52 = vpop.f32.mrb[175].mxu0  ;;  %v12580_v59 = vld [vmem:[#allocation7 + $0x1c4] ss:$8 sps:$4 sm:$0xff]  }
 0xade   : > { %v6556_v60 = vpack.c.bf16 %v6492_v52, %v6488_v10  ;;  %v12578_v52 = vld [vmem:[#allocation7 + $0x1c0] ss:$8 sps:$4 sm:$0xff]  }
 0xae0   : > { %7565 = vmatprep.mubr.bf16.mxu0 %v6556_v60 }
 0xae1   : > { %7566 = vmatmul.mubr.bf16.vlgmr.msra.gmra.mrb[0].mxu0 %v6555_v30 }
 0xae2   : > { %7637 = vmatpush1.bf16.msra.mxu0 %v12542_v62  ;;  %v6496_v16 = vpop.f32.mrb[176].mxu0  ;;  %v12583_v62 = vld [vmem:[#allocation7 + $0x1d4] ss:$8 sps:$4 sm:$0xff]  }
 0xae3   : > { %7638 = vmatprep.subr.bf16.mxu0 %v12547_v5  ;;  %v6498_v18 = vpop.f32.mrb[177].mxu0  ;;  %v12581_v5 = vld [vmem:[#allocation7 + $0x1d0] ss:$8 sps:$4 sm:$0xff]  }
 0xae4   : > { %v6500_v40 = vpop.f32.mrb[178].mxu0 }
 0xae5   : > { %v6557_v48 = vpack.c.bf16 %v6500_v40, %v6496_v16  ;;  %v6502_v32 = vpop.f32.mrb[179].mxu0  ;;  %v12586_v16 = vld [vmem:[#allocation7 + $0x1e4] ss:$8 sps:$4 sm:$0xff]  }
 0xae6   : > { %7639 = vmatpush1.bf16.msra.mxu0 %v12545_v9  ;;  %v6558_v58 = vpack.c.bf16 %v6502_v32, %v6498_v18  ;;  %v12584_v32 = vld [vmem:[#allocation7 + $0x1e0] ss:$8 sps:$4 sm:$0xff]  }
 0xae7   : > { %7640 = vmatprep.subr.bf16.mxu0 %v12550_v6 }
 0xae8   : > { %7575 = vmatprep.mubr.bf16.mxu0 %v6558_v58  ;;  %v12589_v58 = vld [vmem:[#allocation7 + $0x1f4] ss:$8 sps:$4 sm:$0xff]  }
 0xae9   : > { %7576 = vmatmul.mubr.bf16.gmra.mrb[4].mxu0 %v6557_v48 }
 0xaea   : > { %7641 = vmatpush1.bf16.msra.mxu0 %v12548_v57  ;;  %v6506_v15 = vpop.f32.mrb[180].mxu0 }
 0xaeb   : > { %7642 = vmatprep.subr.bf16.mxu0 %v12553_v61  ;;  %v6508_v21 = vpop.f32.mrb[181].mxu0  ;;  %v12587_v61 = vld [vmem:[#allocation7 + $0x1f0] ss:$8 sps:$4 sm:$0xff]  }
 0xaec   : > { %v6510_v36 = vpop.f32.mrb[182].mxu0 }
 0xaed   : > { %v6559_v8 = vpack.c.bf16 %v6510_v36, %v6506_v15  ;;  %v6512_v45 = vpop.f32.mrb[183].mxu0  ;;  %v12592_v15 = vld [vmem:[#allocation7 + $0x204] ss:$8 sps:$4 sm:$0xff]  }
 0xaee   : > { %7643 = vmatpush1.bf16.msra.mxu0 %v12551_v13  ;;  %v6560_v38 = vpack.c.bf16 %v6512_v45, %v6508_v21  ;;  %v12590_v45 = vld [vmem:[#allocation7 + $0x200] ss:$8 sps:$4 sm:$0xff]  }
 0xaef   : > { %7644 = vmatprep.subr.bf16.mxu0 %v12556_v24 }
 0xaf0   : > { %7585 = vmatprep.mubr.bf16.mxu0 %v6560_v38  ;;  %v12595_v38 = vld [vmem:[#allocation7 + $0x214] ss:$8 sps:$4 sm:$0xff]  }
 0xaf1   : > { %7586 = vmatmul.mubr.bf16.gmra.mrb[8].mxu0 %v6559_v8 }
 0xaf2   : > { %7645 = vmatpush1.bf16.msra.mxu0 %v12554_v33  ;;  %v6516_v31 = vpop.f32.mrb[184].mxu0 }
 0xaf3   : > { %7646 = vmatprep.subr.bf16.mxu0 %v12559_v41  ;;  %v6518_v34 = vpop.f32.mrb[185].mxu0  ;;  %v12593_v41 = vld [vmem:[#allocation7 + $0x210] ss:$8 sps:$4 sm:$0xff]  }
 0xaf4   : > { %v6520_v17 = vpop.f32.mrb[186].mxu0 }
 0xaf5   : > { %v6561_v19 = vpack.c.bf16 %v6520_v17, %v6516_v31  ;;  %v6522_v26 = vpop.f32.mrb[187].mxu0  ;;  %v12598_v31 = vld [vmem:[#allocation7 + $0x224] ss:$8 sps:$4 sm:$0xff]  }
 0xaf6   : > { %7647 = vmatpush1.bf16.msra.mxu0 %v12557_v12  ;;  %v6562_v51 = vpack.c.bf16 %v6522_v26, %v6518_v34  ;;  %v12596_v26 = vld [vmem:[#allocation7 + $0x220] ss:$8 sps:$4 sm:$0xff]  }
 0xaf7   : > { %7648 = vmatprep.subr.bf16.mxu0 %v12562_v37 }
 0xaf8   : > { %7595 = vmatprep.mubr.bf16.mxu0 %v6562_v51  ;;  %v12601_v51 = vld [vmem:[#allocation7 + $0x234] ss:$8 sps:$4 sm:$0xff]  }
 0xaf9   : > { %7596 = vmatmul.mubr.bf16.gmra.mrb[12].mxu0 %v6561_v19 }
 0xafa   : > { %7649 = vmatpush1.bf16.msra.mxu0 %v12560_v46  ;;  %v6526_v35 = vpop.f32.mrb[188].mxu0 }
 0xafb   : > { %7650 = vmatprep.subr.bf16.mxu0 %v12565_v42  ;;  %v6528_v39 = vpop.f32.mrb[189].mxu0  ;;  %v12599_v42 = vld [vmem:[#allocation7 + $0x230] ss:$8 sps:$4 sm:$0xff]  }
 0xafc   : > { %v6530_v50 = vpop.f32.mrb[190].mxu0 }
 0xafd   : > { %v6563_v63 = vpack.c.bf16 %v6530_v50, %v6526_v35  ;;  %v6532_v2 = vpop.f32.mrb[191].mxu0  ;;  %v12604_v35 = vld [vmem:[#allocation7 + $0x244] ss:$8 sps:$4 sm:$0xff]  }
 0xafe   : > { %7651 = vmatpush1.bf16.msra.mxu0 %v12563_v44  ;;  %v6564_v27 = vpack.c.bf16 %v6532_v2, %v6528_v39  ;;  %v12602_v2 = vld [vmem:[#allocation7 + $0x240] ss:$8 sps:$4 sm:$0xff]  }
 0xaff   : > { %7652 = vmatprep.subr.bf16.mxu0 %v12568_v47 }
 0xb00   : > { %7605 = vmatprep.mubr.bf16.mxu0 %v6564_v27  ;;  %v12607_v27 = vld [vmem:[#allocation7 + $0x254] ss:$8 sps:$4 sm:$0xff]  }
 0xb01   : > { %7606 = vmatmul.mubr.bf16.gmra.mrb[16].mxu0 %v6563_v63 }
 0xb02   : > { %7653 = vmatpush1.bf16.msra.mxu0 %v12566_v29  ;;  %v6536_v56 = vpop.f32.mrb[192].mxu0 }
 0xb03   : > { %7654 = vmatprep.subr.bf16.mxu0 %v12571_v49  ;;  %v6538_v43 = vpop.f32.mrb[193].mxu0  ;;  %v12605_v49 = vld [vmem:[#allocation7 + $0x250] ss:$8 sps:$4 sm:$0xff]  }
 0xb04   : > { %v6540_v3 = vpop.f32.mrb[194].mxu0 }
 0xb05   : > { %v6565_v4 = vpack.c.bf16 %v6540_v3, %v6536_v56  ;;  %v6542_v11 = vpop.f32.mrb[195].mxu0  ;;  %v12610_v56 = vld [vmem:[#allocation7 + $0x264] ss:$8 sps:$4 sm:$0xff]  }
 0xb06   : > { %7655 = vmatpush1.bf16.msra.mxu0 %v12569_v53  ;;  %v6566_v20 = vpack.c.bf16 %v6542_v11, %v6538_v43  ;;  %v12608_v11 = vld [vmem:[#allocation7 + $0x260] ss:$8 sps:$4 sm:$0xff]  }
 0xb07   : > { %7656 = vmatprep.subr.bf16.mxu0 %v12574_v1 }
 0xb08   : > { %7615 = vmatprep.mubr.bf16.mxu0 %v6566_v20  ;;  %v12613_v20 = vld [vmem:[#allocation7 + $0x274] ss:$8 sps:$4 sm:$0xff]  }
 0xb09   : > { %7616 = vmatmul.mubr.bf16.gmra.mrb[20].mxu0 %v6565_v4 }
 0xb0a   : > { %7657 = vmatpush1.bf16.msra.mxu0 %v12572_v14  ;;  %v6546_v7 = vpop.f32.mrb[196].mxu0 }
 0xb0b   : > { %7658 = vmatprep.subr.bf16.mxu0 %v12577_v22  ;;  %v6548_v55 = vpop.f32.mrb[197].mxu0  ;;  %v12611_v22 = vld [vmem:[#allocation7 + $0x270] ss:$8 sps:$4 sm:$0xff]  }
 0xb0c   : > { %v6550_v10 = vpop.f32.mrb[198].mxu0 }
 0xb0d   : > { %v6567_v54 = vpack.c.bf16 %v6550_v10, %v6546_v7  ;;  %v6552_v30 = vpop.f32.mrb[199].mxu0  ;;  %v12616_v7 = vld [vmem:[#allocation7 + $0x284] ss:$8 sps:$4 sm:$0xff]  }
 0xb0e   : > { %7659 = vmatpush1.bf16.msra.mxu0 %v12575_v28  ;;  %v6568_v60 = vpack.c.bf16 %v6552_v30, %v6548_v55  ;;  %v12614_v30 = vld [vmem:[#allocation7 + $0x280] ss:$8 sps:$4 sm:$0xff]  }
 0xb0f   : > { %7660 = vmatprep.subr.bf16.mxu0 %v12580_v59 }
 0xb10   : > { %7625 = vmatprep.mubr.bf16.mxu0 %v6568_v60  ;;  %v12619_v60 = vld [vmem:[#allocation7 + $0x294] ss:$8 sps:$4 sm:$0xff]  }
 0xb11   : > { %7626 = vmatmul.mubr.bf16.gmra.mrb[24].mxu0 %v6567_v54 }
 0xb12   : > { %7661 = vmatpush1.bf16.msra.mxu0 %v12578_v52  ;;  %v6674_v9 = vpop.f32.mrb[200].mxu0 }
 0xb13   : > { %7662 = vmatprep.subr.bf16.mxu0 %v12583_v62  ;;  %v6676_v18 = vpop.f32.mrb[201].mxu0  ;;  %v12617_v62 = vld [vmem:[#allocation7 + $0x290] ss:$8 sps:$4 sm:$0xff]  }
 0xb14   : > { %v6678_v6 = vpop.f32.mrb[202].mxu0 }
 0xb15   : > { %v6743_v40 = vpack.c.bf16 %v6678_v6, %v6674_v9  ;;  %v6680_v48 = vpop.f32.mrb[203].mxu0  ;;  %v12622_v9 = vld [vmem:[#allocation7 + $0x2a4] ss:$8 sps:$4 sm:$0xff]  }
 0xb16   : > { %7663 = vmatpush1.bf16.msra.mxu0 %v12581_v5  ;;  %v6744_v57 = vpack.c.bf16 %v6680_v48, %v6676_v18  ;;  %v12620_v48 = vld [vmem:[#allocation7 + $0x2a0] ss:$8 sps:$4 sm:$0xff]  }
 0xb17   : > { %7664 = vmatprep.subr.bf16.mxu0 %v12586_v16 }
 0xb18   : > { %7668 = vmatprep.mubr.bf16.mxu0 %v6744_v57  ;;  %v12625_v57 = vld [vmem:[#allocation7 + $0x2b4] ss:$8 sps:$4 sm:$0xff]  }
 0xb1a   : > { %7665 = vmatpush1.bf16.msra.mxu0 %v12584_v32  ;;  %v6684_v13 = vpop.f32.mrb[204].mxu0 }
 0xb1b   : > { %7666 = vmatprep.subr.bf16.mxu0 %v12589_v58  ;;  %v6686_v21 = vpop.f32.mrb[205].mxu0  ;;  %v12623_v58 = vld [vmem:[#allocation7 + $0x2b0] ss:$8 sps:$4 sm:$0xff]  }
 0xb1c   : > { %v6688_v24 = vpop.f32.mrb[206].mxu0 }
 0xb1d   : > { %v6745_v36 = vpack.c.bf16 %v6688_v24, %v6684_v13  ;;  %v6690_v8 = vpop.f32.mrb[207].mxu0  ;;  %v12628_v13 = vld [vmem:[#allocation7 + $0x2c4] ss:$8 sps:$4 sm:$0xff]  }
 0xb1e   : > { %7667 = vmatpush1.bf16.msra.mxu0 %v12587_v61  ;;  %v6746_v33 = vpack.c.bf16 %v6690_v8, %v6686_v21  ;;  %v12626_v8 = vld [vmem:[#allocation7 + $0x2c0] ss:$8 sps:$4 sm:$0xff]  }
 0xb1f   : > { %7739 = vmatprep.subr.bf16.mxu0 %v12592_v15 }
 0xb21   : > { %7669 = vmatmul.mubr.bf16.vlgmr.msra.gmra.mrb[0].mxu0 %v6743_v40 }
 0xb22   : > { %7740 = vmatpush1.bf16.msra.mxu0 %v12590_v45  ;;  %7678 = vmatprep.mubr.bf16.mxu0 %v6746_v33  ;;  %v6694_v12 = vpop.f32.mrb[208].mxu0  ;;  %v12631_v33 = vld [vmem:[#allocation7 + $0x2d4] ss:$8 sps:$4 sm:$0xff]  }
 0xb23   : > { %7741 = vmatprep.subr.bf16.mxu0 %v12595_v38  ;;  %v6696_v34 = vpop.f32.mrb[209].mxu0  ;;  %v12629_v38 = vld [vmem:[#allocation7 + $0x2d0] ss:$8 sps:$4 sm:$0xff]  }
 0xb24   : > { %v6698_v37 = vpop.f32.mrb[210].mxu0 }
 0xb25   : > { %v6747_v17 = vpack.c.bf16 %v6698_v37, %v6694_v12  ;;  %v6700_v19 = vpop.f32.mrb[211].mxu0  ;;  %v12634_v12 = vld [vmem:[#allocation7 + $0x2e4] ss:$8 sps:$4 sm:$0xff]  }
 0xb26   : > { %7742 = vmatpush1.bf16.msra.mxu0 %v12593_v41  ;;  %v6748_v46 = vpack.c.bf16 %v6700_v19, %v6696_v34  ;;  %v12632_v19 = vld [vmem:[#allocation7 + $0x2e0] ss:$8 sps:$4 sm:$0xff]  }
 0xb27   : > { %7743 = vmatprep.subr.bf16.mxu0 %v12598_v31 }
 0xb29   : > { %7679 = vmatmul.mubr.bf16.gmra.mrb[4].mxu0 %v6745_v36 }
 0xb2a   : > { %7744 = vmatpush1.bf16.msra.mxu0 %v12596_v26  ;;  %7688 = vmatprep.mubr.bf16.mxu0 %v6748_v46  ;;  %v6704_v44 = vpop.f32.mrb[212].mxu0  ;;  %v12637_v46 = vld [vmem:[#allocation7 + $0x2f4] ss:$8 sps:$4 sm:$0xff]  }
 0xb2b   : > { %7745 = vmatprep.subr.bf16.mxu0 %v12601_v51  ;;  %v6706_v39 = vpop.f32.mrb[213].mxu0  ;;  %v12635_v51 = vld [vmem:[#allocation7 + $0x2f0] ss:$8 sps:$4 sm:$0xff]  }
 0xb2c   : > { %v6708_v47 = vpop.f32.mrb[214].mxu0 }
 0xb2d   : > { %v6749_v50 = vpack.c.bf16 %v6708_v47, %v6704_v44  ;;  %v6710_v63 = vpop.f32.mrb[215].mxu0 }
 0xb2e   : > { %7746 = vmatpush1.bf16.msra.mxu0 %v12599_v42  ;;  %v6750_v29 = vpack.c.bf16 %v6710_v63, %v6706_v39 }
 0xb2f   : > { %7747 = vmatprep.subr.bf16.mxu0 %v12604_v35 }
 0xb31   : > { %7689 = vmatmul.mubr.bf16.gmra.mrb[8].mxu0 %v6747_v17 }
 0xb32   : > { %7748 = vmatpush1.bf16.msra.mxu0 %v12602_v2  ;;  %7698 = vmatprep.mubr.bf16.mxu0 %v6750_v29  ;;  %v6714_v53 = vpop.f32.mrb[216].mxu0 }
 0xb33   : > { %7749 = vmatprep.subr.bf16.mxu0 %v12607_v27  ;;  %v6716_v43 = vpop.f32.mrb[217].mxu0 }
 0xb34   : > { %v6718_v1 = vpop.f32.mrb[218].mxu0 }
 0xb35   : > { %v6751_v3 = vpack.c.bf16 %v6718_v1, %v6714_v53  ;;  %v6720_v4 = vpop.f32.mrb[219].mxu0 }
 0xb36   : > { %7750 = vmatpush1.bf16.msra.mxu0 %v12605_v49  ;;  %v6752_v14 = vpack.c.bf16 %v6720_v4, %v6716_v43 }
 0xb37   : > { %7751 = vmatprep.subr.bf16.mxu0 %v12610_v56 }
 0xb39   : > { %7699 = vmatmul.mubr.bf16.gmra.mrb[12].mxu0 %v6749_v50 }
 0xb3a   : > { %7752 = vmatpush1.bf16.msra.mxu0 %v12608_v11  ;;  %7708 = vmatprep.mubr.bf16.mxu0 %v6752_v14  ;;  %v6724_v28 = vpop.f32.mrb[220].mxu0 }
 0xb3b   : > { %7753 = vmatprep.subr.bf16.mxu0 %v12613_v20  ;;  %v6726_v55 = vpop.f32.mrb[221].mxu0 }
 0xb3c   : > { %v6728_v59 = vpop.f32.mrb[222].mxu0 }
 0xb3d   : > { %v6753_v10 = vpack.c.bf16 %v6728_v59, %v6724_v28  ;;  %v6730_v54 = vpop.f32.mrb[223].mxu0 }
 0xb3e   : > { %7754 = vmatpush1.bf16.msra.mxu0 %v12611_v22  ;;  %v6754_v52 = vpack.c.bf16 %v6730_v54, %v6726_v55 }
 0xb3f   : > { %7755 = vmatprep.subr.bf16.mxu0 %v12616_v7 }
 0xb41   : > { %7709 = vmatmul.mubr.bf16.gmra.mrb[16].mxu0 %v6751_v3 }
 0xb42   : > { %7756 = vmatpush1.bf16.msra.mxu0 %v12614_v30  ;;  %7718 = vmatprep.mubr.bf16.mxu0 %v6754_v52  ;;  %v6734_v5 = vpop.f32.mrb[224].mxu0 }
 0xb43   : > { %7757 = vmatprep.subr.bf16.mxu0 %v12619_v60  ;;  %v6736_v16 = vpop.f32.mrb[225].mxu0 }
 0xb44   : > { %v6738_v18 = vpop.f32.mrb[226].mxu0 }
 0xb45   : > { %v6755_v6 = vpack.c.bf16 %v6738_v18, %v6734_v5  ;;  %v6740_v40 = vpop.f32.mrb[227].mxu0 }
 0xb46   : > { %7758 = vmatpush1.bf16.msra.mxu0 %v12617_v62  ;;  %v6756_v32 = vpack.c.bf16 %v6740_v40, %v6736_v16  ;;  %v7041_v62 = vld [vmem:[%s16023_s11] sm:$0x3] }
 0xb47   : > { %7759 = vmatprep.subr.bf16.mxu0 %v12622_v9  ;;  %v15201_v5 = vrot.slane %v7041_v62, %v13508_v23  ;;  %v15204_v9 = vrot.slane %v7041_v62, %v13513_v25 }
 0xb49   : > { %7719 = vmatmul.mubr.bf16.gmra.mrb[20].mxu0 %v6753_v10 }
 0xb4a   : > { %7760 = vmatpush1.bf16.msra.mxu0 %v12620_v48  ;;  %7728 = vmatprep.mubr.bf16.mxu0 %v6756_v32  ;;  %v6862_v61 = vpop.f32.mrb[228].mxu0 }
 0xb4b   : > { %7761 = vmatprep.subr.bf16.mxu0 %v12625_v57  ;;  %v6864_v15 = vpop.f32.mrb[229].mxu0 }
 0xb4c   : > { %v6866_v21 = vpop.f32.mrb[230].mxu0 }
 0xb4d   : > { %v6931_v24 = vpack.c.bf16 %v6866_v21, %v6862_v61  ;;  %v6868_v36 = vpop.f32.mrb[231].mxu0 }
 0xb4e   : > { %7762 = vmatpush1.bf16.msra.mxu0 %v12623_v58  ;;  %v6932_v45 = vpack.c.bf16 %v6868_v36, %v6864_v15 }
 0xb4f   : > { %7763 = vmatprep.subr.bf16.mxu0 %v12628_v13 }
 0xb51   : > { %7729 = vmatmul.mubr.bf16.gmra.mrb[24].mxu0 %v6755_v6 }
 0xb52   : > { %7764 = vmatpush1.bf16.msra.mxu0 %v12626_v8  ;;  %7771 = vmatprep.mubr.bf16.mxu0 %v6932_v45  ;;  %v6872_v41 = vpop.f32.mrb[232].mxu0 }
 0xb53   : > { %7765 = vmatprep.subr.bf16.mxu0 %v12631_v33  ;;  %v6874_v31 = vpop.f32.mrb[233].mxu0 }
 0xb54   : > { %v6876_v34 = vpop.f32.mrb[234].mxu0 }
 0xb55   : > { %v6933_v37 = vpack.c.bf16 %v6876_v34, %v6872_v41  ;;  %v6878_v17 = vpop.f32.mrb[235].mxu0 }
 0xb56   : > { %7766 = vmatpush1.bf16.msra.mxu0 %v12629_v38  ;;  %v6934_v26 = vpack.c.bf16 %v6878_v17, %v6874_v31 }
 0xb57   : > { %7767 = vmatprep.subr.bf16.mxu0 %v12634_v12 }
 0xb5a   : > { %7768 = vmatpush1.bf16.msra.mxu0 %v12632_v19  ;;  %v6882_v42 = vpop.f32.mrb[236].mxu0 }
 0xb5b   : > { %7769 = vmatprep.subr.bf16.mxu0 %v12637_v46  ;;  %v6884_v44 = vpop.f32.mrb[237].mxu0 }
 0xb5c   : > { %v6886_v35 = vpop.f32.mrb[238].mxu0 }
 0xb5d   : > { %v6935_v39 = vpack.c.bf16 %v6886_v35, %v6882_v42  ;;  %v6888_v47 = vpop.f32.mrb[239].mxu0 }
 0xb5e   : > { %7770 = vmatpush1.bf16.msra.mxu0 %v12635_v51  ;;  %v6936_v50 = vpack.c.bf16 %v6888_v47, %v6884_v44 }
 0xb61   : > { %7772 = vmatmul.mubr.bf16.vlgmr.msra.gmra.mrb[0].mxu0 %v6931_v24 }
 0xb62   : > { %7781 = vmatprep.mubr.bf16.mxu0 %v6934_v26  ;;  %v6892_v63 = vpop.f32.mrb[240].mxu0 }
 0xb63   : > { %v6894_v2 = vpop.f32.mrb[241].mxu0 }
 0xb64   : > { %v6896_v29 = vpop.f32.mrb[242].mxu0 }
 0xb65   : > { %v6937_v27 = vpack.c.bf16 %v6896_v29, %v6892_v63  ;;  %v6898_v49 = vpop.f32.mrb[243].mxu0 }
 0xb66   : > { %v6938_v53 = vpack.c.bf16 %v6898_v49, %v6894_v2 }
 0xb69   : > { %7782 = vmatmul.mubr.bf16.gmra.mrb[4].mxu0 %v6933_v37 }
 0xb6a   : > { %7791 = vmatprep.mubr.bf16.mxu0 %v6936_v50  ;;  %v6902_v56 = vpop.f32.mrb[244].mxu0 }
 0xb6b   : > { %v6904_v43 = vpop.f32.mrb[245].mxu0 }
 0xb6c   : > { %v6906_v1 = vpop.f32.mrb[246].mxu0 }
 0xb6d   : > { %v6939_v3 = vpack.c.bf16 %v6906_v1, %v6902_v56  ;;  %v6908_v4 = vpop.f32.mrb[247].mxu0 }
 0xb6e   : > { %v6940_v11 = vpack.c.bf16 %v6908_v4, %v6904_v43 }
 0xb71   : > { %7792 = vmatmul.mubr.bf16.gmra.mrb[8].mxu0 %v6935_v39 }
 0xb72   : > { %7801 = vmatprep.mubr.bf16.mxu0 %v6938_v53  ;;  %v6912_v14 = vpop.f32.mrb[248].mxu0 }
 0xb73   : > { %v6914_v20 = vpop.f32.mrb[249].mxu0 }
 0xb74   : > { %v6916_v22 = vpop.f32.mrb[250].mxu0 }
 0xb75   : > { %v6941_v28 = vpack.c.bf16 %v6916_v22, %v6912_v14  ;;  %v6918_v7 = vpop.f32.mrb[251].mxu0 }
 0xb76   : > { %v6942_v55 = vpack.c.bf16 %v6918_v7, %v6914_v20 }
 0xb79   : > { %7802 = vmatmul.mubr.bf16.gmra.mrb[12].mxu0 %v6937_v27 }
 0xb7a   : > { %7811 = vmatprep.mubr.bf16.mxu0 %v6940_v11  ;;  %v6922_v59 = vpop.f32.mrb[252].mxu0 }
 0xb7b   : > { %v6924_v10 = vpop.f32.mrb[253].mxu0 }
 0xb7c   : > { %v6926_v54 = vpop.f32.mrb[254].mxu0 }
 0xb7d   : > { %v6943_v30 = vpack.c.bf16 %v6926_v54, %v6922_v59  ;;  %v6928_v52 = vpop.f32.mrb[255].mxu0 }
 0xb7e   : > { %v6944_v60 = vpack.c.bf16 %v6928_v52, %v6924_v10 }
 0xb81   : > { %7812 = vmatmul.mubr.bf16.gmra.mrb[16].mxu0 %v6939_v3 }
 0xb82   : > { %7821 = vmatprep.mubr.bf16.mxu0 %v6942_v55 }
 0xb89   : > { %7822 = vmatmul.mubr.bf16.gmra.mrb[20].mxu0 %v6941_v28 }
 0xb8a   : > { %7831 = vmatprep.mubr.bf16.mxu0 %v6944_v60 }
 0xb91   : > { %7832 = vmatmul.mubr.bf16.gmra.mrb[24].mxu0 %v6943_v30 }
 0xb92   : > { %8056 = vmatprep.mubr.bf16.mxu0 %v13042_v0 }
 0xc34   : > { %v7773_v16 = vpop.f32.mrb[0].mxu0 }
 0xc35   : > { %v11587_v18 = vadd.f32 %v7773_v16, %v15201_v5  ;;  %v7775_v6 = vpop.f32.mrb[1].mxu0 }
 0xc36   : > { %v11588_v40 = vadd.f32 %v7775_v6, %v15204_v9  ;;  %v7777_v48 = vpop.f32.mrb[2].mxu0 }
 0xc37   : > { %v11589_v32 = vadd.f32 %v7777_v48, %v15201_v5  ;;  %v7779_v57 = vpop.f32.mrb[3].mxu0  ;;  %v7842_v61 = vmax.f32 %v11587_v18, 0.0 }
 0xc38   : > { %v11590_v58 = vadd.f32 %v7779_v57, %v15204_v9  ;;  %v7843_v15 = vmax.f32 %v11588_v40, 0.0 }
 0xc39   : > { %v7844_v13 = vmax.f32 %v11589_v32, 0.0 }
 0xc3a   : > { %v7845_v23 = vmax.f32 %v11590_v58, 0.0 }
 0xc3b   : > { %v15210_v21 = vpack.c.bf16 %v7844_v13, %v7842_v61 }
 0xc3c   : > { %v15212_v25 = vpack.c.bf16 %v7845_v23, %v7843_v15  ;;  %v7783_v24 = vpop.f32.mrb[4].mxu0 }
 0xc3d   : > { %v11591_v36 = vadd.f32 %v7783_v24, %v15201_v5  ;;  %v7785_v8 = vpop.f32.mrb[5].mxu0 }
 0xc3e   : > { %v11592_v45 = vadd.f32 %v7785_v8, %v15204_v9  ;;  %v7787_v33 = vpop.f32.mrb[6].mxu0  ;;  %8024 = vmatprep.subr.bf16.mxu0 %v15212_v25  ;;  %11517 = vmatprep.subr.bf16.mxu1 %v15212_v25 }
 0xc3f   : > { %v11593_v38 = vadd.f32 %v7787_v33, %v15201_v5  ;;  %v7789_v41 = vpop.f32.mrb[7].mxu0  ;;  %8025 = vmatpush1.bf16.msra.mxu0 %v15210_v21  ;;  %11524 = vmatpush1.bf16.msra.mxu1 %v15210_v21  ;;  %v7846_v31 = vmax.f32 %v11591_v36, 0.0 }
 0xc40   : > { %v11594_v12 = vadd.f32 %v7789_v41, %v15204_v9  ;;  %v7847_v37 = vmax.f32 %v11592_v45, 0.0 }
 0xc41   : > { %v7848_v34 = vmax.f32 %v11593_v38, 0.0 }
 0xc42   : > { %v7849_v17 = vmax.f32 %v11594_v12, 0.0 }
 0xc43   : > { %v15222_v19 = vpack.c.bf16 %v7848_v34, %v7846_v31 }
 0xc44   : > { %v15224_v26 = vpack.c.bf16 %v7849_v17, %v7847_v37  ;;  %v7793_v46 = vpop.f32.mrb[8].mxu0 }
 0xc45   : > { %v11595_v51 = vadd.f32 %v7793_v46, %v15201_v5  ;;  %v7795_v42 = vpop.f32.mrb[9].mxu0 }
 0xc46   : > { %v11596_v44 = vadd.f32 %v7795_v42, %v15204_v9  ;;  %v7797_v35 = vpop.f32.mrb[10].mxu0  ;;  %8026 = vmatprep.subr.bf16.mxu0 %v15224_v26  ;;  %11518 = vmatprep.subr.bf16.mxu1 %v15224_v26 }
 0xc47   : > { %v11597_v39 = vadd.f32 %v7797_v35, %v15201_v5  ;;  %v7799_v47 = vpop.f32.mrb[11].mxu0  ;;  %8027 = vmatpush1.bf16.msra.mxu0 %v15222_v19  ;;  %11525 = vmatpush1.bf16.msra.mxu1 %v15222_v19  ;;  %v7850_v63 = vmax.f32 %v11595_v51, 0.0 }
 0xc48   : > { %v11598_v50 = vadd.f32 %v7799_v47, %v15204_v9  ;;  %v7851_v29 = vmax.f32 %v11596_v44, 0.0 }
 0xc49   : > { %v7852_v2 = vmax.f32 %v11597_v39, 0.0 }
 0xc4a   : > { %v7853_v27 = vmax.f32 %v11598_v50, 0.0 }
 0xc4b   : > { %v15234_v49 = vpack.c.bf16 %v7852_v2, %v7850_v63 }
 0xc4c   : > { %v15236_v53 = vpack.c.bf16 %v7853_v27, %v7851_v29  ;;  %v7803_v56 = vpop.f32.mrb[12].mxu0 }
 0xc4d   : > { %v11599_v43 = vadd.f32 %v7803_v56, %v15201_v5  ;;  %v7805_v1 = vpop.f32.mrb[13].mxu0 }
 0xc4e   : > { %v11600_v3 = vadd.f32 %v7805_v1, %v15204_v9  ;;  %v7807_v4 = vpop.f32.mrb[14].mxu0  ;;  %8028 = vmatprep.subr.bf16.mxu0 %v15236_v53  ;;  %11519 = vmatprep.subr.bf16.mxu1 %v15236_v53  ;;  %v12639_v1 = vld [vmem:[#allocation9 + $0x30] sm:$0xff]  }
 0xc4f   : > { %v11601_v11 = vadd.f32 %v7807_v4, %v15201_v5  ;;  %v7809_v14 = vpop.f32.mrb[15].mxu0  ;;  %8029 = vmatpush1.bf16.msra.mxu0 %v15234_v49  ;;  %11526 = vmatpush1.bf16.msra.mxu1 %v15234_v49  ;;  %v7854_v22 = vmax.f32 %v11599_v43, 0.0  ;;  %v12638_v43 = vld [vmem:[#allocation9] sm:$0xff]   ;;  %v12648_v4 = vld [vmem:[#allocation9 + $0x28] sm:$0xff]  }
 0xc50   : > { %v11602_v20 = vadd.f32 %v7809_v14, %v15204_v9  ;;  %v7855_v7 = vmax.f32 %v11600_v3, 0.0  ;;  %v12647_v3 = vld [vmem:[#allocation9 + $0x50] sm:$0xff]   ;;  %v12650_v14 = vld [vmem:[#allocation9 + $0x60] sm:$0xff]  }
 0xc51   : > { %v7856_v28 = vmax.f32 %v11601_v11, 0.0  ;;  %v12649_v11 = vld [vmem:[#allocation9 + $0x58] sm:$0xff]  }
 0xc52   : > { %v7857_v55 = vmax.f32 %v11602_v20, 0.0  ;;  %v12660_v20 = vld [vmem:[#allocation9 + $0xe0] sm:$0xff]  }
 0xc53   : > { %v15246_v59 = vpack.c.bf16 %v7856_v28, %v7854_v22  ;;  %v12651_v22 = vld [vmem:[#allocation9 + $0x68] sm:$0xff]  }
 0xc54   : > { %v15248_v10 = vpack.c.bf16 %v7857_v55, %v7855_v7  ;;  %v7813_v54 = vpop.f32.mrb[16].mxu0  ;;  %v12663_v28 = vld [vmem:[#allocation9 + $0xe8] sm:$0xff]   ;;  %v12652_v7 = vld [vmem:[#allocation9 + $0x70] sm:$0xff]  }
 0xc55   : > { %v11603_v30 = vadd.f32 %v7813_v54, %v15201_v5  ;;  %v7815_v52 = vpop.f32.mrb[17].mxu0  ;;  %v12667_v55 = vld [vmem:[#allocation9 + $0xf0] sm:$0xff]   ;;  %v12665_v54 = vld [vmem:[#allocation10 + $0x8] sm:$0xff]  }
 0xc56   : > { %v11604_v60 = vadd.f32 %v7815_v52, %v15204_v9  ;;  %v7817_v62 = vpop.f32.mrb[18].mxu0  ;;  %8030 = vmatprep.subr.bf16.mxu0 %v15248_v10  ;;  %11520 = vmatprep.subr.bf16.mxu1 %v15248_v10  ;;  %v12653_v52 = vld [vmem:[#allocation9 + $0x78] sm:$0xff]  }
 0xc57   : > { %v11605_v16 = vadd.f32 %v7817_v62, %v15201_v5  ;;  %v7819_v18 = vpop.f32.mrb[19].mxu0  ;;  %8031 = vmatpush1.bf16.msra.mxu0 %v15246_v59  ;;  %11527 = vmatpush1.bf16.msra.mxu1 %v15246_v59  ;;  %v7858_v40 = vmax.f32 %v11603_v30, 0.0  ;;  %v12670_v30 = vld [vmem:[#allocation10 + $0x50] sm:$0xff]  }
 0xc58   : > { %v11606_v6 = vadd.f32 %v7819_v18, %v15204_v9  ;;  %v7859_v32 = vmax.f32 %v11604_v60, 0.0  ;;  %v12669_v60 = vld [vmem:[#allocation9 + $0xf8] sm:$0xff]   ;;  %v12671_v62 = vld [vmem:[#allocation10 + $0x10] sm:$0xff]   ;;  %v12677_v18 = vld [vmem:[#allocation10 + $0x18] sm:$0xff]  }
 0xc59   : > { %v7860_v48 = vmax.f32 %v11605_v16, 0.0  ;;  %v12676_v16 = vld [vmem:[#allocation10 + $0x58] sm:$0xff]  }
 0xc5a   : > { %v7861_v57 = vmax.f32 %v11606_v6, 0.0  ;;  %v12680_v6 = vld [vmem:[#allocation10 + $0x60] sm:$0xff]  }
 0xc5b   : > { %v15258_v58 = vpack.c.bf16 %v7860_v48, %v7858_v40  ;;  %v12654_v40 = vld [vmem:[#allocation9 + $0x80] sm:$0xff]  }
 0xc5c   : > { %v15260_v61 = vpack.c.bf16 %v7861_v57, %v7859_v32  ;;  %v7823_v13 = vpop.f32.mrb[20].mxu0  ;;  %v12673_v48 = vld [vmem:[#allocation9 + $0x100] sm:$0xff]   ;;  %v12683_v32 = vld [vmem:[#allocation10 + $0x20] sm:$0xff]   ;;  %v12685_v57 = vld [vmem:[#allocation10 + $0x68] sm:$0xff]  }
 0xc5d   : > { %v11607_v15 = vadd.f32 %v7823_v13, %v15201_v5  ;;  %v7825_v23 = vpop.f32.mrb[21].mxu0  ;;  %v12655_v13 = vld [vmem:[#allocation9 + $0x88] sm:$0xff]  }
 0xc5e   : > { %v11608_v24 = vadd.f32 %v7825_v23, %v15204_v9  ;;  %v7827_v36 = vpop.f32.mrb[22].mxu0  ;;  %8032 = vmatprep.subr.bf16.mxu0 %v15260_v61  ;;  %11521 = vmatprep.subr.bf16.mxu1 %v15260_v61  ;;  %v12690_v23 = vld [vmem:[#allocation10 + $0x30] sm:$0xff]  }
 0xc5f   : > { %v11609_v8 = vadd.f32 %v7827_v36, %v15201_v5  ;;  %v7829_v45 = vpop.f32.mrb[23].mxu0  ;;  %8033 = vmatpush1.bf16.msra.mxu0 %v15258_v58  ;;  %11528 = vmatpush1.bf16.msra.mxu1 %v15258_v58  ;;  %v7862_v38 = vmax.f32 %v11607_v15, 0.0  ;;  %v12675_v15 = vld [vmem:[#allocation9 + $0x108] sm:$0xff]  }
 0xc60   : > { %v11610_v33 = vadd.f32 %v7829_v45, %v15204_v9  ;;  %v7863_v12 = vmax.f32 %v11608_v24, 0.0  ;;  %v12693_v24 = vld [vmem:[#allocation10 + $0x78] sm:$0xff]   ;;  %v12679_v45 = vld [vmem:[#allocation9 + $0x110] sm:$0xff]  }
 0xc61   : > { %v7864_v41 = vmax.f32 %v11609_v8, 0.0  ;;  %v12694_v36 = vld [vmem:[#allocation10 + $0x38] sm:$0xff]   ;;  %v12656_v8 = vld [vmem:[#allocation9 + $0x90] sm:$0xff]  }
 0xc62   : > { %v7865_v31 = vmax.f32 %v11610_v33, 0.0  ;;  %v12696_v33 = vld [vmem:[#allocation10 + $0xc0] sm:$0xff]  }
 0xc63   : > { %v15270_v34 = vpack.c.bf16 %v7864_v41, %v7862_v38  ;;  %v12697_v38 = vld [vmem:[#allocation10 + $0x80] sm:$0xff]  }
 0xc64   : > { %v7881_v37 = vpack.c.bf16 %v7865_v31, %v7863_v12  ;;  %v7833_v17 = vpop.f32.mrb[24].mxu0  ;;  %v12698_v41 = vld [vmem:[#allocation10 + $0x140] sm:$0xff]   ;;  %v12657_v12 = vld [vmem:[#allocation9 + $0x98] sm:$0xff]  }
 0xc65   : > { %v11611_v46 = vadd.f32 %v7833_v17, %v15201_v5  ;;  %v7835_v51 = vpop.f32.mrb[25].mxu0  ;;  %v12682_v31 = vld [vmem:[#allocation9 + $0x118] sm:$0xff]   ;;  %v12684_v17 = vld [vmem:[#allocation9 + $0x120] sm:$0xff]  }
 0xc66   : > { %v11612_v42 = vadd.f32 %v7835_v51, %v15204_v9  ;;  %v7837_v44 = vpop.f32.mrb[26].mxu0  ;;  %8034 = vmatprep.subr.bf16.mxu0 %v7881_v37  ;;  %11522 = vmatprep.subr.bf16.mxu1 %v7881_v37  ;;  %v12662_v51 = vld [vmem:[#allocation9 + $0xa8] sm:$0xff]  }
 0xc67   : > { %v11613_v35 = vadd.f32 %v7837_v44, %v15201_v5  ;;  %v7839_v39 = vpop.f32.mrb[27].mxu0  ;;  %8035 = vmatpush1.bf16.msra.mxu0 %v15270_v34  ;;  %11529 = vmatpush1.bf16.msra.mxu1 %v15270_v34  ;;  %v7866_v50 = vmax.f32 %v11611_v46, 0.0  ;;  %v12640_v5 = vld [vmem:[#allocation9 + $0x8] sm:$0xff]   ;;  %v12701_v46 = vld [vmem:[#allocation10 + $0x88] sm:$0xff]   ;;  %v12704_v44 = vld [vmem:[#allocation10 + $0xd0] sm:$0xff]  }
 0xc68   : > { %v11614_v47 = vadd.f32 %v7839_v39, %v15204_v9  ;;  %v7867_v2 = vmax.f32 %v11612_v42, 0.0  ;;  %v12641_v9 = vld [vmem:[#allocation9 + $0x38] sm:$0xff]   ;;  %v12687_v42 = vld [vmem:[#allocation9 + $0x128] sm:$0xff]   ;;  %v12666_v39 = vld [vmem:[#allocation9 + $0xb0] sm:$0xff]  }
 0xc69   : > { %v7868_v63 = vmax.f32 %v11613_v35, 0.0  ;;  %v12705_v35 = vld [vmem:[#allocation10 + $0x90] sm:$0xff]  }
 0xc6a   : > { %v7869_v29 = vmax.f32 %v11614_v47, 0.0  ;;  %v12688_v47 = vld [vmem:[#allocation9 + $0x130] sm:$0xff]  }
 0xc6b   : > { %v7882_v27 = vpack.c.bf16 %v7868_v63, %v7866_v50  ;;  %v12708_v50 = vld [vmem:[#allocation10 + $0xd8] sm:$0xff]  }
 0xc6c   : > { %v7883_v56 = vpack.c.bf16 %v7869_v29, %v7867_v2  ;;  %v12709_v63 = vld [vmem:[#allocation10 + $0x98] sm:$0xff]   ;;  %v12668_v2 = vld [vmem:[#allocation9 + $0xb8] sm:$0xff]  }
 0xc6d   : > { %v12691_v29 = vld [vmem:[#allocation9 + $0x138] sm:$0xff]  }
 0xc6e   : > { %8036 = vmatprep.subr.bf16.mxu0 %v7883_v56  ;;  %11523 = vmatprep.subr.bf16.mxu1 %v7883_v56 }
 0xc6f   : > { %8037 = vmatpush1.bf16.msra.mxu0 %v7882_v27  ;;  %11530 = vmatpush1.bf16.msra.mxu1 %v7882_v27 }
 0xc70   : > { %8366 = vmatprep.subr.bf16.mxu1 %v15212_v25  ;;  %8708 = vmatprep.subr.bf16.mxu0 %v15212_v25  ;;  %v12643_v25 = vld [vmem:[#allocation9 + $0x40] sm:$0xff]  }
 0xc72   : > { %10837 = vmatmul.mubr.msk.bf16.vlgmr.msra.gmra.mrb[28].mxu0 %vm1965_vm1, %v12638_v43  ;;  %10843 = vmatmul.mubr.msk.bf16.vlgmr.msra.gmra.mrb[132].mxu1 %vm1965_vm1, %v12639_v1  ;;  %v12714_v43 = vld [vmem:[#allocation10 + $0xe8] sm:$0xff]  }
 0xc73   : > { %8367 = vmatpush1.bf16.msra.mxu1 %v15210_v21  ;;  %8709 = vmatpush1.bf16.msra.mxu0 %v15210_v21  ;;  %v12642_v21 = vld [vmem:[#allocation9 + $0x10] sm:$0xff]   ;;  %v12715_v1 = vld [vmem:[#allocation10 + $0xa8] sm:$0xff]  }
 0xc74   : > { %8368 = vmatprep.subr.bf16.mxu1 %v15224_v26  ;;  %8710 = vmatprep.subr.bf16.mxu0 %v15224_v26  ;;  %v12645_v26 = vld [vmem:[#allocation9 + $0x48] sm:$0xff]  }
 0xc75   : > { %8066 = vmatprep.mubr.bf16.mxu0 %v13042_v0  ;;  %8126 = vmatprep.mubr.bf16.mxu1 %v13042_v0 }
 0xc77   : > { %8369 = vmatpush1.bf16.msra.mxu1 %v15222_v19  ;;  %8711 = vmatpush1.bf16.msra.mxu0 %v15222_v19  ;;  %v12644_v19 = vld [vmem:[#allocation9 + $0x18] sm:$0xff]  }
 0xc78   : > { %8370 = vmatprep.subr.bf16.mxu1 %v15236_v53  ;;  %8712 = vmatprep.subr.bf16.mxu0 %v15236_v53  ;;  %v12646_v53 = vld [vmem:[#allocation9 + $0x20] sm:$0xff]  }
 0xc7a   : > { %10838 = vmatmul.mubr.msk.bf16.gmra.mrb[32].mxu0 %vm1965_vm1, %v12640_v5  ;;  %10844 = vmatmul.mubr.msk.bf16.gmra.mrb[136].mxu1 %vm1965_vm1, %v12641_v9  ;;  %v12672_v5 = vld [vmem:[#allocation9 + $0xc0] sm:$0xff]  }
 0xc7b   : > { %8371 = vmatpush1.bf16.msra.mxu1 %v15234_v49  ;;  %8713 = vmatpush1.bf16.msra.mxu0 %v15234_v49  ;;  %v12658_v49 = vld [vmem:[#allocation10 + $0x40] sm:$0xff]   ;;  %v12692_v9 = vld [vmem:[#allocation9 + $0x140] sm:$0xff]  }
 0xc7c   : > { %8372 = vmatprep.subr.bf16.mxu1 %v15248_v10  ;;  %8714 = vmatprep.subr.bf16.mxu0 %v15248_v10  ;;  %v12664_v10 = vld [vmem:[#allocation10 + $0x48] sm:$0xff]  }
 0xc7d   : > { %8076 = vmatprep.mubr.bf16.mxu0 %v13042_v0  ;;  %8136 = vmatprep.mubr.bf16.mxu1 %v13042_v0 }
 0xc7f   : > { %8373 = vmatpush1.bf16.msra.mxu1 %v15246_v59  ;;  %8715 = vmatpush1.bf16.msra.mxu0 %v15246_v59  ;;  %v12661_v59 = vld [vmem:[#allocation10] sm:$0xff]  }
 0xc80   : > { %8374 = vmatprep.subr.bf16.mxu1 %v15260_v61  ;;  %8716 = vmatprep.subr.bf16.mxu0 %v15260_v61  ;;  %v12689_v61 = vld [vmem:[#allocation10 + $0x70] sm:$0xff]  }
 0xc82   : > { %10839 = vmatmul.mubr.msk.bf16.gmra.mrb[36].mxu0 %vm1965_vm1, %v12642_v21  ;;  %10845 = vmatmul.mubr.msk.bf16.gmra.mrb[140].mxu1 %vm1965_vm1, %v12643_v25  ;;  %v12716_v21 = vld [vmem:[#allocation10 + $0xf0] sm:$0xff]  }
 0xc83   : > { %8375 = vmatpush1.bf16.msra.mxu1 %v15258_v58  ;;  %8717 = vmatpush1.bf16.msra.mxu0 %v15258_v58  ;;  %v12686_v58 = vld [vmem:[#allocation10 + $0x28] sm:$0xff]   ;;  %v12717_v25 = vld [vmem:[#allocation10 + $0xb0] sm:$0xff]  }
 0xc84   : > { %8376 = vmatprep.subr.bf16.mxu1 %v7881_v37  ;;  %8718 = vmatprep.subr.bf16.mxu0 %v7881_v37  ;;  %v12659_v37 = vld [vmem:[#allocation9 + $0xa0] sm:$0xff]  }
 0xc85   : > { %8086 = vmatprep.mubr.bf16.mxu0 %v13042_v0  ;;  %8146 = vmatprep.mubr.bf16.mxu1 %v13042_v0 }
 0xc87   : > { %8377 = vmatpush1.bf16.msra.mxu1 %v15270_v34  ;;  %8719 = vmatpush1.bf16.msra.mxu0 %v15270_v34  ;;  %v12700_v34 = vld [vmem:[#allocation10 + $0xc8] sm:$0xff]  }
 0xc88   : > { %8378 = vmatprep.subr.bf16.mxu1 %v7883_v56  ;;  %8720 = vmatprep.subr.bf16.mxu0 %v7883_v56  ;;  %v12713_v56 = vld [vmem:[#allocation10 + $0xa0] sm:$0xff]  }
 0xc8a   : > { %10840 = vmatmul.mubr.msk.bf16.gmra.mrb[40].mxu0 %vm1965_vm1, %v12644_v19  ;;  %10846 = vmatmul.mubr.msk.bf16.gmra.mrb[144].mxu1 %vm1965_vm1, %v12645_v26  ;;  %v12674_v19 = vld [vmem:[#allocation9 + $0xc8] sm:$0xff]  }
 0xc8b   : > { %8379 = vmatpush1.bf16.msra.mxu1 %v7882_v27  ;;  %8721 = vmatpush1.bf16.msra.mxu0 %v7882_v27  ;;  %v12711_v27 = vld [vmem:[#allocation10 + $0xe0] sm:$0xff]   ;;  %v12695_v26 = vld [vmem:[#allocation9 + $0x148] sm:$0xff]  }
 0xc8c   : > { %8096 = vmatprep.mubr.bf16.mxu0 %v13042_v0  ;;  %8156 = vmatprep.mubr.bf16.mxu1 %v13042_v0 }
 0xc8d   : > { %11147 = vmatprep.subr.bf16.mxu1 %v12658_v49  ;;  %11247 = vmatprep.subr.bf16.mxu0 %v12696_v33  ;;  %v12718_v49 = vld [vmem:[#allocation10 + $0xf8] sm:$0xff]  }
 0xc92   : > { %10841 = vmatmul.mubr.msk.bf16.gmra.mrb[44].mxu0 %vm1965_vm1, %v12646_v53  ;;  %10847 = vmatmul.mubr.msk.bf16.gmra.mrb[148].mxu1 %vm1965_vm1, %v12647_v3  ;;  %v12719_v53 = vld [vmem:[#allocation10 + $0xb8] sm:$0xff]   ;;  %v12678_v3 = vld [vmem:[#allocation9 + $0xd0] sm:$0xff]  }
 0xc93   : > { %8106 = vmatprep.mubr.bf16.mxu0 %v13042_v0  ;;  %8166 = vmatprep.mubr.bf16.mxu1 %v13042_v0 }
 0xc9a   : > { %10842 = vmatmul.mubr.msk.bf16.gmra.mrb[48].mxu0 %vm1965_vm1, %v12648_v4  ;;  %10848 = vmatmul.mubr.msk.bf16.gmra.mrb[152].mxu1 %vm1965_vm1, %v12649_v11  ;;  %v12681_v4 = vld [vmem:[#allocation9 + $0xd8] sm:$0xff]  }
 0xc9b   : > { %8176 = vmatprep.mubr.bf16.mxu1 %v13042_v0  ;;  %8740 = vmatprep.mubr.bf16.mxu0 %v13042_v0 }
 0xca2   : > { %10849 = vmatmul.mubr.msk.bf16.gmra.mrb[156].mxu1 %vm1965_vm1, %v12650_v14  ;;  %10893 = vmatmul.mubr.msk.bf16.vlgmr.msra.gmra.mrb[52].mxu0 %vm1965_vm1, %v12660_v20 }
 0xca3   : > { %8186 = vmatprep.mubr.bf16.mxu1 %v13042_v0  ;;  %8750 = vmatprep.mubr.bf16.mxu0 %v13042_v0 }
 0xca4   : > { %11248 = vmatpush3.bf16.msra.mxu0 %v12697_v38  ;;  %v12712_v38 = vld [vmem:[#allocation10 + $0x118] sm:$0xff]  }
 0xca5   : > { %11249 = vmatprep.subr.bf16.mxu0 %v12700_v34 }
 0xca8   : > { %11250 = vmatpush3.bf16.msra.mxu0 %v12701_v46 }
 0xca9   : > { %11251 = vmatprep.subr.bf16.mxu0 %v12704_v44 }
 0xcaa   : > { %10850 = vmatmul.mubr.msk.bf16.gmra.mrb[160].mxu1 %vm1965_vm1, %v12651_v22  ;;  %10894 = vmatmul.mubr.msk.bf16.gmra.mrb[56].mxu0 %vm1965_vm1, %v12663_v28 }
 0xcab   : > { %8398 = vmatprep.mubr.bf16.mxu1 %v13042_v0  ;;  %8760 = vmatprep.mubr.bf16.mxu0 %v13042_v0 }
 0xcac   : > { %11252 = vmatpush3.bf16.msra.mxu0 %v12705_v35 }
 0xcad   : > { %11253 = vmatprep.subr.bf16.mxu0 %v12708_v50 }
 0xcb0   : > { %11254 = vmatpush3.bf16.msra.mxu0 %v12709_v63 }
 0xcb1   : > { %11255 = vmatprep.subr.bf16.mxu0 %v12711_v27 }
 0xcb2   : > { %10865 = vmatmul.mubr.msk.bf16.vlgmr.msra.gmra.mrb[164].mxu1 %vm1965_vm1, %v12652_v7  ;;  %10895 = vmatmul.mubr.msk.bf16.gmra.mrb[60].mxu0 %vm1965_vm1, %v12667_v55 }
 0xcb3   : > { %8408 = vmatprep.mubr.bf16.mxu1 %v13042_v0  ;;  %11148 = vmatpush3.bf16.msra.mxu1 %v12661_v59 }
 0xcb4   : > { %11149 = vmatprep.subr.bf16.mxu1 %v12664_v10  ;;  %8770 = vmatprep.mubr.bf16.mxu0 %v13042_v0 }
 0xcb5   : > { %11256 = vmatpush3.bf16.msra.mxu0 %v12713_v56  ;;  %v12724_v56 = vld [vmem:[#allocation10 + $0x170] sm:$0xff]  }
 0xcb6   : > { %11257 = vmatprep.subr.bf16.mxu0 %v12714_v43 }
 0xcb7   : > { %11150 = vmatpush3.bf16.msra.mxu1 %v12665_v54 }
 0xcb8   : > { %11151 = vmatprep.subr.bf16.mxu1 %v12670_v30  ;;  %v12699_v30 = vld [vmem:[#allocation10 + $0x100] sm:$0xff]  }
 0xcb9   : > { %11258 = vmatpush3.bf16.msra.mxu0 %v12715_v1 }
 0xcba   : > { %10866 = vmatmul.mubr.msk.bf16.gmra.mrb[168].mxu1 %vm1965_vm1, %v12653_v52  ;;  %10896 = vmatmul.mubr.msk.bf16.gmra.mrb[64].mxu0 %vm1965_vm1, %v12669_v60  ;;  %v12702_v60 = vld [vmem:[#allocation10 + $0x148] sm:$0xff]  }
 0xcbb   : > { %8418 = vmatprep.mubr.bf16.mxu1 %v13042_v0  ;;  %11152 = vmatpush3.bf16.msra.mxu1 %v12671_v62 }
 0xcbc   : > { %8780 = vmatprep.mubr.bf16.mxu0 %v13042_v0  ;;  %11153 = vmatprep.subr.bf16.mxu1 %v12676_v16  ;;  %v12703_v16 = vld [vmem:[#allocation10 + $0x108] sm:$0xff]  }
 0xcbd   : > { %11259 = vmatprep.subr.bf16.mxu0 %v12716_v21 }
 0xcbe   : > { %11260 = vmatpush3.bf16.msra.mxu0 %v12717_v25 }
 0xcbf   : > { %11154 = vmatpush3.bf16.msra.mxu1 %v12677_v18  ;;  %11261 = vmatprep.subr.bf16.mxu0 %v12718_v49  ;;  %v12725_v49 = vld [vmem:[#allocation10 + $0x130] sm:$0xff]  }
 0xcc0   : > { %11155 = vmatprep.subr.bf16.mxu1 %v12680_v6 }
 0xcc2   : > { %10867 = vmatmul.mubr.msk.bf16.gmra.mrb[172].mxu1 %vm1965_vm1, %v12654_v40  ;;  %10897 = vmatmul.mubr.msk.bf16.gmra.mrb[68].mxu0 %vm1965_vm1, %v12673_v48  ;;  %v12706_v48 = vld [vmem:[#allocation10 + $0x150] sm:$0xff]  }
 0xcc3   : > { %8428 = vmatprep.mubr.bf16.mxu1 %v13042_v0  ;;  %8790 = vmatprep.mubr.bf16.mxu0 %v13042_v0 }
 0xcc4   : > { %11156 = vmatpush3.bf16.msra.mxu1 %v12683_v32  ;;  %11262 = vmatpush3.bf16.msra.mxu0 %v12719_v53  ;;  %v12726_v53 = vld [vmem:[#allocation10 + $0x178] sm:$0xff]  }
 0xcc5   : > { %11157 = vmatprep.subr.bf16.mxu1 %v12685_v57 }
 0xcc8   : > { %11158 = vmatpush3.bf16.msra.mxu1 %v12686_v58 }
 0xcc9   : > { %11159 = vmatprep.subr.bf16.mxu1 %v12689_v61 }
 0xcca   : > { %10868 = vmatmul.mubr.msk.bf16.gmra.mrb[176].mxu1 %vm1965_vm1, %v12655_v13  ;;  %10898 = vmatmul.mubr.msk.bf16.gmra.mrb[72].mxu0 %vm1965_vm1, %v12675_v15 }
 0xccb   : > { %8438 = vmatprep.mubr.bf16.mxu1 %v13042_v0  ;;  %8800 = vmatprep.mubr.bf16.mxu0 %v13042_v0 }
 0xccc   : > { %11160 = vmatpush3.bf16.msra.mxu1 %v12690_v23 }
 0xccd   : > { %11161 = vmatprep.subr.bf16.mxu1 %v12693_v24 }
 0xcd0   : > { %11162 = vmatpush3.bf16.msra.mxu1 %v12694_v36  ;;  %v12707_v36 = vld [vmem:[#allocation10 + $0x110] sm:$0xff]  }
 0xcd1   : > { %11347 = vmatprep.subr.bf16.mxu1 %v12698_v41 }
 0xcd2   : > { %10869 = vmatmul.mubr.msk.bf16.gmra.mrb[180].mxu1 %vm1965_vm1, %v12656_v8  ;;  %10899 = vmatmul.mubr.msk.bf16.gmra.mrb[76].mxu0 %vm1965_vm1, %v12679_v45  ;;  %v12710_v8 = vld [vmem:[#allocation10 + $0x158] sm:$0xff]  }
 0xcd3   : > { %8448 = vmatprep.mubr.bf16.mxu1 %v13042_v0  ;;  %8810 = vmatprep.mubr.bf16.mxu0 %v13042_v0 }
 0xcda   : > { %10870 = vmatmul.mubr.msk.bf16.gmra.mrb[184].mxu1 %vm1965_vm1, %v12657_v12  ;;  %10900 = vmatmul.mubr.msk.bf16.gmra.mrb[80].mxu0 %vm1965_vm1, %v12682_v31  ;;  %v12720_v31 = vld [vmem:[#allocation10 + $0x160] sm:$0xff]  }
 0xcdb   : > { %8458 = vmatprep.mubr.bf16.mxu1 %v13042_v0  ;;  %8820 = vmatprep.mubr.bf16.mxu0 %v13042_v0 }
 0xce2   : > { %10871 = vmatmul.mubr.msk.bf16.gmra.mrb[188].mxu1 %vm1965_vm1, %v12659_v37  ;;  %10901 = vmatmul.mubr.msk.bf16.gmra.mrb[84].mxu0 %vm1965_vm1, %v12684_v17 }
 0xce3   : > { %8468 = vmatprep.mubr.bf16.mxu1 %v13042_v0  ;;  %8830 = vmatprep.mubr.bf16.mxu0 %v13042_v0 }
 0xcea   : > { %10872 = vmatmul.mubr.msk.bf16.gmra.mrb[192].mxu1 %vm1965_vm1, %v12662_v51  ;;  %10902 = vmatmul.mubr.msk.bf16.gmra.mrb[88].mxu0 %vm1965_vm1, %v12687_v42 }
 0xceb   : > { %8478 = vmatprep.mubr.bf16.mxu1 %v13042_v0  ;;  %8840 = vmatprep.mubr.bf16.mxu0 %v13042_v0 }
 0xcf2   : > { %10873 = vmatmul.mubr.msk.bf16.gmra.mrb[196].mxu1 %vm1965_vm1, %v12666_v39  ;;  %10903 = vmatmul.mubr.msk.bf16.gmra.mrb[92].mxu0 %vm1965_vm1, %v12688_v47  ;;  %v12721_v39 = vld [vmem:[#allocation10 + $0x120] sm:$0xff]   ;;  %v12722_v47 = vld [vmem:[#allocation10 + $0x168] sm:$0xff]  }
 0xcf3   : > { %8488 = vmatprep.mubr.bf16.mxu1 %v13042_v0  ;;  %8850 = vmatprep.mubr.bf16.mxu0 %v13042_v0 }
 0xcfa   : > { %10874 = vmatmul.mubr.msk.bf16.gmra.mrb[200].mxu1 %vm1965_vm1, %v12668_v2  ;;  %10904 = vmatmul.mubr.msk.bf16.gmra.mrb[96].mxu0 %vm1965_vm1, %v12691_v29  ;;  %v12723_v2 = vld [vmem:[#allocation10 + $0x128] sm:$0xff]  }
 0xcfb   : > { %8498 = vmatprep.mubr.bf16.mxu1 %v13042_v0  ;;  %8860 = vmatprep.mubr.bf16.mxu0 %v13042_v0 }
 0xd02   : > { %10875 = vmatmul.mubr.msk.bf16.gmra.mrb[204].mxu1 %vm1965_vm1, %v12672_v5  ;;  %10905 = vmatmul.mubr.msk.bf16.gmra.mrb[100].mxu0 %vm1965_vm1, %v12692_v9 }
 0xd03   : > { %8508 = vmatprep.mubr.bf16.mxu1 %v13042_v0  ;;  %8870 = vmatprep.mubr.bf16.mxu0 %v13042_v0 }
 0xd0a   : > { %10876 = vmatmul.mubr.msk.bf16.gmra.mrb[208].mxu1 %vm1965_vm1, %v12674_v19  ;;  %10906 = vmatmul.mubr.msk.bf16.gmra.mrb[104].mxu0 %vm1965_vm1, %v12695_v26 }
 0xd0b   : > { %8518 = vmatprep.mubr.bf16.mxu1 %v13042_v0 }
 0xd12   : > { %10877 = vmatmul.mubr.msk.bf16.gmra.mrb[212].mxu1 %vm1965_vm1, %v12678_v3 }
 0xd13   : > { %8528 = vmatprep.mubr.bf16.mxu1 %v13042_v0 }
 0xd1a   : > { %10878 = vmatmul.mubr.msk.bf16.gmra.mrb[216].mxu1 %vm1965_vm1, %v12681_v4 }
 0xd45   : > { %v8058_v11 = vpop.f32.mrb[28].mxu0  ;;  %v15382_v14 = vpop.f32.mrb[132].mxu1 }
 0xd46   : > { %v8060_v20 = vpop.f32.mrb[29].mxu0  ;;  %v15384_v22 = vpop.f32.mrb[133].mxu1 }
 0xd47   : > { %v8062_v28 = vpop.f32.mrb[30].mxu0  ;;  %v15386_v7 = vpop.f32.mrb[134].mxu1 }
 0xd48   : > { %v8197_v55 = vpack.c.bf16 %v8062_v28, %v8058_v11  ;;  %v8064_v59 = vpop.f32.mrb[31].mxu0  ;;  %v8209_v10 = vpack.c.bf16 %v15386_v7, %v15382_v14  ;;  %v15390_v54 = vpop.f32.mrb[135].mxu1  ;;  %v12727_v11 = vld [vmem:[#allocation10 + $0x138] sm:$0xff]  }
 0xd49   : > { %v8198_v0 = vpack.c.bf16 %v8064_v59, %v8060_v20  ;;  %v8210_v52 = vpack.c.bf16 %v15390_v54, %v15384_v22 }
 0xd4b   : > { %9332 = vmatprep.mubr.bf16.mxu1 %v8198_v0 }
 0xd4c   : > { %9333 = vmatmul.mubr.bf16.vlgmr.msra.gmra.mrb[220].mxu1 %v8197_v55 }
 0xd4d   : > { %v8068_v62 = vpop.f32.mrb[32].mxu0  ;;  %11348 = vmatpush3.bf16.msra.mxu1 %v12699_v30  ;;  %v15394_v18 = vpop.f32.mrb[136].mxu1 }
 0xd4e   : > { %v8070_v6 = vpop.f32.mrb[33].mxu0  ;;  %11349 = vmatprep.subr.bf16.mxu1 %v12702_v60  ;;  %v15396_v40 = vpop.f32.mrb[137].mxu1 }
 0xd4f   : > { %v8072_v32 = vpop.f32.mrb[34].mxu0  ;;  %v15398_v57 = vpop.f32.mrb[138].mxu1 }
 0xd50   : > { %v8199_v58 = vpack.c.bf16 %v8072_v32, %v8068_v62  ;;  %v8074_v61 = vpop.f32.mrb[35].mxu0  ;;  %v8211_v13 = vpack.c.bf16 %v15398_v57, %v15394_v18  ;;  %v15402_v15 = vpop.f32.mrb[139].mxu1 }
 0xd51   : > { %v8200_v23 = vpack.c.bf16 %v8074_v61, %v8070_v6  ;;  %11350 = vmatpush3.bf16.msra.mxu1 %v12703_v16  ;;  %v8212_v24 = vpack.c.bf16 %v15402_v15, %v15396_v40 }
 0xd52   : > { %11351 = vmatprep.subr.bf16.mxu1 %v12706_v48 }
 0xd53   : > { %9340 = vmatprep.mubr.bf16.mxu1 %v8200_v23 }
 0xd54   : > { %9341 = vmatmul.mubr.bf16.gmra.mrb[224].mxu1 %v8199_v58 }
 0xd55   : > { %v8078_v45 = vpop.f32.mrb[36].mxu0  ;;  %v15406_v33 = vpop.f32.mrb[140].mxu1  ;;  %11352 = vmatpush3.bf16.msra.mxu1 %v12707_v36 }
 0xd56   : > { %v8080_v41 = vpop.f32.mrb[37].mxu0  ;;  %v15408_v12 = vpop.f32.mrb[141].mxu1  ;;  %11353 = vmatprep.subr.bf16.mxu1 %v12710_v8 }
 0xd57   : > { %v8082_v34 = vpop.f32.mrb[38].mxu0  ;;  %v15410_v37 = vpop.f32.mrb[142].mxu1 }
 0xd58   : > { %v8201_v17 = vpack.c.bf16 %v8082_v34, %v8078_v45  ;;  %v8084_v46 = vpop.f32.mrb[39].mxu0  ;;  %v8213_v51 = vpack.c.bf16 %v15410_v37, %v15406_v33  ;;  %v15414_v42 = vpop.f32.mrb[143].mxu1 }
 0xd59   : > { %v8202_v44 = vpack.c.bf16 %v8084_v46, %v8080_v41  ;;  %v8214_v35 = vpack.c.bf16 %v15414_v42, %v15408_v12  ;;  %11354 = vmatpush3.bf16.msra.mxu1 %v12712_v38 }
 0xd5a   : > { %11355 = vmatprep.subr.bf16.mxu1 %v12720_v31 }
 0xd5b   : > { %9348 = vmatprep.mubr.bf16.mxu1 %v8202_v44 }
 0xd5c   : > { %9349 = vmatmul.mubr.bf16.gmra.mrb[228].mxu1 %v8201_v17 }
 0xd5d   : > { %v8088_v50 = vpop.f32.mrb[40].mxu0  ;;  %v15418_v63 = vpop.f32.mrb[144].mxu1  ;;  %11356 = vmatpush3.bf16.msra.mxu1 %v12721_v39 }
 0xd5e   : > { %v8090_v29 = vpop.f32.mrb[41].mxu0  ;;  %v15420_v27 = vpop.f32.mrb[145].mxu1  ;;  %11357 = vmatprep.subr.bf16.mxu1 %v12722_v47 }
 0xd5f   : > { %v8092_v43 = vpop.f32.mrb[42].mxu0  ;;  %v15422_v1 = vpop.f32.mrb[146].mxu1 }
 0xd60   : > { %v8203_v5 = vpack.c.bf16 %v8092_v43, %v8088_v50  ;;  %v8094_v9 = vpop.f32.mrb[43].mxu0  ;;  %v8215_v21 = vpack.c.bf16 %v15422_v1, %v15418_v63  ;;  %v15426_v25 = vpop.f32.mrb[147].mxu1 }
 0xd61   : > { %v8204_v19 = vpack.c.bf16 %v8094_v9, %v8090_v29  ;;  %v8216_v26 = vpack.c.bf16 %v15426_v25, %v15420_v27  ;;  %11358 = vmatpush3.bf16.msra.mxu1 %v12723_v2 }
 0xd62   : > { %11359 = vmatprep.subr.bf16.mxu1 %v12724_v56 }
 0xd63   : > { %9356 = vmatprep.mubr.bf16.mxu1 %v8204_v19 }
 0xd64   : > { %9357 = vmatmul.mubr.bf16.gmra.mrb[232].mxu1 %v8203_v5 }
 0xd65   : > { %v8098_v3 = vpop.f32.mrb[44].mxu0  ;;  %v15430_v4 = vpop.f32.mrb[148].mxu1  ;;  %11360 = vmatpush3.bf16.msra.mxu1 %v12725_v49 }
 0xd66   : > { %v8100_v20 = vpop.f32.mrb[45].mxu0  ;;  %v15432_v28 = vpop.f32.mrb[149].mxu1  ;;  %11361 = vmatprep.subr.bf16.mxu1 %v12726_v53 }
 0xd67   : > { %v8102_v55 = vpop.f32.mrb[46].mxu0  ;;  %v15434_v59 = vpop.f32.mrb[150].mxu1 }
 0xd68   : > { %v8205_v0 = vpack.c.bf16 %v8102_v55, %v8098_v3  ;;  %v8104_v30 = vpop.f32.mrb[47].mxu0  ;;  %v8217_v60 = vpack.c.bf16 %v15434_v59, %v15430_v4  ;;  %v15438_v62 = vpop.f32.mrb[151].mxu1 }
 0xd69   : > { %v8206_v16 = vpack.c.bf16 %v8104_v30, %v8100_v20  ;;  %v8218_v6 = vpack.c.bf16 %v15438_v62, %v15432_v28  ;;  %11362 = vmatpush3.bf16.msra.mxu1 %v12727_v11 }
 0xd6b   : > { %9364 = vmatprep.mubr.bf16.mxu1 %v8206_v16 }
 0xd6c   : > { %9365 = vmatmul.mubr.bf16.gmra.mrb[236].mxu1 %v8205_v0 }
 0xd6d   : > { %v8108_v48 = vpop.f32.mrb[48].mxu0  ;;  %v15442_v32 = vpop.f32.mrb[152].mxu1 }
 0xd6e   : > { %v8110_v58 = vpop.f32.mrb[49].mxu0  ;;  %v15444_v61 = vpop.f32.mrb[153].mxu1 }
 0xd6f   : > { %v8112_v23 = vpop.f32.mrb[50].mxu0  ;;  %v15446_v36 = vpop.f32.mrb[154].mxu1 }
 0xd70   : > { %v8207_v8 = vpack.c.bf16 %v8112_v23, %v8108_v48  ;;  %v8114_v45 = vpop.f32.mrb[51].mxu0  ;;  %v8219_v38 = vpack.c.bf16 %v15446_v36, %v15442_v32  ;;  %v15450_v41 = vpop.f32.mrb[155].mxu1 }
 0xd71   : > { %v8208_v31 = vpack.c.bf16 %v8114_v45, %v8110_v58  ;;  %v8220_v34 = vpack.c.bf16 %v15450_v41, %v15444_v61 }
 0xd73   : > { %9372 = vmatprep.mubr.bf16.mxu1 %v8208_v31 }
 0xd74   : > { %9373 = vmatmul.mubr.bf16.gmra.mrb[240].mxu1 %v8207_v8 }
 0xd75   : > { %9380 = vmatprep.mubr.bf16.mxu1 %v8210_v52  ;;  %v15457_v17 = vpop.f32.mrb[156].mxu1  ;;  %v15459_v46 = vpop.f32.mrb[52].mxu0 }
 0xd76   : > { %v15461_v44 = vpop.f32.mrb[157].mxu1  ;;  %v15463_v39 = vpop.f32.mrb[53].mxu0 }
 0xd77   : > { %v15465_v47 = vpop.f32.mrb[158].mxu1  ;;  %v15467_v50 = vpop.f32.mrb[54].mxu0 }
 0xd78   : > { %v8221_v2 = vpack.c.bf16 %v15465_v47, %v15457_v17  ;;  %v15471_v29 = vpop.f32.mrb[159].mxu1  ;;  %v8881_v22 = vpack.c.bf16 %v15467_v50, %v15459_v46  ;;  %v15475_v54 = vpop.f32.mrb[55].mxu0 }
 0xd79   : > { %v8222_v52 = vpack.c.bf16 %v15471_v29, %v15461_v44  ;;  %v8882_v56 = vpack.c.bf16 %v15475_v54, %v15463_v39 }
 0xd7c   : > { %9381 = vmatmul.mubr.bf16.gmra.mrb[244].mxu1 %v8209_v10 }
 0xd7d   : > { %9388 = vmatprep.mubr.bf16.mxu1 %v8212_v24  ;;  %v15487_v43 = vpop.f32.mrb[160].mxu1  ;;  %v15489_v5 = vpop.f32.mrb[56].mxu0 }
 0xd7e   : > { %v15491_v9 = vpop.f32.mrb[161].mxu1  ;;  %v15493_v19 = vpop.f32.mrb[57].mxu0 }
 0xd7f   : > { %v15495_v49 = vpop.f32.mrb[162].mxu1  ;;  %v15497_v53 = vpop.f32.mrb[58].mxu0 }
 0xd80   : > { %v8223_v14 = vpack.c.bf16 %v15495_v49, %v15487_v43  ;;  %v15501_v7 = vpop.f32.mrb[163].mxu1  ;;  %v8883_v10 = vpack.c.bf16 %v15497_v53, %v15489_v5  ;;  %v15505_v40 = vpop.f32.mrb[59].mxu0 }
 0xd81   : > { %v8224_v15 = vpack.c.bf16 %v15501_v7, %v15491_v9  ;;  %v8884_v24 = vpack.c.bf16 %v15505_v40, %v15493_v19 }
 0xd84   : > { %9389 = vmatmul.mubr.bf16.gmra.mrb[248].mxu1 %v8211_v13 }
 0xd85   : > { %v8400_v3 = vpop.f32.mrb[164].mxu1  ;;  %9396 = vmatprep.mubr.bf16.mxu1 %v8214_v35  ;;  %v15517_v11 = vpop.f32.mrb[60].mxu0 }
 0xd86   : > { %v8402_v20 = vpop.f32.mrb[165].mxu1  ;;  %v15519_v55 = vpop.f32.mrb[61].mxu0 }
 0xd87   : > { %v8404_v0 = vpop.f32.mrb[166].mxu1  ;;  %v15521_v30 = vpop.f32.mrb[62].mxu0 }
 0xd88   : > { %v8539_v16 = vpack.c.bf16 %v8404_v0, %v8400_v3  ;;  %v8406_v48 = vpop.f32.mrb[167].mxu1  ;;  %v8885_v58 = vpack.c.bf16 %v15521_v30, %v15517_v11  ;;  %v15525_v18 = vpop.f32.mrb[63].mxu0 }
 0xd89   : > { %v8540_v57 = vpack.c.bf16 %v8406_v48, %v8402_v20  ;;  %v8886_v13 = vpack.c.bf16 %v15525_v18, %v15519_v55 }
 0xd8b   : > { %9477 = vmatprep.mubr.bf16.mxu0 %v8540_v57 }
 0xd8c   : > { %9397 = vmatmul.mubr.bf16.gmra.mrb[252].mxu1 %v8213_v51  ;;  %9478 = vmatmul.mubr.bf16.vlgmr.msra.gmra.mrb[108].mxu0 %v8539_v16 }
 0xd8d   : > { %v8410_v12 = vpop.f32.mrb[168].mxu1  ;;  %9404 = vmatprep.mubr.bf16.mxu1 %v8216_v26  ;;  %v15535_v42 = vpop.f32.mrb[64].mxu0 }
 0xd8e   : > { %v8412_v35 = vpop.f32.mrb[169].mxu1  ;;  %v15537_v23 = vpop.f32.mrb[65].mxu0 }
 0xd8f   : > { %v8414_v8 = vpop.f32.mrb[170].mxu1  ;;  %v15539_v45 = vpop.f32.mrb[66].mxu0 }
 0xd90   : > { %v8541_v31 = vpack.c.bf16 %v8414_v8, %v8410_v12  ;;  %v8416_v3 = vpop.f32.mrb[171].mxu1  ;;  %v8887_v33 = vpack.c.bf16 %v15539_v45, %v15535_v42  ;;  %v15543_v37 = vpop.f32.mrb[67].mxu0 }
 0xd91   : > { %v8542_v51 = vpack.c.bf16 %v8416_v3, %v8412_v35  ;;  %v8888_v27 = vpack.c.bf16 %v15543_v37, %v15537_v23 }
 0xd93   : > { %9485 = vmatprep.mubr.bf16.mxu0 %v8542_v51 }
 0xd94   : > { %9405 = vmatmul.mubr.bf16.gmra.mrb[0].mxu1 %v8215_v21  ;;  %9486 = vmatmul.mubr.bf16.gmra.mrb[112].mxu0 %v8541_v31 }
 0xd95   : > { %v8420_v25 = vpop.f32.mrb[172].mxu1  ;;  %9412 = vmatprep.mubr.bf16.mxu1 %v8218_v6  ;;  %v15553_v26 = vpop.f32.mrb[68].mxu0 }
 0xd96   : > { %v8422_v20 = vpop.f32.mrb[173].mxu1  ;;  %v15555_v0 = vpop.f32.mrb[69].mxu0 }
 0xd97   : > { %v8424_v16 = vpop.f32.mrb[174].mxu1  ;;  %v15557_v48 = vpop.f32.mrb[70].mxu0 }
 0xd98   : > { %v8543_v57 = vpack.c.bf16 %v8424_v16, %v8420_v25  ;;  %v8426_v12 = vpop.f32.mrb[175].mxu1  ;;  %v8889_v63 = vpack.c.bf16 %v15557_v48, %v15553_v26  ;;  %v15561_v1 = vpop.f32.mrb[71].mxu0 }
 0xd99   : > { %v8544_v21 = vpack.c.bf16 %v8426_v12, %v8422_v20  ;;  %v8890_v28 = vpack.c.bf16 %v15561_v1, %v15555_v0 }
 0xd9b   : > { %9493 = vmatprep.mubr.bf16.mxu0 %v8544_v21 }
 0xd9c   : > { %9413 = vmatmul.mubr.bf16.gmra.mrb[4].mxu1 %v8217_v60  ;;  %9494 = vmatmul.mubr.bf16.gmra.mrb[116].mxu0 %v8543_v57 }
 0xd9d   : > { %v8430_v62 = vpop.f32.mrb[176].mxu1  ;;  %9420 = vmatprep.mubr.bf16.mxu1 %v8220_v34  ;;  %v15571_v6 = vpop.f32.mrb[72].mxu0 }
 0xd9e   : > { %v8432_v35 = vpop.f32.mrb[177].mxu1  ;;  %v15573_v8 = vpop.f32.mrb[73].mxu0 }
 0xd9f   : > { %v8434_v31 = vpop.f32.mrb[178].mxu1  ;;  %v15575_v3 = vpop.f32.mrb[74].mxu0 }
 0xda0   : > { %v8545_v51 = vpack.c.bf16 %v8434_v31, %v8430_v62  ;;  %v8436_v25 = vpop.f32.mrb[179].mxu1  ;;  %v8891_v4 = vpack.c.bf16 %v15575_v3, %v15571_v6  ;;  %v15579_v59 = vpop.f32.mrb[75].mxu0 }
 0xda1   : > { %v8546_v60 = vpack.c.bf16 %v8436_v25, %v8432_v35  ;;  %v8892_v61 = vpack.c.bf16 %v15579_v59, %v15573_v8 }
 0xda3   : > { %9501 = vmatprep.mubr.bf16.mxu0 %v8546_v60 }
 0xda4   : > { %9421 = vmatmul.mubr.bf16.gmra.mrb[8].mxu1 %v8219_v38  ;;  %9502 = vmatmul.mubr.bf16.gmra.mrb[120].mxu0 %v8545_v51 }
 0xda5   : > { %v8440_v41 = vpop.f32.mrb[180].mxu1  ;;  %9428 = vmatprep.mubr.bf16.mxu1 %v8222_v52  ;;  %v15589_v34 = vpop.f32.mrb[76].mxu0 }
 0xda6   : > { %v8442_v20 = vpop.f32.mrb[181].mxu1  ;;  %v15591_v16 = vpop.f32.mrb[77].mxu0 }
 0xda7   : > { %v8444_v57 = vpop.f32.mrb[182].mxu1  ;;  %v15593_v12 = vpop.f32.mrb[78].mxu0 }
 0xda8   : > { %v8547_v21 = vpack.c.bf16 %v8444_v57, %v8440_v41  ;;  %v8446_v62 = vpop.f32.mrb[183].mxu1  ;;  %v8893_v32 = vpack.c.bf16 %v15593_v12, %v15589_v34  ;;  %v15597_v36 = vpop.f32.mrb[79].mxu0 }
 0xda9   : > { %v8548_v38 = vpack.c.bf16 %v8446_v62, %v8442_v20  ;;  %v8894_v44 = vpack.c.bf16 %v15597_v36, %v15591_v16 }
 0xdab   : > { %9509 = vmatprep.mubr.bf16.mxu0 %v8548_v38 }
 0xdac   : > { %9429 = vmatmul.mubr.bf16.gmra.mrb[12].mxu1 %v8221_v2  ;;  %9510 = vmatmul.mubr.bf16.gmra.mrb[124].mxu0 %v8547_v21 }
 0xdad   : > { %v8450_v29 = vpop.f32.mrb[184].mxu1  ;;  %9436 = vmatprep.mubr.bf16.mxu1 %v8224_v15  ;;  %v15607_v52 = vpop.f32.mrb[80].mxu0 }
 0xdae   : > { %v8452_v35 = vpop.f32.mrb[185].mxu1  ;;  %v15609_v31 = vpop.f32.mrb[81].mxu0 }
 0xdaf   : > { %v8454_v51 = vpop.f32.mrb[186].mxu1  ;;  %v15611_v25 = vpop.f32.mrb[82].mxu0 }
 0xdb0   : > { %v8549_v60 = vpack.c.bf16 %v8454_v51, %v8450_v29  ;;  %v8456_v41 = vpop.f32.mrb[187].mxu1  ;;  %v8895_v17 = vpack.c.bf16 %v15611_v25, %v15607_v52  ;;  %v15615_v47 = vpop.f32.mrb[83].mxu0 }
 0xdb1   : > { %v8550_v2 = vpack.c.bf16 %v8456_v41, %v8452_v35  ;;  %v8896_v9 = vpack.c.bf16 %v15615_v47, %v15609_v31 }
 0xdb3   : > { %9517 = vmatprep.mubr.bf16.mxu0 %v8550_v2 }
 0xdb4   : > { %9437 = vmatmul.mubr.bf16.gmra.mrb[16].mxu1 %v8223_v14  ;;  %9518 = vmatmul.mubr.bf16.gmra.mrb[128].mxu0 %v8549_v60 }
 0xdb5   : > { %v8460_v7 = vpop.f32.mrb[188].mxu1  ;;  %9622 = vmatprep.mubr.bf16.mxu1 %v8882_v56  ;;  %v15625_v15 = vpop.f32.mrb[84].mxu0 }
 0xdb6   : > { %v8462_v20 = vpop.f32.mrb[189].mxu1  ;;  %v15627_v57 = vpop.f32.mrb[85].mxu0 }
 0xdb7   : > { %v8464_v21 = vpop.f32.mrb[190].mxu1  ;;  %v15629_v62 = vpop.f32.mrb[86].mxu0 }
 0xdb8   : > { %v8551_v38 = vpack.c.bf16 %v8464_v21, %v8460_v7  ;;  %v8466_v29 = vpop.f32.mrb[191].mxu1  ;;  %v8897_v43 = vpack.c.bf16 %v15629_v62, %v15625_v15  ;;  %v15633_v49 = vpop.f32.mrb[87].mxu0 }
 0xdb9   : > { %v8552_v14 = vpack.c.bf16 %v8466_v29, %v8462_v20  ;;  %v8898_v39 = vpack.c.bf16 %v15633_v49, %v15627_v57 }
 0xdbb   : > { %9525 = vmatprep.mubr.bf16.mxu0 %v8552_v14 }
 0xdbc   : > { %9526 = vmatmul.mubr.bf16.gmra.mrb[132].mxu0 %v8551_v38  ;;  %9623 = vmatmul.mubr.bf16.vlgmr.msra.gmra.mrb[20].mxu1 %v8881_v22 }
 0xdbd   : > { %v8470_v54 = vpop.f32.mrb[192].mxu1  ;;  %9630 = vmatprep.mubr.bf16.mxu1 %v8884_v24  ;;  %v15643_v56 = vpop.f32.mrb[88].mxu0 }
 0xdbe   : > { %v8472_v35 = vpop.f32.mrb[193].mxu1  ;;  %v15645_v51 = vpop.f32.mrb[89].mxu0 }
 0xdbf   : > { %v8474_v60 = vpop.f32.mrb[194].mxu1  ;;  %v15647_v41 = vpop.f32.mrb[90].mxu0 }
 0xdc0   : > { %v8553_v2 = vpack.c.bf16 %v8474_v60, %v8470_v54  ;;  %v8476_v7 = vpop.f32.mrb[195].mxu1  ;;  %v8899_v20 = vpack.c.bf16 %v15647_v41, %v15643_v56  ;;  %v15651_v46 = vpop.f32.mrb[91].mxu0 }
 0xdc1   : > { %v8554_v50 = vpack.c.bf16 %v8476_v7, %v8472_v35  ;;  %v8900_v22 = vpack.c.bf16 %v15651_v46, %v15645_v51 }
 0xdc3   : > { %9533 = vmatprep.mubr.bf16.mxu0 %v8554_v50 }
 0xdc4   : > { %9534 = vmatmul.mubr.bf16.gmra.mrb[136].mxu0 %v8553_v2  ;;  %9631 = vmatmul.mubr.bf16.gmra.mrb[24].mxu1 %v8883_v10 }
 0xdc5   : > { %v8480_v19 = vpop.f32.mrb[196].mxu1  ;;  %9638 = vmatprep.mubr.bf16.mxu1 %v8886_v13  ;;  %v15661_v40 = vpop.f32.mrb[92].mxu0 }
 0xdc6   : > { %v8482_v24 = vpop.f32.mrb[197].mxu1  ;;  %v15663_v21 = vpop.f32.mrb[93].mxu0 }
 0xdc7   : > { %v8484_v38 = vpop.f32.mrb[198].mxu1  ;;  %v15665_v29 = vpop.f32.mrb[94].mxu0 }
 0xdc8   : > { %v8555_v14 = vpack.c.bf16 %v8484_v38, %v8480_v19  ;;  %v8486_v54 = vpop.f32.mrb[199].mxu1  ;;  %v8901_v35 = vpack.c.bf16 %v15665_v29, %v15661_v40  ;;  %v15669_v5 = vpop.f32.mrb[95].mxu0 }
 0xdc9   : > { %v8556_v53 = vpack.c.bf16 %v8486_v54, %v8482_v24  ;;  %v8902_v10 = vpack.c.bf16 %v15669_v5, %v15663_v21 }
 0xdcb   : > { %9541 = vmatprep.mubr.bf16.mxu0 %v8556_v53 }
 0xdcc   : > { %9542 = vmatmul.mubr.bf16.gmra.mrb[140].mxu0 %v8555_v14  ;;  %9639 = vmatmul.mubr.bf16.gmra.mrb[28].mxu1 %v8885_v58 }
 0xdcd   : > { %v8490_v55 = vpop.f32.mrb[200].mxu1  ;;  %9646 = vmatprep.mubr.bf16.mxu1 %v8888_v27  ;;  %v15679_v18 = vpop.f32.mrb[96].mxu0 }
 0xdce   : > { %v8492_v13 = vpop.f32.mrb[201].mxu1  ;;  %v15681_v60 = vpop.f32.mrb[97].mxu0 }
 0xdcf   : > { %v8494_v2 = vpop.f32.mrb[202].mxu1  ;;  %v15683_v7 = vpop.f32.mrb[98].mxu0 }
 0xdd0   : > { %v8557_v50 = vpack.c.bf16 %v8494_v2, %v8490_v55  ;;  %v8496_v19 = vpop.f32.mrb[203].mxu1  ;;  %v8903_v24 = vpack.c.bf16 %v15683_v7, %v15679_v18  ;;  %v15687_v11 = vpop.f32.mrb[99].mxu0 }
 0xdd1   : > { %v8558_v30 = vpack.c.bf16 %v8496_v19, %v8492_v13  ;;  %v8904_v58 = vpack.c.bf16 %v15687_v11, %v15681_v60 }
 0xdd3   : > { %9549 = vmatprep.mubr.bf16.mxu0 %v8558_v30 }
 0xdd4   : > { %9550 = vmatmul.mubr.bf16.gmra.mrb[144].mxu0 %v8557_v50  ;;  %9647 = vmatmul.mubr.bf16.gmra.mrb[32].mxu1 %v8887_v33 }
 0xdd5   : > { %v8500_v23 = vpop.f32.mrb[204].mxu1  ;;  %9654 = vmatprep.mubr.bf16.mxu1 %v8890_v28  ;;  %v8862_v37 = vpop.f32.mrb[100].mxu0 }
 0xdd6   : > { %v8502_v27 = vpop.f32.mrb[205].mxu1  ;;  %v8864_v38 = vpop.f32.mrb[101].mxu0 }
 0xdd7   : > { %v8504_v14 = vpop.f32.mrb[206].mxu1  ;;  %v8866_v54 = vpop.f32.mrb[102].mxu0 }
 0xdd8   : > { %v8559_v53 = vpack.c.bf16 %v8504_v14, %v8500_v23  ;;  %v8506_v55 = vpop.f32.mrb[207].mxu1  ;;  %v8905_v13 = vpack.c.bf16 %v8866_v54, %v8862_v37  ;;  %v8868_v60 = vpop.f32.mrb[103].mxu0 }
 0xdd9   : > { %v8560_v2 = vpack.c.bf16 %v8506_v55, %v8502_v27  ;;  %v8906_v50 = vpack.c.bf16 %v8868_v60, %v8864_v38 }
 0xddb   : > { %9557 = vmatprep.mubr.bf16.mxu0 %v8560_v2 }
 0xddc   : > { %9558 = vmatmul.mubr.bf16.gmra.mrb[148].mxu0 %v8559_v53  ;;  %9655 = vmatmul.mubr.bf16.gmra.mrb[36].mxu1 %v8889_v63 }
 0xddd   : > { %v8510_v42 = vpop.f32.mrb[208].mxu1  ;;  %9662 = vmatprep.mubr.bf16.mxu1 %v8892_v61  ;;  %v8872_v45 = vpop.f32.mrb[104].mxu0 }
 0xdde   : > { %v8512_v33 = vpop.f32.mrb[209].mxu1  ;;  %v8874_v0 = vpop.f32.mrb[105].mxu0 }
 0xddf   : > { %v8514_v1 = vpop.f32.mrb[210].mxu1  ;;  %v8876_v28 = vpop.f32.mrb[106].mxu0 }
 0xde0   : > { %v8561_v19 = vpack.c.bf16 %v8514_v1, %v8510_v42  ;;  %v8516_v11 = vpop.f32.mrb[211].mxu1  ;;  %v8907_v30 = vpack.c.bf16 %v8876_v28, %v8872_v45  ;;  %v8878_v23 = vpop.f32.mrb[107].mxu0 }
 0xde1   : > { %v8562_v37 = vpack.c.bf16 %v8516_v11, %v8512_v33  ;;  %v8908_v27 = vpack.c.bf16 %v8878_v23, %v8874_v0 }
 0xde3   : > { %9565 = vmatprep.mubr.bf16.mxu0 %v8562_v37 }
 0xde4   : > { %9566 = vmatmul.mubr.bf16.gmra.mrb[152].mxu0 %v8561_v19  ;;  %9663 = vmatmul.mubr.bf16.gmra.mrb[40].mxu1 %v8891_v4 }
 0xde5   : > { %v8520_v26 = vpop.f32.mrb[212].mxu1  ;;  %9670 = vmatprep.mubr.bf16.mxu1 %v8894_v44 }
 0xde6   : > { %v8522_v48 = vpop.f32.mrb[213].mxu1 }
 0xde7   : > { %v8524_v63 = vpop.f32.mrb[214].mxu1 }
 0xde8   : > { %v8563_v8 = vpack.c.bf16 %v8524_v63, %v8520_v26  ;;  %v8526_v59 = vpop.f32.mrb[215].mxu1 }
 0xde9   : > { %v8564_v61 = vpack.c.bf16 %v8526_v59, %v8522_v48 }
 0xdeb   : > { %9573 = vmatprep.mubr.bf16.mxu0 %v8564_v61 }
 0xdec   : > { %9574 = vmatmul.mubr.bf16.gmra.mrb[156].mxu0 %v8563_v8  ;;  %9671 = vmatmul.mubr.bf16.gmra.mrb[44].mxu1 %v8893_v32 }
 0xded   : > { %v8530_v38 = vpop.f32.mrb[216].mxu1  ;;  %9678 = vmatprep.mubr.bf16.mxu1 %v8896_v9 }
 0xdee   : > { %v8532_v6 = vpop.f32.mrb[217].mxu1 }
 0xdef   : > { %v8534_v3 = vpop.f32.mrb[218].mxu1 }
 0xdf0   : > { %v8565_v4 = vpack.c.bf16 %v8534_v3, %v8530_v38  ;;  %v8536_v16 = vpop.f32.mrb[219].mxu1 }
 0xdf1   : > { %v8566_v36 = vpack.c.bf16 %v8536_v16, %v8532_v6 }
 0xdf3   : > { %9581 = vmatprep.mubr.bf16.mxu0 %v8566_v36 }
 0xdf4   : > { %9582 = vmatmul.mubr.bf16.gmra.mrb[160].mxu0 %v8565_v4  ;;  %9679 = vmatmul.mubr.bf16.gmra.mrb[48].mxu1 %v8895_v17 }
 0xdf5   : > { %9686 = vmatprep.mubr.bf16.mxu1 %v8898_v39 }
 0xdfc   : > { %9687 = vmatmul.mubr.bf16.gmra.mrb[52].mxu1 %v8897_v43 }
 0xdfd   : > { %9694 = vmatprep.mubr.bf16.mxu1 %v8900_v22 }
 0xe04   : > { %9695 = vmatmul.mubr.bf16.gmra.mrb[56].mxu1 %v8899_v20 }
 0xe05   : > { %9702 = vmatprep.mubr.bf16.mxu1 %v8902_v10 }
 0xe0c   : > { %9703 = vmatmul.mubr.bf16.gmra.mrb[60].mxu1 %v8901_v35 }
 0xe0d   : > { %9710 = vmatprep.mubr.bf16.mxu1 %v8904_v58 }
 0xe14   : > { %9711 = vmatmul.mubr.bf16.gmra.mrb[64].mxu1 %v8903_v24 }
 0xe15   : > { %9718 = vmatprep.mubr.bf16.mxu1 %v8906_v50 }
 0xe1c   : > { %9719 = vmatmul.mubr.bf16.gmra.mrb[68].mxu1 %v8905_v13 }
 0xe1d   : > { %9726 = vmatprep.mubr.bf16.mxu1 %v8908_v27 }
 0xe1f   : > { %v11163_v34 = vpop.f32.mrb[220].mxu1 }
 0xe20   : > { %v11164_v12 = vpop.f32.mrb[221].mxu1 }
 0xe21   : > { %v11165_v32 = vadd.f32 %v11164_v12, %v11163_v34  ;;  %v11166_v44 = vpop.f32.mrb[222].mxu1 }
 0xe22   : > { %v11167_v52 = vpop.f32.mrb[223].mxu1 }
 0xe23   : > { %v11168_v31 = vadd.f32 %v11167_v52, %v11166_v44 }
 0xe24   : > { %9727 = vmatmul.mubr.bf16.gmra.mrb[72].mxu1 %v8907_v30  ;;  %v15768_v30 = vld [vmem:[%s16024_s26] ss:$0 sm:$0xff] }
 0xe25   : > { %v9335_v48 = vadd.f32 %v11165_v32, %v15768_v30  ;;  %v9338_v3 = vadd.f32 %v11168_v31, %v15768_v30 }
 0xe27   : > { %v11169_v25 = vpop.f32.mrb[224].mxu1 }
 0xe28   : > { %v11170_v17 = vpop.f32.mrb[225].mxu1 }
 0xe29   : > { %v11171_v47 = vadd.f32 %v11170_v17, %v11169_v25  ;;  %v11172_v9 = vpop.f32.mrb[226].mxu1 }
 0xe2a   : > { %v11173_v15 = vpop.f32.mrb[227].mxu1 }
 0xe2b   : > { %v15739_v57 = vadd.f32 %v11173_v15, %v11172_v9  ;;  %v9343_v25 = vadd.f32 %v11171_v47, %v15768_v30 }
 0xe2f   : > { %v11175_v62 = vpop.f32.mrb[228].mxu1 }
 0xe30   : > { %v11176_v43 = vpop.f32.mrb[229].mxu1 }
 0xe31   : > { %v15741_v49 = vadd.f32 %v11176_v43, %v11175_v62  ;;  %v11178_v39 = vpop.f32.mrb[230].mxu1 }
 0xe32   : > { %v11179_v56 = vpop.f32.mrb[231].mxu1 }
 0xe33   : > { %v15743_v51 = vadd.f32 %v11179_v56, %v11178_v39  ;;  %v9346_v39 = vadd.f32 %v15739_v57, %v15768_v30 }
 0xe37   : > { %v11181_v41 = vpop.f32.mrb[232].mxu1 }
 0xe38   : > { %v11182_v20 = vpop.f32.mrb[233].mxu1 }
 0xe39   : > { %v15745_v46 = vadd.f32 %v11182_v20, %v11181_v41  ;;  %v11184_v22 = vpop.f32.mrb[234].mxu1 }
 0xe3a   : > { %v11185_v40 = vpop.f32.mrb[235].mxu1 }
 0xe3b   : > { %v15747_v21 = vadd.f32 %v11185_v40, %v11184_v22 }
 0xe3f   : > { %v11187_v29 = vpop.f32.mrb[236].mxu1 }
 0xe40   : > { %v11188_v35 = vpop.f32.mrb[237].mxu1 }
 0xe41   : > { %v15749_v5 = vadd.f32 %v11188_v35, %v11187_v29  ;;  %v11190_v10 = vpop.f32.mrb[238].mxu1 }
 0xe42   : > { %v11191_v18 = vpop.f32.mrb[239].mxu1 }
 0xe43   : > { %v15751_v7 = vadd.f32 %v11191_v18, %v11190_v10  ;;  %v9351_v10 = vadd.f32 %v15741_v49, %v15768_v30 }
 0xe47   : > { %v11193_v24 = vpop.f32.mrb[240].mxu1 }
 0xe48   : > { %v11194_v58 = vpop.f32.mrb[241].mxu1 }
 0xe49   : > { %v15753_v14 = vadd.f32 %v11194_v58, %v11193_v24  ;;  %v11196_v54 = vpop.f32.mrb[242].mxu1 }
 0xe4a   : > { %v11197_v53 = vpop.f32.mrb[243].mxu1 }
 0xe4b   : > { %v15755_v55 = vadd.f32 %v11197_v53, %v11196_v54 }
 0xe4f   : > { %v11199_v13 = vpop.f32.mrb[244].mxu1 }
 0xe50   : > { %v11200_v60 = vpop.f32.mrb[245].mxu1 }
 0xe51   : > { %v15757_v2 = vadd.f32 %v11200_v60, %v11199_v13  ;;  %v11202_v50 = vpop.f32.mrb[246].mxu1  ;;  %v9354_v13 = vadd.f32 %v15743_v51, %v15768_v30 }
 0xe52   : > { %v11203_v42 = vpop.f32.mrb[247].mxu1 }
 0xe53   : > { %v15759_v45 = vadd.f32 %v11203_v42, %v11202_v50 }
 0xe57   : > { %v11205_v33 = vpop.f32.mrb[248].mxu1 }
 0xe58   : > { %v11206_v0 = vpop.f32.mrb[249].mxu1 }
 0xe59   : > { %v15761_v1 = vadd.f32 %v11206_v0, %v11205_v33  ;;  %v11208_v28 = vpop.f32.mrb[250].mxu1 }
 0xe5a   : > { %v11209_v19 = vpop.f32.mrb[251].mxu1 }
 0xe5b   : > { %v15763_v11 = vadd.f32 %v11209_v19, %v11208_v28 }
 0xe5f   : > { %v11211_v23 = vpop.f32.mrb[252].mxu1  ;;  %v11263_v37 = vpop.f32.mrb[108].mxu0 }
 0xe60   : > { %v11212_v27 = vpop.f32.mrb[253].mxu1  ;;  %v11264_v26 = vpop.f32.mrb[109].mxu0 }
 0xe61   : > { %v15771_v63 = vadd.f32 %v11212_v27, %v11211_v23  ;;  %v11265_v8 = vadd.f32 %v11264_v26, %v11263_v37  ;;  %v11214_v59 = vpop.f32.mrb[254].mxu1  ;;  %v11266_v61 = vpop.f32.mrb[110].mxu0  ;;  %v9359_v23 = vadd.f32 %v15745_v46, %v15768_v30 }
 0xe62   : > { %v11215_v38 = vpop.f32.mrb[255].mxu1  ;;  %v11267_v6 = vpop.f32.mrb[111].mxu0 }
 0xe63   : > { %v15774_v4 = vadd.f32 %v11265_v8, %v9335_v48  ;;  %v15776_v16 = vadd.f32 %v11215_v38, %v11214_v59  ;;  %v11268_v36 = vadd.f32 %v11267_v6, %v11266_v61  ;;  %v9362_v59 = vadd.f32 %v15747_v21, %v15768_v30 }
 0xe65   : > { %v15778_v34 = vadd.f32 %v11268_v36, %v9338_v3 }
 0xe67   : > { %v11217_v12 = vpop.f32.mrb[0].mxu1  ;;  %v11269_v44 = vpop.f32.mrb[112].mxu0 }
 0xe68   : > { %v11218_v52 = vpop.f32.mrb[1].mxu1  ;;  %v11270_v32 = vpop.f32.mrb[113].mxu0 }
 0xe69   : > { %v15781_v17 = vadd.f32 %v11218_v52, %v11217_v12  ;;  %v11271_v9 = vadd.f32 %v11270_v32, %v11269_v44  ;;  %v11220_v15 = vpop.f32.mrb[2].mxu1  ;;  %v11272_v62 = vpop.f32.mrb[114].mxu0  ;;  %v9367_v52 = vadd.f32 %v15749_v5, %v15768_v30 }
 0xe6a   : > { %v11221_v43 = vpop.f32.mrb[3].mxu1  ;;  %v11273_v31 = vpop.f32.mrb[115].mxu0 }
 0xe6b   : > { %v15785_v56 = vadd.f32 %v11271_v9, %v9343_v25  ;;  %v15787_v41 = vadd.f32 %v11221_v43, %v11220_v15  ;;  %v11274_v20 = vadd.f32 %v11273_v31, %v11272_v62  ;;  %v9370_v43 = vadd.f32 %v15751_v7, %v15768_v30 }
 0xe6d   : > { %v15789_v22 = vadd.f32 %v11274_v20, %v9346_v39 }
 0xe6f   : > { %v11223_v40 = vpop.f32.mrb[4].mxu1  ;;  %v11275_v29 = vpop.f32.mrb[116].mxu0 }
 0xe70   : > { %v11224_v47 = vpop.f32.mrb[5].mxu1  ;;  %v11276_v35 = vpop.f32.mrb[117].mxu0 }
 0xe71   : > { %v15793_v18 = vadd.f32 %v11224_v47, %v11223_v40  ;;  %v11277_v24 = vadd.f32 %v11276_v35, %v11275_v29  ;;  %v11226_v58 = vpop.f32.mrb[6].mxu1  ;;  %v11278_v54 = vpop.f32.mrb[118].mxu0 }
 0xe72   : > { %v11227_v57 = vpop.f32.mrb[7].mxu1  ;;  %v11279_v53 = vpop.f32.mrb[119].mxu0 }
 0xe73   : > { %v15797_v60 = vadd.f32 %v11277_v24, %v9351_v10  ;;  %v15799_v50 = vadd.f32 %v11227_v57, %v11226_v58  ;;  %v11280_v42 = vadd.f32 %v11279_v53, %v11278_v54  ;;  %v9375_v10 = vadd.f32 %v15753_v14, %v15768_v30 }
 0xe75   : > { %v15801_v33 = vadd.f32 %v11280_v42, %v9354_v13  ;;  %v9378_v13 = vadd.f32 %v15755_v55, %v15768_v30  ;;  %v9386_v55 = vadd.f32 %v15759_v45, %v15768_v30  ;;  %v9391_v45 = vadd.f32 %v15761_v1, %v15768_v30 }
 0xe77   : > { %v11229_v0 = vpop.f32.mrb[8].mxu1  ;;  %v11281_v28 = vpop.f32.mrb[120].mxu0 }
 0xe78   : > { %v11230_v49 = vpop.f32.mrb[9].mxu1  ;;  %v11282_v19 = vpop.f32.mrb[121].mxu0 }
 0xe79   : > { %v15805_v37 = vadd.f32 %v11230_v49, %v11229_v0  ;;  %v11283_v27 = vadd.f32 %v11282_v19, %v11281_v28  ;;  %v11232_v26 = vpop.f32.mrb[10].mxu1  ;;  %v11284_v48 = vpop.f32.mrb[122].mxu0 }
 0xe7a   : > { %v11233_v51 = vpop.f32.mrb[11].mxu1  ;;  %v11285_v8 = vpop.f32.mrb[123].mxu0 }
 0xe7b   : > { %v15809_v61 = vadd.f32 %v11283_v27, %v9359_v23  ;;  %v15811_v38 = vadd.f32 %v11233_v51, %v11232_v26  ;;  %v11286_v6 = vadd.f32 %v11285_v8, %v11284_v48  ;;  %v9383_v26 = vadd.f32 %v15757_v2, %v15768_v30 }
 0xe7d   : > { %v15813_v3 = vadd.f32 %v11286_v6, %v9362_v59 }
 0xe7f   : > { %v11235_v36 = vpop.f32.mrb[12].mxu1  ;;  %v11287_v12 = vpop.f32.mrb[124].mxu0 }
 0xe80   : > { %v11236_v46 = vpop.f32.mrb[13].mxu1  ;;  %v11288_v44 = vpop.f32.mrb[125].mxu0 }
 0xe81   : > { %v15817_v32 = vadd.f32 %v11236_v46, %v11235_v36  ;;  %v11289_v25 = vadd.f32 %v11288_v44, %v11287_v12  ;;  %v11238_v9 = vpop.f32.mrb[14].mxu1  ;;  %v11290_v15 = vpop.f32.mrb[126].mxu0 }
 0xe82   : > { %v11239_v21 = vpop.f32.mrb[15].mxu1  ;;  %v11291_v62 = vpop.f32.mrb[127].mxu0 }
 0xe83   : > { %v15821_v31 = vadd.f32 %v11289_v25, %v9367_v52  ;;  %v15823_v39 = vadd.f32 %v11239_v21, %v11238_v9  ;;  %v11292_v20 = vadd.f32 %v11291_v62, %v11290_v15 }
 0xe85   : > { %v15825_v40 = vadd.f32 %v11292_v20, %v9370_v43 }
 0xe87   : > { %v11241_v29 = vpop.f32.mrb[16].mxu1  ;;  %v11293_v47 = vpop.f32.mrb[128].mxu0 }
 0xe88   : > { %v11242_v5 = vpop.f32.mrb[17].mxu1  ;;  %v11294_v35 = vpop.f32.mrb[129].mxu0 }
 0xe89   : > { %v15829_v24 = vadd.f32 %v11242_v5, %v11241_v29  ;;  %v11295_v58 = vadd.f32 %v11294_v35, %v11293_v47  ;;  %v11244_v54 = vpop.f32.mrb[18].mxu1  ;;  %v11296_v57 = vpop.f32.mrb[130].mxu0 }
 0xe8a   : > { %v11245_v7 = vpop.f32.mrb[19].mxu1  ;;  %v11297_v53 = vpop.f32.mrb[131].mxu0 }
 0xe8b   : > { %v15833_v42 = vadd.f32 %v11295_v58, %v9375_v10  ;;  %v15835_v0 = vadd.f32 %v11245_v7, %v11244_v54  ;;  %v11298_v28 = vadd.f32 %v11297_v53, %v11296_v57  ;;  %v9394_v58 = vadd.f32 %v15763_v11, %v15768_v30 }
 0xe8d   : > { %v15837_v49 = vadd.f32 %v11298_v28, %v9378_v13 }
 0xe8f   : > { %v11299_v19 = vpop.f32.mrb[132].mxu0  ;;  %v11363_v23 = vpop.f32.mrb[20].mxu1 }
 0xe90   : > { %v11300_v14 = vpop.f32.mrb[133].mxu0  ;;  %v11364_v27 = vpop.f32.mrb[21].mxu1 }
 0xe91   : > { %v11301_v48 = vadd.f32 %v11300_v14, %v11299_v19  ;;  %v11365_v51 = vadd.f32 %v11364_v27, %v11363_v23  ;;  %v11302_v8 = vpop.f32.mrb[134].mxu0  ;;  %v11366_v59 = vpop.f32.mrb[22].mxu1 }
 0xe92   : > { %v11303_v6 = vpop.f32.mrb[135].mxu0  ;;  %v11367_v36 = vpop.f32.mrb[23].mxu1 }
 0xe93   : > { %v15843_v12 = vadd.f32 %v11301_v48, %v9383_v26  ;;  %v9625_v46 = vadd.f32 %v11365_v51, %v15774_v4  ;;  %v11304_v44 = vadd.f32 %v11303_v6, %v11302_v8  ;;  %v11368_v52 = vadd.f32 %v11367_v36, %v11366_v59 }
 0xe94   : > { %v9399_v51 = vadd.f32 %v15771_v63, %v15768_v30  ;;  %v9402_v6 = vadd.f32 %v15776_v16, %v15768_v30 }
 0xe95   : > { %v9735_v25 = vsub.f32 0.0, %v9625_v46  ;;  %v15846_v9 = vadd.f32 %v11304_v44, %v9386_v55  ;;  %v9628_v2 = vadd.f32 %v11368_v52, %v15778_v34 }
 0xe97   : > { %v9763_v15 = vmul.f32 1.442695, %v9735_v25  ;;  %v9736_v21 = vsub.f32 0.0, %v9628_v2  ;;  %v11305_v62 = vpop.f32.mrb[136].mxu0  ;;  %v11369_v43 = vpop.f32.mrb[24].mxu1 }
 0xe98   : > { %v11306_v20 = vpop.f32.mrb[137].mxu0  ;;  %v11370_v29 = vpop.f32.mrb[25].mxu1 }
 0xe99   : > { %12728 = vpow2.f32 %v9763_v15  ;;  %v9765_v47 = vmul.f32 1.442695, %v9736_v21  ;;  %v11307_v5 = vadd.f32 %v11306_v20, %v11305_v62  ;;  %v11371_v4 = vadd.f32 %v11370_v29, %v11369_v43  ;;  %v11308_v35 = vpop.f32.mrb[138].mxu0  ;;  %v11372_v10 = vpop.f32.mrb[26].mxu1 }
 0xe9a   : > { %v11309_v54 = vpop.f32.mrb[139].mxu0  ;;  %v11373_v34 = vpop.f32.mrb[27].mxu1 }
 0xe9b   : > { %12730 = vpow2.f32 %v9765_v47  ;;  %v15853_v57 = vadd.f32 %v11307_v5, %v9391_v45  ;;  %v9633_v7 = vadd.f32 %v11371_v4, %v15785_v56  ;;  %v11310_v53 = vadd.f32 %v11309_v54, %v11308_v35 }
 0xe9c   : > { %v11374_v1 = vadd.f32 %v11373_v34, %v11372_v10  ;;  %v9407_v4 = vadd.f32 %v15781_v17, %v15768_v30 }
 0xe9d   : > { %v9737_v13 = vsub.f32 0.0, %v9633_v7  ;;  %v15856_v28 = vadd.f32 %v11310_v53, %v9394_v58 }
 0xe9e   : > { %v9636_v19 = vadd.f32 %v11374_v1, %v15789_v22 }
 0xe9f   : > { %v9767_v23 = vmul.f32 1.442695, %v9737_v13  ;;  %v11311_v14 = vpop.f32.mrb[140].mxu0  ;;  %v11375_v27 = vpop.f32.mrb[28].mxu1 }
 0xea0   : > { %v9738_v26 = vsub.f32 0.0, %v9636_v19  ;;  %v11312_v48 = vpop.f32.mrb[141].mxu0  ;;  %v11376_v11 = vpop.f32.mrb[29].mxu1 }
 0xea1   : > { %12732 = vpow2.f32 %v9767_v23  ;;  %v11313_v8 = vadd.f32 %v11312_v48, %v11311_v14  ;;  %v11377_v59 = vadd.f32 %v11376_v11, %v11375_v27  ;;  %v11314_v56 = vpop.f32.mrb[142].mxu0  ;;  %v11378_v55 = vpop.f32.mrb[30].mxu1 }
 0xea2   : > { %v9769_v36 = vmul.f32 1.442695, %v9738_v26  ;;  %v11315_v46 = vpop.f32.mrb[143].mxu0  ;;  %v11379_v22 = vpop.f32.mrb[31].mxu1 }
 0xea3   : > { %v12729_v44 = vpop.eup %12728  ;;  %v15863_v52 = vadd.f32 %v11313_v8, %v9399_v51  ;;  %v9641_v25 = vadd.f32 %v11377_v59, %v15797_v60  ;;  %v11316_v2 = vadd.f32 %v11315_v46, %v11314_v56  ;;  %v11380_v15 = vadd.f32 %v11379_v22, %v11378_v55 }
 0xea4   : > { %v9819_v21 = vadd.f32 1.0, %v12729_v44  ;;  %12734 = vpow2.f32 %v9769_v36 }
 0xea5   : > { %v12731_v63 = vpop.eup %12730  ;;  %v9739_v62 = vsub.f32 0.0, %v9641_v25  ;;  %v15866_v43 = vadd.f32 %v11316_v2, %v9402_v6  ;;  %v9644_v45 = vadd.f32 %v11380_v15, %v15801_v33  ;;  %v9410_v33 = vadd.f32 %v15787_v41, %v15768_v30 }
 0xea6   : > { %12736 = vrcp.f32 %v9819_v21  ;;  %v9820_v16 = vadd.f32 1.0, %v12731_v63  ;;  %v9418_v21 = vadd.f32 %v15799_v50, %v15768_v30 }
 0xea7   : > { %v9771_v20 = vmul.f32 1.442695, %v9739_v62  ;;  %v9740_v29 = vsub.f32 0.0, %v9644_v45  ;;  %v11317_v47 = vpop.f32.mrb[144].mxu0  ;;  %v11381_v5 = vpop.f32.mrb[32].mxu1 }
 0xea8   : > { %12738 = vrcp.f32 %v9820_v16  ;;  %v11318_v60 = vpop.f32.mrb[145].mxu0  ;;  %v11382_v35 = vpop.f32.mrb[33].mxu1 }
 0xea9   : > { %12740 = vpow2.f32 %v9771_v20  ;;  %v9773_v10 = vmul.f32 1.442695, %v9740_v29  ;;  %v11319_v58 = vadd.f32 %v11318_v60, %v11317_v47  ;;  %v11383_v54 = vadd.f32 %v11382_v35, %v11381_v5  ;;  %v11320_v34 = vpop.f32.mrb[146].mxu0  ;;  %v11384_v7 = vpop.f32.mrb[34].mxu1 }
 0xeaa   : > { %v11321_v53 = vpop.f32.mrb[147].mxu0  ;;  %v11385_v1 = vpop.f32.mrb[35].mxu1 }
 0xeab   : > { %v12733_v13 = vpop.eup %12732  ;;  %12742 = vpow2.f32 %v9773_v10  ;;  %v15873_v19 = vadd.f32 %v11319_v58, %v9407_v4  ;;  %v9649_v17 = vadd.f32 %v11383_v54, %v15809_v61  ;;  %v11322_v23 = vadd.f32 %v11321_v53, %v11320_v34 }
 0xeac   : > { %v9821_v14 = vadd.f32 1.0, %v12733_v13  ;;  %v11386_v27 = vadd.f32 %v11385_v1, %v11384_v7  ;;  %v9415_v61 = vadd.f32 %v15793_v18, %v15768_v30 }
 0xead   : > { %v9741_v26 = vsub.f32 0.0, %v9649_v17  ;;  %v15877_v48 = vadd.f32 %v11322_v23, %v9410_v33 }
 0xeae   : > { %v12735_v11 = vpop.eup %12734  ;;  %12744 = vrcp.f32 %v9821_v14  ;;  %v9652_v51 = vadd.f32 %v11386_v27, %v15813_v3 }
 0xeaf   : > { %v9822_v41 = vadd.f32 1.0, %v12735_v11  ;;  %v9775_v8 = vmul.f32 1.442695, %v9741_v26  ;;  %v11323_v59 = vpop.f32.mrb[148].mxu0  ;;  %v11387_v56 = vpop.f32.mrb[36].mxu1 }
 0xeb0   : > { %v12737_v55 = vpop.eup %12736  ;;  %v9742_v6 = vsub.f32 0.0, %v9652_v51  ;;  %v11324_v36 = vpop.f32.mrb[149].mxu0 }
 0xeb1   : > { %v11388_v46 = vpop.f32.mrb[37].mxu1  ;;  %v9875_v22 = vmin.f32 %v12737_v55, 1.0  ;;  %12746 = vrcp.f32 %v9822_v41  ;;  %v11325_v3 = vadd.f32 %v11324_v36, %v11323_v59  ;;  %v11326_v25 = vpop.f32.mrb[150].mxu0 }
 0xeb2   : > { %v11389_v44 = vadd.f32 %v11388_v46, %v11387_v56  ;;  %v11390_v2 = vpop.f32.mrb[38].mxu1  ;;  %v12739_v15 = vpop.eup %12738  ;;  %12748 = vpow2.f32 %v9775_v8  ;;  %v9777_v63 = vmul.f32 1.442695, %v9742_v6 }
 0xeb3   : > { %v11327_v62 = vpop.f32.mrb[151].mxu0  ;;  %v11391_v45 = vpop.f32.mrb[39].mxu1  ;;  %9903 = vst [vmem:[%s15883_s18] sm:$0xff] %v9875_v22  ;;  %v9876_v16 = vmin.f32 %v12739_v15, 1.0  ;;  %v15890_v20 = vadd.f32 %v11325_v3, %v9415_v61 }
 0xeb4   : > { %v12741_v18 = vpop.eup %12740  ;;  %v9657_v29 = vadd.f32 %v11389_v44, %v15821_v31  ;;  %v11328_v47 = vadd.f32 %v11327_v62, %v11326_v25  ;;  %12750 = vpow2.f32 %v9777_v63  ;;  %v11392_v4 = vadd.f32 %v11391_v45, %v11390_v2 }
 0xeb5   : > { %v9823_v5 = vadd.f32 1.0, %v12741_v18  ;;  %v12743_v60 = vpop.eup %12742  ;;  %9904 = vst [vmem:[%s15883_s18 + $0x8] sm:$0xff] %v9876_v16  ;;  %v9423_v31 = vadd.f32 %v15805_v37, %v15768_v30  ;;  %v9431_v63 = vadd.f32 %v15817_v32, %v15768_v30 }
 0xeb6   : > { %v9743_v35 = vsub.f32 0.0, %v9657_v29  ;;  %v15894_v10 = vadd.f32 %v11328_v47, %v9418_v21  ;;  %v9824_v50 = vadd.f32 1.0, %v12743_v60  ;;  %v9660_v58 = vadd.f32 %v11392_v4, %v15825_v40 }
 0xeb7   : > { %12752 = vrcp.f32 %v9823_v5  ;;  %v11329_v34 = vpop.f32.mrb[152].mxu0  ;;  %v11393_v7 = vpop.f32.mrb[40].mxu1  ;;  %v9426_v40 = vadd.f32 %v15811_v38, %v15768_v30  ;;  %v9434_v4 = vadd.f32 %v15823_v39, %v15768_v30 }
 0xeb8   : > { %v9779_v54 = vmul.f32 1.442695, %v9743_v35  ;;  %v12745_v33 = vpop.eup %12744  ;;  %12754 = vrcp.f32 %v9824_v50  ;;  %v9744_v53 = vsub.f32 0.0, %v9660_v58  ;;  %v11330_v1 = vpop.f32.mrb[153].mxu0 }
 0xeb9   : > { %v11394_v13 = vpop.f32.mrb[41].mxu1  ;;  %v9877_v17 = vmin.f32 %v12745_v33, 1.0  ;;  %v11331_v23 = vadd.f32 %v11330_v1, %v11329_v34  ;;  %v11332_v27 = vpop.f32.mrb[154].mxu0 }
 0xeba   : > { %12756 = vpow2.f32 %v9779_v54  ;;  %v11395_v14 = vadd.f32 %v11394_v13, %v11393_v7  ;;  %v11396_v26 = vpop.f32.mrb[42].mxu1  ;;  %v9781_v11 = vmul.f32 1.442695, %v9744_v53  ;;  %v11333_v51 = vpop.f32.mrb[155].mxu0 }
 0xebb   : > { %v11397_v41 = vpop.f32.mrb[43].mxu1  ;;  %v12747_v8 = vpop.eup %12746  ;;  %9905 = vst [vmem:[%s15883_s18 + $0x10] sm:$0xff] %v9877_v17  ;;  %v15902_v37 = vadd.f32 %v11331_v23, %v9423_v31  ;;  %v11334_v56 = vadd.f32 %v11333_v51, %v11332_v27 }
 0xebc   : > { %v9665_v59 = vadd.f32 %v11395_v14, %v15833_v42  ;;  %v11398_v55 = vadd.f32 %v11397_v41, %v11396_v26  ;;  %v12749_v61 = vpop.eup %12748  ;;  %v9878_v6 = vmin.f32 %v12747_v8, 1.0  ;;  %12758 = vpow2.f32 %v9781_v11 }
 0xebd   : > { %v9825_v36 = vadd.f32 1.0, %v12749_v61  ;;  %v15905_v22 = vadd.f32 %v11334_v56, %v9426_v40 }
 0xebe   : > { %v9745_v46 = vsub.f32 0.0, %v9665_v59  ;;  %v9668_v38 = vadd.f32 %v11398_v55, %v15837_v49  ;;  %v12751_v3 = vpop.eup %12750  ;;  %9906 = vst [vmem:[%s15883_s18 + $0x18] sm:$0xff] %v9878_v6 }
 0xebf   : > { %12760 = vrcp.f32 %v9825_v36  ;;  %v9826_v44 = vadd.f32 1.0, %v12751_v3  ;;  %v11335_v15 = vpop.f32.mrb[156].mxu0  ;;  %v11399_v21 = vpop.f32.mrb[44].mxu1 }
 0xec0   : > { %v9783_v25 = vmul.f32 1.442695, %v9745_v46  ;;  %v9746_v2 = vsub.f32 0.0, %v9668_v38  ;;  %v11336_v62 = vpop.f32.mrb[157].mxu0  ;;  %v11400_v45 = vpop.f32.mrb[45].mxu1 }
 0xec1   : > { %v12753_v42 = vpop.eup %12752  ;;  %12762 = vrcp.f32 %v9826_v44  ;;  %v11337_v29 = vadd.f32 %v11336_v62, %v11335_v15  ;;  %v11338_v49 = vpop.f32.mrb[158].mxu0  ;;  %v11401_v60 = vadd.f32 %v11400_v45, %v11399_v21 }
 0xec2   : > { %v9879_v18 = vmin.f32 %v12753_v42, 1.0  ;;  %v9785_v16 = vmul.f32 1.442695, %v9746_v2  ;;  %v11402_v47 = vpop.f32.mrb[46].mxu1  ;;  %v12755_v5 = vpop.eup %12754  ;;  %12764 = vpow2.f32 %v9783_v25 }
 0xec3   : > { %v11339_v35 = vpop.f32.mrb[159].mxu0  ;;  %v11403_v50 = vpop.f32.mrb[47].mxu1  ;;  %v9880_v32 = vmin.f32 %v12755_v5, 1.0  ;;  %v15914_v54 = vadd.f32 %v11337_v29, %v9431_v63  ;;  %v9673_v33 = vadd.f32 %v11401_v60, %v15843_v12  ;;  %v9439_v12 = vadd.f32 %v15829_v24, %v15768_v30 }
 0xec4   : > { %v12757_v58 = vpop.eup %12756  ;;  %9907 = vst [vmem:[%s15883_s18 + $0x20] sm:$0xff] %v9879_v18  ;;  %12766 = vpow2.f32 %v9785_v16  ;;  %v11340_v34 = vadd.f32 %v11339_v35, %v11338_v49  ;;  %v11404_v31 = vadd.f32 %v11403_v50, %v11402_v47 }
 0xec5   : > { %v9827_v7 = vadd.f32 1.0, %v12757_v58  ;;  %9908 = vst [vmem:[%s15883_s18 + $0x28] sm:$0xff] %v9880_v32  ;;  %v9747_v39 = vsub.f32 0.0, %v9673_v33 }
 0xec6   : > { %v15918_v53 = vadd.f32 %v11340_v34, %v9434_v4  ;;  %v12759_v1 = vpop.eup %12758  ;;  %v9676_v13 = vadd.f32 %v11404_v31, %v15846_v9  ;;  %v9442_v9 = vadd.f32 %v15835_v0, %v15768_v30 }
 0xec7   : > { %12768 = vrcp.f32 %v9827_v7  ;;  %v9828_v17 = vadd.f32 1.0, %v12759_v1  ;;  %v11341_v23 = vpop.f32.mrb[160].mxu0  ;;  %v11405_v14 = vpop.f32.mrb[48].mxu1  ;;  %v9787_v27 = vmul.f32 1.442695, %v9747_v39 }
 0xec8   : > { %v9748_v26 = vsub.f32 0.0, %v9676_v13  ;;  %v11342_v40 = vpop.f32.mrb[161].mxu0  ;;  %v11406_v11 = vpop.f32.mrb[49].mxu1 }
 0xec9   : > { %v12761_v51 = vpop.eup %12760  ;;  %12770 = vrcp.f32 %v9828_v17  ;;  %v11343_v41 = vadd.f32 %v11342_v40, %v11341_v23  ;;  %v11407_v8 = vadd.f32 %v11406_v11, %v11405_v14  ;;  %v11344_v59 = vpop.f32.mrb[162].mxu0 }
 0xeca   : > { %v11408_v56 = vpop.f32.mrb[50].mxu1  ;;  %v9881_v55 = vmin.f32 %v12761_v51, 1.0  ;;  %12772 = vpow2.f32 %v9787_v27  ;;  %v9789_v61 = vmul.f32 1.442695, %v9748_v26  ;;  %v11345_v6 = vpop.f32.mrb[163].mxu0 }
 0xecb   : > { %v11409_v36 = vpop.f32.mrb[51].mxu1  ;;  %v12763_v46 = vpop.eup %12762  ;;  %v15925_v38 = vadd.f32 %v11343_v41, %v9439_v12  ;;  %v9681_v24 = vadd.f32 %v11407_v8, %v15853_v57  ;;  %v11346_v3 = vadd.f32 %v11345_v6, %v11344_v59 }
 0xecc   : > { %v11410_v44 = vadd.f32 %v11409_v36, %v11408_v56  ;;  %v12765_v25 = vpop.eup %12764  ;;  %9909 = vst [vmem:[%s15883_s18 + $0x30] sm:$0xff] %v9881_v55  ;;  %v9882_v2 = vmin.f32 %v12763_v46, 1.0  ;;  %12774 = vpow2.f32 %v9789_v61 }
 0xecd   : > { %v9829_v21 = vadd.f32 1.0, %v12765_v25  ;;  %v9749_v30 = vsub.f32 0.0, %v9681_v24  ;;  %v15929_v0 = vadd.f32 %v11346_v3, %v9442_v9 }
 0xece   : > { %v12767_v15 = vpop.eup %12766  ;;  %v9684_v42 = vadd.f32 %v11410_v44, %v15856_v28  ;;  %9910 = vst [vmem:[%s15883_s18 + $0x38] sm:$0xff] %v9882_v2 }
 0xecf   : > { %v9830_v63 = vadd.f32 1.0, %v12767_v15  ;;  %12776 = vrcp.f32 %v9829_v21  ;;  %v9791_v62 = vmul.f32 1.442695, %v9749_v30  ;;  %v11411_v57 = vpop.f32.mrb[52].mxu1 }
 0xed0   : > { %v9750_v45 = vsub.f32 0.0, %v9684_v42  ;;  %v11412_v16 = vpop.f32.mrb[53].mxu1 }
 0xed1   : > { %v12769_v18 = vpop.eup %12768  ;;  %12778 = vrcp.f32 %v9830_v63  ;;  %v11413_v47 = vadd.f32 %v11412_v16, %v11411_v57  ;;  %v11414_v5 = vpop.f32.mrb[54].mxu1 }
 0xed2   : > { %v9883_v29 = vmin.f32 %v12769_v18, 1.0  ;;  %12780 = vpow2.f32 %v9791_v62  ;;  %v9793_v49 = vmul.f32 1.442695, %v9750_v45  ;;  %v11415_v4 = vpop.f32.mrb[55].mxu1 }
 0xed3   : > { %v12771_v60 = vpop.eup %12770  ;;  %v9689_v28 = vadd.f32 %v11413_v47, %v15863_v52  ;;  %v11416_v35 = vadd.f32 %v11415_v4, %v11414_v5 }
 0xed4   : > { %9911 = vst [vmem:[%s15883_s18 + $0x40] sm:$0xff] %v9883_v29  ;;  %12782 = vpow2.f32 %v9793_v49  ;;  %v12773_v50 = vpop.eup %12772  ;;  %v9884_v58 = vmin.f32 %v12771_v60, 1.0 }
 0xed5   : > { %v9831_v32 = vadd.f32 1.0, %v12773_v50  ;;  %v9751_v34 = vsub.f32 0.0, %v9689_v28  ;;  %v9692_v7 = vadd.f32 %v11416_v35, %v15866_v43 }
 0xed6   : > { %v12775_v33 = vpop.eup %12774  ;;  %9912 = vst [vmem:[%s15883_s18 + $0x48] sm:$0xff] %v9884_v58 }
 0xed7   : > { %12784 = vrcp.f32 %v9831_v32  ;;  %v9832_v31 = vadd.f32 1.0, %v12775_v33  ;;  %v9795_v1 = vmul.f32 1.442695, %v9751_v34  ;;  %v9752_v39 = vsub.f32 0.0, %v9692_v7  ;;  %v11417_v13 = vpop.f32.mrb[56].mxu1 }
 0xed8   : > { %v11418_v17 = vpop.f32.mrb[57].mxu1 }
 0xed9   : > { %v12777_v23 = vpop.eup %12776  ;;  %12786 = vrcp.f32 %v9832_v31  ;;  %v9797_v52 = vmul.f32 1.442695, %v9752_v39  ;;  %v11419_v14 = vadd.f32 %v11418_v17, %v11417_v13  ;;  %v11420_v27 = vpop.f32.mrb[58].mxu1 }
 0xeda   : > { %v9885_v40 = vmin.f32 %v12777_v23, 1.0  ;;  %12788 = vpow2.f32 %v9795_v1  ;;  %v11421_v11 = vpop.f32.mrb[59].mxu1 }
 0xedb   : > { %v12779_v26 = vpop.eup %12778  ;;  %12790 = vpow2.f32 %v9797_v52  ;;  %v9697_v12 = vadd.f32 %v11419_v14, %v15873_v19  ;;  %v11422_v41 = vadd.f32 %v11421_v11, %v11420_v27 }
 0xedc   : > { %v12781_v43 = vpop.eup %12780  ;;  %v9886_v51 = vmin.f32 %v12779_v26, 1.0  ;;  %9913 = vst [vmem:[%s15883_s18 + $0x50] sm:$0xff] %v9885_v40 }
 0xedd   : > { %v9833_v8 = vadd.f32 1.0, %v12781_v43  ;;  %v9753_v56 = vsub.f32 0.0, %v9697_v12  ;;  %v9700_v9 = vadd.f32 %v11422_v41, %v15877_v48 }
 0xede   : > { %v12783_v59 = vpop.eup %12782  ;;  %9914 = vst [vmem:[%s15883_s18 + $0x58] sm:$0xff] %v9886_v51 }
 0xedf   : > { %12792 = vrcp.f32 %v9833_v8  ;;  %v9834_v55 = vadd.f32 1.0, %v12783_v59  ;;  %v9799_v61 = vmul.f32 1.442695, %v9753_v56  ;;  %v9754_v6 = vsub.f32 0.0, %v9700_v9  ;;  %v11423_v36 = vpop.f32.mrb[60].mxu1 }
 0xee0   : > { %v11424_v46 = vpop.f32.mrb[61].mxu1 }
 0xee1   : > { %12794 = vrcp.f32 %v9834_v55  ;;  %v12785_v24 = vpop.eup %12784  ;;  %v9801_v3 = vmul.f32 1.442695, %v9754_v6  ;;  %v11425_v19 = vadd.f32 %v11424_v46, %v11423_v36  ;;  %v11426_v44 = vpop.f32.mrb[62].mxu1 }
 0xee2   : > { %12796 = vpow2.f32 %v9799_v61  ;;  %v9887_v25 = vmin.f32 %v12785_v24, 1.0  ;;  %v11427_v2 = vpop.f32.mrb[63].mxu1 }
 0xee3   : > { %v12787_v15 = vpop.eup %12786  ;;  %12798 = vpow2.f32 %v9801_v3  ;;  %v9705_v48 = vadd.f32 %v11425_v19, %v15890_v20  ;;  %v11428_v21 = vadd.f32 %v11427_v2, %v11426_v44 }
 0xee4   : > { %v12789_v30 = vpop.eup %12788  ;;  %9915 = vst [vmem:[%s15883_s18 + $0x60] sm:$0xff] %v9887_v25  ;;  %v9888_v42 = vmin.f32 %v12787_v15, 1.0 }
 0xee5   : > { %v12791_v63 = vpop.eup %12790  ;;  %v9835_v62 = vadd.f32 1.0, %v12789_v30  ;;  %v9755_v45 = vsub.f32 0.0, %v9705_v48  ;;  %v9708_v57 = vadd.f32 %v11428_v21, %v15894_v10 }
 0xee6   : > { %9916 = vst [vmem:[%s15883_s18 + $0x68] sm:$0xff] %v9888_v42  ;;  %v9836_v18 = vadd.f32 1.0, %v12791_v63 }
 0xee7   : > { %12800 = vrcp.f32 %v9835_v62  ;;  %v9803_v16 = vmul.f32 1.442695, %v9755_v45  ;;  %v9756_v29 = vsub.f32 0.0, %v9708_v57  ;;  %v11429_v49 = vpop.f32.mrb[64].mxu1 }
 0xee8   : > { %12802 = vrcp.f32 %v9836_v18  ;;  %v11430_v5 = vpop.f32.mrb[65].mxu1 }
 0xee9   : > { %v12793_v47 = vpop.eup %12792  ;;  %12804 = vpow2.f32 %v9803_v16  ;;  %v9805_v4 = vmul.f32 1.442695, %v9756_v29  ;;  %v11431_v60 = vadd.f32 %v11430_v5, %v11429_v49  ;;  %v11432_v28 = vpop.f32.mrb[66].mxu1 }
 0xeea   : > { %v9889_v20 = vmin.f32 %v12793_v47, 1.0  ;;  %v11433_v50 = vpop.f32.mrb[67].mxu1 }
 0xeeb   : > { %v12795_v35 = vpop.eup %12794  ;;  %12806 = vpow2.f32 %v9805_v4  ;;  %v9713_v32 = vadd.f32 %v11431_v60, %v15902_v37  ;;  %v11434_v34 = vadd.f32 %v11433_v50, %v11432_v28 }
 0xeec   : > { %v12797_v58 = vpop.eup %12796  ;;  %9917 = vst [vmem:[%s15883_s18 + $0x70] sm:$0xff] %v9889_v20  ;;  %v9890_v10 = vmin.f32 %v12795_v35, 1.0 }
 0xeed   : > { %v9837_v7 = vadd.f32 1.0, %v12797_v58  ;;  %v12799_v33 = vpop.eup %12798  ;;  %v9757_v31 = vsub.f32 0.0, %v9713_v32  ;;  %v9716_v1 = vadd.f32 %v11434_v34, %v15905_v22 }
 0xeee   : > { %9918 = vst [vmem:[%s15883_s18 + $0x78] sm:$0xff] %v9890_v10  ;;  %v9838_v39 = vadd.f32 1.0, %v12799_v33 }
 0xeef   : > { %12808 = vrcp.f32 %v9837_v7  ;;  %v9807_v13 = vmul.f32 1.442695, %v9757_v31  ;;  %v9758_v17 = vsub.f32 0.0, %v9716_v1  ;;  %v11435_v23 = vpop.f32.mrb[68].mxu1 }
 0xef0   : > { %12810 = vrcp.f32 %v9838_v39  ;;  %v11436_v52 = vpop.f32.mrb[69].mxu1 }
 0xef1   : > { %v12801_v14 = vpop.eup %12800  ;;  %12812 = vpow2.f32 %v9807_v13  ;;  %v9809_v27 = vmul.f32 1.442695, %v9758_v17  ;;  %v11437_v37 = vadd.f32 %v11436_v52, %v11435_v23  ;;  %v11438_v26 = vpop.f32.mrb[70].mxu1 }
 0xef2   : > { %v12803_v40 = vpop.eup %12802  ;;  %v9891_v11 = vmin.f32 %v12801_v14, 1.0  ;;  %v11439_v43 = vpop.f32.mrb[71].mxu1 }
 0xef3   : > { %v12805_v51 = vpop.eup %12804  ;;  %v9892_v12 = vmin.f32 %v12803_v40, 1.0  ;;  %12814 = vpow2.f32 %v9809_v27  ;;  %v9721_v22 = vadd.f32 %v11437_v37, %v15914_v54  ;;  %v11440_v41 = vadd.f32 %v11439_v43, %v11438_v26 }
 0xef4   : > { %9919 = vst [vmem:[%s15883_s18 + $0x80] sm:$0xff] %v9891_v11  ;;  %v9839_v8 = vadd.f32 1.0, %v12805_v51 }
 0xef5   : > { %v12807_v59 = vpop.eup %12806  ;;  %9920 = vst [vmem:[%s15883_s18 + $0x88] sm:$0xff] %v9892_v12  ;;  %v9759_v56 = vsub.f32 0.0, %v9721_v22  ;;  %v9724_v9 = vadd.f32 %v11440_v41, %v15918_v53 }
 0xef6   : > { %12816 = vrcp.f32 %v9839_v8  ;;  %v9840_v55 = vadd.f32 1.0, %v12807_v59 }
 0xef7   : > { %v9811_v61 = vmul.f32 1.442695, %v9759_v56  ;;  %v9760_v6 = vsub.f32 0.0, %v9724_v9  ;;  %v11441_v36 = vpop.f32.mrb[72].mxu1 }
 0xef8   : > { %12818 = vrcp.f32 %v9840_v55  ;;  %v11442_v24 = vpop.f32.mrb[73].mxu1 }
 0xef9   : > { %v12809_v46 = vpop.eup %12808  ;;  %12820 = vpow2.f32 %v9811_v61  ;;  %v9813_v54 = vmul.f32 1.442695, %v9760_v6  ;;  %v11443_v19 = vadd.f32 %v11442_v24, %v11441_v36  ;;  %v11444_v44 = vpop.f32.mrb[74].mxu1 }
 0xefa   : > { %v9893_v3 = vmin.f32 %v12809_v46, 1.0  ;;  %v12811_v25 = vpop.eup %12810  ;;  %v11445_v2 = vpop.f32.mrb[75].mxu1 }
 0xefb   : > { %v12813_v15 = vpop.eup %12812  ;;  %v9894_v53 = vmin.f32 %v12811_v25, 1.0  ;;  %12822 = vpow2.f32 %v9813_v54  ;;  %v9729_v48 = vadd.f32 %v11443_v19, %v15925_v38  ;;  %v11446_v21 = vadd.f32 %v11445_v2, %v11444_v44 }
 0xefc   : > { %9921 = vst [vmem:[%s15883_s18 + $0x90] sm:$0xff] %v9893_v3  ;;  %v9841_v30 = vadd.f32 1.0, %v12813_v15 }
 0xefd   : > { %v12815_v42 = vpop.eup %12814  ;;  %9922 = vst [vmem:[%s15883_s18 + $0x98] sm:$0xff] %v9894_v53  ;;  %v9761_v63 = vsub.f32 0.0, %v9729_v48  ;;  %v9732_v62 = vadd.f32 %v11446_v21, %v15929_v0 }
 0xefe   : > { %12824 = vrcp.f32 %v9841_v30  ;;  %v9842_v45 = vadd.f32 1.0, %v12815_v42 }
 0xeff   : > { %v9815_v57 = vmul.f32 1.442695, %v9761_v63  ;;  %v9762_v18 = vsub.f32 0.0, %v9732_v62 }
 0xf00   : > { %v12817_v16 = vpop.eup %12816  ;;  %12826 = vrcp.f32 %v9842_v45 }
 0xf01   : > { %v9895_v29 = vmin.f32 %v12817_v16, 1.0  ;;  %12828 = vpow2.f32 %v9815_v57  ;;  %v9817_v49 = vmul.f32 1.442695, %v9762_v18 }
 0xf02   : > { %v12819_v38 = vpop.eup %12818 }
 0xf03   : > { %v12821_v47 = vpop.eup %12820  ;;  %9923 = vst [vmem:[%s15883_s18 + $0xa0] sm:$0xff] %v9895_v29  ;;  %v9896_v5 = vmin.f32 %v12819_v38, 1.0  ;;  %12830 = vpow2.f32 %v9817_v49 }
 0xf04   : > { %v9843_v20 = vadd.f32 1.0, %v12821_v47 }
 0xf05   : > { %v12823_v4 = vpop.eup %12822  ;;  %9924 = vst [vmem:[%s15883_s18 + $0xa8] sm:$0xff] %v9896_v5 }
 0xf06   : > { %12832 = vrcp.f32 %v9843_v20  ;;  %v9844_v0 = vadd.f32 1.0, %v12823_v4 }
 0xf08   : > { %v12825_v60 = vpop.eup %12824  ;;  %12834 = vrcp.f32 %v9844_v0 }
 0xf09   : > { %v9897_v28 = vmin.f32 %v12825_v60, 1.0 }
 0xf0a   : > { %v12827_v35 = vpop.eup %12826 }
 0xf0b   : > { %v12829_v50 = vpop.eup %12828  ;;  %9925 = vst [vmem:[%s15883_s18 + $0xb0] sm:$0xff] %v9897_v28  ;;  %v9898_v58 = vmin.f32 %v12827_v35, 1.0 }
 0xf0c   : > { %v9845_v10 = vadd.f32 1.0, %v12829_v50 }
 0xf0d   : > { %v12831_v32 = vpop.eup %12830  ;;  %9926 = vst [vmem:[%s15883_s18 + $0xb8] sm:$0xff] %v9898_v58 }
 0xf0e   : > { %12836 = vrcp.f32 %v9845_v10  ;;  %v9846_v34 = vadd.f32 1.0, %v12831_v32 }
 0xf10   : > { %v12833_v7 = vpop.eup %12832  ;;  %12838 = vrcp.f32 %v9846_v34 }
 0xf11   : > { %v9899_v33 = vmin.f32 %v12833_v7, 1.0 }
 0xf12   : > { %v12835_v31 = vpop.eup %12834 }
 0xf13   : > { %9927 = vst [vmem:[%s15883_s18 + $0xc0] sm:$0xff] %v9899_v33  ;;  %v9900_v1 = vmin.f32 %v12835_v31, 1.0 }
 0xf15   : > { %9928 = vst [vmem:[%s15883_s18 + $0xc8] sm:$0xff] %v9900_v1 }
 0xf18   : > { %v12837_v39 = vpop.eup %12836 }
 0xf19   : > { %v9901_v13 = vmin.f32 %v12837_v39, 1.0 }
 0xf1a   : > { %v12839_v17 = vpop.eup %12838 }
 0xf1b   : > { %9929 = vst [vmem:[%s15883_s18 + $0xd0] sm:$0xff] %v9901_v13  ;;  %v9902_v23 = vmin.f32 %v12839_v17, 1.0 }
 0xf1d   : > { %9930 = vst [vmem:[%s15883_s18 + $0xd8] sm:$0xff] %v9902_v23 }
 0xf1e PF: > { %s33_s0 = sadd.s32 1, %s13030_s0  }
 0xf1f   : > { %p30_p3 = scmp.ge.s32.totalorder %s33_s0, 4  }
 0xf21   :  { %32 = sbr.rel (!%p30_p3) target bundleno = 16 (0x10), region = 171 }
 0xf28   :  { %9953 = vsyncpa [#allocation3], 1 }
 0xf29   :  { %9955 = vsyncpa [#allocation3 + $0x1], 1 }
 0xf2a   :  { %9956 = vsyncpa [#allocation5], 1 }
 0xf2b   :  { %9957 = vsyncpa [#allocation8], 1 }
 0xf2c   :  { %9958 = vsyncpa [#allocation11], 1 }

</bundles_post_ra>
